<compile_context>
chip_gen: v5e
topology: v5e:2x2
jax: 0.10.0
libtpu: 0.0.40
codegen_flags: <defaults>
</compile_context>

<pallas_src>
import functools
import math

import jax
import jax.numpy as jnp
from jax.experimental import pallas as pl
from jax.experimental.pallas import tpu as pltpu

IN_CHANNELS = 64      # must be divisible by 32 for GroupNorm(32, C)
NUM_GROUPS = 32
NUM_CONVS = 2         # cfg.TRAIN.NUM_CONVS (SiamBAN default is 4; 2 keeps this small)
BN_EPS = 1e-5
GN_EPS = 1e-5
HEAD_PAD = 128        # lane-dense head output width (cls uses cols 0:2, reg cols 0:4)


def _round_up(n, m):
    return ((n + m - 1) // m) * m


# ----------------------------- Pallas kernels -----------------------------

def _conv_bias_relu_kernel(xt_ref, w_ref, b_ref, o_ref):
    """Deep-K 3x3 conv (tap-stacked, K=9*Cin) + folded-BN bias + ReLU. Cout=128."""
    y = jnp.dot(xt_ref[0], w_ref[0], preferred_element_type=jnp.float32) + b_ref[0]
    o_ref[0] = jnp.maximum(y, 0.0).astype(o_ref.dtype)


def _conv_gn_relu_kernel(xt_ref, w_ref, b_ref, gmat_ref, gamma_ref, beta_ref, o_ref,
                         *, n_img, pp, p_valid, cpg, eps):
    """Deep-K 3x3 conv + bias + GroupNorm(32) + ReLU for one branch (all images).

    The matmul M dim carries n_img images of pp (padded) spatial rows each; GN
    statistics are computed per image with a centered two-pass variance. Group
    projection uses a (n_img,C)x(C,C) membership matmul.
    """
    acc = jnp.dot(xt_ref[0], w_ref[0], preferred_element_type=jnp.float32) + b_ref[0]
    c = acc.shape[-1]
    acc3 = acc.reshape(n_img, pp, c)
    # Rows >= p_valid within each image block are sublane padding; mask for stats.
    row = jax.lax.broadcasted_iota(jnp.int32, acc3.shape, 1)
    valid = row < p_valid
    cnt = float(p_valid * cpg)
    s = jnp.sum(jnp.where(valid, acc3, 0.0), axis=1)                       # (n_img, C)
    mean = jnp.dot(s, gmat_ref[...], preferred_element_type=jnp.float32) / cnt
    d = jnp.where(valid, acc3 - mean[:, None, :], 0.0)                     # centered
    ssq = jnp.sum(d * d, axis=1)                                           # (n_img, C)
    var = jnp.dot(ssq, gmat_ref[...], preferred_element_type=jnp.float32) / cnt
    inv = jax.lax.rsqrt(var + eps)
    y = d * (inv[:, None, :] * gamma_ref[0]) + beta_ref[0]
    y = jnp.maximum(y, 0.0)
    o_ref[0] = y.reshape(n_img * pp, c).astype(o_ref.dtype)


def _conv_bias_kernel(xt_ref, w_ref, b_ref, o_ref):
    """Deep-K 3x3 conv + bias (head convs, lane-dense padded Cout=128, f32 out)."""
    y = jnp.dot(xt_ref[0], w_ref[0], preferred_element_type=jnp.float32) + b_ref[0]
    o_ref[0] = y.astype(o_ref.dtype)


def _dw_xcorr_kernel(s_ref, k_ref, o_ref, *, n_taps):
    """Depthwise cross-correlation for one (branch, image): FMA over aligned taps."""
    acc = jnp.zeros(o_ref.shape[1:], jnp.float32)
    for t in range(n_taps):
        acc = acc + s_ref[t, 0].astype(jnp.float32) * k_ref[t, 0].astype(jnp.float32)
    o_ref[0] = acc.astype(o_ref.dtype)


# ----------------------------- wrappers -----------------------------

def _make_taps_deep(x):
    """(B, Hp, Wp, C) -> (B, Ho*Wo, 9*C) tap-stacked deep-K layout (pure XLA glue)."""
    B, Hp, Wp, C = x.shape
    Ho, Wo = Hp - 2, Wp - 2
    taps = [x[:, dy:dy + Ho, dx:dx + Wo, :] for dy in range(3) for dx in range(3)]
    return jnp.concatenate(taps, axis=-1).reshape(B, Ho * Wo, 9 * C), Ho, Wo


def xcorr_branch_convs(z, x, w2, b2):
    """conv3x3(valid, BN folded) + ReLU of template (z) and search (x), with the
    cls+reg weights merged along Cout (128 lanes). Grid step 0: z, step 1: x."""
    N, _, _, C = z.shape
    zt, Hk, Wk = _make_taps_deep(z)
    xt, Hs, Ws = _make_taps_deep(x)
    K = 9 * C
    Mz, Mx = N * Hk * Wk, N * Hs * Ws
    Mmax = _round_up(max(Mz, Mx), 8)
    zt = jnp.pad(zt.reshape(Mz, K), ((0, Mmax - Mz), (0, 0)))
    xt = jnp.pad(xt.reshape(Mx, K), ((0, Mmax - Mx), (0, 0)))
    taps = jnp.stack([zt, xt], axis=0).astype(jnp.bfloat16)            # (2, Mmax, K)
    out = pl.pallas_call(
        _conv_bias_relu_kernel,
        out_shape=jax.ShapeDtypeStruct((2, Mmax, 2 * C), jnp.bfloat16),
        grid=(2,),
        in_specs=[
            pl.BlockSpec((1, Mmax, K), lambda i: (i, 0, 0)),
            pl.BlockSpec((1, K, 2 * C), lambda i: (i, 0, 0)),
            pl.BlockSpec((1, 1, 2 * C), lambda i: (i, 0, 0)),
        ],
        out_specs=pl.BlockSpec((1, Mmax, 2 * C), lambda i: (i, 0, 0)),
        compiler_params=pltpu.CompilerParams(dimension_semantics=("parallel",)),
    )(taps, w2, b2)
    k_both = out[0, :Mz].reshape(N, Hk, Wk, 2 * C)
    s_both = out[1, :Mx].reshape(N, Hs, Ws, 2 * C)
    # Split the merged 128 channels back to (cls, reg), branch-major over batch.
    k_feat = jnp.concatenate([k_both[..., :C], k_both[..., C:]], axis=0)   # (2N,Hk,Wk,C)
    s_feat = jnp.concatenate([s_both[..., :C], s_both[..., C:]], axis=0)   # (2N,Hs,Ws,C)
    return s_feat, k_feat


def dw_xcorr(search, kernel):
    """Depthwise cross-correlation; one (branch, image) per grid step (parallel)."""
    B, Hs, Ws, C = search.shape
    _, Hk, Wk, _ = kernel.shape
    Ho, Wo = Hs - Hk + 1, Ws - Wk + 1
    T = Hk * Wk
    P = Ho * Wo
    # Pre-stack shifted views in XLA so the kernel only sees lane-aligned 2-D blocks.
    s_taps = jnp.stack([search[:, u:u + Ho, v:v + Wo, :].reshape(B, P, C)
                        for u in range(Hk) for v in range(Wk)], axis=0)   # (T, B, P, C)
    k_taps = jnp.transpose(kernel.reshape(B, T, C), (1, 0, 2)).reshape(T, B, 1, C)
    s_taps = s_taps.astype(jnp.bfloat16)
    k_taps = k_taps.astype(jnp.bfloat16)
    out = pl.pallas_call(
        functools.partial(_dw_xcorr_kernel, n_taps=T),
        out_shape=jax.ShapeDtypeStruct((B, P, C), jnp.bfloat16),
        grid=(B,),
        in_specs=[
            pl.BlockSpec((T, 1, P, C), lambda b: (0, b, 0, 0)),
            pl.BlockSpec((T, 1, 1, C), lambda b: (0, b, 0, 0)),
        ],
        out_specs=pl.BlockSpec((1, P, C), lambda b: (b, 0, 0)),
        compiler_params=pltpu.CompilerParams(dimension_semantics=("parallel",)),
    )(s_taps, k_taps)
    return out.reshape(B, Ho, Wo, C)


def _flatten_branch_taps(feat, n_img, pp):
    """(2*n_img, H, W, C) -> ((2, n_img*pp, 9C) bf16 tap stack, Ho, Wo). 'same' pad."""
    xp = jnp.pad(feat, ((0, 0), (1, 1), (1, 1), (0, 0)))
    xt, Ho, Wo = _make_taps_deep(xp)
    P = Ho * Wo
    xt = jnp.pad(xt, ((0, 0), (0, pp - P), (0, 0)))
    C = feat.shape[-1]
    return xt.reshape(2, n_img * pp, 9 * C).astype(jnp.bfloat16), Ho, Wo


def tower_conv_gn_relu(feat, w2, b2, gamma2, beta2, gmat):
    """3x3 'same' conv + GroupNorm(32) + ReLU; one grid step per branch (batch in M)."""
    B, H, W, C = feat.shape
    n_img = B // 2
    P = H * W
    Pp = _round_up(P, 8)
    xt, Ho, Wo = _flatten_branch_taps(feat, n_img, Pp)
    K = 9 * C
    M = n_img * Pp
    w2 = w2.reshape(2, K, C).astype(jnp.bfloat16)
    out = pl.pallas_call(
        functools.partial(_conv_gn_relu_kernel, n_img=n_img, pp=Pp, p_valid=P,
                          cpg=C // NUM_GROUPS, eps=GN_EPS),
        out_shape=jax.ShapeDtypeStruct((2, M, C), jnp.bfloat16),
        grid=(2,),
        in_specs=[
            pl.BlockSpec((1, M, K), lambda b: (b, 0, 0)),
            pl.BlockSpec((1, K, C), lambda b: (b, 0, 0)),
            pl.BlockSpec((1, 1, C), lambda b: (b, 0, 0)),
            pl.BlockSpec((C, C), lambda b: (0, 0)),
            pl.BlockSpec((1, 1, C), lambda b: (b, 0, 0)),
            pl.BlockSpec((1, 1, C), lambda b: (b, 0, 0)),
        ],
        out_specs=pl.BlockSpec((1, M, C), lambda b: (b, 0, 0)),
        compiler_params=pltpu.CompilerParams(dimension_semantics=("parallel",)),
    )(xt, w2, b2, gmat, gamma2, beta2)
    return out.reshape(B, Pp, C)[:, :P, :].reshape(B, Ho, Wo, C)


def head_conv(feat, w2, b2):
    """3x3 'same' conv, both heads in one call (batch in M), lane-dense Cout=128."""
    B, H, W, C = feat.shape
    n_img = B // 2
    P = H * W
    Pp = _round_up(P, 8)
    xt, Ho, Wo = _flatten_branch_taps(feat, n_img, Pp)
    K = 9 * C
    M = n_img * Pp
    w2 = w2.reshape(2, K, HEAD_PAD).astype(jnp.bfloat16)
    out = pl.pallas_call(
        _conv_bias_kernel,
        out_shape=jax.ShapeDtypeStruct((2, M, HEAD_PAD), jnp.float32),
        grid=(2,),
        in_specs=[
            pl.BlockSpec((1, M, K), lambda b: (b, 0, 0)),
            pl.BlockSpec((1, K, HEAD_PAD), lambda b: (b, 0, 0)),
            pl.BlockSpec((1, 1, HEAD_PAD), lambda b: (b, 0, 0)),
        ],
        out_specs=pl.BlockSpec((1, M, HEAD_PAD), lambda b: (b, 0, 0)),
        compiler_params=pltpu.CompilerParams(dimension_semantics=("parallel",)),
    )(xt, w2, b2)
    # (2 branches, n_img, Ho, Wo, 128)
    return out.reshape(2, n_img, Pp, HEAD_PAD)[:, :, :P, :].reshape(
        2, n_img, Ho, Wo, HEAD_PAD)


# ----------------------------- parameters -----------------------------

def init_params(key):
    C = IN_CHANNELS
    keys = iter(jax.random.split(key, 16))

    def conv_w(k, cin, cout):
        std = math.sqrt(2.0 / (3 * 3 * cout))      # normal_(0, sqrt(2/n)), n=k*k*out
        return std * jax.random.normal(k, (3, 3, cin, cout), jnp.float32)

    # eval-mode BN (gamma=1, beta=0, mean=0, var=1): scale folds into the weights,
    # shift (= beta - mean*scale) is carried as an explicit per-channel bias.
    bn_scale = 1.0 / math.sqrt(1.0 + BN_EPS)
    bn_shift = 0.0

    # merged along Cout: z-weight = [cls.conv_kernel | reg.conv_kernel],
    #                    x-weight = [cls.conv_search | reg.conv_search]
    w_z = jnp.concatenate([conv_w(next(keys), C, C), conv_w(next(keys), C, C)], axis=-1)
    w_x = jnp.concatenate([conv_w(next(keys), C, C), conv_w(next(keys), C, C)], axis=-1)
    xcorr_w = (jnp.stack([w_z, w_x]) * bn_scale).reshape(2, 9 * C, 2 * C).astype(jnp.bfloat16)
    xcorr_b = jnp.full((2, 1, 2 * C), bn_shift, jnp.float32)

    tower = [dict(w=jnp.stack([conv_w(next(keys), C, C) for _ in range(2)]),  # (cls, reg)
                  b=jnp.zeros((2, 1, C), jnp.float32),
                  gamma=jnp.ones((2, 1, C), jnp.float32),
                  beta=jnp.zeros((2, 1, C), jnp.float32))
             for _ in range(NUM_CONVS)]

    head_w = jnp.zeros((2, 3, 3, C, HEAD_PAD), jnp.float32)
    head_w = head_w.at[0, ..., :2].set(conv_w(next(keys), C, 2))   # cls_logits
    head_w = head_w.at[1, ..., :4].set(conv_w(next(keys), C, 4))   # bbox_pred
    head_b = jnp.zeros((2, 1, HEAD_PAD), jnp.float32)

    cpg = C // NUM_GROUPS
    grp = jnp.arange(C) // cpg
    gmat = (grp[:, None] == grp[None, :]).astype(jnp.float32)      # (C, C) group membership

    return dict(xcorr_w=xcorr_w, xcorr_b=xcorr_b, tower=tower,
                head_w=head_w, head_b=head_b, gmat=gmat)


# ----------------------------- forward -----------------------------

def depthwise_ban_forward(params, z_f, x_f):
    """z_f, x_f: NCHW float32 (PyTorch convention). Returns (logits, exp(bbox)) in NCHW."""
    z = jnp.transpose(z_f, (0, 2, 3, 1))
    x = jnp.transpose(x_f, (0, 2, 3, 1))

    # DepthwiseXCorr: conv+BN+ReLU on z and x for both branches (1 call, Cout=128),
    # then depthwise cross-correlation over the branch-major (2N, ...) stack (1 call).
    s_feat, k_feat = xcorr_branch_convs(z, x, params['xcorr_w'], params['xcorr_b'])
    feat = dw_xcorr(s_feat, k_feat)                                # (2N, Ho, Wo, C) bf16

    # cls_tower / bbox_tower: one call per layer, batch flattened into the matmul M dim.
    for lp in params['tower']:
        feat = tower_conv_gn_relu(feat, lp['w'], lp['b'], lp['gamma'], lp['beta'],
                                  params['gmat'])

    # Heads: one lane-dense call; slice the real channels (2 / 4) in the wrapper.
    head = head_conv(feat, params['head_w'], params['head_b'])     # (2, N, Ho, Wo, 128)
    logits = head[0, ..., :2]
    bbox = jnp.exp(head[1, ..., :4])                               # torch.exp(bbox_reg), f32
    return (jnp.transpose(logits, (0, 3, 1, 2)),
            jnp.transpose(bbox, (0, 3, 1, 2)))


if __name__ == "__main__":
    key = jax.random.PRNGKey(0)
    kp, kz, kx = jax.random.split(key, 3)
    params = init_params(kp)
    z_f = jax.random.normal(kz, (2, IN_CHANNELS, 8, 8), jnp.float32)    # template
    x_f = jax.random.normal(kx, (2, IN_CHANNELS, 16, 16), jnp.float32)  # search

    fwd = jax.jit(depthwise_ban_forward)
    logits, bbox = fwd(params, z_f, x_f)
    jax.block_until_ready((logits, bbox))

    assert logits.shape == (2, 2, 9, 9), logits.shape
    assert bbox.shape == (2, 4, 9, 9), bbox.shape
    assert bool(jnp.all(jnp.isfinite(logits))) and bool(jnp.all(jnp.isfinite(bbox)))
    assert bool(jnp.all(bbox > 0.0))   # exp output must be positive
    print("KERNEL_OK")
</pallas_src>

<mosaic_0001>
module attributes {stable_mosaic.version = 11 : i64} {
  func.func @_conv_bias_relu_kernel(%arg0: i32, %arg1: memref<1x392x576xbf16, #tpu.memory_space<vmem>>, %arg2: memref<1x576x128xbf16, #tpu.memory_space<vmem>>, %arg3: memref<1x1x128xf32, #tpu.memory_space<vmem>>, %arg4: memref<1x392x128xbf16, #tpu.memory_space<vmem>>) attributes {dimension_semantics = [#tpu.dimension_semantics<parallel>], iteration_bounds = array<i64: 2>, scalar_prefetch = 0 : i64, scratch_operands = 0 : i64, tpu.core_type = #tpu.core_type<tc>, window_params = [{transform_indices = @transform_0, window_bounds = array<i64: 1, 392, 576>}, {transform_indices = @transform_1, window_bounds = array<i64: 1, 576, 128>}, {transform_indices = @transform_2, window_bounds = array<i64: 1, 1, 128>}, {transform_indices = @transform_3, window_bounds = array<i64: 1, 392, 128>}]} {
    %c0 = arith.constant 0 : index
    %c0_0 = arith.constant 0 : index
    %c0_1 = arith.constant 0 : index
    %0 = vector.load %arg1[%c0, %c0_0, %c0_1] : memref<1x392x576xbf16, #tpu.memory_space<vmem>>, vector<1x392x576xbf16>
    %1 = vector.shape_cast %0 : vector<1x392x576xbf16> to vector<392x576xbf16>
    %c0_2 = arith.constant 0 : index
    %c0_3 = arith.constant 0 : index
    %c0_4 = arith.constant 0 : index
    %2 = vector.load %arg2[%c0_2, %c0_3, %c0_4] : memref<1x576x128xbf16, #tpu.memory_space<vmem>>, vector<1x576x128xbf16>
    %3 = vector.shape_cast %2 : vector<1x576x128xbf16> to vector<576x128xbf16>
    %cst = arith.constant dense<0.000000e+00> : vector<392x128xf32>
    %4 = tpu.matmul %1, %3, %cst {dimension_numbers = #tpu.dot_dimension_numbers<[1], [0], [0], [1], [0, 0, 1, 1], [], []>} : vector<392x576xbf16>, vector<576x128xbf16>, vector<392x128xf32> -> vector<392x128xf32>
    %c0_5 = arith.constant 0 : index
    %c0_6 = arith.constant 0 : index
    %c0_7 = arith.constant 0 : index
    %5 = vector.load %arg3[%c0_5, %c0_6, %c0_7] : memref<1x1x128xf32, #tpu.memory_space<vmem>>, vector<1x1x128xf32>
    %6 = vector.shape_cast %5 : vector<1x1x128xf32> to vector<1x128xf32>
    %7 = vector.broadcast %6 : vector<1x128xf32> to vector<392x128xf32>
    %8 = arith.addf %4, %7 : vector<392x128xf32>
    %cst_8 = arith.constant 0.000000e+00 : f32
    %9 = vector.broadcast %cst_8 : f32 to vector<392x128xf32>
    %10 = arith.maximumf %8, %9 : vector<392x128xf32>
    %11 = arith.truncf %10 : vector<392x128xf32> to vector<392x128xbf16>
    %c0_9 = arith.constant 0 : index
    %c0_10 = arith.constant 0 : index
    %c0_11 = arith.constant 0 : index
    %12 = vector.load %arg4[%c0_9, %c0_10, %c0_11] : memref<1x392x128xbf16, #tpu.memory_space<vmem>>, vector<1x392x128xbf16>
    %13 = vector.shape_cast %12 : vector<1x392x128xbf16> to vector<392x128xbf16>
    %14 = vector.shape_cast %11 : vector<392x128xbf16> to vector<1x392x128xbf16>
    tpu.vector_store %arg4[%c0_9, %c0_10, %c0_11], %14 {strides = array<i32>} : memref<1x392x128xbf16, #tpu.memory_space<vmem>>, vector<1x392x128xbf16>,
    return
  }
  func.func @transform_0(%arg0: i32) -> (i32, i32, i32) {
    %c0_i32 = arith.constant 0 : i32
    %c0_i32_0 = arith.constant 0 : i32
    %c0_i32_1 = arith.constant 0 : i32
    return %arg0, %c0_i32, %c0_i32_0 : i32, i32, i32
  }
  func.func @transform_1(%arg0: i32) -> (i32, i32, i32) {
    %c0_i32 = arith.constant 0 : i32
    %c0_i32_0 = arith.constant 0 : i32
    %c0_i32_1 = arith.constant 0 : i32
    return %arg0, %c0_i32, %c0_i32_0 : i32, i32, i32
  }
  func.func @transform_2(%arg0: i32) -> (i32, i32, i32) {
    %c0_i32 = arith.constant 0 : i32
    %c0_i32_0 = arith.constant 0 : i32
    %c0_i32_1 = arith.constant 0 : i32
    return %arg0, %c0_i32, %c0_i32_0 : i32, i32, i32
  }
  func.func @transform_3(%arg0: i32) -> (i32, i32, i32) {
    %c0_i32 = arith.constant 0 : i32
    %c0_i32_0 = arith.constant 0 : i32
    %c0_i32_1 = arith.constant 0 : i32
    return %arg0, %c0_i32, %c0_i32_0 : i32, i32, i32
  }
}

module attributes {stable_mosaic.version = 11 : i64} {
  func.func @_dw_xcorr_kernel(%arg0: i32, %arg1: memref<36x1x81x64xbf16, #tpu.memory_space<vmem>>, %arg2: memref<36x1x1x64xbf16, #tpu.memory_space<vmem>>, %arg3: memref<1x81x64xbf16, #tpu.memory_space<vmem>>) attributes {dimension_semantics = [#tpu.dimension_semantics<parallel>], iteration_bounds = array<i64: 4>, scalar_prefetch = 0 : i64, scratch_operands = 0 : i64, tpu.core_type = #tpu.core_type<tc>, window_params = [{transform_indices = @transform_0, window_bounds = array<i64: 36, 1, 81, 64>}, {transform_indices = @transform_1, window_bounds = array<i64: 36, 1, 1, 64>}, {transform_indices = @transform_2, window_bounds = array<i64: 1, 81, 64>}]} {
    %cst = arith.constant 0.000000e+00 : f32
    %0 = vector.broadcast %cst : f32 to vector<81x64xf32>
    %c0 = arith.constant 0 : index
    %c0_0 = arith.constant 0 : index
    %c0_1 = arith.constant 0 : index
    %c0_2 = arith.constant 0 : index
    %1 = vector.load %arg1[%c0, %c0_0, %c0_1, %c0_2] : memref<36x1x81x64xbf16, #tpu.memory_space<vmem>>, vector<1x1x81x64xbf16>
    %2 = vector.shape_cast %1 : vector<1x1x81x64xbf16> to vector<81x64xbf16>
    %3 = arith.extf %2 : vector<81x64xbf16> to vector<81x64xf32>
    %c0_3 = arith.constant 0 : index
    %c0_4 = arith.constant 0 : index
    %c0_5 = arith.constant 0 : index
    %c0_6 = arith.constant 0 : index
    %4 = vector.load %arg2[%c0_3, %c0_4, %c0_5, %c0_6] : memref<36x1x1x64xbf16, #tpu.memory_space<vmem>>, vector<1x1x1x64xbf16>
    %5 = vector.shape_cast %4 : vector<1x1x1x64xbf16> to vector<1x64xbf16>
    %6 = arith.extf %5 : vector<1x64xbf16> to vector<1x64xf32>
    %7 = vector.broadcast %6 : vector<1x64xf32> to vector<81x64xf32>
    %8 = arith.mulf %3, %7 : vector<81x64xf32>
    %9 = arith.addf %0, %8 : vector<81x64xf32>
    %c1 = arith.constant 1 : index
    %c0_7 = arith.constant 0 : index
    %c0_8 = arith.constant 0 : index
    %c0_9 = arith.constant 0 : index
    %10 = vector.load %arg1[%c1, %c0_7, %c0_8, %c0_9] : memref<36x1x81x64xbf16, #tpu.memory_space<vmem>>, vector<1x1x81x64xbf16>
    %11 = vector.shape_cast %10 : vector<1x1x81x64xbf16> to vector<81x64xbf16>
    %12 = arith.extf %11 : vector<81x64xbf16> to vector<81x64xf32>
    %c1_10 = arith.constant 1 : index
    %c0_11 = arith.constant 0 : index
    %c0_12 = arith.constant 0 : index
    %c0_13 = arith.constant 0 : index
    %13 = vector.load %arg2[%c1_10, %c0_11, %c0_12, %c0_13] : memref<36x1x1x64xbf16, #tpu.memory_space<vmem>>, vector<1x1x1x64xbf16>
    %14 = vector.shape_cast %13 : vector<1x1x1x64xbf16> to vector<1x64xbf16>
    %15 = arith.extf %14 : vector<1x64xbf16> to vector<1x64xf32>
    %16 = vector.broadcast %15 : vector<1x64xf32> to vector<81x64xf32>
    %17 = arith.mulf %12, %16 : vector<81x64xf32>
    %18 = arith.addf %9, %17 : vector<81x64xf32>
    %c2 = arith.constant 2 : index
    %c0_14 = arith.constant 0 : index
    %c0_15 = arith.constant 0 : index
    %c0_16 = arith.constant 0 : index
    %19 = vector.load %arg1[%c2, %c0_14, %c0_15, %c0_16] : memref<36x1x81x64xbf16, #tpu.memory_space<vmem>>, vector<1x1x81x64xbf16>
    %20 = vector.shape_cast %19 : vector<1x1x81x64xbf16> to vector<81x64xbf16>
    %21 = arith.extf %20 : vector<81x64xbf16> to vector<81x64xf32>
    %c2_17 = arith.constant 2 : index
    %c0_18 = arith.constant 0 : index
    %c0_19 = arith.constant 0 : index
    %c0_20 = arith.constant 0 : index
    %22 = vector.load %arg2[%c2_17, %c0_18, %c0_19, %c0_20] : memref<36x1x1x64xbf16, #tpu.memory_space<vmem>>, vector<1x1x1x64xbf16>
    %23 = vector.shape_cast %22 : vector<1x1x1x64xbf16> to vector<1x64xbf16>
    %24 = arith.extf %23 : vector<1x64xbf16> to vector<1x64xf32>
    %25 = vector.broadcast %24 : vector<1x64xf32> to vector<81x64xf32>
    %26 = arith.mulf %21, %25 : vector<81x64xf32>
    %27 = arith.addf %18, %26 : vector<81x64xf32>
    %c3 = arith.constant 3 : index
    %c0_21 = arith.constant 0 : index
    %c0_22 = arith.constant 0 : index
    %c0_23 = arith.constant 0 : index
    %28 = vector.load %arg1[%c3, %c0_21, %c0_22, %c0_23] : memref<36x1x81x64xbf16, #tpu.memory_space<vmem>>, vector<1x1x81x64xbf16>
    %29 = vector.shape_cast %28 : vector<1x1x81x64xbf16> to vector<81x64xbf16>
    %30 = arith.extf %29 : vector<81x64xbf16> to vector<81x64xf32>
    %c3_24 = arith.constant 3 : index
    %c0_25 = arith.constant 0 : index
    %c0_26 = arith.constant 0 : index
    %c0_27 = arith.constant 0 : index
    %31 = vector.load %arg2[%c3_24, %c0_25, %c0_26, %c0_27] : memref<36x1x1x64xbf16, #tpu.memory_space<vmem>>, vector<1x1x1x64xbf16>
    %32 = vector.shape_cast %31 : vector<1x1x1x64xbf16> to vector<1x64xbf16>
    %33 = arith.extf %32 : vector<1x64xbf16> to vector<1x64xf32>
    %34 = vector.broadcast %33 : vector<1x64xf32> to vector<81x64xf32>
    %35 = arith.mulf %30, %34 : vector<81x64xf32>
    %36 = arith.addf %27, %35 : vector<81x64xf32>
    %c4 = arith.constant 4 : index
    %c0_28 = arith.constant 0 : index
    %c0_29 = arith.constant 0 : index
    %c0_30 = arith.constant 0 : index
    %37 = vector.load %arg1[%c4, %c0_28, %c0_29, %c0_30] : memref<36x1x81x64xbf16, #tpu.memory_space<vmem>>, vector<1x1x81x64xbf16>
    %38 = vector.shape_cast %37 : vector<1x1x81x64xbf16> to vector<81x64xbf16>
    %39 = arith.extf %38 : vector<81x64xbf16> to vector<81x64xf32>
    %c4_31 = arith.constant 4 : index
    %c0_32 = arith.constant 0 : index
    %c0_33 = arith.constant 0 : index
    %c0_34 = arith.constant 0 : index
    %40 = vector.load %arg2[%c4_31, %c0_32, %c0_33, %c0_34] : memref<36x1x1x64xbf16, #tpu.memory_space<vmem>>, vector<1x1x1x64xbf16>
    %41 = vector.shape_cast %40 : vector<1x1x1x64xbf16> to vector<1x64xbf16>
    %42 = arith.extf %41 : vector<1x64xbf16> to vector<1x64xf32>
    %43 = vector.broadcast %42 : vector<1x64xf32> to vector<81x64xf32>
    %44 = arith.mulf %39, %43 : vector<81x64xf32>
    %45 = arith.addf %36, %44 : vector<81x64xf32>
    %c5 = arith.constant 5 : index
    %c0_35 = arith.constant 0 : index
    %c0_36 = arith.constant 0 : index
    %c0_37 = arith.constant 0 : index
    %46 = vector.load %arg1[%c5, %c0_35, %c0_36, %c0_37] : memref<36x1x81x64xbf16, #tpu.memory_space<vmem>>, vector<1x1x81x64xbf16>
    %47 = vector.shape_cast %46 : vector<1x1x81x64xbf16> to vector<81x64xbf16>
    %48 = arith.extf %47 : vector<81x64xbf16> to vector<81x64xf32>
    %c5_38 = arith.constant 5 : index
    %c0_39 = arith.constant 0 : index
    %c0_40 = arith.constant 0 : index
    %c0_41 = arith.constant 0 : index
    %49 = vector.load %arg2[%c5_38, %c0_39, %c0_40, %c0_41] : memref<36x1x1x64xbf16, #tpu.memory_space<vmem>>, vector<1x1x1x64xbf16>
    %50 = vector.shape_cast %49 : vector<1x1x1x64xbf16> to vector<1x64xbf16>
    %51 = arith.extf %50 : vector<1x64xbf16> to vector<1x64xf32>
    %52 = vector.broadcast %51 : vector<1x64xf32> to vector<81x64xf32>
    %53 = arith.mulf %48, %52 : vector<81x64xf32>
    %54 = arith.addf %45, %53 : vector<81x64xf32>
    %c6 = arith.constant 6 : index
    %c0_42 = arith.constant 0 : index
    %c0_43 = arith.constant 0 : index
    %c0_44 = arith.constant 0 : index
    %55 = vector.load %arg1[%c6, %c0_42, %c0_43, %c0_44] : memref<36x1x81x64xbf16, #tpu.memory_space<vmem>>, vector<1x1x81x64xbf16>
    %56 = vector.shape_cast %55 : vector<1x1x81x64xbf16> to vector<81x64xbf16>
    %57 = arith.extf %56 : vector<81x64xbf16> to vector<81x64xf32>
    %c6_45 = arith.constant 6 : index
    %c0_46 = arith.constant 0 : index
    %c0_47 = arith.constant 0 : index
    %c0_48 = arith.constant 0 : index
    %58 = vector.load %arg2[%c6_45, %c0_46, %c0_47, %c0_48] : memref<36x1x1x64xbf16, #tpu.memory_space<vmem>>, vector<1x1x1x64xbf16>
    %59 = vector.shape_cast %58 : vector<1x1x1x64xbf16> to vector<1x64xbf16>
    %60 = arith.extf %59 : vector<1x64xbf16> to vector<1x64xf32>
    %61 = vector.broadcast %60 : vector<1x64xf32> to vector<81x64xf32>
    %62 = arith.mulf %57, %61 : vector<81x64xf32>
    %63 = arith.addf %54, %62 : vector<81x64xf32>
    %c7 = arith.constant 7 : index
    %c0_49 = arith.constant 0 : index
    %c0_50 = arith.constant 0 : index
    %c0_51 = arith.constant 0 : index
    %64 = vector.load %arg1[%c7, %c0_49, %c0_50, %c0_51] : memref<36x1x81x64xbf16, #tpu.memory_space<vmem>>, vector<1x1x81x64xbf16>
    %65 = vector.shape_cast %64 : vector<1x1x81x64xbf16> to vector<81x64xbf16>
    %66 = arith.extf %65 : vector<81x64xbf16> to vector<81x64xf32>
    %c7_52 = arith.constant 7 : index
    %c0_53 = arith.constant 0 : index
    %c0_54 = arith.constant 0 : index
    %c0_55 = arith.constant 0 : index
    %67 = vector.load %arg2[%c7_52, %c0_53, %c0_54, %c0_55] : memref<36x1x1x64xbf16, #tpu.memory_space<vmem>>, vector<1x1x1x64xbf16>
    %68 = vector.shape_cast %67 : vector<1x1x1x64xbf16> to vector<1x64xbf16>
    %69 = arith.extf %68 : vector<1x64xbf16> to vector<1x64xf32>
    %70 = vector.broadcast %69 : vector<1x64xf32> to vector<81x64xf32>
    %71 = arith.mulf %66, %70 : vector<81x64xf32>
    %72 = arith.addf %63, %71 : vector<81x64xf32>
    %c8 = arith.constant 8 : index
    %c0_56 = arith.constant 0 : index
    %c0_57 = arith.constant 0 : index
    %c0_58 = arith.constant 0 : index
    %73 = vector.load %arg1[%c8, %c0_56, %c0_57, %c0_58] : memref<36x1x81x64xbf16, #tpu.memory_space<vmem>>, vector<1x1x81x64xbf16>
    %74 = vector.shape_cast %73 : vector<1x1x81x64xbf16> to vector<81x64xbf16>
    %75 = arith.extf %74 : vector<81x64xbf16> to vector<81x64xf32>
    %c8_59 = arith.constant 8 : index
    %c0_60 = arith.constant 0 : index
    %c0_61 = arith.constant 0 : index
    %c0_62 = arith.constant 0 : index
    %76 = vector.load %arg2[%c8_59, %c0_60, %c0_61, %c0_62] : memref<36x1x1x64xbf16, #tpu.memory_space<vmem>>, vector<1x1x1x64xbf16>
    %77 = vector.shape_cast %76 : vector<1x1x1x64xbf16> to vector<1x64xbf16>
    %78 = arith.extf %77 : vector<1x64xbf16> to vector<1x64xf32>
    %79 = vector.broadcast %78 : vector<1x64xf32> to vector<81x64xf32>
    %80 = arith.mulf %75, %79 : vector<81x64xf32>
    %81 = arith.addf %72, %80 : vector<81x64xf32>
    %c9 = arith.constant 9 : index
    %c0_63 = arith.constant 0 : index
    %c0_64 = arith.constant 0 : index
    %c0_65 = arith.constant 0 : index
    %82 = vector.load %arg1[%c9, %c0_63, %c0_64, %c0_65] : memref<36x1x81x64xbf16, #tpu.memory_space<vmem>>, vector<1x1x81x64xbf16>
    %83 = vector.shape_cast %82 : vector<1x1x81x64xbf16> to vector<81x64xbf16>
    %84 = arith.extf %83 : vector<81x64xbf16> to vector<81x64xf32>
    %c9_66 = arith.constant 9 : index
    %c0_67 = arith.constant 0 : index
    %c0_68 = arith.constant 0 : index
    %c0_69 = arith.constant 0 : index
    %85 = vector.load %arg2[%c9_66, %c0_67, %c0_68, %c0_69] : memref<36x1x1x64xbf16, #tpu.memory_space<vmem>>, vector<1x1x1x64xbf16>
    %86 = vector.shape_cast %85 : vector<1x1x1x64xbf16> to vector<1x64xbf16>
    %87 = arith.extf %86 : vector<1x64xbf16> to vector<1x64xf32>
    %88 = vector.broadcast %87 : vector<1x64xf32> to vector<81x64xf32>
    %89 = arith.mulf %84, %88 : vector<81x64xf32>
    %90 = arith.addf %81, %89 : vector<81x64xf32>
    %c10 = arith.constant 10 : index
    %c0_70 = arith.constant 0 : index
    %c0_71 = arith.constant 0 : index
    %c0_72 = arith.constant 0 : index
    %91 = vector.load %arg1[%c10, %c0_70, %c0_71, %c0_72] : memref<36x1x81x64xbf16, #tpu.memory_space<vmem>>, vector<1x1x81x64xbf16>
    %92 = vector.shape_cast %91 : vector<1x1x81x64xbf16> to vector<81x64xbf16>
    %93 = arith.extf %92 : vector<81x64xbf16> to vector<81x64xf32>
    %c10_73 = arith.constant 10 : index
    %c0_74 = arith.constant 0 : index
    %c0_75 = arith.constant 0 : index
    %c0_76 = arith.constant 0 : index
    %94 = vector.load %arg2[%c10_73, %c0_74, %c0_75, %c0_76] : memref<36x1x1x64xbf16, #tpu.memory_space<vmem>>, vector<1x1x1x64xbf16>
    %95 = vector.shape_cast %94 : vector<1x1x1x64xbf16> to vector<1x64xbf16>
    %96 = arith.extf %95 : vector<1x64xbf16> to vector<1x64xf32>
    %97 = vector.broadcast %96 : vector<1x64xf32> to vector<81x64xf32>
    %98 = arith.mulf %93, %97 : vector<81x64xf32>
    %99 = arith.addf %90, %98 : vector<81x64xf32>
    %c11 = arith.constant 11 : index
    %c0_77 = arith.constant 0 : index
    %c0_78 = arith.constant 0 : index
    %c0_79 = arith.constant 0 : index
    %100 = vector.load %arg1[%c11, %c0_77, %c0_78, %c0_79] : memref<36x1x81x64xbf16, #tpu.memory_space<vmem>>, vector<1x1x81x64xbf16>
    %101 = vector.shape_cast %100 : vector<1x1x81x64xbf16> to vector<81x64xbf16>
    %102 = arith.extf %101 : vector<81x64xbf16> to vector<81x64xf32>
    %c11_80 = arith.constant 11 : index
    %c0_81 = arith.constant 0 : index
    %c0_82 = arith.constant 0 : index
    %c0_83 = arith.constant 0 : index
    %103 = vector.load %arg2[%c11_80, %c0_81, %c0_82, %c0_83] : memref<36x1x1x64xbf16, #tpu.memory_space<vmem>>, vector<1x1x1x64xbf16>
    %104 = vector.shape_cast %103 : vector<1x1x1x64xbf16> to vector<1x64xbf16>
    %105 = arith.extf %104 : vector<1x64xbf16> to vector<1x64xf32>
    %106 = vector.broadcast %105 : vector<1x64xf32> to vector<81x64xf32>
    %107 = arith.mulf %102, %106 : vector<81x64xf32>
    %108 = arith.addf %99, %107 : vector<81x64xf32>
    %c12 = arith.constant 12 : index
    %c0_84 = arith.constant 0 : index
    %c0_85 = arith.constant 0 : index
    %c0_86 = arith.constant 0 : index
    %109 = vector.load %arg1[%c12, %c0_84, %c0_85, %c0_86] : memref<36x1x81x64xbf16, #tpu.memory_space<vmem>>, vector<1x1x81x64xbf16>
    %110 = vector.shape_cast %109 : vector<1x1x81x64xbf16> to vector<81x64xbf16>
    %111 = arith.extf %110 : vector<81x64xbf16> to vector<81x64xf32>
    %c12_87 = arith.constant 12 : index
    %c0_88 = arith.constant 0 : index
    %c0_89 = arith.constant 0 : index
    %c0_90 = arith.constant 0 : index
    %112 = vector.load %arg2[%c12_87, %c0_88, %c0_89, %c0_90] : memref<36x1x1x64xbf16, #tpu.memory_space<vmem>>, vector<1x1x1x64xbf16>
    %113 = vector.shape_cast %112 : vector<1x1x1x64xbf16> to vector<1x64xbf16>
    %114 = arith.extf %113 : vector<1x64xbf16> to vector<1x64xf32>
    %115 = vector.broadcast %114 : vector<1x64xf32> to vector<81x64xf32>
    %116 = arith.mulf %111, %115 : vector<81x64xf32>
    %117 = arith.addf %108, %116 : vector<81x64xf32>
    %c13 = arith.constant 13 : index
    %c0_91 = arith.constant 0 : index
    %c0_92 = arith.constant 0 : index
    %c0_93 = arith.constant 0 : index
    %118 = vector.load %arg1[%c13, %c0_91, %c0_92, %c0_93] : memref<36x1x81x64xbf16, #tpu.memory_space<vmem>>, vector<1x1x81x64xbf16>
    %119 = vector.shape_cast %118 : vector<1x1x81x64xbf16> to vector<81x64xbf16>
    %120 = arith.extf %119 : vector<81x64xbf16> to vector<81x64xf32>
    %c13_94 = arith.constant 13 : index
    %c0_95 = arith.constant 0 : index
    %c0_96 = arith.constant 0 : index
    %c0_97 = arith.constant 0 : index
    %121 = vector.load %arg2[%c13_94, %c0_95, %c0_96, %c0_97] : memref<36x1x1x64xbf16, #tpu.memory_space<vmem>>, vector<1x1x1x64xbf16>
    %122 = vector.shape_cast %121 : vector<1x1x1x64xbf16> to vector<1x64xbf16>
    %123 = arith.extf %122 : vector<1x64xbf16> to vector<1x64xf32>
    %124 = vector.broadcast %123 : vector<1x64xf32> to vector<81x64xf32>
    %125 = arith.mulf %120, %124 : vector<81x64xf32>
    %126 = arith.addf %117, %125 : vector<81x64xf32>
    %c14 = arith.constant 14 : index
    %c0_98 = arith.constant 0 : index
    %c0_99 = arith.constant 0 : index
    %c0_100 = arith.constant 0 : index
    %127 = vector.load %arg1[%c14, %c0_98, %c0_99, %c0_100] : memref<36x1x81x64xbf16, #tpu.memory_space<vmem>>, vector<1x1x81x64xbf16>
    %128 = vector.shape_cast %127 : vector<1x1x81x64xbf16> to vector<81x64xbf16>
    %129 = arith.extf %128 : vector<81x64xbf16> to vector<81x64xf32>
    %c14_101 = arith.constant 14 : index
    %c0_102 = arith.constant 0 : index
    %c0_103 = arith.constant 0 : index
    %c0_104 = arith.constant 0 : index
    %130 = vector.load %arg2[%c14_101, %c0_102, %c0_103, %c0_104] : memref<36x1x1x64xbf16, #tpu.memory_space<vmem>>, vector<1x1x1x64xbf16>
    %131 = vector.shape_cast %130 : vector<1x1x1x64xbf16> to vector<1x64xbf16>
    %132 = arith.extf %131 : vector<1x64xbf16> to vector<1x64xf32>
    %133 = vector.broadcast %132 : vector<1x64xf32> to vector<81x64xf32>
    %134 = arith.mulf %129, %133 : vector<81x64xf32>
    %135 = arith.addf %126, %134 : vector<81x64xf32>
    %c15 = arith.constant 15 : index
    %c0_105 = arith.constant 0 : index
    %c0_106 = arith.constant 0 : index
    %c0_107 = arith.constant 0 : index
    %136 = vector.load %arg1[%c15, %c0_105, %c0_106, %c0_107] : memref<36x1x81x64xbf16, #tpu.memory_space<vmem>>, vector<1x1x81x64xbf16>
    %137 = vector.shape_cast %136 : vector<1x1x81x64xbf16> to vector<81x64xbf16>
    %138 = arith.extf %137 : vector<81x64xbf16> to vector<81x64xf32>
    %c15_108 = arith.constant 15 : index
    %c0_109 = arith.constant 0 : index
    %c0_110 = arith.constant 0 : index
    %c0_111 = arith.constant 0 : index
    %139 = vector.load %arg2[%c15_108, %c0_109, %c0_110, %c0_111] : memref<36x1x1x64xbf16, #tpu.memory_space<vmem>>, vector<1x1x1x64xbf16>
    %140 = vector.shape_cast %139 : vector<1x1x1x64xbf16> to vector<1x64xbf16>
    %141 = arith.extf %140 : vector<1x64xbf16> to vector<1x64xf32>
    %142 = vector.broadcast %141 : vector<1x64xf32> to vector<81x64xf32>
    %143 = arith.mulf %138, %142 : vector<81x64xf32>
    %144 = arith.addf %135, %143 : vector<81x64xf32>
    %c16 = arith.constant 16 : index
    %c0_112 = arith.constant 0 : index
    %c0_113 = arith.constant 0 : index
    %c0_114 = arith.constant 0 : index
    %145 = vector.load %arg1[%c16, %c0_112, %c0_113, %c0_114] : memref<36x1x81x64xbf16, #tpu.memory_space<vmem>>, vector<1x1x81x64xbf16>
    %146 = vector.shape_cast %145 : vector<1x1x81x64xbf16> to vector<81x64xbf16>
    %147 = arith.extf %146 : vector<81x64xbf16> to vector<81x64xf32>
    %c16_115 = arith.constant 16 : index
    %c0_116 = arith.constant 0 : index
    %c0_117 = arith.constant 0 : index
    %c0_118 = arith.constant 0 : index
    %148 = vector.load %arg2[%c16_115, %c0_116, %c0_117, %c0_118] : memref<36x1x1x64xbf16, #tpu.memory_space<vmem>>, vector<1x1x1x64xbf16>
    %149 = vector.shape_cast %148 : vector<1x1x1x64xbf16> to vector<1x64xbf16>
    %150 = arith.extf %149 : vector<1x64xbf16> to vector<1x64xf32>
    %151 = vector.broadcast %150 : vector<1x64xf32> to vector<81x64xf32>
    %152 = arith.mulf %147, %151 : vector<81x64xf32>
    %153 = arith.addf %144, %152 : vector<81x64xf32>
    %c17 = arith.constant 17 : index
    %c0_119 = arith.constant 0 : index
    %c0_120 = arith.constant 0 : index
    %c0_121 = arith.constant 0 : index
    %154 = vector.load %arg1[%c17, %c0_119, %c0_120, %c0_121] : memref<36x1x81x64xbf16, #tpu.memory_space<vmem>>, vector<1x1x81x64xbf16>
    %155 = vector.shape_cast %154 : vector<1x1x81x64xbf16> to vector<81x64xbf16>
    %156 = arith.extf %155 : vector<81x64xbf16> to vector<81x64xf32>
    %c17_122 = arith.constant 17 : index
    %c0_123 = arith.constant 0 : index
    %c0_124 = arith.constant 0 : index
    %c0_125 = arith.constant 0 : index
    %157 = vector.load %arg2[%c17_122, %c0_123, %c0_124, %c0_125] : memref<36x1x1x64xbf16, #tpu.memory_space<vmem>>, vector<1x1x1x64xbf16>
    %158 = vector.shape_cast %157 : vector<1x1x1x64xbf16> to vector<1x64xbf16>
    %159 = arith.extf %158 : vector<1x64xbf16> to vector<1x64xf32>
    %160 = vector.broadcast %159 : vector<1x64xf32> to vector<81x64xf32>
    %161 = arith.mulf %156, %160 : vector<81x64xf32>
    %162 = arith.addf %153, %161 : vector<81x64xf32>
    %c18 = arith.constant 18 : index
    %c0_126 = arith.constant 0 : index
    %c0_127 = arith.constant 0 : index
    %c0_128 = arith.constant 0 : index
    %163 = vector.load %arg1[%c18, %c0_126, %c0_127, %c0_128] : memref<36x1x81x64xbf16, #tpu.memory_space<vmem>>, vector<1x1x81x64xbf16>
    %164 = vector.shape_cast %163 : vector<1x1x81x64xbf16> to vector<81x64xbf16>
    %165 = arith.extf %164 : vector<81x64xbf16> to vector<81x64xf32>
    %c18_129 = arith.constant 18 : index
    %c0_130 = arith.constant 0 : index
    %c0_131 = arith.constant 0 : index
    %c0_132 = arith.constant 0 : index
    %166 = vector.load %arg2[%c18_129, %c0_130, %c0_131, %c0_132] : memref<36x1x1x64xbf16, #tpu.memory_space<vmem>>, vector<1x1x1x64xbf16>
    %167 = vector.shape_cast %166 : vector<1x1x1x64xbf16> to vector<1x64xbf16>
    %168 = arith.extf %167 : vector<1x64xbf16> to vector<1x64xf32>
    %169 = vector.broadcast %168 : vector<1x64xf32> to vector<81x64xf32>
    %170 = arith.mulf %165, %169 : vector<81x64xf32>
    %171 = arith.addf %162, %170 : vector<81x64xf32>
    %c19 = arith.constant 19 : index
    %c0_133 = arith.constant 0 : index
    %c0_134 = arith.constant 0 : index
    %c0_135 = arith.constant 0 : index
    %172 = vector.load %arg1[%c19, %c0_133, %c0_134, %c0_135] : memref<36x1x81x64xbf16, #tpu.memory_space<vmem>>, vector<1x1x81x64xbf16>
    %173 = vector.shape_cast %172 : vector<1x1x81x64xbf16> to vector<81x64xbf16>
    %174 = arith.extf %173 : vector<81x64xbf16> to vector<81x64xf32>
    %c19_136 = arith.constant 19 : index
    %c0_137 = arith.constant 0 : index
    %c0_138 = arith.constant 0 : index
    %c0_139 = arith.constant 0 : index
    %175 = vector.load %arg2[%c19_136, %c0_137, %c0_138, %c0_139] : memref<36x1x1x64xbf16, #tpu.memory_space<vmem>>, vector<1x1x1x64xbf16>
    %176 = vector.shape_cast %175 : vector<1x1x1x64xbf16> to vector<1x64xbf16>
    %177 = arith.extf %176 : vector<1x64xbf16> to vector<1x64xf32>
    %178 = vector.broadcast %177 : vector<1x64xf32> to vector<81x64xf32>
    %179 = arith.mulf %174, %178 : vector<81x64xf32>
    %180 = arith.addf %171, %179 : vector<81x64xf32>
    %c20 = arith.constant 20 : index
    %c0_140 = arith.constant 0 : index
    %c0_141 = arith.constant 0 : index
    %c0_142 = arith.constant 0 : index
    %181 = vector.load %arg1[%c20, %c0_140, %c0_141, %c0_142] : memref<36x1x81x64xbf16, #tpu.memory_space<vmem>>, vector<1x1x81x64xbf16>
    %182 = vector.shape_cast %181 : vector<1x1x81x64xbf16> to vector<81x64xbf16>
    %183 = arith.extf %182 : vector<81x64xbf16> to vector<81x64xf32>
    %c20_143 = arith.constant 20 : index
    %c0_144 = arith.constant 0 : index
    %c0_145 = arith.constant 0 : index
    %c0_146 = arith.constant 0 : index
    %184 = vector.load %arg2[%c20_143, %c0_144, %c0_145, %c0_146] : memref<36x1x1x64xbf16, #tpu.memory_space<vmem>>, vector<1x1x1x64xbf16>
    %185 = vector.shape_cast %184 : vector<1x1x1x64xbf16> to vector<1x64xbf16>
    %186 = arith.extf %185 : vector<1x64xbf16> to vector<1x64xf32>
    %187 = vector.broadcast %186 : vector<1x64xf32> to vector<81x64xf32>
    %188 = arith.mulf %183, %187 : vector<81x64xf32>
    %189 = arith.addf %180, %188 : vector<81x64xf32>
    %c21 = arith.constant 21 : index
    %c0_147 = arith.constant 0 : index
    %c0_148 = arith.constant 0 : index
    %c0_149 = arith.constant 0 : index
    %190 = vector.load %arg1[%c21, %c0_147, %c0_148, %c0_149] : memref<36x1x81x64xbf16, #tpu.memory_space<vmem>>, vector<1x1x81x64xbf16>
    %191 = vector.shape_cast %190 : vector<1x1x81x64xbf16> to vector<81x64xbf16>
    %192 = arith.extf %191 : vector<81x64xbf16> to vector<81x64xf32>
    %c21_150 = arith.constant 21 : index
    %c0_151 = arith.constant 0 : index
    %c0_152 = arith.constant 0 : index
    %c0_153 = arith.constant 0 : index
    %193 = vector.load %arg2[%c21_150, %c0_151, %c0_152, %c0_153] : memref<36x1x1x64xbf16, #tpu.memory_space<vmem>>, vector<1x1x1x64xbf16>
    %194 = vector.shape_cast %193 : vector<1x1x1x64xbf16> to vector<1x64xbf16>
    %195 = arith.extf %194 : vector<1x64xbf16> to vector<1x64xf32>
    %196 = vector.broadcast %195 : vector<1x64xf32> to vector<81x64xf32>
    %197 = arith.mulf %192, %196 : vector<81x64xf32>
    %198 = arith.addf %189, %197 : vector<81x64xf32>
    %c22 = arith.constant 22 : index
    %c0_154 = arith.constant 0 : index
    %c0_155 = arith.constant 0 : index
    %c0_156 = arith.constant 0 : index
    %199 = vector.load %arg1[%c22, %c0_154, %c0_155, %c0_156] : memref<36x1x81x64xbf16, #tpu.memory_space<vmem>>, vector<1x1x81x64xbf16>
    %200 = vector.shape_cast %199 : vector<1x1x81x64xbf16> to vector<81x64xbf16>
    %201 = arith.extf %200 : vector<81x64xbf16> to vector<81x64xf32>
    %c22_157 = arith.constant 22 : index
    %c0_158 = arith.constant 0 : index
    %c0_159 = arith.constant 0 : index
    %c0_160 = arith.constant 0 : index
    %202 = vector.load %arg2[%c22_157, %c0_158, %c0_159, %c0_160] : memref<36x1x1x64xbf16, #tpu.memory_space<vmem>>, vector<1x1x1x64xbf16>
    %203 = vector.shape_cast %202 : vector<1x1x1x64xbf16> to vector<1x64xbf16>
    %204 = arith.extf %203 : vector<1x64xbf16> to vector<1x64xf32>
    %205 = vector.broadcast %204 : vector<1x64xf32> to vector<81x64xf32>
    %206 = arith.mulf %201, %205 : vector<81x64xf32>
    %207 = arith.addf %198, %206 : vector<81x64xf32>
    %c23 = arith.constant 23 : index
    %c0_161 = arith.constant 0 : index
    %c0_162 = arith.constant 0 : index
    %c0_163 = arith.constant 0 : index
    %208 = vector.load %arg1[%c23, %c0_161, %c0_162, %c0_163] : memref<36x1x81x64xbf16, #tpu.memory_space<vmem>>, vector<1x1x81x64xbf16>
    %209 = vector.shape_cast %208 : vector<1x1x81x64xbf16> to vector<81x64xbf16>
    %210 = arith.extf %209 : vector<81x64xbf16> to vector<81x64xf32>
    %c23_164 = arith.constant 23 : index
    %c0_165 = arith.constant 0 : index
    %c0_166 = arith.constant 0 : index
    %c0_167 = arith.constant 0 : index
    %211 = vector.load %arg2[%c23_164, %c0_165, %c0_166, %c0_167] : memref<36x1x1x64xbf16, #tpu.memory_space<vmem>>, vector<1x1x1x64xbf16>
    %212 = vector.shape_cast %211 : vector<1x1x1x64xbf16> to vector<1x64xbf16>
    %213 = arith.extf %212 : vector<1x64xbf16> to vector<1x64xf32>
    %214 = vector.broadcast %213 : vector<1x64xf32> to vector<81x64xf32>
    %215 = arith.mulf %210, %214 : vector<81x64xf32>
    %216 = arith.addf %207, %215 : vector<81x64xf32>
    %c24 = arith.constant 24 : index
    %c0_168 = arith.constant 0 : index
    %c0_169 = arith.constant 0 : index
    %c0_170 = arith.constant 0 : index
    %217 = vector.load %arg1[%c24, %c0_168, %c0_169, %c0_170] : memref<36x1x81x64xbf16, #tpu.memory_space<vmem>>, vector<1x1x81x64xbf16>
    %218 = vector.shape_cast %217 : vector<1x1x81x64xbf16> to vector<81x64xbf16>
    %219 = arith.extf %218 : vector<81x64xbf16> to vector<81x64xf32>
    %c24_171 = arith.constant 24 : index
    %c0_172 = arith.constant 0 : index
    %c0_173 = arith.constant 0 : index
    %c0_174 = arith.constant 0 : index
    %220 = vector.load %arg2[%c24_171, %c0_172, %c0_173, %c0_174] : memref<36x1x1x64xbf16, #tpu.memory_space<vmem>>, vector<1x1x1x64xbf16>
    %221 = vector.shape_cast %220 : vector<1x1x1x64xbf16> to vector<1x64xbf16>
    %222 = arith.extf %221 : vector<1x64xbf16> to vector<1x64xf32>
    %223 = vector.broadcast %222 : vector<1x64xf32> to vector<81x64xf32>
    %224 = arith.mulf %219, %223 : vector<81x64xf32>
    %225 = arith.addf %216, %224 : vector<81x64xf32>
    %c25 = arith.constant 25 : index
    %c0_175 = arith.constant 0 : index
    %c0_176 = arith.constant 0 : index
    %c0_177 = arith.constant 0 : index
    %226 = vector.load %arg1[%c25, %c0_175, %c0_176, %c0_177] : memref<36x1x81x64xbf16, #tpu.memory_space<vmem>>, vector<1x1x81x64xbf16>
    %227 = vector.shape_cast %226 : vector<1x1x81x64xbf16> to vector<81x64xbf16>
    %228 = arith.extf %227 : vector<81x64xbf16> to vector<81x64xf32>
    %c25_178 = arith.constant 25 : index
    %c0_179 = arith.constant 0 : index
    %c0_180 = arith.constant 0 : index
    %c0_181 = arith.constant 0 : index
    %229 = vector.load %arg2[%c25_178, %c0_179, %c0_180, %c0_181] : memref<36x1x1x64xbf16, #tpu.memory_space<vmem>>, vector<1x1x1x64xbf16>
    %230 = vector.shape_cast %229 : vector<1x1x1x64xbf16> to vector<1x64xbf16>
    %231 = arith.extf %230 : vector<1x64xbf16> to vector<1x64xf32>
    %232 = vector.broadcast %231 : vector<1x64xf32> to vector<81x64xf32>
    %233 = arith.mulf %228, %232 : vector<81x64xf32>
    %234 = arith.addf %225, %233 : vector<81x64xf32>
    %c26 = arith.constant 26 : index
    %c0_182 = arith.constant 0 : index
    %c0_183 = arith.constant 0 : index
    %c0_184 = arith.constant 0 : index
    %235 = vector.load %arg1[%c26, %c0_182, %c0_183, %c0_184] : memref<36x1x81x64xbf16, #tpu.memory_space<vmem>>, vector<1x1x81x64xbf16>
    %236 = vector.shape_cast %235 : vector<1x1x81x64xbf16> to vector<81x64xbf16>
    %237 = arith.extf %236 : vector<81x64xbf16> to vector<81x64xf32>
    %c26_185 = arith.constant 26 : index
    %c0_186 = arith.constant 0 : index
    %c0_187 = arith.constant 0 : index
    %c0_188 = arith.constant 0 : index
    %238 = vector.load %arg2[%c26_185, %c0_186, %c0_187, %c0_188] : memref<36x1x1x64xbf16, #tpu.memory_space<vmem>>, vector<1x1x1x64xbf16>
    %239 = vector.shape_cast %238 : vector<1x1x1x64xbf16> to vector<1x64xbf16>
    %240 = arith.extf %239 : vector<1x64xbf16> to vector<1x64xf32>
    %241 = vector.broadcast %240 : vector<1x64xf32> to vector<81x64xf32>
    %242 = arith.mulf %237, %241 : vector<81x64xf32>
    %243 = arith.addf %234, %242 : vector<81x64xf32>
    %c27 = arith.constant 27 : index
    %c0_189 = arith.constant 0 : index
    %c0_190 = arith.constant 0 : index
    %c0_191 = arith.constant 0 : index
    %244 = vector.load %arg1[%c27, %c0_189, %c0_190, %c0_191] : memref<36x1x81x64xbf16, #tpu.memory_space<vmem>>, vector<1x1x81x64xbf16>
    %245 = vector.shape_cast %244 : vector<1x1x81x64xbf16> to vector<81x64xbf16>
    %246 = arith.extf %245 : vector<81x64xbf16> to vector<81x64xf32>
    %c27_192 = arith.constant 27 : index
    %c0_193 = arith.constant 0 : index
    %c0_194 = arith.constant 0 : index
    %c0_195 = arith.constant 0 : index
    %247 = vector.load %arg2[%c27_192, %c0_193, %c0_194, %c0_195] : memref<36x1x1x64xbf16, #tpu.memory_space<vmem>>, vector<1x1x1x64xbf16>
    %248 = vector.shape_cast %247 : vector<1x1x1x64xbf16> to vector<1x64xbf16>
    %249 = arith.extf %248 : vector<1x64xbf16> to vector<1x64xf32>
    %250 = vector.broadcast %249 : vector<1x64xf32> to vector<81x64xf32>
    %251 = arith.mulf %246, %250 : vector<81x64xf32>
    %252 = arith.addf %243, %251 : vector<81x64xf32>
    %c28 = arith.constant 28 : index
    %c0_196 = arith.constant 0 : index
    %c0_197 = arith.constant 0 : index
    %c0_198 = arith.constant 0 : index
    %253 = vector.load %arg1[%c28, %c0_196, %c0_197, %c0_198] : memref<36x1x81x64xbf16, #tpu.memory_space<vmem>>, vector<1x1x81x64xbf16>
    %254 = vector.shape_cast %253 : vector<1x1x81x64xbf16> to vector<81x64xbf16>
    %255 = arith.extf %254 : vector<81x64xbf16> to vector<81x64xf32>
    %c28_199 = arith.constant 28 : index
    %c0_200 = arith.constant 0 : index
    %c0_201 = arith.constant 0 : index
    %c0_202 = arith.constant 0 : index
    %256 = vector.load %arg2[%c28_199, %c0_200, %c0_201, %c0_202] : memref<36x1x1x64xbf16, #tpu.memory_space<vmem>>, vector<1x1x1x64xbf16>
    %257 = vector.shape_cast %256 : vector<1x1x1x64xbf16> to vector<1x64xbf16>
    %258 = arith.extf %257 : vector<1x64xbf16> to vector<1x64xf32>
    %259 = vector.broadcast %258 : vector<1x64xf32> to vector<81x64xf32>
    %260 = arith.mulf %255, %259 : vector<81x64xf32>
    %261 = arith.addf %252, %260 : vector<81x64xf32>
    %c29 = arith.constant 29 : index
    %c0_203 = arith.constant 0 : index
    %c0_204 = arith.constant 0 : index
    %c0_205 = arith.constant 0 : index
    %262 = vector.load %arg1[%c29, %c0_203, %c0_204, %c0_205] : memref<36x1x81x64xbf16, #tpu.memory_space<vmem>>, vector<1x1x81x64xbf16>
    %263 = vector.shape_cast %262 : vector<1x1x81x64xbf16> to vector<81x64xbf16>
    %264 = arith.extf %263 : vector<81x64xbf16> to vector<81x64xf32>
    %c29_206 = arith.constant 29 : index
    %c0_207 = arith.constant 0 : index
    %c0_208 = arith.constant 0 : index
    %c0_209 = arith.constant 0 : index
    %265 = vector.load %arg2[%c29_206, %c0_207, %c0_208, %c0_209] : memref<36x1x1x64xbf16, #tpu.memory_space<vmem>>, vector<1x1x1x64xbf16>
    %266 = vector.shape_cast %265 : vector<1x1x1x64xbf16> to vector<1x64xbf16>
    %267 = arith.extf %266 : vector<1x64xbf16> to vector<1x64xf32>
    %268 = vector.broadcast %267 : vector<1x64xf32> to vector<81x64xf32>
    %269 = arith.mulf %264, %268 : vector<81x64xf32>
    %270 = arith.addf %261, %269 : vector<81x64xf32>
    %c30 = arith.constant 30 : index
    %c0_210 = arith.constant 0 : index
    %c0_211 = arith.constant 0 : index
    %c0_212 = arith.constant 0 : index
    %271 = vector.load %arg1[%c30, %c0_210, %c0_211, %c0_212] : memref<36x1x81x64xbf16, #tpu.memory_space<vmem>>, vector<1x1x81x64xbf16>
    %272 = vector.shape_cast %271 : vector<1x1x81x64xbf16> to vector<81x64xbf16>
    %273 = arith.extf %272 : vector<81x64xbf16> to vector<81x64xf32>
    %c30_213 = arith.constant 30 : index
    %c0_214 = arith.constant 0 : index
    %c0_215 = arith.constant 0 : index
    %c0_216 = arith.constant 0 : index
    %274 = vector.load %arg2[%c30_213, %c0_214, %c0_215, %c0_216] : memref<36x1x1x64xbf16, #tpu.memory_space<vmem>>, vector<1x1x1x64xbf16>
    %275 = vector.shape_cast %274 : vector<1x1x1x64xbf16> to vector<1x64xbf16>
    %276 = arith.extf %275 : vector<1x64xbf16> to vector<1x64xf32>
    %277 = vector.broadcast %276 : vector<1x64xf32> to vector<81x64xf32>
    %278 = arith.mulf %273, %277 : vector<81x64xf32>
    %279 = arith.addf %270, %278 : vector<81x64xf32>
    %c31 = arith.constant 31 : index
    %c0_217 = arith.constant 0 : index
    %c0_218 = arith.constant 0 : index
    %c0_219 = arith.constant 0 : index
    %280 = vector.load %arg1[%c31, %c0_217, %c0_218, %c0_219] : memref<36x1x81x64xbf16, #tpu.memory_space<vmem>>, vector<1x1x81x64xbf16>
    %281 = vector.shape_cast %280 : vector<1x1x81x64xbf16> to vector<81x64xbf16>
    %282 = arith.extf %281 : vector<81x64xbf16> to vector<81x64xf32>
    %c31_220 = arith.constant 31 : index
    %c0_221 = arith.constant 0 : index
    %c0_222 = arith.constant 0 : index
    %c0_223 = arith.constant 0 : index
    %283 = vector.load %arg2[%c31_220, %c0_221, %c0_222, %c0_223] : memref<36x1x1x64xbf16, #tpu.memory_space<vmem>>, vector<1x1x1x64xbf16>
    %284 = vector.shape_cast %283 : vector<1x1x1x64xbf16> to vector<1x64xbf16>
    %285 = arith.extf %284 : vector<1x64xbf16> to vector<1x64xf32>
    %286 = vector.broadcast %285 : vector<1x64xf32> to vector<81x64xf32>
    %287 = arith.mulf %282, %286 : vector<81x64xf32>
    %288 = arith.addf %279, %287 : vector<81x64xf32>
    %c32 = arith.constant 32 : index
    %c0_224 = arith.constant 0 : index
    %c0_225 = arith.constant 0 : index
    %c0_226 = arith.constant 0 : index
    %289 = vector.load %arg1[%c32, %c0_224, %c0_225, %c0_226] : memref<36x1x81x64xbf16, #tpu.memory_space<vmem>>, vector<1x1x81x64xbf16>
    %290 = vector.shape_cast %289 : vector<1x1x81x64xbf16> to vector<81x64xbf16>
    %291 = arith.extf %290 : vector<81x64xbf16> to vector<81x64xf32>
    %c32_227 = arith.constant 32 : index
    %c0_228 = arith.constant 0 : index
    %c0_229 = arith.constant 0 : index
    %c0_230 = arith.constant 0 : index
    %292 = vector.load %arg2[%c32_227, %c0_228, %c0_229, %c0_230] : memref<36x1x1x64xbf16, #tpu.memory_space<vmem>>, vector<1x1x1x64xbf16>
    %293 = vector.shape_cast %292 : vector<1x1x1x64xbf16> to vector<1x64xbf16>
    %294 = arith.extf %293 : vector<1x64xbf16> to vector<1x64xf32>
    %295 = vector.broadcast %294 : vector<1x64xf32> to vector<81x64xf32>
    %296 = arith.mulf %291, %295 : vector<81x64xf32>
    %297 = arith.addf %288, %296 : vector<81x64xf32>
    %c33 = arith.constant 33 : index
    %c0_231 = arith.constant 0 : index
    %c0_232 = arith.constant 0 : index
    %c0_233 = arith.constant 0 : index
    %298 = vector.load %arg1[%c33, %c0_231, %c0_232, %c0_233] : memref<36x1x81x64xbf16, #tpu.memory_space<vmem>>, vector<1x1x81x64xbf16>
    %299 = vector.shape_cast %298 : vector<1x1x81x64xbf16> to vector<81x64xbf16>
    %300 = arith.extf %299 : vector<81x64xbf16> to vector<81x64xf32>
    %c33_234 = arith.constant 33 : index
    %c0_235 = arith.constant 0 : index
    %c0_236 = arith.constant 0 : index
    %c0_237 = arith.constant 0 : index
    %301 = vector.load %arg2[%c33_234, %c0_235, %c0_236, %c0_237] : memref<36x1x1x64xbf16, #tpu.memory_space<vmem>>, vector<1x1x1x64xbf16>
    %302 = vector.shape_cast %301 : vector<1x1x1x64xbf16> to vector<1x64xbf16>
    %303 = arith.extf %302 : vector<1x64xbf16> to vector<1x64xf32>
    %304 = vector.broadcast %303 : vector<1x64xf32> to vector<81x64xf32>
    %305 = arith.mulf %300, %304 : vector<81x64xf32>
    %306 = arith.addf %297, %305 : vector<81x64xf32>
    %c34 = arith.constant 34 : index
    %c0_238 = arith.constant 0 : index
    %c0_239 = arith.constant 0 : index
    %c0_240 = arith.constant 0 : index
    %307 = vector.load %arg1[%c34, %c0_238, %c0_239, %c0_240] : memref<36x1x81x64xbf16, #tpu.memory_space<vmem>>, vector<1x1x81x64xbf16>
    %308 = vector.shape_cast %307 : vector<1x1x81x64xbf16> to vector<81x64xbf16>
    %309 = arith.extf %308 : vector<81x64xbf16> to vector<81x64xf32>
    %c34_241 = arith.constant 34 : index
    %c0_242 = arith.constant 0 : index
    %c0_243 = arith.constant 0 : index
    %c0_244 = arith.constant 0 : index
    %310 = vector.load %arg2[%c34_241, %c0_242, %c0_243, %c0_244] : memref<36x1x1x64xbf16, #tpu.memory_space<vmem>>, vector<1x1x1x64xbf16>
    %311 = vector.shape_cast %310 : vector<1x1x1x64xbf16> to vector<1x64xbf16>
    %312 = arith.extf %311 : vector<1x64xbf16> to vector<1x64xf32>
    %313 = vector.broadcast %312 : vector<1x64xf32> to vector<81x64xf32>
    %314 = arith.mulf %309, %313 : vector<81x64xf32>
    %315 = arith.addf %306, %314 : vector<81x64xf32>
    %c35 = arith.constant 35 : index
    %c0_245 = arith.constant 0 : index
    %c0_246 = arith.constant 0 : index
    %c0_247 = arith.constant 0 : index
    %316 = vector.load %arg1[%c35, %c0_245, %c0_246, %c0_247] : memref<36x1x81x64xbf16, #tpu.memory_space<vmem>>, vector<1x1x81x64xbf16>
    %317 = vector.shape_cast %316 : vector<1x1x81x64xbf16> to vector<81x64xbf16>
    %318 = arith.extf %317 : vector<81x64xbf16> to vector<81x64xf32>
    %c35_248 = arith.constant 35 : index
    %c0_249 = arith.constant 0 : index
    %c0_250 = arith.constant 0 : index
    %c0_251 = arith.constant 0 : index
    %319 = vector.load %arg2[%c35_248, %c0_249, %c0_250, %c0_251] : memref<36x1x1x64xbf16, #tpu.memory_space<vmem>>, vector<1x1x1x64xbf16>
    %320 = vector.shape_cast %319 : vector<1x1x1x64xbf16> to vector<1x64xbf16>
    %321 = arith.extf %320 : vector<1x64xbf16> to vector<1x64xf32>
    %322 = vector.broadcast %321 : vector<1x64xf32> to vector<81x64xf32>
    %323 = arith.mulf %318, %322 : vector<81x64xf32>
    %324 = arith.addf %315, %323 : vector<81x64xf32>
    %325 = arith.truncf %324 : vector<81x64xf32> to vector<81x64xbf16>
    %c0_252 = arith.constant 0 : index
    %c0_253 = arith.constant 0 : index
    %c0_254 = arith.constant 0 : index
    %326 = vector.load %arg3[%c0_252, %c0_253, %c0_254] : memref<1x81x64xbf16, #tpu.memory_space<vmem>>, vector<1x81x64xbf16>
    %327 = vector.shape_cast %326 : vector<1x81x64xbf16> to vector<81x64xbf16>
    %328 = vector.shape_cast %325 : vector<81x64xbf16> to vector<1x81x64xbf16>
    tpu.vector_store %arg3[%c0_252, %c0_253, %c0_254], %328 {strides = array<i32>} : memref<1x81x64xbf16, #tpu.memory_space<vmem>>, vector<1x81x64xbf16>,
    return
  }
  func.func @transform_0(%arg0: i32) -> (i32, i32, i32, i32) {
    %c0_i32 = arith.constant 0 : i32
    %c0_i32_0 = arith.constant 0 : i32
    %c0_i32_1 = arith.constant 0 : i32
    %c0_i32_2 = arith.constant 0 : i32
    return %c0_i32, %arg0, %c0_i32_0, %c0_i32_1 : i32, i32, i32, i32
  }
  func.func @transform_1(%arg0: i32) -> (i32, i32, i32, i32) {
    %c0_i32 = arith.constant 0 : i32
    %c0_i32_0 = arith.constant 0 : i32
    %c0_i32_1 = arith.constant 0 : i32
    %c0_i32_2 = arith.constant 0 : i32
    return %c0_i32, %arg0, %c0_i32_0, %c0_i32_1 : i32, i32, i32, i32
  }
  func.func @transform_2(%arg0: i32) -> (i32, i32, i32) {
    %c0_i32 = arith.constant 0 : i32
    %c0_i32_0 = arith.constant 0 : i32
    %c0_i32_1 = arith.constant 0 : i32
    return %arg0, %c0_i32, %c0_i32_0 : i32, i32, i32
  }
}

module attributes {stable_mosaic.version = 11 : i64} {
  func.func @_conv_gn_relu_kernel(%arg0: i32, %arg1: memref<1x176x576xbf16, #tpu.memory_space<vmem>>, %arg2: memref<1x576x64xbf16, #tpu.memory_space<vmem>>, %arg3: memref<1x1x64xf32, #tpu.memory_space<vmem>>, %arg4: memref<64x64xf32, #tpu.memory_space<vmem>>, %arg5: memref<1x1x64xf32, #tpu.memory_space<vmem>>, %arg6: memref<1x1x64xf32, #tpu.memory_space<vmem>>, %arg7: memref<1x176x64xbf16, #tpu.memory_space<vmem>>) attributes {dimension_semantics = [#tpu.dimension_semantics<parallel>], iteration_bounds = array<i64: 2>, scalar_prefetch = 0 : i64, scratch_operands = 0 : i64, tpu.core_type = #tpu.core_type<tc>, window_params = [{transform_indices = @transform_0, window_bounds = array<i64: 1, 176, 576>}, {transform_indices = @transform_1, window_bounds = array<i64: 1, 576, 64>}, {transform_indices = @transform_2, window_bounds = array<i64: 1, 1, 64>}, {pipeline_mode = #tpu.pipeline_mode<synchronous>, transform_indices = @transform_3, window_bounds = array<i64: 64, 64>}, {transform_indices = @transform_4, window_bounds = array<i64: 1, 1, 64>}, {transform_indices = @transform_5, window_bounds = array<i64: 1, 1, 64>}, {transform_indices = @transform_6, window_bounds = array<i64: 1, 176, 64>}]} {
    %c0 = arith.constant 0 : index
    %c0_0 = arith.constant 0 : index
    %c0_1 = arith.constant 0 : index
    %0 = vector.load %arg1[%c0, %c0_0, %c0_1] : memref<1x176x576xbf16, #tpu.memory_space<vmem>>, vector<1x176x576xbf16>
    %1 = vector.shape_cast %0 : vector<1x176x576xbf16> to vector<176x576xbf16>
    %c0_2 = arith.constant 0 : index
    %c0_3 = arith.constant 0 : index
    %c0_4 = arith.constant 0 : index
    %2 = vector.load %arg2[%c0_2, %c0_3, %c0_4] : memref<1x576x64xbf16, #tpu.memory_space<vmem>>, vector<1x576x64xbf16>
    %3 = vector.shape_cast %2 : vector<1x576x64xbf16> to vector<576x64xbf16>
    %cst = arith.constant dense<0.000000e+00> : vector<176x64xf32>
    %4 = tpu.matmul %1, %3, %cst {dimension_numbers = #tpu.dot_dimension_numbers<[1], [0], [0], [1], [0, 0, 1, 1], [], []>} : vector<176x576xbf16>, vector<576x64xbf16>, vector<176x64xf32> -> vector<176x64xf32>
    %c0_5 = arith.constant 0 : index
    %c0_6 = arith.constant 0 : index
    %c0_7 = arith.constant 0 : index
    %5 = vector.load %arg3[%c0_5, %c0_6, %c0_7] : memref<1x1x64xf32, #tpu.memory_space<vmem>>, vector<1x1x64xf32>
    %6 = vector.shape_cast %5 : vector<1x1x64xf32> to vector<1x64xf32>
    %7 = vector.broadcast %6 : vector<1x64xf32> to vector<176x64xf32>
    %8 = arith.addf %4, %7 : vector<176x64xf32>
    %9 = vector.shape_cast %8 : vector<176x64xf32> to vector<2x88x64xf32>
    %10 = tpu.iota {dimensions = array<i32: 1>} : vector<2x88x64xi32>
    %c81_i32 = arith.constant 81 : i32
    %11 = vector.broadcast %c81_i32 : i32 to vector<2x88x64xi32>
    %12 = arith.cmpi slt, %10, %11 : vector<2x88x64xi32>
    %cst_8 = arith.constant 0.000000e+00 : f32
    %13 = vector.broadcast %cst_8 : f32 to vector<2x88x64xf32>
    %14 = arith.select %12, %9, %13 : vector<2x88x64xi1>, vector<2x88x64xf32>
    %cst_9 = arith.constant dense<0.000000e+00> : vector<2x64xf32>
    %15 = vector.multi_reduction <add>, %14, %cst_9 [1] : vector<2x88x64xf32> to vector<2x64xf32>
    %c0_10 = arith.constant 0 : index
    %c0_11 = arith.constant 0 : index
    %16 = vector.load %arg4[%c0_10, %c0_11] : memref<64x64xf32, #tpu.memory_space<vmem>>, vector<64x64xf32>
    %cst_12 = arith.constant dense<0.000000e+00> : vector<2x64xf32>
    %17 = tpu.matmul %15, %16, %cst_12 {dimension_numbers = #tpu.dot_dimension_numbers<[1], [0], [0], [1], [0, 0, 1, 1], [], []>} : vector<2x64xf32>, vector<64x64xf32>, vector<2x64xf32> -> vector<2x64xf32>
    %cst_13 = arith.constant 1.620000e+02 : f32
    %18 = vector.broadcast %cst_13 : f32 to vector<2x64xf32>
    %19 = arith.divf %17, %18 : vector<2x64xf32>
    %20 = vector.shape_cast %19 : vector<2x64xf32> to vector<2x1x64xf32>
    %21 = vector.broadcast %20 : vector<2x1x64xf32> to vector<2x88x64xf32>
    %22 = arith.subf %9, %21 : vector<2x88x64xf32>
    %cst_14 = arith.constant 0.000000e+00 : f32
    %23 = vector.broadcast %cst_14 : f32 to vector<2x88x64xf32>
    %24 = arith.select %12, %22, %23 : vector<2x88x64xi1>, vector<2x88x64xf32>
    %25 = arith.mulf %24, %24 : vector<2x88x64xf32>
    %cst_15 = arith.constant dense<0.000000e+00> : vector<2x64xf32>
    %26 = vector.multi_reduction <add>, %25, %cst_15 [1] : vector<2x88x64xf32> to vector<2x64xf32>
    %c0_16 = arith.constant 0 : index
    %c0_17 = arith.constant 0 : index
    %27 = vector.load %arg4[%c0_16, %c0_17] : memref<64x64xf32, #tpu.memory_space<vmem>>, vector<64x64xf32>
    %cst_18 = arith.constant dense<0.000000e+00> : vector<2x64xf32>
    %28 = tpu.matmul %26, %27, %cst_18 {dimension_numbers = #tpu.dot_dimension_numbers<[1], [0], [0], [1], [0, 0, 1, 1], [], []>} : vector<2x64xf32>, vector<64x64xf32>, vector<2x64xf32> -> vector<2x64xf32>
    %cst_19 = arith.constant 1.620000e+02 : f32
    %29 = vector.broadcast %cst_19 : f32 to vector<2x64xf32>
    %30 = arith.divf %28, %29 : vector<2x64xf32>
    %cst_20 = arith.constant 9.99999974E-6 : f32
    %31 = vector.broadcast %cst_20 : f32 to vector<2x64xf32>
    %32 = arith.addf %30, %31 : vector<2x64xf32>
    %33 = math.rsqrt %32 : vector<2x64xf32>
    %34 = vector.shape_cast %33 : vector<2x64xf32> to vector<2x1x64xf32>
    %c0_21 = arith.constant 0 : index
    %c0_22 = arith.constant 0 : index
    %c0_23 = arith.constant 0 : index
    %35 = vector.load %arg5[%c0_21, %c0_22, %c0_23] : memref<1x1x64xf32, #tpu.memory_space<vmem>>, vector<1x1x64xf32>
    %36 = vector.shape_cast %35 : vector<1x1x64xf32> to vector<1x64xf32>
    %37 = vector.shape_cast %36 : vector<1x64xf32> to vector<1x1x64xf32>
    %38 = vector.broadcast %37 : vector<1x1x64xf32> to vector<2x1x64xf32>
    %39 = arith.mulf %34, %38 : vector<2x1x64xf32>
    %40 = vector.broadcast %39 : vector<2x1x64xf32> to vector<2x88x64xf32>
    %41 = arith.mulf %24, %40 : vector<2x88x64xf32>
    %c0_24 = arith.constant 0 : index
    %c0_25 = arith.constant 0 : index
    %c0_26 = arith.constant 0 : index
    %42 = vector.load %arg6[%c0_24, %c0_25, %c0_26] : memref<1x1x64xf32, #tpu.memory_space<vmem>>, vector<1x1x64xf32>
    %43 = vector.shape_cast %42 : vector<1x1x64xf32> to vector<1x64xf32>
    %44 = vector.shape_cast %43 : vector<1x64xf32> to vector<1x1x64xf32>
    %45 = vector.broadcast %44 : vector<1x1x64xf32> to vector<2x88x64xf32>
    %46 = arith.addf %41, %45 : vector<2x88x64xf32>
    %cst_27 = arith.constant 0.000000e+00 : f32
    %47 = vector.broadcast %cst_27 : f32 to vector<2x88x64xf32>
    %48 = arith.maximumf %46, %47 : vector<2x88x64xf32>
    %49 = vector.shape_cast %48 : vector<2x88x64xf32> to vector<176x64xf32>
    %50 = arith.truncf %49 : vector<176x64xf32> to vector<176x64xbf16>
    %c0_28 = arith.constant 0 : index
    %c0_29 = arith.constant 0 : index
    %c0_30 = arith.constant 0 : index
    %51 = vector.load %arg7[%c0_28, %c0_29, %c0_30] : memref<1x176x64xbf16, #tpu.memory_space<vmem>>, vector<1x176x64xbf16>
    %52 = vector.shape_cast %51 : vector<1x176x64xbf16> to vector<176x64xbf16>
    %53 = vector.shape_cast %50 : vector<176x64xbf16> to vector<1x176x64xbf16>
    tpu.vector_store %arg7[%c0_28, %c0_29, %c0_30], %53 {strides = array<i32>} : memref<1x176x64xbf16, #tpu.memory_space<vmem>>, vector<1x176x64xbf16>,
    return
  }
  func.func @transform_0(%arg0: i32) -> (i32, i32, i32) {
    %c0_i32 = arith.constant 0 : i32
    %c0_i32_0 = arith.constant 0 : i32
    %c0_i32_1 = arith.constant 0 : i32
    return %arg0, %c0_i32, %c0_i32_0 : i32, i32, i32
  }
  func.func @transform_1(%arg0: i32) -> (i32, i32, i32) {
    %c0_i32 = arith.constant 0 : i32
    %c0_i32_0 = arith.constant 0 : i32
    %c0_i32_1 = arith.constant 0 : i32
    return %arg0, %c0_i32, %c0_i32_0 : i32, i32, i32
  }
  func.func @transform_2(%arg0: i32) -> (i32, i32, i32) {
    %c0_i32 = arith.constant 0 : i32
    %c0_i32_0 = arith.constant 0 : i32
    %c0_i32_1 = arith.constant 0 : i32
    return %arg0, %c0_i32, %c0_i32_0 : i32, i32, i32
  }
  func.func @transform_3(%arg0: i32) -> (i32, i32) {
    %c0_i32 = arith.constant 0 : i32
    %c0_i32_0 = arith.constant 0 : i32
    %c0_i32_1 = arith.constant 0 : i32
    return %c0_i32, %c0_i32_0 : i32, i32
  }
  func.func @transform_4(%arg0: i32) -> (i32, i32, i32) {
    %c0_i32 = arith.constant 0 : i32
    %c0_i32_0 = arith.constant 0 : i32
    %c0_i32_1 = arith.constant 0 : i32
    return %arg0, %c0_i32, %c0_i32_0 : i32, i32, i32
  }
  func.func @transform_5(%arg0: i32) -> (i32, i32, i32) {
    %c0_i32 = arith.constant 0 : i32
    %c0_i32_0 = arith.constant 0 : i32
    %c0_i32_1 = arith.constant 0 : i32
    return %arg0, %c0_i32, %c0_i32_0 : i32, i32, i32
  }
  func.func @transform_6(%arg0: i32) -> (i32, i32, i32) {
    %c0_i32 = arith.constant 0 : i32
    %c0_i32_0 = arith.constant 0 : i32
    %c0_i32_1 = arith.constant 0 : i32
    return %arg0, %c0_i32, %c0_i32_0 : i32, i32, i32
  }
}

module attributes {stable_mosaic.version = 11 : i64} {
  func.func @_conv_bias_kernel(%arg0: i32, %arg1: memref<1x176x576xbf16, #tpu.memory_space<vmem>>, %arg2: memref<1x576x128xbf16, #tpu.memory_space<vmem>>, %arg3: memref<1x1x128xf32, #tpu.memory_space<vmem>>, %arg4: memref<1x176x128xf32, #tpu.memory_space<vmem>>) attributes {dimension_semantics = [#tpu.dimension_semantics<parallel>], iteration_bounds = array<i64: 2>, scalar_prefetch = 0 : i64, scratch_operands = 0 : i64, tpu.core_type = #tpu.core_type<tc>, window_params = [{transform_indices = @transform_0, window_bounds = array<i64: 1, 176, 576>}, {transform_indices = @transform_1, window_bounds = array<i64: 1, 576, 128>}, {transform_indices = @transform_2, window_bounds = array<i64: 1, 1, 128>}, {transform_indices = @transform_3, window_bounds = array<i64: 1, 176, 128>}]} {
    %c0 = arith.constant 0 : index
    %c0_0 = arith.constant 0 : index
    %c0_1 = arith.constant 0 : index
    %0 = vector.load %arg1[%c0, %c0_0, %c0_1] : memref<1x176x576xbf16, #tpu.memory_space<vmem>>, vector<1x176x576xbf16>
    %1 = vector.shape_cast %0 : vector<1x176x576xbf16> to vector<176x576xbf16>
    %c0_2 = arith.constant 0 : index
    %c0_3 = arith.constant 0 : index
    %c0_4 = arith.constant 0 : index
    %2 = vector.load %arg2[%c0_2, %c0_3, %c0_4] : memref<1x576x128xbf16, #tpu.memory_space<vmem>>, vector<1x576x128xbf16>
    %3 = vector.shape_cast %2 : vector<1x576x128xbf16> to vector<576x128xbf16>
    %cst = arith.constant dense<0.000000e+00> : vector<176x128xf32>
    %4 = tpu.matmul %1, %3, %cst {dimension_numbers = #tpu.dot_dimension_numbers<[1], [0], [0], [1], [0, 0, 1, 1], [], []>} : vector<176x576xbf16>, vector<576x128xbf16>, vector<176x128xf32> -> vector<176x128xf32>
    %c0_5 = arith.constant 0 : index
    %c0_6 = arith.constant 0 : index
    %c0_7 = arith.constant 0 : index
    %5 = vector.load %arg3[%c0_5, %c0_6, %c0_7] : memref<1x1x128xf32, #tpu.memory_space<vmem>>, vector<1x1x128xf32>
    %6 = vector.shape_cast %5 : vector<1x1x128xf32> to vector<1x128xf32>
    %7 = vector.broadcast %6 : vector<1x128xf32> to vector<176x128xf32>
    %8 = arith.addf %4, %7 : vector<176x128xf32>
    %c0_8 = arith.constant 0 : index
    %c0_9 = arith.constant 0 : index
    %c0_10 = arith.constant 0 : index
    %9 = vector.load %arg4[%c0_8, %c0_9, %c0_10] : memref<1x176x128xf32, #tpu.memory_space<vmem>>, vector<1x176x128xf32>
    %10 = vector.shape_cast %9 : vector<1x176x128xf32> to vector<176x128xf32>
    %11 = vector.shape_cast %8 : vector<176x128xf32> to vector<1x176x128xf32>
    tpu.vector_store %arg4[%c0_8, %c0_9, %c0_10], %11 {strides = array<i32>} : memref<1x176x128xf32, #tpu.memory_space<vmem>>, vector<1x176x128xf32>,
    return
  }
  func.func @transform_0(%arg0: i32) -> (i32, i32, i32) {
    %c0_i32 = arith.constant 0 : i32
    %c0_i32_0 = arith.constant 0 : i32
    %c0_i32_1 = arith.constant 0 : i32
    return %arg0, %c0_i32, %c0_i32_0 : i32, i32, i32
  }
  func.func @transform_1(%arg0: i32) -> (i32, i32, i32) {
    %c0_i32 = arith.constant 0 : i32
    %c0_i32_0 = arith.constant 0 : i32
    %c0_i32_1 = arith.constant 0 : i32
    return %arg0, %c0_i32, %c0_i32_0 : i32, i32, i32
  }
  func.func @transform_2(%arg0: i32) -> (i32, i32, i32) {
    %c0_i32 = arith.constant 0 : i32
    %c0_i32_0 = arith.constant 0 : i32
    %c0_i32_1 = arith.constant 0 : i32
    return %arg0, %c0_i32, %c0_i32_0 : i32, i32, i32
  }
  func.func @transform_3(%arg0: i32) -> (i32, i32, i32) {
    %c0_i32 = arith.constant 0 : i32
    %c0_i32_0 = arith.constant 0 : i32
    %c0_i32_1 = arith.constant 0 : i32
    return %arg0, %c0_i32, %c0_i32_0 : i32, i32, i32
  }
}

</mosaic_0001>

<bundles_post_ra>
// kernel: squeeze.5
= control target key start
LH: loop header
LB: loop body
LE: loop exit
PB: predicated region body
PF: predicated region fallthrough
CT: control target
= control target key end

     0   :  { %s1997_s0 = inlined_call_operand.vmem [shape: bf16[1,392,128], index: 0, kind: input, shape index: {}]   ;;  %s1998_s1 = inlined_call_operand.vmem [shape: bf16[2,14,14,128], index: 1, kind: output, shape index: {}]  }
   0x1   :  { %v1767_v0 = vld [vmem:[%s1997_s0 + $0xb0] sm:$0xff]   ;;  %v1773_v2 = vld [vmem:[%s1997_s0 + $0xa0] sm:$0xff]   ;;  %v1726_v21 = vld [vmem:[%s1997_s0 + $0x8] sm:$0xff]  }
   0x2   :  { %v1474_v1 = vunpack.c.l.bf16 %v1767_v0  ;;  %v1482_v3 = vunpack.c.l.bf16 %v1773_v2  ;;  %v1779_v4 = vld [vmem:[%s1997_s0 + $0x90] sm:$0xff]   ;;  %v1784_v5 = vld [vmem:[%s1997_s0 + $0x80] sm:$0xff]   ;;  %v1558_v25 = vunpack.c.l.bf16 %v1726_v21  ;;  %v1559_v27 = vunpack.c.h.bf16 %v1726_v21  ;;  %v1837_v28 = vld [vmem:[%s1997_s0 + $0x18] sm:$0xff]  }
   0x3   :  { %v1490_v6 = vunpack.c.l.bf16 %v1779_v4  ;;  %v1498_v7 = vunpack.c.l.bf16 %v1784_v5  ;;  %v1791_v8 = vld [vmem:[%s1997_s0 + $0x70] sm:$0xff]   ;;  %v1796_v9 = vld [vmem:[%s1997_s0 + $0x60] sm:$0xff]   ;;  %v1550_v30 = vunpack.c.l.bf16 %v1837_v28  ;;  %v1722_v31 = vld [vmem:[%s1997_s0 + $0x28] sm:$0xff]   ;;  %v1551_v33 = vunpack.c.h.bf16 %v1837_v28 }
   0x4   :  { %952 = vst [vmem:[#allocation0 + $0x192] sm:$0xff] %v1474_v1   ;;  %v1801_v10 = vld [vmem:[%s1997_s0 + $0x50] sm:$0xff]   ;;  %v1506_v11 = vunpack.c.l.bf16 %v1791_v8  ;;  %v1719_v12 = vld [vmem:[%s1997_s0 + $0x40] sm:$0xff]   ;;  %v1514_v13 = vunpack.c.l.bf16 %v1796_v9  ;;  %v1542_v34 = vunpack.c.l.bf16 %v1722_v31  ;;  %v1543_v35 = vunpack.c.h.bf16 %v1722_v31  ;;  %v1847_v36 = vld [vmem:[%s1997_s0 + $0x38] sm:$0xff]  }
   0x5   :  { %932 = vst [vmem:[#allocation0 + $0x16c] sm:$0x3] %v1482_v3   ;;  %v1721_v14 = vld [vmem:[%s1997_s0 + $0x30] sm:$0xff]   ;;  %v1522_v15 = vunpack.c.l.bf16 %v1801_v10  ;;  %v1723_v16 = vld [vmem:[%s1997_s0 + $0x20] sm:$0xff]   ;;  %v1530_v17 = vunpack.c.l.bf16 %v1719_v12  ;;  %v1535_v38 = vunpack.c.h.bf16 %v1847_v36  ;;  %v1718_v39 = vld [vmem:[%s1997_s0 + $0x48] sm:$0xff]   ;;  %v1534_v40 = vunpack.c.l.bf16 %v1847_v36 }
   0x6   :  { %912 = vst [vmem:[#allocation0 + $0x148] sm:$0x3f] %v1490_v6   ;;  %v1725_v18 = vld [vmem:[%s1997_s0 + $0x10] sm:$0xff]   ;;  %v1538_v19 = vunpack.c.l.bf16 %v1721_v14  ;;  %v1546_v20 = vunpack.c.l.bf16 %v1723_v16  ;;  %v1830_v22 = vld [vmem:[%s1997_s0] sm:$0xff]   ;;  %v1547_v32 = vunpack.c.h.bf16 %v1723_v16  ;;  %v1539_v37 = vunpack.c.h.bf16 %v1721_v14  ;;  %v1716_v43 = vld [vmem:[%s1997_s0 + $0x58] sm:$0xff]  }
   0x7   :  { %894 = vst [vmem:[#allocation0 + $0x124] sm:$0xff] %v1498_v7   ;;  %v1554_v23 = vunpack.c.l.bf16 %v1725_v18  ;;  %v1562_v24 = vunpack.c.l.bf16 %v1830_v22  ;;  %v1563_v26 = vunpack.c.h.bf16 %v1830_v22  ;;  %v1555_v29 = vunpack.c.h.bf16 %v1725_v18  ;;  %v1714_v47 = vld [vmem:[%s1997_s0 + $0x68] sm:$0xff]   ;;  %v1712_v51 = vld [vmem:[%s1997_s0 + $0x78] sm:$0xff]  }
   0x8   :  { %854 = vst [vmem:[#allocation0 + $0xda] sm:$0xf] %v1514_v13   ;;  %v1531_v41 = vunpack.c.h.bf16 %v1719_v12  ;;  %v1526_v42 = vunpack.c.l.bf16 %v1718_v39  ;;  %v1527_v44 = vunpack.c.h.bf16 %v1718_v39  ;;  %v1518_v45 = vunpack.c.l.bf16 %v1716_v43  ;;  %v1871_v56 = vld [vmem:[%s1997_s0 + $0x88] sm:$0xff]   ;;  %v1708_v59 = vld [vmem:[%s1997_s0 + $0x98] sm:$0xff]  }
   0x9   :  { %836 = vst [vmem:[#allocation0 + $0xb6] sm:$0xff] %v1522_v15   ;;  %v1523_v46 = vunpack.c.h.bf16 %v1801_v10  ;;  %v1519_v48 = vunpack.c.h.bf16 %v1716_v43  ;;  %v1515_v49 = vunpack.c.h.bf16 %v1796_v9  ;;  %v1510_v50 = vunpack.c.l.bf16 %v1714_v47  ;;  %v1885_v1 = vld [vmem:[%s1997_s0 + $0xa8] sm:$0xff]  }
   0xa   :  { %816 = vst [vmem:[#allocation0 + $0x92] sm:$0xff] %v1530_v17   ;;  %v1511_v52 = vunpack.c.h.bf16 %v1714_v47  ;;  %v1507_v53 = vunpack.c.h.bf16 %v1791_v8  ;;  %v1502_v54 = vunpack.c.l.bf16 %v1712_v51  ;;  %v1503_v55 = vunpack.c.h.bf16 %v1712_v51 }
   0xb   :  { %796 = vst [vmem:[#allocation0 + $0x6c] sm:$0x3] %v1538_v19   ;;  %v1499_v57 = vunpack.c.h.bf16 %v1784_v5  ;;  %v1494_v58 = vunpack.c.l.bf16 %v1871_v56  ;;  %v1491_v60 = vunpack.c.h.bf16 %v1779_v4  ;;  %v1495_v61 = vunpack.c.h.bf16 %v1871_v56 }
   0xc   :  { %776 = vst [vmem:[#allocation0 + $0x48] sm:$0x3f] %v1546_v20   ;;  %v1486_v62 = vunpack.c.l.bf16 %v1708_v59  ;;  %v1487_v63 = vunpack.c.h.bf16 %v1708_v59  ;;  %v1483_v4 = vunpack.c.h.bf16 %v1773_v2  ;;  %v1479_v5 = vunpack.c.h.bf16 %v1885_v1  ;;  %v1365_v2 = vld [vmem:[%s1997_s0 + $0xc0] sm:$0xf] }
   0xd   :  { %758 = vst [vmem:[#allocation0 + $0x24] sm:$0xff] %v1554_v23   ;;  %v1478_v7 = vunpack.c.l.bf16 %v1885_v1  ;;  %v1475_v0 = vunpack.c.h.bf16 %v1767_v0  ;;  %v15_v15 = vunpack.c.l.bf16 %v1365_v2 }
   0xe   :  { %742 = vst [vmem:[#allocation0 + $0x8] sm:$0x3f] %v1563_v26  }
   0xf   :  { %744 = vst [vmem:[#allocation0 + $0xa] sm:$0xc0] %v1563_v26  }
  0x10   :  { %748 = vst [vmem:[#allocation0 + $0x12] sm:$0xff] %v1558_v25  }
  0x11   :  { %752 = vst [vmem:[#allocation0 + $0x1a] sm:$0xf] %v1559_v27  }
  0x12   :  { %754 = vst [vmem:[#allocation0 + $0x1c] sm:$0xf0] %v1559_v27  }
  0x13   :  { %762 = vst [vmem:[#allocation0 + $0x2c] sm:$0x3] %v1555_v29   ;;  %v1037_v22 = vld [vmem:[#allocation0 + $0x48] sm:$0xff] }
  0x14   :  { %764 = vst [vmem:[#allocation0 + $0x2e] sm:$0xfc] %v1555_v29   ;;  %v1587_v28 = vpack.c.bf16 %v1037_v22, %v1551_v33 }
  0x15   :  { %768 = vst [vmem:[#allocation0 + $0x36] sm:$0xff] %v1550_v30   ;;  %v981_v12 = vld [vmem:[#allocation0 + $0x8] sm:$0xff] }
  0x16   :  { %778 = vst [vmem:[#allocation0 + $0x4a] sm:$0xc0] %v1546_v20   ;;  %v1567_v18 = vpack.c.bf16 %v981_v12, %v1562_v24 }
  0x17   :  { %782 = vst [vmem:[#allocation0 + $0x52] sm:$0xff] %v1547_v32  }
  0x18   :  { %786 = vst [vmem:[#allocation0 + $0x5a] sm:$0xf] %v1542_v34   ;;  %v995_v14 = vld [vmem:[#allocation0 + $0x18] sm:$0xff] }
  0x19   :  { %788 = vst [vmem:[#allocation0 + $0x5c] sm:$0xf0] %v1542_v34   ;;  %v1002_v16 = vld [vmem:[#allocation0 + $0x20] sm:$0xff] }
  0x1a   :  { %792 = vst [vmem:[#allocation0 + $0x64] sm:$0xff] %v1543_v35   ;;  %v1009_v17 = vld [vmem:[#allocation0 + $0x28] sm:$0xff] }
  0x1b   :  { %798 = vst [vmem:[#allocation0 + $0x6e] sm:$0xfc] %v1538_v19   ;;  %v1577_v23 = vpack.c.bf16 %v1009_v17, %v1002_v16 }
  0x1c   :  { %802 = vst [vmem:[#allocation0 + $0x76] sm:$0xff] %v1539_v37   ;;  %v1016_v19 = vld [vmem:[#allocation0 + $0x30] sm:$0xff]  ;;  %v1023_v20 = vld [vmem:[#allocation0 + $0x38] sm:$0xff] }
  0x1d   :  { %810 = vst [vmem:[#allocation0 + $0x88] sm:$0x3f] %v1535_v38   ;;  %v1582_v26 = vpack.c.bf16 %v1023_v20, %v1016_v19 }
  0x1e   :  { %812 = vst [vmem:[#allocation0 + $0x8a] sm:$0xc0] %v1535_v38   ;;  %v1044_v24 = vld [vmem:[#allocation0 + $0x50] sm:$0xff] }
  0x1f   :  { %820 = vst [vmem:[#allocation0 + $0x9a] sm:$0xf] %v1531_v41   ;;  %v1051_v25 = vld [vmem:[#allocation0 + $0x58] sm:$0xff] }
  0x20   :  { %822 = vst [vmem:[#allocation0 + $0x9c] sm:$0xf0] %v1531_v41   ;;  %v1592_v32 = vpack.c.bf16 %v1051_v25, %v1044_v24 }
  0x21   :  { %826 = vst [vmem:[#allocation0 + $0xa4] sm:$0xff] %v1526_v42   ;;  %v1058_v27 = vld [vmem:[#allocation0 + $0x60] sm:$0xff]  ;;  %v1065_v29 = vld [vmem:[#allocation0 + $0x68] sm:$0xff]  ;;  %v1135_v42 = vld [vmem:[#allocation0 + $0xb8] sm:$0xff] }
  0x22   :  { %830 = vst [vmem:[#allocation0 + $0xac] sm:$0x3] %v1527_v44   ;;  %v1597_v34 = vpack.c.bf16 %v1065_v29, %v1058_v27 }
  0x23   :  { %832 = vst [vmem:[#allocation0 + $0xae] sm:$0xfc] %v1527_v44   ;;  %v1072_v30 = vld [vmem:[#allocation0 + $0x70] sm:$0xff]  ;;  %v1079_v31 = vld [vmem:[#allocation0 + $0x78] sm:$0xff] }
  0x24   :  { %844 = vst [vmem:[#allocation0 + $0xc8] sm:$0x3f] %v1518_v45   ;;  %v1093_v33 = vld [vmem:[#allocation0 + $0x88] sm:$0xff]  ;;  %v1602_v38 = vpack.c.bf16 %v1079_v31, %v1072_v30 }
  0x25   :  { %846 = vst [vmem:[#allocation0 + $0xca] sm:$0xc0] %v1518_v45   ;;  %v1100_v35 = vld [vmem:[#allocation0 + $0x90] sm:$0xff]  ;;  %v1607_v36 = vpack.c.bf16 %v1093_v33, %v1534_v40 }
  0x26   :  { %850 = vst [vmem:[#allocation0 + $0xd2] sm:$0xff] %v1519_v48   ;;  %v1107_v37 = vld [vmem:[#allocation0 + $0x98] sm:$0xff] }
  0x27   :  { %856 = vst [vmem:[#allocation0 + $0xdc] sm:$0xf0] %v1514_v13   ;;  %v988_v13 = vld [vmem:[#allocation0 + $0x10] sm:$0xff]  ;;  %v1612_v43 = vpack.c.bf16 %v1107_v37, %v1100_v35 }
  0x28   :  { %860 = vst [vmem:[#allocation0 + $0xe4] sm:$0xff] %v1515_v49   ;;  %v1572_v21 = vpack.c.bf16 %v995_v14, %v988_v13  ;;  %v1114_v39 = vld [vmem:[#allocation0 + $0xa0] sm:$0xff] }
  0x29   :  { %864 = vst [vmem:[#allocation0 + $0xec] sm:$0x3] %v1510_v50   ;;  %v1121_v41 = vld [vmem:[#allocation0 + $0xa8] sm:$0xff] }
  0x2a   :  { %866 = vst [vmem:[#allocation0 + $0xee] sm:$0xfc] %v1510_v50   ;;  %v1128_v40 = vld [vmem:[#allocation0 + $0xb0] sm:$0xff]  ;;  %v1617_v45 = vpack.c.bf16 %v1121_v41, %v1114_v39 }
  0x2b   :  { %870 = vst [vmem:[#allocation0 + $0xf6] sm:$0xff] %v1511_v52   ;;  %v1149_v44 = vld [vmem:[#allocation0 + $0xc8] sm:$0xff]  ;;  %v1622_v49 = vpack.c.bf16 %v1135_v42, %v1128_v40 }
  0x2c   :  { %878 = vst [vmem:[#allocation0 + $0x108] sm:$0x3f] %v1507_v53   ;;  %v1627_v10 = vpack.c.bf16 %v1149_v44, %v1523_v46 }
  0x2d   :  { %880 = vst [vmem:[#allocation0 + $0x10a] sm:$0xc0] %v1507_v53   ;;  %v1156_v47 = vld [vmem:[#allocation0 + $0xd0] sm:$0xff]  ;;  %v1163_v48 = vld [vmem:[#allocation0 + $0xd8] sm:$0xff] }
  0x2e   :  { %884 = vst [vmem:[#allocation0 + $0x112] sm:$0xff] %v1502_v54   ;;  %v1632_v53 = vpack.c.bf16 %v1163_v48, %v1156_v47 }
  0x2f   :  { %888 = vst [vmem:[#allocation0 + $0x11a] sm:$0xf] %v1503_v55   ;;  %v1170_v50 = vld [vmem:[#allocation0 + $0xe0] sm:$0xff] }
  0x30   :  { %890 = vst [vmem:[#allocation0 + $0x11c] sm:$0xf0] %v1503_v55   ;;  %v1177_v51 = vld [vmem:[#allocation0 + $0xe8] sm:$0xff] }
  0x31   :  { %898 = vst [vmem:[#allocation0 + $0x12c] sm:$0x3] %v1499_v57   ;;  %v1637_v55 = vpack.c.bf16 %v1177_v51, %v1170_v50 }
  0x32   :  { %900 = vst [vmem:[#allocation0 + $0x12e] sm:$0xfc] %v1499_v57   ;;  %v1184_v46 = vld [vmem:[#allocation0 + $0xf0] sm:$0xff]  ;;  %v1191_v52 = vld [vmem:[#allocation0 + $0xf8] sm:$0xff] }
  0x33   :  { %904 = vst [vmem:[#allocation0 + $0x136] sm:$0xff] %v1494_v58   ;;  %v1205_v54 = vld [vmem:[#allocation0 + $0x108] sm:$0xff]  ;;  %v1642_v59 = vpack.c.bf16 %v1191_v52, %v1184_v46 }
  0x34   :  { %914 = vst [vmem:[#allocation0 + $0x14a] sm:$0xc0] %v1490_v6   ;;  %v1704_v6 = vld [vmem:[%s1997_s0 + $0xb8] sm:$0xff]   ;;  %v1647_v8 = vpack.c.bf16 %v1205_v54, %v1506_v11 }
  0x35   :  { %918 = vst [vmem:[#allocation0 + $0x152] sm:$0xff] %v1491_v60   ;;  %v1471_v9 = vunpack.c.h.bf16 %v1704_v6  ;;  %v1212_v57 = vld [vmem:[#allocation0 + $0x110] sm:$0xff] }
  0x36   :  { %922 = vst [vmem:[#allocation0 + $0x15a] sm:$0xf] %v1486_v62   ;;  %v1219_v58 = vld [vmem:[#allocation0 + $0x118] sm:$0xff] }
  0x37   :  { %924 = vst [vmem:[#allocation0 + $0x15c] sm:$0xf0] %v1486_v62   ;;  %v1226_v60 = vld [vmem:[#allocation0 + $0x120] sm:$0xff] }
  0x38   :  { %928 = vst [vmem:[#allocation0 + $0x164] sm:$0xff] %v1487_v63   ;;  %v1233_v62 = vld [vmem:[#allocation0 + $0x128] sm:$0xff] }
  0x39   :  { %934 = vst [vmem:[#allocation0 + $0x16e] sm:$0xfc] %v1482_v3   ;;  %v1470_v3 = vunpack.c.l.bf16 %v1704_v6  ;;  %v1657_v6 = vpack.c.bf16 %v1233_v62, %v1226_v60 }
  0x3a   :  { %938 = vst [vmem:[#allocation0 + $0x176] sm:$0xff] %v1483_v4   ;;  %v1240_v11 = vld [vmem:[#allocation0 + $0x130] sm:$0xff]  ;;  %v1247_v63 = vld [vmem:[#allocation0 + $0x138] sm:$0xff]  ;;  %v1652_v4 = vpack.c.bf16 %v1219_v58, %v1212_v57 }
  0x3b   :  { %946 = vst [vmem:[#allocation0 + $0x188] sm:$0x3f] %v1479_v5  }
  0x3c   :  { %948 = vst [vmem:[#allocation0 + $0x18a] sm:$0xc0] %v1479_v5   ;;  %v1261_v5 = vld [vmem:[#allocation0 + $0x148] sm:$0xff] }
  0x3d   :  { %956 = vst [vmem:[#allocation0 + $0x19a] sm:$0xf] %v1475_v0   ;;  %v1275_v2 = vld [vmem:[#allocation0 + $0x158] sm:$0xff]  ;;  %v1667_v56 = vpack.c.bf16 %v1261_v5, %v1495_v61 }
  0x3e   :  { %958 = vst [vmem:[#allocation0 + $0x19c] sm:$0xf0] %v1475_v0   ;;  %v1268_v0 = vld [vmem:[#allocation0 + $0x150] sm:$0xff] }
  0x3f   :  { %962 = vst [vmem:[#allocation0 + $0x1a4] sm:$0xff] %v1470_v3   ;;  %v1662_v3 = vpack.c.bf16 %v1247_v63, %v1240_v11  ;;  %v1289_v12 = vld [vmem:[#allocation0 + $0x168] sm:$0xff]  ;;  %v1672_v14 = vpack.c.bf16 %v1275_v2, %v1268_v0 }
  0x40   :  { %966 = vst [vmem:[#allocation0 + $0x1ac] sm:$0x3] %v1471_v9  }
  0x41   :  { %968 = vst [vmem:[#allocation0 + $0x1ae] sm:$0xfc] %v1471_v9   ;;  %v1282_v9 = vld [vmem:[#allocation0 + $0x160] sm:$0xff]  ;;  %v1296_v61 = vld [vmem:[#allocation0 + $0x170] sm:$0xff]  ;;  %v1303_v13 = vld [vmem:[#allocation0 + $0x178] sm:$0xff] }
  0x42   :  { %972 = vst [vmem:[#allocation0 + $0x1b6] sm:$0xff] %v15_v15   ;;  %v1317_v15 = vld [vmem:[#allocation0 + $0x188] sm:$0xff]  ;;  %v1677_v16 = vpack.c.bf16 %v1289_v12, %v1282_v9  ;;  %v1682_v19 = vpack.c.bf16 %v1303_v13, %v1296_v61 }
  0x43   :  { %1568 = vst [vmem:[%s1998_s1] sm:$0xff] %v1567_v18   ;;  %v1324_v17 = vld [vmem:[#allocation0 + $0x190] sm:$0xff]  ;;  %v1687_v1 = vpack.c.bf16 %v1317_v15, %v1478_v7 }
  0x44   :  { %1727 = vst [vmem:[%s1998_s1 + $0x8] sm:$0xff] %v1572_v21   ;;  %v1331_v18 = vld [vmem:[#allocation0 + $0x198] sm:$0xff] }
  0x45   :  { %1728 = vst [vmem:[%s1998_s1 + $0x10] sm:$0xff] %v1577_v23   ;;  %v1692_v23 = vpack.c.bf16 %v1331_v18, %v1324_v17 }
  0x46   :  { %1729 = vst [vmem:[%s1998_s1 + $0x18] sm:$0xff] %v1582_v26   ;;  %v1338_v20 = vld [vmem:[#allocation0 + $0x1a0] sm:$0xff] }
  0x47   :  { %1730 = vst [vmem:[%s1998_s1 + $0x20] sm:$0xff] %v1587_v28   ;;  %v1345_v21 = vld [vmem:[#allocation0 + $0x1a8] sm:$0xff] }
  0x48   :  { %1731 = vst [vmem:[%s1998_s1 + $0x28] sm:$0xff] %v1592_v32   ;;  %v1697_v24 = vpack.c.bf16 %v1345_v21, %v1338_v20 }
  0x49   :  { %1732 = vst [vmem:[%s1998_s1 + $0x30] sm:$0xff] %v1597_v34   ;;  %v1352_v7 = vld [vmem:[#allocation0 + $0x1b0] sm:$0xff]  ;;  %v1359_v22 = vld [vmem:[#allocation0 + $0x1b8] sm:$0xff] }
  0x4a   :  { %1733 = vst [vmem:[%s1998_s1 + $0x38] sm:$0xff] %v1602_v38   ;;  %v1702_v25 = vpack.c.bf16 %v1359_v22, %v1352_v7 }
  0x4b   :  { %1734 = vst [vmem:[%s1998_s1 + $0x40] sm:$0xff] %v1607_v36  }
  0x4c   :  { %1735 = vst [vmem:[%s1998_s1 + $0x48] sm:$0xff] %v1612_v43  }
  0x4d   :  { %1736 = vst [vmem:[%s1998_s1 + $0x50] sm:$0xff] %v1617_v45  }
  0x4e   :  { %1737 = vst [vmem:[%s1998_s1 + $0x58] sm:$0xff] %v1622_v49  }
  0x4f   :  { %1738 = vst [vmem:[%s1998_s1 + $0x60] sm:$0xff] %v1627_v10  }
  0x50   :  { %1739 = vst [vmem:[%s1998_s1 + $0x68] sm:$0xff] %v1632_v53  }
  0x51   :  { %1740 = vst [vmem:[%s1998_s1 + $0x70] sm:$0xff] %v1637_v55  }
  0x52   :  { %1741 = vst [vmem:[%s1998_s1 + $0x78] sm:$0xff] %v1642_v59  }
  0x53   :  { %1742 = vst [vmem:[%s1998_s1 + $0x80] sm:$0xff] %v1647_v8  }
  0x54   :  { %1743 = vst [vmem:[%s1998_s1 + $0x88] sm:$0xff] %v1652_v4  }
  0x55   :  { %1744 = vst [vmem:[%s1998_s1 + $0x90] sm:$0xff] %v1657_v6  }
  0x56   :  { %1745 = vst [vmem:[%s1998_s1 + $0x98] sm:$0xff] %v1662_v3  }
  0x57   :  { %1746 = vst [vmem:[%s1998_s1 + $0xa0] sm:$0xff] %v1667_v56  }
  0x58   :  { %1747 = vst [vmem:[%s1998_s1 + $0xa8] sm:$0xff] %v1672_v14  }
  0x59   :  { %1748 = vst [vmem:[%s1998_s1 + $0xb0] sm:$0xff] %v1677_v16  }
  0x5a   :  { %1749 = vst [vmem:[%s1998_s1 + $0xb8] sm:$0xff] %v1682_v19  }
  0x5b   :  { %1750 = vst [vmem:[%s1998_s1 + $0xc0] sm:$0xff] %v1687_v1  }
  0x5c   :  { %1751 = vst [vmem:[%s1998_s1 + $0xc8] sm:$0xff] %v1692_v23  }
  0x5d   :  { %1752 = vst [vmem:[%s1998_s1 + $0xd0] sm:$0xff] %v1697_v24  }
  0x5e   :  { %1753 = vst [vmem:[%s1998_s1 + $0xd8] sm:$0xff] %v1702_v25  }

// kernel: depthwise_ban_forward.5
= control target key start
LH: loop header
LB: loop body
LE: loop exit
PB: predicated region body
PF: predicated region fallthrough
CT: control target
= control target key end

     0   :  { %s3250_s12 = smov 0   ;;  %s3934_s0 = inlined_call_operand.vmem [shape: bf16[2,392,576], index: 0, kind: input, shape index: {}]   ;;  %s3935_s1 = inlined_call_operand.vmem [shape: bf16[2,576,128], index: 1, kind: input, shape index: {}]   ;;  %s3936_s2 = inlined_call_operand.vmem [shape: f32[2,1,128], index: 2, kind: input, shape index: {}]   ;;  %s3937_s3 = inlined_call_operand.vmem [shape: bf16[2,392,128], index: 3, kind: output, shape index: {}]  }
   0x1 LB: > { %s2226_s13 = sadd.s32 4294967295, %s3228_s12   ;;  %p2230_p0 = scmp.ge.s32.totalorder %s3228_s12, 1  ;;  %s3228_s12 = sphi %s3250_s12, %s13_s12  }
   0x2   : > { %p155_p1 = scmp.lt.s32.totalorder %s3228_s12, 3 }
   0x4   : > { %p156_p2 = pnand %p2230_p0, %p155_p1 }
   0x6   : > { %159 = sbr.rel (%p156_p2) target bundleno = 688 (0x2b0), region = 32 }
   0xb   : > { %p187_p3 = scmp.lt.s32.totalorder %s2226_s13, 1  ;;  %vm1262_vm0 = vcmask 523264  }
   0xd   : > { %s3969_s13 = smov (!%p187_p3, %s2226_s13), 1 }
   0xe   : > { %s3209_s14 = smul.u32 288, %s3969_s13  ;;  %s3277_s21 = scalar_lea.vmem %s3936_s2, %s3969_s13 }
   0xf   : > { %s3208_s18 = smul.u32 980, %s3969_s13 }
  0x10   : > { %s3264_s17 = scalar_lea.vmem %s3935_s1, %s3209_s14  ;;  %s3210_s25 = smul.u32 196, %s3969_s13 }
  0x11   : > { %v3012_v0 = vld [vmem:[%s3264_s17 + $0x38] sm:$0xff]  ;;  %v3011_v1 = vld [vmem:[%s3264_s17 + $0x30] sm:$0xff]  ;;  %v3010_v2 = vld [vmem:[%s3264_s17 + $0x28] sm:$0xff]  ;;  %s3283_s24 = scalar_lea.vmem %s3934_s0, %s3208_s18 }
  0x12   : > { %3184 = vmatpush.bf16.msra.mxu1 %v3012_v0  ;;  %3185 = vmatpush.bf16.msra.mxu2 %v3012_v0  ;;  %v3009_v3 = vld [vmem:[%s3264_s17 + $0x20] sm:$0xff]  ;;  %v3008_v4 = vld [vmem:[%s3264_s17 + $0x18] sm:$0xff]  ;;  %v3007_v5 = vld [vmem:[%s3264_s17 + $0x10] sm:$0xff]  ;;  %s3584_s28 = scalar_lea.vmem %s3937_s3, %s3210_s25 }
  0x13   : > { %1338 = vmatpush.bf16.msra.mxu0 %v3012_v0  ;;  %3186 = vmatpush.bf16.msra.mxu3 %v3012_v0  ;;  %v3006_v6 = vld [vmem:[%s3264_s17 + $0x8] sm:$0xff]  ;;  %v3005_v7 = vld [vmem:[%s3264_s17] sm:$0xff]  ;;  %v2376_v8 = vld [vmem:[%s3283_s24 + $0x118] sm:$0xf] }
  0x14   : > { %v2922_v9 = vld [vmem:[%s3283_s24 + $0x128] sm:$0xf0]  ;;  %v2516_v10 = vld [vmem:[%s3283_s24 + $0x230] sm:$0xf]  ;;  %v2957_v11 = vld [vmem:[%s3283_s24 + $0x240] sm:$0xf0] }
  0x15   : > { %v3028_v12 = vld [vmem:[%s3264_s17 + $0xb8] sm:$0xff]  ;;  %v2236_v13 = vld [vmem:[%s3283_s24] sm:$0xf]  ;;  %v2887_v14 = vld [vmem:[%s3283_s24 + $0x10] sm:$0xf0]  ;;  %v2377_v17 = vor.u32 %v2922_v9, %v2376_v8  ;;  %v2517_v18 = vor.u32 %v2957_v11, %v2516_v10 }
  0x16   : > { %3187 = vmatpush.bf16.msra.mxu1 %v3011_v1  ;;  %3188 = vmatpush.bf16.msra.mxu2 %v3011_v1  ;;  %v3020_v15 = vld [vmem:[%s3264_s17 + $0x78] sm:$0xff]  ;;  %v2237_v19 = vor.u32 %v2887_v14, %v2236_v13  ;;  %v3027_v20 = vld [vmem:[%s3264_s17 + $0xb0] sm:$0xff]  ;;  %v2656_v23 = vld [vmem:[%s3283_s24 + $0x348] sm:$0xf] }
  0x17   : > { %1339 = vmatpush.bf16.msra.mxu0 %v3011_v1  ;;  %3189 = vmatpush.bf16.msra.mxu3 %v3011_v1  ;;  %v3040_v16 = vld [vmem:[%s3264_s17 + $0x118] sm:$0xff]  ;;  %v3019_v21 = vld [vmem:[%s3264_s17 + $0x70] sm:$0xff]  ;;  %v3026_v25 = vld [vmem:[%s3264_s17 + $0xa8] sm:$0xff] }
  0x18   : > { %v3039_v22 = vld [vmem:[%s3264_s17 + $0x110] sm:$0xff]  ;;  %v2992_v24 = vld [vmem:[%s3283_s24 + $0x358] sm:$0xf0]  ;;  %v3018_v27 = vld [vmem:[%s3264_s17 + $0x68] sm:$0xff] }
  0x19   : > { %v2657_v26 = vor.u32 %v2992_v24, %v2656_v23  ;;  %v3025_v28 = vld [vmem:[%s3264_s17 + $0xa0] sm:$0xff]  ;;  %v2927_v31 = vld [vmem:[%s3283_s24 + $0x150] sm:$0xf0]  ;;  %v2536_v32 = vld [vmem:[%s3283_s24 + $0x258] sm:$0xf] }
  0x1a   : > { %3190 = vmatpush.bf16.msra.mxu1 %v3010_v2  ;;  %3191 = vmatpush.bf16.msra.mxu2 %v3010_v2  ;;  %v3017_v29 = vld [vmem:[%s3264_s17 + $0x60] sm:$0xff]  ;;  %v2962_v33 = vld [vmem:[%s3283_s24 + $0x268] sm:$0xf0]  ;;  %v2256_v34 = vld [vmem:[%s3283_s24 + $0x28] sm:$0xf] }
  0x1b   : > { %1340 = vmatpush.bf16.msra.mxu0 %v3010_v2  ;;  %3192 = vmatpush.bf16.msra.mxu3 %v3010_v2  ;;  %v2396_v30 = vld [vmem:[%s3283_s24 + $0x140] sm:$0xf]  ;;  %v2892_v35 = vld [vmem:[%s3283_s24 + $0x38] sm:$0xf0]  ;;  %v2537_v37 = vor.u32 %v2962_v33, %v2536_v32  ;;  %v2676_v41 = vld [vmem:[%s3283_s24 + $0x370] sm:$0xf] }
  0x1c   : > { %v2397_v36 = vor.u32 %v2927_v31, %v2396_v30  ;;  %v2257_v38 = vor.u32 %v2892_v35, %v2256_v34  ;;  %v3036_v39 = vld [vmem:[%s3264_s17 + $0xf8] sm:$0xff]  ;;  %v2997_v42 = vld [vmem:[%s3283_s24 + $0x380] sm:$0xf0]  ;;  %v3035_v45 = vld [vmem:[%s3264_s17 + $0xf0] sm:$0xff] }
  0x1d   : > { %v3024_v40 = vld [vmem:[%s3264_s17 + $0x98] sm:$0xff]  ;;  %v2677_v44 = vor.u32 %v2997_v42, %v2676_v41  ;;  %v2416_v46 = vld [vmem:[%s3283_s24 + $0x168] sm:$0xf]  ;;  %v2556_v48 = vld [vmem:[%s3283_s24 + $0x280] sm:$0xf] }
  0x1e   : > { %3193 = vmatpush.bf16.msra.mxu1 %v3009_v3  ;;  %3194 = vmatpush.bf16.msra.mxu2 %v3009_v3  ;;  %v3016_v43 = vld [vmem:[%s3264_s17 + $0x58] sm:$0xff]  ;;  %v2967_v49 = vld [vmem:[%s3283_s24 + $0x290] sm:$0xf0]  ;;  %v2276_v50 = vld [vmem:[%s3283_s24 + $0x50] sm:$0xf] }
  0x1f   : > { %1341 = vmatpush.bf16.msra.mxu0 %v3009_v3  ;;  %3195 = vmatpush.bf16.msra.mxu3 %v3009_v3  ;;  %v2932_v47 = vld [vmem:[%s3283_s24 + $0x178] sm:$0xf0]  ;;  %v2897_v51 = vld [vmem:[%s3283_s24 + $0x60] sm:$0xf0]  ;;  %v2557_v53 = vor.u32 %v2967_v49, %v2556_v48  ;;  %v3038_v55 = vld [vmem:[%s3264_s17 + $0x108] sm:$0xff] }
  0x20   : > { %v2417_v52 = vor.u32 %v2932_v47, %v2416_v46  ;;  %v2277_v54 = vor.u32 %v2897_v51, %v2276_v50  ;;  %v3034_v56 = vld [vmem:[%s3264_s17 + $0xe8] sm:$0xff]  ;;  %v3023_v57 = vld [vmem:[%s3264_s17 + $0x90] sm:$0xff]  ;;  %v2696_v58 = vld [vmem:[%s3283_s24 + $0x398] sm:$0xf] }
  0x21   : > { %v3002_v59 = vld [vmem:[%s3283_s24 + $0x3a8] sm:$0xf0]  ;;  %v3015_v60 = vld [vmem:[%s3264_s17 + $0x50] sm:$0xff]  ;;  %v3033_v62 = vld [vmem:[%s3264_s17 + $0xe0] sm:$0xff] }
  0x22   : > { %3196 = vmatpush.bf16.msra.mxu1 %v3008_v4  ;;  %3197 = vmatpush.bf16.msra.mxu2 %v3008_v4  ;;  %v2697_v61 = vor.u32 %v3002_v59, %v2696_v58  ;;  %v2436_v63 = vld [vmem:[%s3283_s24 + $0x190] sm:$0xf]  ;;  %v2937_v0 = vld [vmem:[%s3283_s24 + $0x1a0] sm:$0xf0]  ;;  %v2576_v1 = vld [vmem:[%s3283_s24 + $0x2a8] sm:$0xf] }
  0x23   : > { %1342 = vmatpush.bf16.msra.mxu0 %v3008_v4  ;;  %3198 = vmatpush.bf16.msra.mxu3 %v3008_v4  ;;  %v2972_v2 = vld [vmem:[%s3283_s24 + $0x2b8] sm:$0xf0]  ;;  %v2296_v3 = vld [vmem:[%s3283_s24 + $0x78] sm:$0xf]  ;;  %v2902_v4 = vld [vmem:[%s3283_s24 + $0x88] sm:$0xf0] }
  0x24   : > { %v3032_v8 = vld [vmem:[%s3264_s17 + $0xd8] sm:$0xff]  ;;  %v3022_v9 = vld [vmem:[%s3264_s17 + $0x88] sm:$0xff]  ;;  %v350_v11 = vld [vmem:[%s3283_s24 + $0x3c0] sm:$0xff] }
  0x25   : > { %v3014_v10 = vld [vmem:[%s3264_s17 + $0x48] sm:$0xff]  ;;  %v816_v13 = vunpack.c.l.b16 %v350_v11  ;;  %v3031_v14 = vld [vmem:[%s3264_s17 + $0xd0] sm:$0xff]  ;;  %v2246_v30 = vld [vmem:[%s3283_s24 + $0x1c] sm:$0xf0] }
  0x26   : > { %3199 = vmatpush.bf16.msra.mxu1 %v3007_v5  ;;  %3200 = vmatpush.bf16.msra.mxu2 %v3007_v5  ;;  %v2476_v32 = vld [vmem:[%s3283_s24 + $0x1e0] sm:$0xf]  ;;  %v2947_v33 = vld [vmem:[%s3283_s24 + $0x1f0] sm:$0xf0]  ;;  %v2616_v34 = vld [vmem:[%s3283_s24 + $0x2f8] sm:$0xf] }
  0x27   : > { %1343 = vmatpush.bf16.msra.mxu0 %v3007_v5  ;;  %3201 = vmatpush.bf16.msra.mxu3 %v3007_v5  ;;  %v2437_v5 = vor.u32 %v2937_v0, %v2436_v63  ;;  %v2982_v35 = vld [vmem:[%s3283_s24 + $0x308] sm:$0xf0]  ;;  %v2891_v41 = vld [vmem:[%s3283_s24 + $0x34] sm:$0xf]  ;;  %v2266_v42 = vld [vmem:[%s3283_s24 + $0x44] sm:$0xf0] }
  0x28   : > { %v2636_v46 = vld [vmem:[%s3283_s24 + $0x320] sm:$0xf]  ;;  %v2987_v47 = vld [vmem:[%s3283_s24 + $0x330] sm:$0xf0]  ;;  %v2356_v48 = vld [vmem:[%s3283_s24 + $0xf0] sm:$0xf] }
  0x29   : > { %v2917_v49 = vld [vmem:[%s3283_s24 + $0x100] sm:$0xf0]  ;;  %v2637_v51 = vor.u32 %v2987_v47, %v2636_v46  ;;  %v2244_v58 = vld [vmem:[%s3283_s24 + $0x8] sm:$0xf]  ;;  %v2888_v59 = vld [vmem:[%s3283_s24 + $0x18] sm:$0xf0] }
  0x2a   : > { %3202 = vmatpush.bf16.msra.mxu1 %v3006_v6  ;;  %3203 = vmatpush.bf16.msra.mxu2 %v3006_v6  ;;  %v2245_v63 = vor.u32 %v2888_v59, %v2244_v58  ;;  %v2904_v46 = vld [vmem:[%s3283_s24 + $0x98] sm:$0xf0]  ;;  %v2366_v59 = vld [vmem:[%s3283_s24 + $0x10c] sm:$0xf0] }
  0x2b   : > { %1344 = vmatpush.bf16.msra.mxu0 %v3006_v6  ;;  %3204 = vmatpush.bf16.msra.mxu3 %v3006_v6  ;;  %v2577_v6 = vor.u32 %v2972_v2, %v2576_v1  ;;  %v2901_v1 = vld [vmem:[%s3283_s24 + $0x84] sm:$0xf]  ;;  %v2306_v2 = vld [vmem:[%s3283_s24 + $0x94] sm:$0xf0]  ;;  %v2916_v58 = vld [vmem:[%s3283_s24 + $0xfc] sm:$0xf] }
  0x2e   : > { %3205 = vmatpush.bf16.msra.mxu1 %v3005_v7  ;;  %3206 = vmatpush.bf16.msra.mxu2 %v3005_v7 }
  0x2f   : > { %1345 = vmatpush.bf16.msra.mxu0 %v3005_v7  ;;  %3207 = vmatpush.bf16.msra.mxu3 %v3005_v7  ;;  %v2297_v7 = vor.u32 %v2902_v4, %v2296_v3  ;;  %v2890_v3 = vld [vmem:[%s3283_s24 + $0x2c] sm:$0xf]  ;;  %v2309_v4 = vor.u32 %v2901_v1, %v2306_v2  ;;  %v2332_v1 = vld [vmem:[%s3283_s24 + $0xb0] sm:$0xf]  ;;  %v2909_v2 = vld [vmem:[%s3283_s24 + $0xc0] sm:$0xf0] }
  0x31   : > { %1381 = vmatmul.bf16.vlgmr.msra.gmra.mxu1 %v2377_v17  ;;  %1416 = vmatmul.bf16.vlgmr.msra.gmra.mxu2 %v2517_v18  ;;  %v2942_v17 = vld [vmem:[%s3283_s24 + $0x1c8] sm:$0xf0]  ;;  %v2596_v18 = vld [vmem:[%s3283_s24 + $0x2d0] sm:$0xf] }
  0x32   : > { %1604 = vmatpush.bf16.msrb.mxu2 %v3028_v12  ;;  %1471 = vmatpush.bf16.msrb.mxu1 %v3020_v15  ;;  %v3037_v12 = vld [vmem:[%s3264_s17 + $0x100] sm:$0xff]  ;;  %v941_v15 = vpack.c.b16 %v816_v13, %v816_v13 }
  0x33   : > { %1874 = vmatpush.bf16.msrb.mxu0 %v3040_v16  ;;  %1451 = vmatmul.bf16.vlgmr.msra.gmra.mxu3 %v2657_v26  ;;  %v2456_v16 = vld [vmem:[%s3283_s24 + $0x1b8] sm:$0xf]  ;;  %v3030_v26 = vld [vmem:[%s3264_s17 + $0xc8] sm:$0xff] }
  0x34   : > { %1346 = vmatmul.bf16.vlgmr.msra.gmra.mxu0 %v2237_v19  ;;  %1737 = vmatpush.bf16.msrb.mxu3 %v3036_v39  ;;  %v2977_v19 = vld [vmem:[%s3283_s24 + $0x2e0] sm:$0xf0]  ;;  %v2617_v39 = vor.u32 %v2982_v35, %v2616_v34 }
  0x35   : > { %v2597_v23 = vor.u32 %v2977_v19, %v2596_v18  ;;  %v2906_v18 = vld [vmem:[%s3283_s24 + $0xac] sm:$0xf]  ;;  %v2326_v19 = vld [vmem:[%s3283_s24 + $0xbc] sm:$0xf0] }
  0x36   : > { %1605 = vmatpush.bf16.msrb.mxu2 %v3027_v20  ;;  %1472 = vmatpush.bf16.msrb.mxu1 %v3019_v21  ;;  %v2316_v20 = vld [vmem:[%s3283_s24 + $0xa0] sm:$0xf]  ;;  %v2907_v21 = vld [vmem:[%s3283_s24 + $0xb0] sm:$0xf0] }
  0x37   : > { %1875 = vmatpush.bf16.msrb.mxu0 %v3039_v22  ;;  %v2457_v22 = vor.u32 %v2942_v17, %v2456_v16  ;;  %v2317_v24 = vor.u32 %v2907_v21, %v2316_v20  ;;  %v2895_v20 = vld [vmem:[%s3283_s24 + $0x54] sm:$0xf]  ;;  %v2329_v21 = vor.u32 %v2906_v18, %v2326_v19  ;;  %v2921_v19 = vld [vmem:[%s3283_s24 + $0x124] sm:$0xf] }
  0x38   : > { %1738 = vmatpush.bf16.msrb.mxu3 %v3035_v45  ;;  %v2952_v45 = vld [vmem:[%s3283_s24 + $0x218] sm:$0xf0] }
  0x3a   : > { %1606 = vmatpush.bf16.msrb.mxu2 %v3026_v25  ;;  %1473 = vmatpush.bf16.msrb.mxu1 %v3018_v27  ;;  %v3021_v25 = vld [vmem:[%s3264_s17 + $0x80] sm:$0xff] }
  0x3b   : > { %1876 = vmatpush.bf16.msrb.mxu0 %v3038_v55  ;;  %v3013_v27 = vld [vmem:[%s3264_s17 + $0x40] sm:$0xff] }
  0x3c   : > { %1739 = vmatpush.bf16.msrb.mxu3 %v3034_v56  ;;  %v2885_v55 = vld [vmem:[%s3283_s24 + $0x4] sm:$0xf] }
  0x3e   : > { %1607 = vmatpush.bf16.msrb.mxu2 %v3025_v28  ;;  %1474 = vmatpush.bf16.msrb.mxu1 %v3017_v29  ;;  %v3029_v28 = vld [vmem:[%s3264_s17 + $0xc0] sm:$0xff]  ;;  %v2886_v29 = vld [vmem:[%s3283_s24 + $0xc] sm:$0xf] }
  0x3f   : > { %1877 = vmatpush.bf16.msrb.mxu0 %v3037_v12  ;;  %v2249_v31 = vor.u32 %v2886_v29, %v2246_v30 }
  0x40   : > { %1740 = vmatpush.bf16.msrb.mxu3 %v3033_v62 }
  0x41   : > { %1386 = vmatmul.bf16.gmra.mxu1 %v2397_v36  ;;  %1421 = vmatmul.bf16.gmra.mxu2 %v2537_v37  ;;  %v2336_v36 = vld [vmem:[%s3283_s24 + $0xc8] sm:$0xf]  ;;  %v2912_v37 = vld [vmem:[%s3283_s24 + $0xd8] sm:$0xf0] }
  0x42   : > { %1608 = vmatpush.bf16.msrb.mxu2 %v3024_v40  ;;  %1475 = vmatpush.bf16.msrb.mxu1 %v3016_v43  ;;  %v2337_v40 = vor.u32 %v2912_v37, %v2336_v36  ;;  %v2269_v43 = vor.u32 %v2891_v41, %v2266_v42  ;;  %v2298_v42 = vld [vmem:[%s3283_s24 + $0x8c] sm:$0xf0] }
  0x43   : > { %1456 = vmatmul.bf16.gmra.mxu3 %v2677_v44  ;;  %v2496_v44 = vld [vmem:[%s3283_s24 + $0x208] sm:$0xf] }
  0x44   : > { %1351 = vmatmul.bf16.gmra.mxu0 %v2257_v38  ;;  %1741 = vmatpush.bf16.msrb.mxu3 %v3032_v8  ;;  %v2477_v38 = vor.u32 %v2947_v33, %v2476_v32  ;;  %v2497_v50 = vor.u32 %v2952_v45, %v2496_v44  ;;  %v2272_v8 = vld [vmem:[%s3283_s24 + $0x38] sm:$0xf]  ;;  %v2903_v44 = vld [vmem:[%s3283_s24 + $0x90] sm:$0xf0]  ;;  %v2312_v45 = vld [vmem:[%s3283_s24 + $0x88] sm:$0xf] }
  0x46   : > { %1609 = vmatpush.bf16.msrb.mxu2 %v3023_v57  ;;  %1476 = vmatpush.bf16.msrb.mxu1 %v3015_v60  ;;  %v2238_v57 = vld [vmem:[%s3283_s24 + $0x14] sm:$0xf0]  ;;  %v2252_v60 = vld [vmem:[%s3283_s24 + $0x10] sm:$0xf] }
  0x47   : > { %v2241_v62 = vor.u32 %v2885_v55, %v2238_v57 }
  0x48   : > { %1742 = vmatpush.bf16.msrb.mxu3 %v3031_v14 }
  0x4a   : > { %1610 = vmatpush.bf16.msrb.mxu2 %v3022_v9  ;;  %1477 = vmatpush.bf16.msrb.mxu1 %v3014_v10  ;;  %v2894_v9 = vld [vmem:[%s3283_s24 + $0x48] sm:$0xf0] }
  0x4b   : > { %v2273_v13 = vor.u32 %v2894_v9, %v2272_v8 }
  0x4c   : > { %1743 = vmatpush.bf16.msrb.mxu3 %v3030_v26  ;;  %v2899_v26 = vld [vmem:[%s3283_s24 + $0x70] sm:$0xf0] }
  0x4e   : > { %1611 = vmatpush.bf16.msrb.mxu2 %v3021_v25  ;;  %1478 = vmatpush.bf16.msrb.mxu1 %v3013_v27  ;;  %v2292_v25 = vld [vmem:[%s3283_s24 + $0x60] sm:$0xf] }
  0x50   : > { %1744 = vmatpush.bf16.msrb.mxu3 %v3029_v28 }
  0x51   : > { %1391 = vmatmul.bf16.gmra.mxu1 %v2417_v52  ;;  %1426 = vmatmul.bf16.gmra.mxu2 %v2557_v53  ;;  %v2357_v52 = vor.u32 %v2917_v49, %v2356_v48  ;;  %v2896_v53 = vld [vmem:[%s3283_s24 + $0x5c] sm:$0xf] }
  0x53   : > { %1461 = vmatmul.bf16.gmra.mxu3 %v2697_v61  ;;  %v2889_v61 = vld [vmem:[%s3283_s24 + $0x20] sm:$0xf0] }
  0x54   : > { %1356 = vmatmul.bf16.gmra.mxu0 %v2277_v54  ;;  %v2286_v54 = vld [vmem:[%s3283_s24 + $0x6c] sm:$0xf0]  ;;  %v2253_v0 = vor.u32 %v2889_v61, %v2252_v60  ;;  %v2905_v60 = vld [vmem:[%s3283_s24 + $0xa4] sm:$0xf]  ;;  %v2369_v61 = vor.u32 %v2916_v58, %v2366_v59  ;;  %v2358_v59 = vld [vmem:[%s3283_s24 + $0x104] sm:$0xf0] }
  0x55   : > { %v2289_v56 = vor.u32 %v2896_v53, %v2286_v54 }
  0x61   : > { %1396 = vmatmul.bf16.gmra.mxu1 %v2437_v5  ;;  %1431 = vmatmul.bf16.gmra.mxu2 %v2577_v6  ;;  %v2258_v5 = vld [vmem:[%s3283_s24 + $0x3c] sm:$0xf0]  ;;  %v2264_v6 = vld [vmem:[%s3283_s24 + $0x30] sm:$0xf] }
  0x62   : > { %v2261_v10 = vor.u32 %v2890_v3, %v2258_v5 }
  0x63   : > { %1466 = vmatmul.bf16.gmra.mxu3 %v941_v15 }
  0x64   : > { %1361 = vmatmul.bf16.gmra.mxu0 %v2297_v7  ;;  %v2893_v7 = vld [vmem:[%s3283_s24 + $0x40] sm:$0xf0] }
  0x65   : > { %v2265_v11 = vor.u32 %v2893_v7, %v2264_v6  ;;  %v2333_v7 = vor.u32 %v2909_v2, %v2332_v1 }
  0x71   : > { %1401 = vmatmul.bf16.gmra.mxu1 %v2457_v22  ;;  %1436 = vmatmul.bf16.gmra.mxu2 %v2597_v23  ;;  %v2278_v22 = vld [vmem:[%s3283_s24 + $0x64] sm:$0xf0]  ;;  %v2284_v23 = vld [vmem:[%s3283_s24 + $0x58] sm:$0xf] }
  0x72   : > { %v2281_v28 = vor.u32 %v2895_v20, %v2278_v22  ;;  %v2386_v20 = vld [vmem:[%s3283_s24 + $0x134] sm:$0xf0] }
  0x73   : > { %1745 = vmatmul.bf16.vlgmr.msrb.gmra.mxu3 %v2249_v31  ;;  %v2293_v31 = vor.u32 %v2899_v26, %v2292_v25  ;;  %v2389_v22 = vor.u32 %v2921_v19, %v2386_v20  ;;  %v2913_v25 = vld [vmem:[%s3283_s24 + $0xe0] sm:$0xf0]  ;;  %v2352_v26 = vld [vmem:[%s3283_s24 + $0xd8] sm:$0xf] }
  0x74   : > { %1366 = vmatmul.bf16.gmra.mxu0 %v2317_v24  ;;  %v2898_v24 = vld [vmem:[%s3283_s24 + $0x68] sm:$0xf0] }
  0x75   : > { %v2285_v29 = vor.u32 %v2898_v24, %v2284_v23  ;;  %v2338_v23 = vld [vmem:[%s3283_s24 + $0xdc] sm:$0xf0]  ;;  %v2344_v24 = vld [vmem:[%s3283_s24 + $0xd0] sm:$0xf] }
  0x81   : > { %1406 = vmatmul.bf16.gmra.mxu1 %v2477_v38  ;;  %1441 = vmatmul.bf16.gmra.mxu2 %v2617_v39  ;;  %v2911_v38 = vld [vmem:[%s3283_s24 + $0xd4] sm:$0xf]  ;;  %v2346_v39 = vld [vmem:[%s3283_s24 + $0xe4] sm:$0xf0] }
  0x82   : > { %v2349_v41 = vor.u32 %v2911_v38, %v2346_v39  ;;  %v2345_v38 = vor.u32 %v2913_v25, %v2344_v24  ;;  %v2931_v24 = vld [vmem:[%s3283_s24 + $0x174] sm:$0xf]  ;;  %v2426_v25 = vld [vmem:[%s3283_s24 + $0x184] sm:$0xf0] }
  0x83   : > { %1750 = vmatmul.bf16.gmra.mxu3 %v2269_v43  ;;  %v2304_v43 = vld [vmem:[%s3283_s24 + $0x80] sm:$0xf] }
  0x84   : > { %1371 = vmatmul.bf16.gmra.mxu0 %v2337_v40  ;;  %v2900_v40 = vld [vmem:[%s3283_s24 + $0x7c] sm:$0xf]  ;;  %v2305_v49 = vor.u32 %v2903_v44, %v2304_v43 }
  0x85   : > { %v2301_v48 = vor.u32 %v2900_v40, %v2298_v42 }
  0x91   : > { %1411 = vmatmul.bf16.gmra.mxu1 %v2497_v50  ;;  %1446 = vmatmul.bf16.gmra.mxu2 %v2637_v51  ;;  %v2313_v51 = vor.u32 %v2904_v46, %v2312_v45 }
  0x93   : > { %1755 = vmatmul.bf16.gmra.mxu3 %v2289_v56 }
  0x94   : > { %1376 = vmatmul.bf16.gmra.mxu0 %v2357_v52 }
  0xa1   : > { %1479 = vmatmul.bf16.vlgmr.msrb.gmra.mxu1 %v2241_v62  ;;  %1612 = vmatmul.bf16.vlgmr.msrb.gmra.mxu2 %v2245_v63  ;;  %v2318_v62 = vld [vmem:[%s3283_s24 + $0xb4] sm:$0xf0]  ;;  %v2324_v63 = vld [vmem:[%s3283_s24 + $0xa8] sm:$0xf] }
  0xa3   : > { %1760 = vmatmul.bf16.gmra.mxu3 %v2309_v4  ;;  %v2321_v4 = vor.u32 %v2905_v60, %v2318_v62  ;;  %v2364_v60 = vld [vmem:[%s3283_s24 + $0xf8] sm:$0xf]  ;;  %v2372_v62 = vld [vmem:[%s3283_s24 + $0x100] sm:$0xf] }
  0xa4   : > { %2858 = vmatmul.msk.bf16.vlgmr.msrb.gmra.mxu0 %vm1262_vm0, %v2253_v0  ;;  %v2908_v0 = vld [vmem:[%s3283_s24 + $0xb8] sm:$0xf0] }
  0xa5   : > { %v2325_v5 = vor.u32 %v2908_v0, %v2324_v63  ;;  %v2919_v63 = vld [vmem:[%s3283_s24 + $0x110] sm:$0xf0] }
  0xae   : > { %v3384_v12 = vpop.f32.mrf.mxu1 }
  0xb1   : > { %v3386_v14 = vpop.f32.mrf.mxu0  ;;  %1484 = vmatmul.bf16.gmra.mxu1 %v2261_v10  ;;  %1617 = vmatmul.bf16.gmra.mxu2 %v2265_v11 }
  0xb3   : > { %1765 = vmatmul.bf16.gmra.mxu3 %v2329_v21  ;;  %v2910_v21 = vld [vmem:[%s3283_s24 + $0xcc] sm:$0xf] }
  0xb4   : > { %2859 = vmatmul.msk.bf16.gmra.mxu0 %vm1262_vm0, %v2273_v13  ;;  %v3389_v15 = vpop.f32.mrf.mxu2 }
  0xb6   : > { %v3391_v16 = vpop.f32.mrf.mxu1  ;;  %v3407_v32 = vpop.f32.mrf.mxu3 }
  0xb7   : > { %3938 = vst [vmem:[#allocation2_spill] sm:$0xff] %v3407_v32  ;;  %v2424_v32 = vld [vmem:[%s3283_s24 + $0x170] sm:$0xf] }
  0xb9   : > { %v3393_v17 = vpop.f32.mrf.mxu0 }
  0xbc   : > { %v3403_v27 = vpop.f32.mrf.mxu2 }
  0xbe   : > { %v3405_v30 = vpop.f32.mrf.mxu1  ;;  %v3416_v36 = vpop.f32.mrf.mxu3 }
  0xbf   : > { %3939 = vst [vmem:[#allocation3_spill] sm:$0xff] %v3416_v36 }
  0xc1   : > { %v3409_v33 = vpop.f32.mrf.mxu0  ;;  %1489 = vmatmul.bf16.gmra.mxu1 %v2281_v28  ;;  %1622 = vmatmul.bf16.gmra.mxu2 %v2285_v29  ;;  %v2914_v28 = vld [vmem:[%s3283_s24 + $0xe8] sm:$0xf0] }
  0xc2   : > { %v2353_v40 = vor.u32 %v2914_v28, %v2352_v26  ;;  %v2920_v26 = vld [vmem:[%s3283_s24 + $0x11c] sm:$0xf]  ;;  %v2429_v28 = vor.u32 %v2931_v24, %v2426_v25  ;;  %v2446_v25 = vld [vmem:[%s3283_s24 + $0x1ac] sm:$0xf0] }
  0xc3   : > { %1770 = vmatmul.bf16.gmra.mxu3 %v2349_v41  ;;  %v2936_v24 = vld [vmem:[%s3283_s24 + $0x19c] sm:$0xf] }
  0xc4   : > { %2860 = vmatmul.msk.bf16.gmra.mxu0 %vm1262_vm0, %v2293_v31  ;;  %v3412_v34 = vpop.f32.mrf.mxu2  ;;  %v2341_v31 = vor.u32 %v2910_v21, %v2338_v23 }
  0xc6   : > { %v3414_v35 = vpop.f32.mrf.mxu1  ;;  %v3432_v52 = vpop.f32.mrf.mxu3 }
  0xc7   : > { %3940 = vst [vmem:[#allocation4_spill] sm:$0xff] %v3432_v52  ;;  %v3556_v52 = vld [vmem:[%s3277_s21] ss:$0 sm:$0xff] }
  0xc9   : > { %v3418_v37 = vpop.f32.mrf.mxu0 }
  0xcc   : > { %v3428_v47 = vpop.f32.mrf.mxu2 }
  0xce   : > { %v3430_v50 = vpop.f32.mrf.mxu1  ;;  %v3441_v56 = vpop.f32.mrf.mxu3 }
  0xcf   : > { %3941 = vst [vmem:[#allocation5_spill] sm:$0xff] %v3441_v56 }
  0xd1   : > { %v3434_v53 = vpop.f32.mrf.mxu0  ;;  %1494 = vmatmul.bf16.gmra.mxu1 %v2301_v48  ;;  %1627 = vmatmul.bf16.gmra.mxu2 %v2305_v49  ;;  %v2926_v48 = vld [vmem:[%s3283_s24 + $0x14c] sm:$0xf]  ;;  %v2406_v49 = vld [vmem:[%s3283_s24 + $0x15c] sm:$0xf0] }
  0xd2   : > { %v2409_v58 = vor.u32 %v2926_v48, %v2406_v49  ;;  %v2924_v48 = vld [vmem:[%s3283_s24 + $0x138] sm:$0xf0] }
  0xd3   : > { %1775 = vmatmul.bf16.gmra.mxu3 %v2369_v61  ;;  %v2918_v61 = vld [vmem:[%s3283_s24 + $0x108] sm:$0xf0] }
  0xd4   : > { %2861 = vmatmul.msk.bf16.gmra.mxu0 %vm1262_vm0, %v2313_v51  ;;  %v3437_v54 = vpop.f32.mrf.mxu2  ;;  %v2915_v51 = vld [vmem:[%s3283_s24 + $0xf4] sm:$0xf]  ;;  %v2365_v2 = vor.u32 %v2918_v61, %v2364_v60 }
  0xd5   : > { %v2361_v1 = vor.u32 %v2915_v51, %v2358_v59 }
  0xd6   : > { %v3439_v55 = vpop.f32.mrf.mxu1  ;;  %v3457_v8 = vpop.f32.mrf.mxu3 }
  0xd7   : > { %3942 = vst [vmem:[#allocation6_spill] sm:$0xff] %v3457_v8 }
  0xd9   : > { %v3443_v57 = vpop.f32.mrf.mxu0 }
  0xdc   : > { %v3453_v3 = vpop.f32.mrf.mxu2 }
  0xde   : > { %v3455_v6 = vpop.f32.mrf.mxu1  ;;  %v3466_v13 = vpop.f32.mrf.mxu3 }
  0xdf   : > { %3944 = vst [vmem:[#allocation8_spill] sm:$0xff] %v3466_v13 }
  0xe1   : > { %v3459_v9 = vpop.f32.mrf.mxu0  ;;  %1499 = vmatmul.bf16.gmra.mxu1 %v2321_v4  ;;  %1632 = vmatmul.bf16.gmra.mxu2 %v2325_v5  ;;  %v2373_v5 = vor.u32 %v2919_v63, %v2372_v62 }
  0xe3   : > { %1780 = vmatmul.bf16.gmra.mxu3 %v2389_v22 }
  0xe4   : > { %2862 = vmatmul.msk.bf16.gmra.mxu0 %vm1262_vm0, %v2333_v7  ;;  %v3462_v10 = vpop.f32.mrf.mxu2 }
  0xe5   : > { %3943 = vst [vmem:[#allocation7_spill] sm:$0xff] %v3462_v10 }
  0xe6   : > { %v3464_v11 = vpop.f32.mrf.mxu1  ;;  %v3482_v41 = vpop.f32.mrf.mxu3 }
  0xe7   : > { %3946 = vst [vmem:[#allocation10_spill] sm:$0xff] %v3482_v41 }
  0xe9   : > { %v3468_v18 = vpop.f32.mrf.mxu0 }
  0xec   : > { %v3478_v29 = vpop.f32.mrf.mxu2 }
  0xed   : > { %3945 = vst [vmem:[#allocation9_spill] sm:$0xff] %v3478_v29 }
  0xee   : > { %v3480_v39 = vpop.f32.mrf.mxu1  ;;  %v1469_v45 = vpop.f32.mrf.mxu3 }
  0xef   : > { %v2392_v45 = vld [vmem:[%s3283_s24 + $0x128] sm:$0xf] }
  0xf0   : > { %v2393_v60 = vor.u32 %v2924_v48, %v2392_v45  ;;  %v2412_v45 = vld [vmem:[%s3283_s24 + $0x150] sm:$0xf]  ;;  %v2929_v48 = vld [vmem:[%s3283_s24 + $0x160] sm:$0xf0] }
  0xf1   : > { %v3484_v42 = vpop.f32.mrf.mxu0  ;;  %1504 = vmatmul.bf16.gmra.mxu1 %v2341_v31  ;;  %1637 = vmatmul.bf16.gmra.mxu2 %v2345_v38  ;;  %v2378_v31 = vld [vmem:[%s3283_s24 + $0x12c] sm:$0xf0]  ;;  %v2384_v38 = vld [vmem:[%s3283_s24 + $0x120] sm:$0xf]  ;;  %v2413_v13 = vor.u32 %v2929_v48, %v2412_v45  ;;  %v2941_v45 = vld [vmem:[%s3283_s24 + $0x1c4] sm:$0xf] }
  0xf2   : > { %v2381_v51 = vor.u32 %v2920_v26, %v2378_v31  ;;  %v2925_v26 = vld [vmem:[%s3283_s24 + $0x144] sm:$0xf]  ;;  %v2398_v31 = vld [vmem:[%s3283_s24 + $0x154] sm:$0xf0] }
  0xf3   : > { %1785 = vmatmul.bf16.gmra.mxu3 %v2409_v58  ;;  %v2466_v48 = vld [vmem:[%s3283_s24 + $0x1d4] sm:$0xf0] }
  0xf4   : > { %2863 = vmatmul.msk.bf16.gmra.mxu0 %vm1262_vm0, %v2353_v40  ;;  %v3487_v43 = vpop.f32.mrf.mxu2  ;;  %v2923_v40 = vld [vmem:[%s3283_s24 + $0x130] sm:$0xf0]  ;;  %v2469_v36 = vor.u32 %v2941_v45, %v2466_v48 }
  0xf5   : > { %3947 = vst [vmem:[#allocation11_spill] sm:$0xff] %v3487_v43  ;;  %v2385_v58 = vor.u32 %v2923_v40, %v2384_v38  ;;  %v2404_v38 = vld [vmem:[%s3283_s24 + $0x148] sm:$0xf]  ;;  %v2928_v40 = vld [vmem:[%s3283_s24 + $0x158] sm:$0xf0] }
  0xf6   : > { %v3489_v44 = vpop.f32.mrf.mxu1  ;;  %v3505_v7 = vpop.f32.mrf.mxu3 }
  0xf9   : > { %v3491_v46 = vpop.f32.mrf.mxu0 }
  0xfc   : > { %v3501_v0 = vpop.f32.mrf.mxu2 }
  0xfd   : > { %3948 = vst [vmem:[#allocation12_spill] sm:$0xff] %v3501_v0 }
  0xfe   : > { %v3503_v4 = vpop.f32.mrf.mxu1  ;;  %v3514_v22 = vpop.f32.mrf.mxu3 }
 0x101   : > { %v3507_v19 = vpop.f32.mrf.mxu0  ;;  %1509 = vmatmul.bf16.gmra.mxu1 %v2361_v1  ;;  %1642 = vmatmul.bf16.gmra.mxu2 %v2365_v2 }
 0x103   : > { %1790 = vmatmul.bf16.gmra.mxu3 %v2429_v28  ;;  %v2449_v28 = vor.u32 %v2936_v24, %v2446_v25  ;;  %v1348_v24 = vadd.f32 %v3556_v52, %v3386_v14 }
 0x104   : > { %2864 = vmatmul.msk.bf16.gmra.mxu0 %vm1262_vm0, %v2373_v5  ;;  %v3510_v20 = vpop.f32.mrf.mxu2 }
 0x105   : > { %3949 = vst [vmem:[#allocation13_spill] sm:$0xff] %v3510_v20 }
 0x106   : > { %v3512_v21 = vpop.f32.mrf.mxu1  ;;  %v3530_v61 = vpop.f32.mrf.mxu3 }
 0x109   : > { %v3516_v23 = vpop.f32.mrf.mxu0 }
 0x10c   : > { %v3526_v49 = vpop.f32.mrf.mxu2 }
 0x10d   : > { %3950 = vst [vmem:[#allocation14_spill] sm:$0xff] %v3526_v49 }
 0x10e   : > { %v3528_v59 = vpop.f32.mrf.mxu1  ;;  %v3539_v2 = vpop.f32.mrf.mxu3 }
 0x111   : > { %v3532_v62 = vpop.f32.mrf.mxu0  ;;  %1514 = vmatmul.bf16.gmra.mxu1 %v2381_v51  ;;  %1647 = vmatmul.bf16.gmra.mxu2 %v2385_v58  ;;  %v2401_v58 = vor.u32 %v2925_v26, %v2398_v31 }
 0x113   : > { %1795 = vmatmul.bf16.gmra.mxu3 %v2449_v28 }
 0x114   : > { %2865 = vmatmul.msk.bf16.gmra.mxu0 %vm1262_vm0, %v2393_v60  ;;  %v3535_v63 = vpop.f32.mrf.mxu2  ;;  %v2405_v60 = vor.u32 %v2928_v40, %v2404_v38 }
 0x115   : > { %3951 = vst [vmem:[#allocation15_spill] sm:$0xff] %v3535_v63  ;;  %v2934_v63 = vld [vmem:[%s3283_s24 + $0x188] sm:$0xf0] }
 0x116   : > { %v3537_v1 = vpop.f32.mrf.mxu1  ;;  %v3553_v8 = vpop.f32.mrf.mxu3 }
 0x119   : > { %v3541_v5 = vpop.f32.mrf.mxu0 }
 0x11c   : > { %v3551_v51 = vpop.f32.mrf.mxu2 }
 0x11d   : > { %3952 = vst [vmem:[#allocation16_spill] sm:$0xff] %v3551_v51  ;;  %v2933_v51 = vld [vmem:[%s3283_s24 + $0x180] sm:$0xf0] }
 0x11e   : > { %v1480_v41 = vpop.f32.mrf.mxu1  ;;  %v3561_v31 = vpop.f32.mrf.mxu3  ;;  %v2425_v20 = vor.u32 %v2933_v51, %v2424_v32  ;;  %v1353_v32 = vadd.f32 %v3556_v52, %v3409_v33  ;;  %v2486_v51 = vld [vmem:[%s3283_s24 + $0x1fc] sm:$0xf0] }
 0x11f   : > { %v1481_v26 = vadd.f32 %v1480_v41, %v1348_v24  ;;  %v2432_v24 = vld [vmem:[%s3283_s24 + $0x178] sm:$0xf] }
 0x120   : > { %v2433_v43 = vor.u32 %v2934_v63, %v2432_v24  ;;  %v2939_v24 = vld [vmem:[%s3283_s24 + $0x1b0] sm:$0xf0] }
 0x121   : > { %v1879_v56 = vpop.f32.mrf.mxu0  ;;  %1519 = vmatmul.bf16.gmra.mxu1 %v2401_v58  ;;  %1652 = vmatmul.bf16.gmra.mxu2 %v2405_v60  ;;  %v1350_v58 = vadd.f32 %v3556_v52, %v3393_v17  ;;  %v2930_v60 = vld [vmem:[%s3283_s24 + $0x16c] sm:$0xf] }
 0x123   : > { %1800 = vmatmul.bf16.gmra.mxu3 %v2469_v36 }
 0x124   : > { %2866 = vmatmul.msk.bf16.gmra.mxu0 %vm1262_vm0, %v2413_v13  ;;  %v1613_v25 = vpop.f32.mrf.mxu2  ;;  %v2418_v13 = vld [vmem:[%s3283_s24 + $0x17c] sm:$0xf0] }
 0x125   : > { %v1614_v38 = vadd.f32 %v1613_v25, %v1481_v26  ;;  %v2421_v26 = vor.u32 %v2930_v60, %v2418_v13  ;;  %v2444_v60 = vld [vmem:[%s3283_s24 + $0x198] sm:$0xf]  ;;  %v2938_v13 = vld [vmem:[%s3283_s24 + $0x1a8] sm:$0xf0] }
 0x126   : > { %v1482_v28 = vpop.f32.mrf.mxu1  ;;  %v3574_v29 = vpop.f32.mrf.mxu3 }
 0x127   : > { %v1747_v14 = vadd.f32 %v3505_v7, %v1614_v38  ;;  %v1483_v41 = vadd.f32 %v1482_v28, %v1350_v58  ;;  %v1355_v28 = vadd.f32 %v3556_v52, %v3418_v37  ;;  %v2935_v38 = vld [vmem:[%s3283_s24 + $0x194] sm:$0xf]  ;;  %v2438_v58 = vld [vmem:[%s3283_s24 + $0x1a4] sm:$0xf0] }
 0x129   : > { %v1881_v40 = vpop.f32.mrf.mxu0  ;;  %v1880_v17 = vadd.f32 %v1879_v56, %v1747_v14 }
 0x12b   : > { %v2003_v36 = vmax.f32 %v1880_v17, 0.0  ;;  %v2441_v17 = vor.u32 %v2935_v38, %v2438_v58  ;;  %v2506_v58 = vld [vmem:[%s3283_s24 + $0x224] sm:$0xf0] }
 0x12c   : > { %v1615_v49 = vpop.f32.mrf.mxu2 }
 0x12d   : > { %v1616_v25 = vadd.f32 %v1615_v49, %v1483_v41  ;;  %v2452_v41 = vld [vmem:[%s3283_s24 + $0x1a0] sm:$0xf] }
 0x12e   : > { %v1485_v0 = vpop.f32.mrf.mxu1  ;;  %v3586_v49 = vpop.f32.mrf.mxu3 }
 0x12f   : > { %v1749_v45 = vadd.f32 %v3514_v22, %v1616_v25 }
 0x131   : > { %v1884_v48 = vpop.f32.mrf.mxu0  ;;  %v1882_v10 = vadd.f32 %v1881_v40, %v1749_v45  ;;  %1524 = vmatmul.bf16.gmra.mxu1 %v2421_v26  ;;  %1657 = vmatmul.bf16.gmra.mxu2 %v2425_v20  ;;  %v1486_v20 = vadd.f32 %v1485_v0, %v1353_v32  ;;  %v2445_v45 = vor.u32 %v2938_v13, %v2444_v60  ;;  %v2940_v60 = vld [vmem:[%s3283_s24 + $0x1bc] sm:$0xf] }
 0x133   : > { %v2004_v7 = vmax.f32 %v1882_v10, 0.0  ;;  %v2946_v10 = vld [vmem:[%s3283_s24 + $0x1ec] sm:$0xf] }
 0x134   : > { %2867 = vmatmul.msk.bf16.gmra.mxu0 %vm1262_vm0, %v2433_v43  ;;  %v1618_v56 = vpop.f32.mrf.mxu2  ;;  %v2489_v40 = vor.u32 %v2946_v10, %v2486_v51 }
 0x135   : > { %v3044_v22 = vpack.c.bf16 %v2004_v7, %v2003_v36  ;;  %v1619_v33 = vadd.f32 %v1618_v56, %v1486_v20  ;;  %v2453_v36 = vor.u32 %v2939_v24, %v2452_v41  ;;  %v2943_v41 = vld [vmem:[%s3283_s24 + $0x1d0] sm:$0xf0] }
 0x136   : > { %v1487_v43 = vpop.f32.mrf.mxu1  ;;  %1805 = vmatmul.bf16.gmra.mxu3 %v2489_v40  ;;  %v3600_v7 = vpop.f32.mrf.mxu3  ;;  %v2951_v40 = vld [vmem:[%s3283_s24 + $0x214] sm:$0xf] }
 0x137   : > { %3045 = vst [vmem:[%s3584_s28] sm:$0xff] %v3044_v22   ;;  %v1752_v0 = vadd.f32 %v3530_v61, %v1619_v33  ;;  %v1488_v14 = vadd.f32 %v1487_v43, %v1355_v28  ;;  %v1358_v61 = vadd.f32 %v3556_v52, %v3434_v53  ;;  %v1360_v53 = vadd.f32 %v3556_v52, %v3443_v57 }
 0x138   : > { %v2509_v13 = vor.u32 %v2951_v40, %v2506_v58 }
 0x139   : > { %v1886_v63 = vpop.f32.mrf.mxu0  ;;  %v1885_v37 = vadd.f32 %v1884_v48, %v1752_v0  ;;  %v2458_v0 = vld [vmem:[%s3283_s24 + $0x1cc] sm:$0xf0] }
 0x13b   : > { %v2005_v43 = vmax.f32 %v1885_v37, 0.0 }
 0x13c   : > { %v1620_v25 = vpop.f32.mrf.mxu2 }
 0x13d   : > { %v1621_v26 = vadd.f32 %v1620_v25, %v1488_v14  ;;  %v2464_v14 = vld [vmem:[%s3283_s24 + $0x1c0] sm:$0xf] }
 0x13e   : > { %v1490_v32 = vpop.f32.mrf.mxu1  ;;  %v2465_v37 = vor.u32 %v2943_v41, %v2464_v14  ;;  %v2478_v14 = vld [vmem:[%s3283_s24 + $0x1f4] sm:$0xf0]  ;;  %v2484_v41 = vld [vmem:[%s3283_s24 + $0x1e8] sm:$0xf] }
 0x13f   : > { %v1754_v56 = vadd.f32 %v3539_v2, %v1621_v26  ;;  %v1491_v2 = vadd.f32 %v1490_v32, %v1358_v61  ;;  %v2472_v26 = vld [vmem:[%s3283_s24 + $0x1c8] sm:$0xf] }
 0x141   : > { %v1889_v22 = vpop.f32.mrf.mxu0  ;;  %v1887_v20 = vadd.f32 %v1886_v63, %v1754_v56  ;;  %1529 = vmatmul.bf16.gmra.mxu1 %v2441_v17  ;;  %1662 = vmatmul.bf16.gmra.mxu2 %v2445_v45  ;;  %v3606_v63 = vpop.f32.mrf.mxu3  ;;  %v2944_v17 = vld [vmem:[%s3283_s24 + $0x1d8] sm:$0xf0] }
 0x143   : > { %v2006_v33 = vmax.f32 %v1887_v20, 0.0  ;;  %v2473_v20 = vor.u32 %v2944_v17, %v2472_v26  ;;  %v2492_v17 = vld [vmem:[%s3283_s24 + $0x1f0] sm:$0xf] }
 0x144   : > { %2868 = vmatmul.msk.bf16.gmra.mxu0 %vm1262_vm0, %v2453_v36  ;;  %v1623_v48 = vpop.f32.mrf.mxu2  ;;  %v2461_v36 = vor.u32 %v2940_v60, %v2458_v0  ;;  %v2526_v60 = vld [vmem:[%s3283_s24 + $0x24c] sm:$0xf0] }
 0x145   : > { %v3049_v10 = vpack.c.bf16 %v2006_v33, %v2005_v43  ;;  %v1624_v28 = vadd.f32 %v1623_v48, %v1491_v2 }
 0x146   : > { %v1492_v51 = vpop.f32.mrf.mxu1  ;;  %1810 = vmatmul.bf16.gmra.mxu3 %v2509_v13  ;;  %v2945_v13 = vld [vmem:[%s3283_s24 + $0x1e4] sm:$0xf] }
 0x147   : > { %3161 = vst [vmem:[%s3584_s28 + $0x8] sm:$0xff] %v3049_v10   ;;  %v1757_v24 = vadd.f32 %v3553_v8, %v1624_v28  ;;  %v1493_v25 = vadd.f32 %v1492_v51, %v1360_v53  ;;  %v1363_v8 = vadd.f32 %v3556_v52, %v3459_v9  ;;  %v2956_v53 = vld [vmem:[%s3283_s24 + $0x23c] sm:$0xf]  ;;  %v1365_v9 = vadd.f32 %v3556_v52, %v3468_v18 }
 0x148   : > { %v2529_v0 = vor.u32 %v2956_v53, %v2526_v60  ;;  %v2961_v53 = vld [vmem:[%s3283_s24 + $0x264] sm:$0xf]  ;;  %v2546_v60 = vld [vmem:[%s3283_s24 + $0x274] sm:$0xf0] }
 0x149   : > { %v1891_v38 = vpop.f32.mrf.mxu0  ;;  %v3620_v61 = vpop.f32.mrf.mxu3  ;;  %v1890_v57 = vadd.f32 %v1889_v22, %v1757_v24  ;;  %v2948_v24 = vld [vmem:[%s3283_s24 + $0x1f8] sm:$0xf0] }
 0x14b   : > { %v2007_v10 = vmax.f32 %v1890_v57, 0.0 }
 0x14c   : > { %v1625_v45 = vpop.f32.mrf.mxu2 }
 0x14d   : > { %v1626_v32 = vadd.f32 %v1625_v45, %v1493_v25  ;;  %v2949_v45 = vld [vmem:[%s3283_s24 + $0x200] sm:$0xf0] }
 0x14e   : > { %v1495_v56 = vpop.f32.mrf.mxu1  ;;  %v2493_v57 = vor.u32 %v2949_v45, %v2492_v17  ;;  %v2954_v17 = vld [vmem:[%s3283_s24 + $0x228] sm:$0xf0] }
 0x14f   : > { %v1759_v43 = vadd.f32 %v3561_v31, %v1626_v32  ;;  %v1496_v31 = vadd.f32 %v1495_v56, %v1363_v8  ;;  %v2485_v56 = vor.u32 %v2948_v24, %v2484_v41  ;;  %v2953_v41 = vld [vmem:[%s3283_s24 + $0x220] sm:$0xf0] }
 0x151   : > { %v1894_v33 = vpop.f32.mrf.mxu0  ;;  %v1892_v48 = vadd.f32 %v1891_v38, %v1759_v43  ;;  %1534 = vmatmul.bf16.gmra.mxu1 %v2461_v36  ;;  %1667 = vmatmul.bf16.gmra.mxu2 %v2465_v37  ;;  %v3626_v38 = vpop.f32.mrf.mxu3  ;;  %v2481_v37 = vor.u32 %v2945_v13, %v2478_v14  ;;  %v2549_v13 = vor.u32 %v2961_v53, %v2546_v60  ;;  %v2504_v14 = vld [vmem:[%s3283_s24 + $0x210] sm:$0xf]  ;;  %v2955_v53 = vld [vmem:[%s3283_s24 + $0x234] sm:$0xf] }
 0x153   : > { %v2008_v2 = vmax.f32 %v1892_v48, 0.0 }
 0x154   : > { %2869 = vmatmul.msk.bf16.gmra.mxu0 %vm1262_vm0, %v2473_v20  ;;  %v1628_v22 = vpop.f32.mrf.mxu2 }
 0x155   : > { %v3054_v51 = vpack.c.bf16 %v2008_v2, %v2007_v10  ;;  %v1629_v40 = vadd.f32 %v1628_v22, %v1496_v31 }
 0x156   : > { %v1497_v28 = vpop.f32.mrf.mxu1  ;;  %1815 = vmatmul.bf16.gmra.mxu3 %v2529_v0  ;;  %v2498_v0 = vld [vmem:[%s3283_s24 + $0x21c] sm:$0xf0] }
 0x157   : > { %3162 = vst [vmem:[%s3584_s28 + $0x10] sm:$0xff] %v3054_v51   ;;  %v1762_v25 = vadd.f32 %v3574_v29, %v1629_v40  ;;  %v1498_v26 = vadd.f32 %v1497_v28, %v1365_v9  ;;  %v1368_v29 = vadd.f32 %v3556_v52, %v3484_v42  ;;  %v1370_v42 = vadd.f32 %v3556_v52, %v3491_v46  ;;  %v2950_v9 = vld [vmem:[%s3283_s24 + $0x20c] sm:$0xf] }
 0x159   : > { %v1896_v58 = vpop.f32.mrf.mxu0  ;;  %v3640_v43 = vpop.f32.mrf.mxu3  ;;  %v1895_v18 = vadd.f32 %v1894_v33, %v1762_v25 }
 0x15b   : > { %v2009_v2 = vmax.f32 %v1895_v18, 0.0 }
 0x15c   : > { %v1630_v32 = vpop.f32.mrf.mxu2 }
 0x15d   : > { %v1631_v36 = vadd.f32 %v1630_v32, %v1498_v26  ;;  %v2512_v26 = vld [vmem:[%s3283_s24 + $0x218] sm:$0xf] }
 0x15e   : > { %v1500_v20 = vpop.f32.mrf.mxu1 }
 0x15f   : > { %v1764_v48 = vadd.f32 %v3586_v49, %v1631_v36  ;;  %v1501_v49 = vadd.f32 %v1500_v20, %v1368_v29  ;;  %v2501_v36 = vor.u32 %v2950_v9, %v2498_v0  ;;  %v2513_v20 = vor.u32 %v2954_v17, %v2512_v26  ;;  %v2524_v9 = vld [vmem:[%s3283_s24 + $0x238] sm:$0xf] }
 0x161   : > { %v1899_v8 = vpop.f32.mrf.mxu0  ;;  %v1897_v10 = vadd.f32 %v1896_v58, %v1764_v48  ;;  %1539 = vmatmul.bf16.gmra.mxu1 %v2481_v37  ;;  %1672 = vmatmul.bf16.gmra.mxu2 %v2485_v56  ;;  %v3646_v28 = vpop.f32.mrf.mxu3  ;;  %v2505_v37 = vor.u32 %v2953_v41, %v2504_v14  ;;  %v2532_v41 = vld [vmem:[%s3283_s24 + $0x240] sm:$0xf] }
 0x163   : > { %v2010_v22 = vmax.f32 %v1897_v10, 0.0 }
 0x164   : > { %2870 = vmatmul.msk.bf16.gmra.mxu0 %vm1262_vm0, %v2493_v57  ;;  %v1633_v33 = vpop.f32.mrf.mxu2 }
 0x165   : > { %v3059_v51 = vpack.c.bf16 %v2010_v22, %v2009_v2  ;;  %v1634_v40 = vadd.f32 %v1633_v33, %v1501_v49 }
 0x166   : > { %v1502_v31 = vpop.f32.mrf.mxu1  ;;  %1820 = vmatmul.bf16.gmra.mxu3 %v2549_v13  ;;  %v2958_v13 = vld [vmem:[%s3283_s24 + $0x248] sm:$0xf0] }
 0x167   : > { %3163 = vst [vmem:[%s3584_s28 + $0x18] sm:$0xff] %v3059_v51   ;;  %v1767_v24 = vadd.f32 %v3600_v7, %v1634_v40  ;;  %v1503_v25 = vadd.f32 %v1502_v31, %v1370_v42  ;;  %v1373_v7 = vadd.f32 %v3556_v52, %v3507_v19  ;;  %v2966_v40 = vld [vmem:[%s3283_s24 + $0x28c] sm:$0xf]  ;;  %v1375_v19 = vadd.f32 %v3556_v52, %v3516_v23  ;;  %v2518_v42 = vld [vmem:[%s3283_s24 + $0x244] sm:$0xf0] }
 0x168   : > { %v2521_v17 = vor.u32 %v2955_v53, %v2518_v42  ;;  %v2552_v42 = vld [vmem:[%s3283_s24 + $0x268] sm:$0xf] }
 0x169   : > { %v1901_v58 = vpop.f32.mrf.mxu0  ;;  %v3660_v57 = vpop.f32.mrf.mxu3  ;;  %v1900_v46 = vadd.f32 %v1899_v8, %v1767_v24  ;;  %v2959_v24 = vld [vmem:[%s3283_s24 + $0x250] sm:$0xf0] }
 0x16b   : > { %v2011_v29 = vmax.f32 %v1900_v46, 0.0 }
 0x16c   : > { %v1635_v45 = vpop.f32.mrf.mxu2 }
 0x16d   : > { %v1636_v32 = vadd.f32 %v1635_v45, %v1503_v25  ;;  %v2525_v45 = vor.u32 %v2958_v13, %v2524_v9  ;;  %v2964_v9 = vld [vmem:[%s3283_s24 + $0x278] sm:$0xf0] }
 0x16e   : > { %v1505_v56 = vpop.f32.mrf.mxu1 }
 0x16f   : > { %v1769_v18 = vadd.f32 %v3606_v63, %v1636_v32  ;;  %v1506_v63 = vadd.f32 %v1505_v56, %v1373_v7 }
 0x171   : > { %v1904_v48 = vpop.f32.mrf.mxu0  ;;  %v1902_v10 = vadd.f32 %v1901_v58, %v1769_v18  ;;  %1544 = vmatmul.bf16.gmra.mxu1 %v2501_v36  ;;  %1677 = vmatmul.bf16.gmra.mxu2 %v2505_v37  ;;  %v3666_v51 = vpop.f32.mrf.mxu3  ;;  %v2566_v58 = vld [vmem:[%s3283_s24 + $0x29c] sm:$0xf0]  ;;  %v2533_v36 = vor.u32 %v2959_v24, %v2532_v41 }
 0x172   : > { %v2569_v60 = vor.u32 %v2966_v40, %v2566_v58  ;;  %v2538_v40 = vld [vmem:[%s3283_s24 + $0x26c] sm:$0xf0]  ;;  %v2544_v58 = vld [vmem:[%s3283_s24 + $0x260] sm:$0xf] }
 0x173   : > { %v2012_v2 = vmax.f32 %v1902_v10, 0.0 }
 0x174   : > { %2871 = vmatmul.msk.bf16.gmra.mxu0 %vm1262_vm0, %v2513_v20  ;;  %v1638_v8 = vpop.f32.mrf.mxu2 }
 0x175   : > { %v3064_v22 = vpack.c.bf16 %v2012_v2, %v2011_v29  ;;  %v1639_v49 = vadd.f32 %v1638_v8, %v1506_v63  ;;  %v2971_v63 = vld [vmem:[%s3283_s24 + $0x2b4] sm:$0xf] }
 0x176   : > { %v1507_v33 = vpop.f32.mrf.mxu1  ;;  %1825 = vmatmul.bf16.gmra.mxu3 %v2569_v60 }
 0x177   : > { %3164 = vst [vmem:[%s3584_s28 + $0x20] sm:$0xff] %v3064_v22   ;;  %v1772_v0 = vadd.f32 %v3620_v61, %v1639_v49  ;;  %v1508_v14 = vadd.f32 %v1507_v33, %v1375_v19  ;;  %v1378_v61 = vadd.f32 %v3556_v52, %v3532_v62  ;;  %v2586_v33 = vld [vmem:[%s3283_s24 + $0x2c4] sm:$0xf0]  ;;  %v1380_v62 = vadd.f32 %v3556_v52, %v3541_v5  ;;  %v2960_v49 = vld [vmem:[%s3283_s24 + $0x25c] sm:$0xf] }
 0x178   : > { %v2963_v19 = vld [vmem:[%s3283_s24 + $0x270] sm:$0xf0] }
 0x179   : > { %v1906_v31 = vpop.f32.mrf.mxu0  ;;  %v3680_v37 = vpop.f32.mrf.mxu3  ;;  %v1905_v23 = vadd.f32 %v1904_v48, %v1772_v0  ;;  %v2545_v41 = vor.u32 %v2963_v19, %v2544_v58 }
 0x17b   : > { %v2013_v18 = vmax.f32 %v1905_v23, 0.0 }
 0x17c   : > { %v1640_v25 = vpop.f32.mrf.mxu2 }
 0x17d   : > { %v1641_v26 = vadd.f32 %v1640_v25, %v1508_v14  ;;  %v2541_v14 = vor.u32 %v2960_v49, %v2538_v40  ;;  %v2553_v25 = vor.u32 %v2964_v9, %v2552_v42  ;;  %v2572_v49 = vld [vmem:[%s3283_s24 + $0x290] sm:$0xf] }
 0x17e   : > { %v1510_v32 = vpop.f32.mrf.mxu1 }
 0x17f   : > { %v1774_v56 = vadd.f32 %v3626_v38, %v1641_v26  ;;  %v1511_v38 = vadd.f32 %v1510_v32, %v1378_v61 }
 0x181   : > { %v1909_v20 = vpop.f32.mrf.mxu0  ;;  %v1907_v46 = vadd.f32 %v1906_v31, %v1774_v56  ;;  %1549 = vmatmul.bf16.gmra.mxu1 %v2521_v17  ;;  %1682 = vmatmul.bf16.gmra.mxu2 %v2525_v45  ;;  %v3686_v2 = vpop.f32.mrf.mxu3  ;;  %v2589_v31 = vor.u32 %v2971_v63, %v2586_v33  ;;  %v2968_v63 = vld [vmem:[%s3283_s24 + $0x298] sm:$0xf0] }
 0x183   : > { %v2014_v10 = vmax.f32 %v1907_v46, 0.0 }
 0x184   : > { %2872 = vmatmul.msk.bf16.gmra.mxu0 %vm1262_vm0, %v2533_v36  ;;  %v1643_v48 = vpop.f32.mrf.mxu2 }
 0x185   : > { %v3069_v7 = vpack.c.bf16 %v2014_v10, %v2013_v18  ;;  %v1644_v8 = vadd.f32 %v1643_v48, %v1511_v38  ;;  %v2976_v48 = vld [vmem:[%s3283_s24 + $0x2dc] sm:$0xf]  ;;  %v2965_v38 = vld [vmem:[%s3283_s24 + $0x284] sm:$0xf] }
 0x186   : > { %v1512_v29 = vpop.f32.mrf.mxu1  ;;  %1830 = vmatmul.bf16.gmra.mxu3 %v2589_v31  ;;  %v2969_v31 = vld [vmem:[%s3283_s24 + $0x2a0] sm:$0xf0] }
 0x187   : > { %3165 = vst [vmem:[%s3584_s28 + $0x28] sm:$0xff] %v3069_v7   ;;  %v1777_v53 = vadd.f32 %v3640_v43, %v1644_v8  ;;  %v1513_v60 = vadd.f32 %v1512_v29, %v1380_v62  ;;  %v1383_v43 = vadd.f32 %v3556_v52, %v3384_v12  ;;  %v2606_v7 = vld [vmem:[%s3283_s24 + $0x2ec] sm:$0xf0]  ;;  %v1385_v12 = vadd.f32 %v3556_v52, %v3391_v16  ;;  %v2558_v8 = vld [vmem:[%s3283_s24 + $0x294] sm:$0xf0] }
 0x188   : > { %v2609_v29 = vor.u32 %v2976_v48, %v2606_v7  ;;  %v2561_v19 = vor.u32 %v2965_v38, %v2558_v8  ;;  %v2573_v42 = vor.u32 %v2969_v31, %v2572_v49  ;;  %v2592_v7 = vld [vmem:[%s3283_s24 + $0x2b8] sm:$0xf] }
 0x189   : > { %v1911_v22 = vpop.f32.mrf.mxu0  ;;  %v3700_v26 = vpop.f32.mrf.mxu3  ;;  %v1910_v5 = vadd.f32 %v1909_v20, %v1777_v53 }
 0x18b   : > { %v2015_v36 = vmax.f32 %v1910_v5, 0.0 }
 0x18c   : > { %v1645_v13 = vpop.f32.mrf.mxu2 }
 0x18d   : > { %v1646_v0 = vadd.f32 %v1645_v13, %v1513_v60 }
 0x18e   : > { %v1515_v24 = vpop.f32.mrf.mxu1 }
 0x18f   : > { %v1779_v17 = vadd.f32 %v3646_v28, %v1646_v0  ;;  %v1516_v28 = vadd.f32 %v1515_v24, %v1383_v43 }
 0x191   : > { %v1914_v45 = vpop.f32.mrf.mxu0  ;;  %v1912_v32 = vadd.f32 %v1911_v22, %v1779_v17  ;;  %1554 = vmatmul.bf16.gmra.mxu1 %v2541_v14  ;;  %1687 = vmatmul.bf16.gmra.mxu2 %v2545_v41  ;;  %v3706_v61 = vpop.f32.mrf.mxu3  ;;  %v2564_v22 = vld [vmem:[%s3283_s24 + $0x288] sm:$0xf] }
 0x192   : > { %v2565_v53 = vor.u32 %v2968_v63, %v2564_v22 }
 0x193   : > { %v2016_v23 = vmax.f32 %v1912_v32, 0.0 }
 0x194   : > { %2873 = vmatmul.msk.bf16.gmra.mxu0 %vm1262_vm0, %v2553_v25  ;;  %v1648_v56 = vpop.f32.mrf.mxu2 }
 0x195   : > { %v3074_v20 = vpack.c.bf16 %v2016_v23, %v2015_v36  ;;  %v1649_v18 = vadd.f32 %v1648_v56, %v1516_v28  ;;  %v2981_v36 = vld [vmem:[%s3283_s24 + $0x304] sm:$0xf]  ;;  %v2626_v23 = vld [vmem:[%s3283_s24 + $0x314] sm:$0xf0]  ;;  %v2970_v56 = vld [vmem:[%s3283_s24 + $0x2ac] sm:$0xf] }
 0x196   : > { %v1517_v46 = vpop.f32.mrf.mxu1  ;;  %1835 = vmatmul.bf16.gmra.mxu3 %v2609_v29  ;;  %v2578_v28 = vld [vmem:[%s3283_s24 + $0x2bc] sm:$0xf0] }
 0x197   : > { %3166 = vst [vmem:[%s3584_s28 + $0x30] sm:$0xff] %v3074_v20   ;;  %v1782_v33 = vadd.f32 %v3660_v57, %v1649_v18  ;;  %v1518_v62 = vadd.f32 %v1517_v46, %v1385_v12  ;;  %v1388_v57 = vadd.f32 %v3556_v52, %v3405_v30  ;;  %v1390_v30 = vadd.f32 %v3556_v52, %v3414_v35  ;;  %v2584_v46 = vld [vmem:[%s3283_s24 + $0x2b0] sm:$0xf]  ;;  %v2973_v18 = vld [vmem:[%s3283_s24 + $0x2c0] sm:$0xf0] }
 0x198   : > { %v2629_v20 = vor.u32 %v2981_v36, %v2626_v23  ;;  %v2974_v12 = vld [vmem:[%s3283_s24 + $0x2c8] sm:$0xf0]  ;;  %v2581_v8 = vor.u32 %v2970_v56, %v2578_v28  ;;  %v2585_v22 = vor.u32 %v2973_v18, %v2584_v46  ;;  %v2979_v36 = vld [vmem:[%s3283_s24 + $0x2f0] sm:$0xf0] }
 0x199   : > { %v1916_v10 = vpop.f32.mrf.mxu0  ;;  %v3720_v9 = vpop.f32.mrf.mxu3  ;;  %v1915_v16 = vadd.f32 %v1914_v45, %v1782_v33  ;;  %v2593_v33 = vor.u32 %v2974_v12, %v2592_v7 }
 0x19b   : > { %v2017_v41 = vmax.f32 %v1915_v16, 0.0 }
 0x19c   : > { %v1650_v40 = vpop.f32.mrf.mxu2 }
 0x19d   : > { %v1651_v58 = vadd.f32 %v1650_v40, %v1518_v62 }
 0x19e   : > { %v1520_v60 = vpop.f32.mrf.mxu1 }
 0x19f   : > { %v1784_v13 = vadd.f32 %v3666_v51, %v1651_v58  ;;  %v1521_v51 = vadd.f32 %v1520_v60, %v1388_v57  ;;  %v2646_v57 = vld [vmem:[%s3283_s24 + $0x33c] sm:$0xf0] }
 0x1a1   : > { %v1919_v0 = vpop.f32.mrf.mxu0  ;;  %v1917_v14 = vadd.f32 %v1916_v10, %v1784_v13  ;;  %1559 = vmatmul.bf16.gmra.mxu1 %v2561_v19  ;;  %1692 = vmatmul.bf16.gmra.mxu2 %v2565_v53  ;;  %v3726_v45 = vpop.f32.mrf.mxu3 }
 0x1a3   : > { %v2018_v24 = vmax.f32 %v1917_v14, 0.0  ;;  %v2986_v14 = vld [vmem:[%s3283_s24 + $0x32c] sm:$0xf] }
 0x1a4   : > { %2874 = vmatmul.msk.bf16.gmra.mxu0 %vm1262_vm0, %v2573_v42  ;;  %v1653_v25 = vpop.f32.mrf.mxu2 }
 0x1a5   : > { %v3079_v5 = vpack.c.bf16 %v2018_v24, %v2017_v41  ;;  %v1654_v32 = vadd.f32 %v1653_v25, %v1521_v51  ;;  %v2975_v41 = vld [vmem:[%s3283_s24 + $0x2d4] sm:$0xf]  ;;  %v2649_v24 = vor.u32 %v2986_v14, %v2646_v57  ;;  %v2598_v25 = vld [vmem:[%s3283_s24 + $0x2e4] sm:$0xf0]  ;;  %v2978_v51 = vld [vmem:[%s3283_s24 + $0x2e8] sm:$0xf0] }
 0x1a6   : > { %v1522_v17 = vpop.f32.mrf.mxu1  ;;  %1840 = vmatmul.bf16.gmra.mxu3 %v2629_v20  ;;  %v2601_v56 = vor.u32 %v2975_v41, %v2598_v25 }
 0x1a7   : > { %3167 = vst [vmem:[%s3584_s28 + $0x38] sm:$0xff] %v3079_v5   ;;  %v1787_v10 = vadd.f32 %v3680_v37, %v1654_v32  ;;  %v1523_v48 = vadd.f32 %v1522_v17, %v1390_v30  ;;  %v1393_v37 = vadd.f32 %v3556_v52, %v3430_v50  ;;  %v1395_v50 = vadd.f32 %v3556_v52, %v3439_v55  ;;  %v2604_v5 = vld [vmem:[%s3283_s24 + $0x2d8] sm:$0xf] }
 0x1a8   : > { %v2605_v20 = vor.u32 %v2978_v51, %v2604_v5 }
 0x1a9   : > { %v1921_v43 = vpop.f32.mrf.mxu0  ;;  %v3740_v62 = vpop.f32.mrf.mxu3  ;;  %v1920_v35 = vadd.f32 %v1919_v0, %v1787_v10 }
 0x1ab   : > { %v2019_v58 = vmax.f32 %v1920_v35, 0.0 }
 0x1ac   : > { %v1655_v38 = vpop.f32.mrf.mxu2 }
 0x1ad   : > { %v1656_v29 = vadd.f32 %v1655_v38, %v1523_v48 }
 0x1ae   : > { %v1525_v63 = vpop.f32.mrf.mxu1 }
 0x1af   : > { %v1789_v49 = vadd.f32 %v3686_v2, %v1656_v29  ;;  %v1526_v2 = vadd.f32 %v1525_v63, %v1393_v37 }
 0x1b1   : > { %v1924_v31 = vpop.f32.mrf.mxu0  ;;  %v1922_v40 = vadd.f32 %v1921_v43, %v1789_v49  ;;  %1564 = vmatmul.bf16.gmra.mxu1 %v2581_v8  ;;  %1697 = vmatmul.bf16.gmra.mxu2 %v2585_v22  ;;  %v3746_v16 = vpop.f32.mrf.mxu3  ;;  %v2612_v43 = vld [vmem:[%s3283_s24 + $0x2e0] sm:$0xf]  ;;  %v2991_v49 = vld [vmem:[%s3283_s24 + $0x354] sm:$0xf] }
 0x1b2   : > { %v2613_v46 = vor.u32 %v2979_v36, %v2612_v43 }
 0x1b3   : > { %v2020_v19 = vmax.f32 %v1922_v40, 0.0  ;;  %v2980_v40 = vld [vmem:[%s3283_s24 + $0x2fc] sm:$0xf] }
 0x1b4   : > { %2875 = vmatmul.msk.bf16.gmra.mxu0 %vm1262_vm0, %v2593_v33  ;;  %v1658_v53 = vpop.f32.mrf.mxu2 }
 0x1b5   : > { %v3084_v60 = vpack.c.bf16 %v2020_v19, %v2019_v58  ;;  %v1659_v13 = vadd.f32 %v1658_v53, %v1526_v2  ;;  %v2618_v58 = vld [vmem:[%s3283_s24 + $0x30c] sm:$0xf0]  ;;  %v2624_v19 = vld [vmem:[%s3283_s24 + $0x300] sm:$0xf]  ;;  %v2983_v53 = vld [vmem:[%s3283_s24 + $0x310] sm:$0xf0] }
 0x1b6   : > { %v1527_v42 = vpop.f32.mrf.mxu1  ;;  %1845 = vmatmul.bf16.gmra.mxu3 %v2649_v24  ;;  %v2621_v57 = vor.u32 %v2980_v40, %v2618_v58 }
 0x1b7   : > { %3168 = vst [vmem:[%s3584_s28 + $0x40] sm:$0xff] %v3084_v60   ;;  %v1792_v17 = vadd.f32 %v3700_v26, %v1659_v13  ;;  %v1528_v32 = vadd.f32 %v1527_v42, %v1395_v50  ;;  %v1398_v26 = vadd.f32 %v3556_v52, %v3455_v6  ;;  %v1400_v6 = vadd.f32 %v3556_v52, %v3464_v11  ;;  %v2632_v42 = vld [vmem:[%s3283_s24 + $0x308] sm:$0xf]  ;;  %v2984_v13 = vld [vmem:[%s3283_s24 + $0x318] sm:$0xf0] }
 0x1b8   : > { %v2625_v50 = vor.u32 %v2983_v53, %v2624_v19  ;;  %v2633_v24 = vor.u32 %v2984_v13, %v2632_v42 }
 0x1b9   : > { %v1926_v0 = vpop.f32.mrf.mxu0  ;;  %v3760_v18 = vpop.f32.mrf.mxu3  ;;  %v1925_v55 = vadd.f32 %v1924_v31, %v1792_v17  ;;  %v2666_v31 = vld [vmem:[%s3283_s24 + $0x364] sm:$0xf0] }
 0x1ba   : > { %v2669_v37 = vor.u32 %v2991_v49, %v2666_v31 }
 0x1bb   : > { %v2021_v12 = vmax.f32 %v1925_v55, 0.0  ;;  %v2686_v55 = vld [vmem:[%s3283_s24 + $0x38c] sm:$0xf0] }
 0x1bc   : > { %v1660_v23 = vpop.f32.mrf.mxu2 }
 0x1bd   : > { %v1661_v30 = vadd.f32 %v1660_v23, %v1528_v32 }
 0x1be   : > { %v1530_v28 = vpop.f32.mrf.mxu1 }
 0x1bf   : > { %v1794_v10 = vadd.f32 %v3706_v61, %v1661_v30  ;;  %v1531_v61 = vadd.f32 %v1530_v28, %v1398_v26  ;;  %v2644_v26 = vld [vmem:[%s3283_s24 + $0x328] sm:$0xf] }
 0x1c1   : > { %v1929_v48 = vpop.f32.mrf.mxu0  ;;  %v1927_v7 = vadd.f32 %v1926_v0, %v1794_v10  ;;  %1569 = vmatmul.bf16.gmra.mxu1 %v2601_v56  ;;  %1702 = vmatmul.bf16.gmra.mxu2 %v2605_v20  ;;  %v3766_v63 = vpop.f32.mrf.mxu3  ;;  %v2985_v10 = vld [vmem:[%s3283_s24 + $0x324] sm:$0xf] }
 0x1c3   : > { %v2022_v38 = vmax.f32 %v1927_v7, 0.0  ;;  %v2638_v7 = vld [vmem:[%s3283_s24 + $0x334] sm:$0xf0] }
 0x1c4   : > { %2876 = vmatmul.msk.bf16.gmra.mxu0 %vm1262_vm0, %v2613_v46  ;;  %v1663_v29 = vpop.f32.mrf.mxu2  ;;  %v2996_v46 = vld [vmem:[%s3283_s24 + $0x37c] sm:$0xf] }
 0x1c5   : > { %v3089_v8 = vpack.c.bf16 %v2022_v38, %v2021_v12  ;;  %v1664_v33 = vadd.f32 %v1663_v29, %v1531_v61  ;;  %v2988_v12 = vld [vmem:[%s3283_s24 + $0x338] sm:$0xf0]  ;;  %v2989_v61 = vld [vmem:[%s3283_s24 + $0x340] sm:$0xf0] }
 0x1c6   : > { %v1532_v22 = vpop.f32.mrf.mxu1  ;;  %1850 = vmatmul.bf16.gmra.mxu3 %v2669_v37  ;;  %v2645_v49 = vor.u32 %v2988_v12, %v2644_v26 }
 0x1c7   : > { %3169 = vst [vmem:[%s3584_s28 + $0x48] sm:$0xff] %v3089_v8   ;;  %v1797_v60 = vadd.f32 %v3720_v9, %v1664_v33  ;;  %v1533_v2 = vadd.f32 %v1532_v22, %v1400_v6  ;;  %v1403_v9 = vadd.f32 %v3556_v52, %v3480_v39  ;;  %v1405_v39 = vadd.f32 %v3556_v52, %v3489_v44  ;;  %v2652_v8 = vld [vmem:[%s3283_s24 + $0x330] sm:$0xf] }
 0x1c8   : > { %v2653_v6 = vor.u32 %v2989_v61, %v2652_v8  ;;  %v3829_v61 = vld [vmem:[%s3283_s24 + $0x3c8] sm:$0xff] }
 0x1c9   : > { %v1931_v35 = vpop.f32.mrf.mxu0  ;;  %v3780_v25 = vpop.f32.mrf.mxu3  ;;  %v1930_v11 = vadd.f32 %v1929_v48, %v1797_v60  ;;  %v2689_v48 = vor.u32 %v2996_v46, %v2686_v55 }
 0x1cb   : > { %v2023_v32 = vmax.f32 %v1930_v11, 0.0 }
 0x1cc   : > { %v1665_v0 = vpop.f32.mrf.mxu2 }
 0x1cd   : > { %v1666_v14 = vadd.f32 %v1665_v0, %v1533_v2 }
 0x1ce   : > { %v1535_v41 = vpop.f32.mrf.mxu1 }
 0x1cf   : > { %v1799_v5 = vadd.f32 %v3726_v45, %v1666_v14  ;;  %v1536_v45 = vadd.f32 %v1535_v41, %v1403_v9  ;;  %v2706_v41 = vld [vmem:[%s3283_s24 + $0x3b4] sm:$0xf0] }
 0x1d1   : > { %v1934_v51 = vpop.f32.mrf.mxu0  ;;  %v1932_v17 = vadd.f32 %v1931_v35, %v1799_v5  ;;  %1574 = vmatmul.bf16.gmra.mxu1 %v2621_v57  ;;  %1707 = vmatmul.bf16.gmra.mxu2 %v2625_v50  ;;  %v3786_v56 = vpop.f32.mrf.mxu3  ;;  %v2641_v35 = vor.u32 %v2985_v10, %v2638_v7  ;;  %v3001_v50 = vld [vmem:[%s3283_s24 + $0x3a4] sm:$0xf]  ;;  %v2658_v5 = vld [vmem:[%s3283_s24 + $0x35c] sm:$0xf0] }
 0x1d2   : > { %v2709_v11 = vor.u32 %v3001_v50, %v2706_v41 }
 0x1d3   : > { %v2024_v43 = vmax.f32 %v1932_v17, 0.0  ;;  %v2993_v17 = vld [vmem:[%s3283_s24 + $0x360] sm:$0xf0] }
 0x1d4   : > { %2877 = vmatmul.msk.bf16.gmra.mxu0 %vm1262_vm0, %v2633_v24  ;;  %v1668_v36 = vpop.f32.mrf.mxu2  ;;  %v2990_v24 = vld [vmem:[%s3283_s24 + $0x34c] sm:$0xf] }
 0x1d5   : > { %v3094_v23 = vpack.c.bf16 %v2024_v43, %v2023_v32  ;;  %v1669_v20 = vadd.f32 %v1668_v36, %v1536_v45  ;;  %v2672_v43 = vld [vmem:[%s3283_s24 + $0x358] sm:$0xf]  ;;  %v2994_v36 = vld [vmem:[%s3283_s24 + $0x368] sm:$0xf0] }
 0x1d6   : > { %v1537_v30 = vpop.f32.mrf.mxu1  ;;  %1855 = vmatmul.bf16.gmra.mxu3 %v2689_v48  ;;  %v2673_v46 = vor.u32 %v2994_v36, %v2672_v43 }
 0x1d7   : > { %3170 = vst [vmem:[%s3584_s28 + $0x50] sm:$0xff] %v3094_v23   ;;  %v1802_v38 = vadd.f32 %v3740_v62, %v1669_v20  ;;  %v1538_v29 = vadd.f32 %v1537_v30, %v1405_v39  ;;  %v1408_v62 = vadd.f32 %v3556_v52, %v3503_v4  ;;  %v1410_v4 = vadd.f32 %v3556_v52, %v3512_v21 }
 0x1d8   : > { %v2661_v30 = vor.u32 %v2990_v24, %v2658_v5 }
 0x1d9   : > { %v1936_v28 = vpop.f32.mrf.mxu0  ;;  %v3800_v40 = vpop.f32.mrf.mxu3  ;;  %v1935_v44 = vadd.f32 %v1934_v51, %v1802_v38  ;;  %v2664_v51 = vld [vmem:[%s3283_s24 + $0x350] sm:$0xf] }
 0x1da   : > { %v2665_v20 = vor.u32 %v2993_v17, %v2664_v51 }
 0x1db   : > { %v2025_v53 = vmax.f32 %v1935_v44, 0.0  ;;  %v2684_v44 = vld [vmem:[%s3283_s24 + $0x378] sm:$0xf] }
 0x1dc   : > { %v1670_v22 = vpop.f32.mrf.mxu2 }
 0x1dd   : > { %v1671_v33 = vadd.f32 %v1670_v22, %v1538_v29 }
 0x1de   : > { %v1540_v31 = vpop.f32.mrf.mxu1 }
 0x1df   : > { %v1804_v37 = vadd.f32 %v3746_v16, %v1671_v33  ;;  %v1541_v16 = vadd.f32 %v1540_v31, %v1408_v62  ;;  %v2692_v62 = vld [vmem:[%s3283_s24 + $0x380] sm:$0xf] }
 0x1e1   : > { %v1939_v58 = vpop.f32.mrf.mxu0  ;;  %v1937_v19 = vadd.f32 %v1936_v28, %v1804_v37  ;;  %1579 = vmatmul.bf16.gmra.mxu1 %v2641_v35  ;;  %1712 = vmatmul.bf16.gmra.mxu2 %v2645_v49  ;;  %v3806_v0 = vpop.f32.mrf.mxu3  ;;  %v1415_v35 = vadd.f32 %v3556_v52, %v3537_v1  ;;  %v2995_v49 = vld [vmem:[%s3283_s24 + $0x374] sm:$0xf]  ;;  %v2998_v37 = vld [vmem:[%s3283_s24 + $0x388] sm:$0xf0] }
 0x1e3   : > { %v2026_v60 = vmax.f32 %v1937_v19, 0.0 }
 0x1e4   : > { %2878 = vmatmul.msk.bf16.gmra.mxu0 %vm1262_vm0, %v2653_v6  ;;  %v1673_v2 = vpop.f32.mrf.mxu2  ;;  %v2678_v6 = vld [vmem:[%s3283_s24 + $0x384] sm:$0xf0] }
 0x1e5   : > { %v3099_v42 = vpack.c.bf16 %v2026_v60, %v2025_v53  ;;  %v1674_v14 = vadd.f32 %v1673_v2, %v1541_v16  ;;  %v2999_v53 = vld [vmem:[%s3283_s24 + $0x390] sm:$0xf0]  ;;  %v2685_v16 = vor.u32 %v2998_v37, %v2684_v44  ;;  %v352_v37 = vld [vmem:[%s3283_s24 + $0x3d0] sm:$0xf] }
 0x1e6   : > { %v1542_v13 = vpop.f32.mrf.mxu1  ;;  %1860 = vmatmul.bf16.gmra.mxu3 %v2709_v11 }
 0x1e7   : > { %3171 = vst [vmem:[%s3584_s28 + $0x58] sm:$0xff] %v3099_v42   ;;  %v1807_v9 = vadd.f32 %v3760_v18, %v1674_v14  ;;  %v1543_v32 = vadd.f32 %v1542_v13, %v1410_v4  ;;  %v1413_v18 = vadd.f32 %v3556_v52, %v3528_v59  ;;  %v819_v59 = vunpack.c.h.b16 %v3829_v61 }
 0x1e8   : > { %v2681_v42 = vor.u32 %v2995_v49, %v2678_v6  ;;  %v2693_v14 = vor.u32 %v2999_v53, %v2692_v62  ;;  %v818_v53 = vunpack.c.l.b16 %v3829_v61 }
 0x1e9   : > { %v1941_v57 = vpop.f32.mrf.mxu0  ;;  %v3820_v55 = vpop.f32.mrf.mxu3  ;;  %v1940_v21 = vadd.f32 %v1939_v58, %v1807_v9  ;;  %v944_v31 = vpack.c.b16 %v819_v59, %v819_v59 }
 0x1eb   : > { %v2027_v7 = vmax.f32 %v1940_v21, 0.0  ;;  %v3004_v21 = vld [vmem:[%s3283_s24 + $0x3b8] sm:$0xf0] }
 0x1ec   : > { %v1675_v23 = vpop.f32.mrf.mxu2 }
 0x1ed   : > { %v1676_v45 = vadd.f32 %v1675_v23, %v1543_v32  ;;  %v3000_v23 = vld [vmem:[%s3283_s24 + $0x39c] sm:$0xf] }
 0x1ee   : > { %v1545_v28 = vpop.f32.mrf.mxu1 }
 0x1ef   : > { %v1809_v39 = vadd.f32 %v3766_v63, %v1676_v45  ;;  %v1546_v29 = vadd.f32 %v1545_v28, %v1413_v18  ;;  %v2698_v45 = vld [vmem:[%s3283_s24 + $0x3ac] sm:$0xf0] }
 0x1f1   : > { %v1944_v10 = vpop.f32.mrf.mxu0  ;;  %v1942_v48 = vadd.f32 %v1941_v57, %v1809_v39  ;;  %1584 = vmatmul.bf16.gmra.mxu1 %v2661_v30  ;;  %1717 = vmatmul.bf16.gmra.mxu2 %v2665_v20  ;;  %v3826_v8 = vpop.f32.mrf.mxu3  ;;  %v2704_v30 = vld [vmem:[%s3283_s24 + $0x3a0] sm:$0xf] }
 0x1f3   : > { %v2028_v26 = vmax.f32 %v1942_v48, 0.0  ;;  %v2701_v48 = vor.u32 %v3000_v23, %v2698_v45 }
 0x1f4   : > { %2879 = vmatmul.msk.bf16.gmra.mxu0 %vm1262_vm0, %v2673_v46  ;;  %v1678_v12 = vpop.f32.mrf.mxu2  ;;  %v2712_v46 = vld [vmem:[%s3283_s24 + $0x3a8] sm:$0xf] }
 0x1f5   : > { %v3104_v38 = vpack.c.bf16 %v2028_v26, %v2027_v7  ;;  %v1679_v22 = vadd.f32 %v1678_v12, %v1546_v29  ;;  %v2713_v26 = vor.u32 %v3004_v21, %v2712_v46 }
 0x1f6   : > { %v1547_v63 = vpop.f32.mrf.mxu1  ;;  %1865 = vmatmul.bf16.gmra.mxu3 %v944_v31 }
 0x1f7   : > { %3172 = vst [vmem:[%s3584_s28 + $0x60] sm:$0xff] %v3104_v38   ;;  %v1812_v58 = vadd.f32 %v3780_v25, %v1679_v22  ;;  %v1548_v19 = vadd.f32 %v1547_v63, %v1415_v35  ;;  %v3847_v25 = vld [vmem:[%s3277_s21] ss:$0 sm:$0xff] }
 0x1f8   : > { %v1418_v4 = vadd.f32 %v3847_v25, %v3389_v15  ;;  %v1420_v36 = vadd.f32 %v3847_v25, %v3403_v27  ;;  %v3003_v15 = vld [vmem:[%s3283_s24 + $0x3b0] sm:$0xf0]  ;;  %v1425_v62 = vadd.f32 %v3847_v25, %v3428_v47 }
 0x1f9   : > { %v1946_v33 = vpop.f32.mrf.mxu0  ;;  %v3842_v57 = vpop.f32.mrf.mxu3  ;;  %v1945_v52 = vadd.f32 %v1944_v10, %v1812_v58  ;;  %v2705_v18 = vor.u32 %v3003_v15, %v2704_v30  ;;  %v3221_v58 = vld [vmem:[%s3283_s24 + $0x3c0] sm:$0xff] }
 0x1fb   : > { %v2029_v24 = vmax.f32 %v1945_v52, 0.0 }
 0x1fc   : > { %v1680_v60 = vpop.f32.mrf.mxu2 }
 0x1fd   : > { %v1681_v2 = vadd.f32 %v1680_v60, %v1548_v19  ;;  %v817_v19 = vunpack.c.h.b16 %v3221_v58 }
 0x1fe   : > { %v1550_v13 = vpop.f32.mrf.mxu1 }
 0x1ff   : > { %v1814_v1 = vadd.f32 %v3786_v56, %v1681_v2  ;;  %v1551_v51 = vadd.f32 %v1550_v13, %v1418_v4  ;;  %v942_v13 = vpack.c.b16 %v817_v19, %v817_v19  ;;  %v3955_v19 = vld [vmem:[#allocation11_spill] sm:$0xff] }
 0x201   : > { %v1949_v50 = vpop.f32.mrf.mxu0  ;;  %v1947_v41 = vadd.f32 %v1946_v33, %v1814_v1  ;;  %1589 = vmatmul.bf16.gmra.mxu1 %v2681_v42  ;;  %1722 = vmatmul.bf16.gmra.mxu2 %v2685_v16  ;;  %v3851_v9 = vpop.f32.mrf.mxu3 }
 0x203   : > { %v2030_v11 = vmax.f32 %v1947_v41, 0.0 }
 0x204   : > { %2880 = vmatmul.msk.bf16.gmra.mxu0 %vm1262_vm0, %v2693_v14  ;;  %v1683_v5 = vpop.f32.mrf.mxu2  ;;  %v943_v14 = vpack.c.b16 %v818_v53, %v818_v53 }
 0x205   : > { %v3109_v56 = vpack.c.bf16 %v2030_v11, %v2029_v24  ;;  %v1684_v32 = vadd.f32 %v1683_v5, %v1551_v51 }
 0x206   : > { %v1552_v17 = vpop.f32.mrf.mxu1 }
 0x207   : > { %3173 = vst [vmem:[%s3584_s28 + $0x68] sm:$0xff] %v3109_v56   ;;  %v1817_v20 = vadd.f32 %v3800_v40, %v1684_v32  ;;  %v1553_v28 = vadd.f32 %v1552_v17, %v1420_v36  ;;  %v1423_v40 = vadd.f32 %v3847_v25, %v3412_v34  ;;  %v820_v34 = vunpack.c.l.b16 %v352_v37 }
 0x209   : > { %v1951_v43 = vpop.f32.mrf.mxu0  ;;  %v3863_v12 = vpop.f32.mrf.mxu3  ;;  %v1950_v38 = vadd.f32 %v1949_v50, %v1817_v20  ;;  %v945_v1 = vpack.c.b16 %v820_v34, %v820_v34 }
 0x20b   : > { %v2031_v22 = vmax.f32 %v1950_v38, 0.0 }
 0x20c   : > { %v1685_v39 = vpop.f32.mrf.mxu2 }
 0x20d   : > { %v1686_v10 = vadd.f32 %v1685_v39, %v1553_v28 }
 0x20e   : > { %v1555_v7 = vpop.f32.mrf.mxu1 }
 0x20f   : > { %v1819_v27 = vadd.f32 %v3806_v0, %v1686_v10  ;;  %v1556_v49 = vadd.f32 %v1555_v7, %v1423_v40  ;;  %v3953_v10 = vld [vmem:[#allocation7_spill] sm:$0xff]  ;;  %v3954_v40 = vld [vmem:[#allocation9_spill] sm:$0xff] }
 0x211   : > { %v1954_v29 = vpop.f32.mrf.mxu0  ;;  %v1952_v63 = vadd.f32 %v1951_v43, %v1819_v27  ;;  %1594 = vmatmul.bf16.gmra.mxu1 %v2701_v48  ;;  %1727 = vmatmul.bf16.gmra.mxu2 %v2705_v18  ;;  %v3869_v6 = vpop.f32.mrf.mxu3  ;;  %v1433_v48 = vadd.f32 %v3847_v25, %v3953_v10 }
 0x213   : > { %v2032_v33 = vmax.f32 %v1952_v63, 0.0 }
 0x214   : > { %2881 = vmatmul.msk.bf16.gmra.mxu0 %vm1262_vm0, %v2713_v26  ;;  %v1688_v59 = vpop.f32.mrf.mxu2 }
 0x215   : > { %v3114_v35 = vpack.c.bf16 %v2032_v33, %v2031_v22  ;;  %v1689_v0 = vadd.f32 %v1688_v59, %v1556_v49  ;;  %v1435_v22 = vadd.f32 %v3847_v25, %v3954_v40 }
 0x216   : > { %v1557_v31 = vpop.f32.mrf.mxu1 }
 0x217   : > { %3174 = vst [vmem:[%s3584_s28 + $0x70] sm:$0xff] %v3114_v35   ;;  %v1822_v60 = vadd.f32 %v3820_v55, %v1689_v0  ;;  %v1558_v2 = vadd.f32 %v1557_v31, %v1425_v62  ;;  %v1428_v55 = vadd.f32 %v3847_v25, %v3437_v54  ;;  %v1438_v62 = vadd.f32 %v3847_v25, %v3955_v19 }
 0x219   : > { %v1956_v44 = vpop.f32.mrf.mxu0  ;;  %v3878_v50 = vpop.f32.mrf.mxu3  ;;  %v1955_v41 = vadd.f32 %v1954_v29, %v1822_v60 }
 0x21b   : > { %v2033_v61 = vmax.f32 %v1955_v41, 0.0 }
 0x21c   : > { %v1690_v42 = vpop.f32.mrf.mxu2 }
 0x21d   : > { %v1691_v16 = vadd.f32 %v1690_v42, %v1558_v2 }
 0x21e   : > { %v1560_v52 = vpop.f32.mrf.mxu1 }
 0x21f   : > { %v1824_v4 = vadd.f32 %v3826_v8, %v1691_v16  ;;  %v1561_v51 = vadd.f32 %v1560_v52, %v1428_v55  ;;  %v1430_v8 = vadd.f32 %v3847_v25, %v3453_v3  ;;  %v3956_v52 = vld [vmem:[#allocation12_spill] sm:$0xff] }
 0x221   : > { %v1959_v24 = vpop.f32.mrf.mxu0  ;;  %v1957_v47 = vadd.f32 %v1956_v44, %v1824_v4  ;;  %1599 = vmatmul.bf16.gmra.mxu1 %v942_v13  ;;  %1732 = vmatmul.bf16.gmra.mxu2 %v943_v14  ;;  %v1838_v32 = vpop.f32.mrf.mxu3 }
 0x223   : > { %v2034_v11 = vmax.f32 %v1957_v47, 0.0 }
 0x224   : > { %2882 = vmatmul.msk.bf16.gmra.mxu0 %vm1262_vm0, %v945_v1  ;;  %v1693_v5 = vpop.f32.mrf.mxu2  ;;  %v1440_v1 = vadd.f32 %v3847_v25, %v3956_v52 }
 0x225   : > { %v3119_v56 = vpack.c.bf16 %v2034_v11, %v2033_v61  ;;  %v1694_v43 = vadd.f32 %v1693_v5, %v1561_v51  ;;  %v3957_v51 = vld [vmem:[#allocation13_spill] sm:$0xff] }
 0x226   : > { %v1562_v17 = vpop.f32.mrf.mxu1 }
 0x227   : > { %3175 = vst [vmem:[%s3584_s28 + $0x78] sm:$0xff] %v3119_v56   ;;  %v1827_v23 = vadd.f32 %v3842_v57, %v1694_v43  ;;  %v1563_v45 = vadd.f32 %v1562_v17, %v1430_v8  ;;  %v1443_v17 = vadd.f32 %v3847_v25, %v3957_v51 }
 0x229   : > { %v1961_v36 = vpop.f32.mrf.mxu0  ;;  %v1841_v20 = vpop.f32.mrf.mxu3  ;;  %v1960_v28 = vadd.f32 %v1959_v24, %v1827_v23 }
 0x22b   : > { %v2035_v18 = vmax.f32 %v1960_v28, 0.0  ;;  %v3958_v28 = vld [vmem:[#allocation14_spill] sm:$0xff] }
 0x22c   : > { %v1695_v30 = vpop.f32.mrf.mxu2 }
 0x22d   : > { %v1696_v15 = vadd.f32 %v1695_v30, %v1563_v45 }
 0x22e   : > { %v1565_v54 = vpop.f32.mrf.mxu1 }
 0x22f   : > { %v1829_v46 = vadd.f32 %v3851_v9, %v1696_v15  ;;  %v1566_v38 = vadd.f32 %v1565_v54, %v1433_v48 }
 0x231   : > { %v1964_v21 = vpop.f32.mrf.mxu0  ;;  %v1962_v39 = vadd.f32 %v1961_v36, %v1829_v46  ;;  %v1843_v27 = vpop.f32.mrf.mxu3  ;;  %v1445_v46 = vadd.f32 %v3847_v25, %v3958_v28 }
 0x233   : > { %v2036_v7 = vmax.f32 %v1962_v39, 0.0 }
 0x234   : > { %v1698_v26 = vpop.f32.mrf.mxu2 }
 0x235   : > { %v3124_v3 = vpack.c.bf16 %v2036_v7, %v2035_v18  ;;  %v1699_v29 = vadd.f32 %v1698_v26, %v1566_v38 }
 0x236   : > { %v1567_v57 = vpop.f32.mrf.mxu1 }
 0x237   : > { %3176 = vst [vmem:[%s3584_s28 + $0x80] sm:$0xff] %v3124_v3   ;;  %v1832_v9 = vadd.f32 %v3863_v12, %v1699_v29  ;;  %v1568_v33 = vadd.f32 %v1567_v57, %v1435_v22  ;;  %v3959_v57 = vld [vmem:[#allocation15_spill] sm:$0xff] }
 0x238   : > { %v1448_v29 = vadd.f32 %v3847_v25, %v3959_v57 }
 0x239   : > { %v1966_v63 = vpop.f32.mrf.mxu0  ;;  %v1846_v31 = vpop.f32.mrf.mxu3  ;;  %v1965_v0 = vadd.f32 %v1964_v21, %v1832_v9 }
 0x23b   : > { %v2037_v53 = vmax.f32 %v1965_v0, 0.0  ;;  %v3960_v0 = vld [vmem:[#allocation16_spill] sm:$0xff] }
 0x23c   : > { %v1700_v59 = vpop.f32.mrf.mxu2 }
 0x23d   : > { %v1701_v35 = vadd.f32 %v1700_v59, %v1568_v33 }
 0x23e   : > { %v1570_v49 = vpop.f32.mrf.mxu1 }
 0x23f   : > { %v1834_v44 = vadd.f32 %v3869_v6, %v1701_v35  ;;  %v1571_v42 = vadd.f32 %v1570_v49, %v1438_v62 }
 0x241   : > { %v1969_v37 = vpop.f32.mrf.mxu0  ;;  %v1967_v58 = vadd.f32 %v1966_v63, %v1834_v44  ;;  %v1848_v16 = vpop.f32.mrf.mxu3  ;;  %v1450_v44 = vadd.f32 %v3847_v25, %v3960_v0 }
 0x243   : > { %v2038_v34 = vmax.f32 %v1967_v58, 0.0 }
 0x244   : > { %v1703_v60 = vpop.f32.mrf.mxu2 }
 0x245   : > { %v3129_v2 = vpack.c.bf16 %v2038_v34, %v2037_v53  ;;  %v1704_v13 = vadd.f32 %v1703_v60, %v1571_v42 }
 0x246   : > { %v1572_v12 = vpop.f32.mrf.mxu1 }
 0x247   : > { %3177 = vst [vmem:[%s3584_s28 + $0x88] sm:$0xff] %v3129_v2   ;;  %v1837_v6 = vadd.f32 %v3878_v50, %v1704_v13  ;;  %v1573_v41 = vadd.f32 %v1572_v12, %v1440_v1  ;;  %v3961_v12 = vld [vmem:[#allocation2_spill] sm:$0xff] }
 0x248   : > { %v1453_v13 = vadd.f32 %v3847_v25, %v3961_v12 }
 0x249   : > { %v1971_v14 = vpop.f32.mrf.mxu0  ;;  %v1851_v55 = vpop.f32.mrf.mxu3  ;;  %v1970_v61 = vadd.f32 %v1969_v37, %v1837_v6 }
 0x24b   : > { %v2039_v43 = vmax.f32 %v1970_v61, 0.0  ;;  %v3962_v61 = vld [vmem:[#allocation3_spill] sm:$0xff] }
 0x24c   : > { %v1705_v4 = vpop.f32.mrf.mxu2 }
 0x24d   : > { %v1706_v24 = vadd.f32 %v1705_v4, %v1573_v41 }
 0x24e   : > { %v1575_v47 = vpop.f32.mrf.mxu1 }
 0x24f   : > { %v1839_v11 = vadd.f32 %v1838_v32, %v1706_v24  ;;  %v1576_v45 = vadd.f32 %v1575_v47, %v1443_v17 }
 0x251   : > { %v1974_v5 = vpop.f32.mrf.mxu0  ;;  %v1972_v56 = vadd.f32 %v1971_v14, %v1839_v11  ;;  %v1853_v50 = vpop.f32.mrf.mxu3  ;;  %v1455_v11 = vadd.f32 %v3847_v25, %v3962_v61 }
 0x253   : > { %v2040_v36 = vmax.f32 %v1972_v56, 0.0 }
 0x254   : > { %v1708_v8 = vpop.f32.mrf.mxu2 }
 0x255   : > { %v3134_v23 = vpack.c.bf16 %v2040_v36, %v2039_v43  ;;  %v1709_v15 = vadd.f32 %v1708_v8, %v1576_v45 }
 0x256   : > { %v1577_v30 = vpop.f32.mrf.mxu1 }
 0x257   : > { %3178 = vst [vmem:[%s3584_s28 + $0x90] sm:$0xff] %v3134_v23   ;;  %v1842_v21 = vadd.f32 %v1841_v20, %v1709_v15  ;;  %v1578_v32 = vadd.f32 %v1577_v30, %v1445_v46  ;;  %v3963_v30 = vld [vmem:[#allocation4_spill] sm:$0xff] }
 0x258   : > { %v1458_v15 = vadd.f32 %v3847_v25, %v3963_v30 }
 0x259   : > { %v1976_v54 = vpop.f32.mrf.mxu0  ;;  %v1856_v18 = vpop.f32.mrf.mxu3  ;;  %v1975_v7 = vadd.f32 %v1974_v5, %v1842_v21 }
 0x25b   : > { %v2041_v63 = vmax.f32 %v1975_v7, 0.0  ;;  %v3964_v7 = vld [vmem:[#allocation5_spill] sm:$0xff] }
 0x25c   : > { %v1710_v39 = vpop.f32.mrf.mxu2 }
 0x25d   : > { %v1711_v10 = vadd.f32 %v1710_v39, %v1578_v32 }
 0x25e   : > { %v1580_v48 = vpop.f32.mrf.mxu1 }
 0x25f   : > { %v1844_v26 = vadd.f32 %v1843_v27, %v1711_v10  ;;  %v1581_v33 = vadd.f32 %v1580_v48, %v1448_v29 }
 0x261   : > { %v1979_v3 = vpop.f32.mrf.mxu0  ;;  %v1977_v38 = vadd.f32 %v1976_v54, %v1844_v26  ;;  %v1858_v20 = vpop.f32.mrf.mxu3  ;;  %v1460_v26 = vadd.f32 %v3847_v25, %v3964_v7 }
 0x263   : > { %v2042_v40 = vmax.f32 %v1977_v38, 0.0 }
 0x264   : > { %v1713_v22 = vpop.f32.mrf.mxu2 }
 0x265   : > { %v3139_v9 = vpack.c.bf16 %v2042_v40, %v2041_v63  ;;  %v1714_v35 = vadd.f32 %v1713_v22, %v1581_v33  ;;  %v3965_v33 = vld [vmem:[#allocation6_spill] sm:$0xff] }
 0x266   : > { %v1582_v59 = vpop.f32.mrf.mxu1 }
 0x267   : > { %3179 = vst [vmem:[%s3584_s28 + $0x98] sm:$0xff] %v3139_v9   ;;  %v1847_v37 = vadd.f32 %v1846_v31, %v1714_v35  ;;  %v1583_v27 = vadd.f32 %v1582_v59, %v1450_v44  ;;  %v1463_v59 = vadd.f32 %v3847_v25, %v3965_v33 }
 0x269   : > { %v1981_v49 = vpop.f32.mrf.mxu0  ;;  %v1861_v53 = vpop.f32.mrf.mxu3  ;;  %v1980_v34 = vadd.f32 %v1979_v3, %v1847_v37 }
 0x26b   : > { %v2043_v14 = vmax.f32 %v1980_v34, 0.0 }
 0x26c   : > { %v1715_v58 = vpop.f32.mrf.mxu2 }
 0x26d   : > { %v1716_v19 = vadd.f32 %v1715_v58, %v1583_v27 }
 0x26e   : > { %v1585_v62 = vpop.f32.mrf.mxu1 }
 0x26f   : > { %v1849_v60 = vadd.f32 %v1848_v16, %v1716_v19  ;;  %v1586_v41 = vadd.f32 %v1585_v62, %v1453_v13  ;;  %v3966_v19 = vld [vmem:[#allocation8_spill] sm:$0xff] }
 0x270   : > { %v1465_v62 = vadd.f32 %v3847_v25, %v3966_v19 }
 0x271   : > { %v1984_v2 = vpop.f32.mrf.mxu0  ;;  %v1982_v42 = vadd.f32 %v1981_v49, %v1849_v60  ;;  %v1863_v31 = vpop.f32.mrf.mxu3 }
 0x273   : > { %v2044_v52 = vmax.f32 %v1982_v42, 0.0 }
 0x274   : > { %v1718_v1 = vpop.f32.mrf.mxu2 }
 0x275   : > { %v3144_v6 = vpack.c.bf16 %v2044_v52, %v2043_v14  ;;  %v1719_v24 = vadd.f32 %v1718_v1, %v1586_v41  ;;  %v3967_v52 = vld [vmem:[#allocation10_spill] sm:$0xff] }
 0x276   : > { %v1587_v4 = vpop.f32.mrf.mxu1  ;;  %v1468_v1 = vadd.f32 %v3847_v25, %v3967_v52 }
 0x277   : > { %3180 = vst [vmem:[%s3584_s28 + $0xa0] sm:$0xff] %v3144_v6   ;;  %v1852_v5 = vadd.f32 %v1851_v55, %v1719_v24  ;;  %v1588_v16 = vadd.f32 %v1587_v4, %v1455_v11 }
 0x279   : > { %v1986_v47 = vpop.f32.mrf.mxu0  ;;  %v1866_v43 = vpop.f32.mrf.mxu3  ;;  %v1985_v36 = vadd.f32 %v1984_v2, %v1852_v5 }
 0x27b   : > { %v2045_v54 = vmax.f32 %v1985_v36, 0.0 }
 0x27c   : > { %v1720_v56 = vpop.f32.mrf.mxu2 }
 0x27d   : > { %v1721_v51 = vadd.f32 %v1720_v56, %v1588_v16 }
 0x27e   : > { %v1590_v17 = vpop.f32.mrf.mxu1 }
 0x27f   : > { %v1854_v8 = vadd.f32 %v1853_v50, %v1721_v51  ;;  %v1591_v32 = vadd.f32 %v1590_v17, %v1458_v15 }
 0x281   : > { %v1989_v23 = vpop.f32.mrf.mxu0  ;;  %v1987_v45 = vadd.f32 %v1986_v47, %v1854_v8  ;;  %v1868_v55 = vpop.f32.mrf.mxu3 }
 0x283   : > { %v2046_v28 = vmax.f32 %v1987_v45, 0.0 }
 0x284   : > { %v1723_v46 = vpop.f32.mrf.mxu2 }
 0x285   : > { %v3149_v21 = vpack.c.bf16 %v2046_v28, %v2045_v54  ;;  %v1724_v10 = vadd.f32 %v1723_v46, %v1591_v32 }
 0x286   : > { %v1592_v39 = vpop.f32.mrf.mxu1 }
 0x287   : > { %3181 = vst [vmem:[%s3584_s28 + $0xa8] sm:$0xff] %v3149_v21   ;;  %v1857_v3 = vadd.f32 %v1856_v18, %v1724_v10  ;;  %v1593_v50 = vadd.f32 %v1592_v39, %v1460_v26 }
 0x289   : > { %v1991_v48 = vpop.f32.mrf.mxu0  ;;  %v1990_v63 = vadd.f32 %v1989_v23, %v1857_v3 }
 0x28b   : > { %v2047_v35 = vmax.f32 %v1990_v63, 0.0 }
 0x28c   : > { %v1725_v38 = vpop.f32.mrf.mxu2 }
 0x28d   : > { %v1726_v57 = vadd.f32 %v1725_v38, %v1593_v50 }
 0x28e   : > { %v1595_v29 = vpop.f32.mrf.mxu1 }
 0x28f   : > { %v1859_v40 = vadd.f32 %v1858_v20, %v1726_v57  ;;  %v1596_v37 = vadd.f32 %v1595_v29, %v1463_v59 }
 0x291   : > { %v1994_v22 = vpop.f32.mrf.mxu0  ;;  %v1992_v9 = vadd.f32 %v1991_v48, %v1859_v40 }
 0x293   : > { %v2048_v49 = vmax.f32 %v1992_v9, 0.0 }
 0x294   : > { %v1728_v0 = vpop.f32.mrf.mxu2 }
 0x295   : > { %v3154_v44 = vpack.c.bf16 %v2048_v49, %v2047_v35  ;;  %v1729_v18 = vadd.f32 %v1728_v0, %v1596_v37 }
 0x296   : > { %v1597_v27 = vpop.f32.mrf.mxu1 }
 0x297   : > { %3182 = vst [vmem:[%s3584_s28 + $0xb0] sm:$0xff] %v3154_v44   ;;  %v1862_v34 = vadd.f32 %v1861_v53, %v1729_v18  ;;  %v1598_v60 = vadd.f32 %v1597_v27, %v1465_v62 }
 0x299   : > { %v1996_v58 = vpop.f32.mrf.mxu0  ;;  %v1995_v12 = vadd.f32 %v1994_v22, %v1862_v34 }
 0x29b   : > { %v2049_v41 = vmax.f32 %v1995_v12, 0.0 }
 0x29c   : > { %v1730_v20 = vpop.f32.mrf.mxu2 }
 0x29d   : > { %v1731_v2 = vadd.f32 %v1730_v20, %v1598_v60 }
 0x29e   : > { %v1600_v42 = vpop.f32.mrf.mxu1 }
 0x29f   : > { %v1864_v13 = vadd.f32 %v1863_v31, %v1731_v2  ;;  %v1601_v24 = vadd.f32 %v1600_v42, %v1468_v1 }
 0x2a1   : > { %v1999_v14 = vpop.f32.mrf.mxu0  ;;  %v1997_v6 = vadd.f32 %v1996_v58, %v1864_v13 }
 0x2a3   : > { %v2050_v4 = vmax.f32 %v1997_v6, 0.0 }
 0x2a4   : > { %v1733_v47 = vpop.f32.mrf.mxu2 }
 0x2a5   : > { %v3159_v61 = vpack.c.bf16 %v2050_v4, %v2049_v41  ;;  %v1734_v11 = vadd.f32 %v1733_v47, %v1601_v24 }
 0x2a6   : > { %v1602_v53 = vpop.f32.mrf.mxu1 }
 0x2a7   : > { %3183 = vst [vmem:[%s3584_s28 + $0xb8] sm:$0xff] %v3159_v61   ;;  %v1867_v5 = vadd.f32 %v1866_v43, %v1734_v11 }
 0x2a9   : > { %v2001_v16 = vpop.f32.mrf.mxu0  ;;  %v2000_v56 = vadd.f32 %v1999_v14, %v1867_v5 }
 0x2ab   : > { %v2051_v51 = vmax.f32 %v2000_v56, 0.0 }
 0x2ac   : > { %v1735_v17 = vpop.f32.mrf.mxu2 }
 0x2ad   : > { %v2100_v31 = vpack.c.bf16 %v2051_v51, %v2051_v51 }
 0x2af   : > { %2149 = vst [vmem:[%s3584_s28 + $0xc0] sm:$0xf] %v2100_v31 }
 0x2b0 PF: > { %s13_s12 = sadd.s32 1, %s3228_s12  }
 0x2b1   : > { %p10_p4 = scmp.ge.s32.totalorder %s13_s12, 4  }
 0x2b3   :  { %12 = sbr.rel (!%p10_p4) target bundleno = 1 (0x1), region = 68 }

// kernel: squeeze.4
= control target key start
LH: loop header
LB: loop body
LE: loop exit
PB: predicated region body
PF: predicated region fallthrough
CT: control target
= control target key end

     0   :  { %s389_s0 = inlined_call_operand.vmem [shape: bf16[1,72,128], index: 0, kind: input, shape index: {}]   ;;  %s390_s1 = inlined_call_operand.vmem [shape: bf16[2,6,6,128], index: 1, kind: output, shape index: {}]  }
   0x1   :  { %v339_v0 = vld [vmem:[%s389_s0 + $0x10] sm:$0xff]   ;;  %v340_v2 = vld [vmem:[%s389_s0 + $0x8] sm:$0xff]   ;;  %v305_v3 = vld [vmem:[%s389_s0] sm:$0xff]  }
   0x2   :  { %v298_v1 = vunpack.c.l.bf16 %v339_v0  ;;  %v306_v4 = vunpack.c.l.bf16 %v305_v3  ;;  %v307_v5 = vunpack.c.h.bf16 %v305_v3  ;;  %v302_v6 = vunpack.c.l.bf16 %v340_v2  ;;  %v338_v8 = vld [vmem:[%s389_s0 + $0x18] sm:$0xff]   ;;  %v273_v11 = vld [vmem:[%s389_s0 + $0x20] sm:$0xf] }
   0x3   :  { %v303_v7 = vunpack.c.h.bf16 %v340_v2  ;;  %v299_v9 = vunpack.c.h.bf16 %v339_v0  ;;  %v294_v10 = vunpack.c.l.bf16 %v338_v8  ;;  %v295_v12 = vunpack.c.h.bf16 %v338_v8 }
   0x4   :  { %162 = vst [vmem:[#allocation0 + $0x2a] sm:$0xf] %v298_v1   ;;  %v15_v15 = vunpack.c.l.bf16 %v273_v11 }
   0x5   :  { %138 = vst [vmem:[#allocation0] sm:$0x3f] %v306_v4  }
   0x6   :  { %140 = vst [vmem:[#allocation0 + $0x2] sm:$0xc0] %v306_v4  }
   0x7   :  { %144 = vst [vmem:[#allocation0 + $0xa] sm:$0xf] %v307_v5  }
   0x8   :  { %146 = vst [vmem:[#allocation0 + $0xc] sm:$0xf0] %v307_v5  }
   0x9   :  { %150 = vst [vmem:[#allocation0 + $0x14] sm:$0x3] %v302_v6  }
   0xa   :  { %152 = vst [vmem:[#allocation0 + $0x16] sm:$0xfc] %v302_v6  }
   0xb   :  { %156 = vst [vmem:[#allocation0 + $0x20] sm:$0x3f] %v303_v7  }
   0xc   :  { %158 = vst [vmem:[#allocation0 + $0x22] sm:$0xc0] %v303_v7   ;;  %v191_v13 = vld [vmem:[#allocation0] sm:$0xff] }
   0xd   :  { %164 = vst [vmem:[#allocation0 + $0x2c] sm:$0xf0] %v298_v1  }
   0xe   :  { %168 = vst [vmem:[#allocation0 + $0x34] sm:$0x3] %v299_v9   ;;  %v197_v14 = vld [vmem:[#allocation0 + $0x8] sm:$0xff] }
   0xf   :  { %170 = vst [vmem:[#allocation0 + $0x36] sm:$0xfc] %v299_v9   ;;  %v311_v18 = vpack.c.bf16 %v197_v14, %v191_v13 }
  0x10   :  { %174 = vst [vmem:[#allocation0 + $0x40] sm:$0x3f] %v294_v10   ;;  %v204_v16 = vld [vmem:[#allocation0 + $0x10] sm:$0xff] }
  0x11   :  { %176 = vst [vmem:[#allocation0 + $0x42] sm:$0xc0] %v294_v10   ;;  %v211_v17 = vld [vmem:[#allocation0 + $0x18] sm:$0xff] }
  0x12   :  { %180 = vst [vmem:[#allocation0 + $0x4a] sm:$0xf] %v295_v12   ;;  %v218_v19 = vld [vmem:[#allocation0 + $0x20] sm:$0xff]  ;;  %v316_v20 = vpack.c.bf16 %v211_v17, %v204_v16 }
  0x13   :  { %182 = vst [vmem:[#allocation0 + $0x4c] sm:$0xf0] %v295_v12   ;;  %v225_v21 = vld [vmem:[#allocation0 + $0x28] sm:$0xff] }
  0x14   :  { %186 = vst [vmem:[#allocation0 + $0x54] sm:$0x3] %v15_v15   ;;  %v321_v22 = vpack.c.bf16 %v225_v21, %v218_v19 }
  0x15   :  { %188 = vst [vmem:[#allocation0 + $0x56] sm:$0xfc] %v15_v15   ;;  %v232_v23 = vld [vmem:[#allocation0 + $0x30] sm:$0xff] }
  0x16   :  { %312 = vst [vmem:[%s390_s1] sm:$0xff] %v311_v18   ;;  %v239_v24 = vld [vmem:[#allocation0 + $0x38] sm:$0xff] }
  0x17   :  { %341 = vst [vmem:[%s390_s1 + $0x8] sm:$0xff] %v316_v20   ;;  %v326_v25 = vpack.c.bf16 %v239_v24, %v232_v23  ;;  %v246_v26 = vld [vmem:[#allocation0 + $0x40] sm:$0xff] }
  0x18   :  { %342 = vst [vmem:[%s390_s1 + $0x10] sm:$0xff] %v321_v22  }
  0x19   :  { %343 = vst [vmem:[%s390_s1 + $0x18] sm:$0xff] %v326_v25   ;;  %v253_v27 = vld [vmem:[#allocation0 + $0x48] sm:$0xff] }
  0x1a   :  { %v331_v28 = vpack.c.bf16 %v253_v27, %v246_v26 }
  0x1b   :  { %v260_v29 = vld [vmem:[#allocation0 + $0x50] sm:$0xff] }
  0x1c   :  { %344 = vst [vmem:[%s390_s1 + $0x20] sm:$0xff] %v331_v28   ;;  %v267_v30 = vld [vmem:[#allocation0 + $0x58] sm:$0xff] }
  0x1d   :  { %v336_v31 = vpack.c.bf16 %v267_v30, %v260_v29 }
  0x1f   :  { %345 = vst [vmem:[%s390_s1 + $0x28] sm:$0xff] %v336_v31  }

// kernel: depthwise_ban_forward.6
= control target key start
LH: loop header
LB: loop body
LE: loop exit
PB: predicated region body
PF: predicated region fallthrough
CT: control target
= control target key end

     0   :  { %s6763_s9 = smov 0   ;;  %s6765_s10 = smov 0   ;;  %s7682_s0 = inlined_call_operand.vmem [shape: bf16[36,4,81,64], index: 0, kind: input, shape index: {}]   ;;  %s7683_s1 = inlined_call_operand.vmem [shape: bf16[36,4,1,64], index: 1, kind: input, shape index: {}]   ;;  %s7684_s2 = inlined_call_operand.vmem [shape: bf16[4,81,64], index: 2, kind: output, shape index: {}]  }
   0x1   :  { %s6767_s11 = smov 0  }
   0x2 LB: > { %s5456_s12 = sadd.s32 4294967295, %s6746_s11   ;;  %s6780_s13 = sadd.s32 1, %s6746_s11   ;;  %s6746_s11 = sphi %s6767_s11, %s7689_s11   ;;  %s6742_s10 = sphi %s6765_s10, %s7688_s10   ;;  %s6738_s9 = sphi %s6763_s9, %s7687_s9  }
   0x3   : > { %s16_s14 = ssub.s32 %s6746_s11, %s6780_s13  ;;  %s19_s15 = sadd.s32 1, %s6742_s10 }
   0x4   : > { %p17_p0 = scmp.eq.s32.totalorder %s16_s14, 0  ;;  %p26_p1 = scmp.ne.s32.totalorder %s6742_s10, %s6738_s9 }
   0x5   : > { %p27_p2 = scmp.eq.s32.totalorder %s6746_s11, 0  ;;  %p5459_p4 = scmp.ge.s32.totalorder %s6746_s11, 4 }
   0x6   : > { %s6789_s16 = scalar_select %p17_p0, %s6742_s10, %s19_s15  }
   0x7   : > { %p6791_p3 = por %p27_p2, %p26_p1  ;;  %104 = sbr.rel (%p5459_p4) target bundleno = 273 (0x111), region = 16 }
   0xc   : > { %107 = sbr.rel (!%p6791_p3) target bundleno = 233 (0xe9), region = 20  ;;  %s109_s18 = sand.u32 (%p6791_p3), 1, %s6742_s10  }
   0xd   : > { %s6695_s19 = smul.u32 (%p6791_p3), 44, %s6746_s11 }
   0xe   : > { %s6694_s20 = smul.u32 (%p6791_p3), 1584, %s109_s18 }
   0xf   : > { %s6803_s23 = scalar_lea.vmem (%p6791_p3), %s7682_s0, %s6695_s19 }
  0x10   : > { %v131_v0 = vld [vmem:[%s6803_s23] sm:$0xff] (%p6791_p3)   ;;  %v135_v1 = vld [vmem:[%s6803_s23 + $0x8] sm:$0xff] (%p6791_p3)   ;;  %v139_v2 = vld [vmem:[%s6803_s23 + $0x10] sm:$0xff] (%p6791_p3)   ;;  %s6808_s24 = scalar_lea.vmem (%p6791_p3), [#allocation2], %s6694_s20 }
  0x11   : > { %132 = vst [vmem:[%s6808_s24] sm:$0xff] %v131_v0   ;;  %v143_v3 = vld [vmem:[%s6803_s23 + $0x18] sm:$0xff]   ;;  %v147_v4 = vld [vmem:[%s6803_s23 + $0x20] sm:$0xff]   ;;  %v151_v5 = vld [vmem:[%s6803_s23 + $0x28] sm:$0xf] }
  0x12   : > { %136 = vst [vmem:[%s6808_s24 + $0x8] sm:$0xff] %v135_v1   ;;  %v153_v6 = vld [vmem:[%s6803_s23 + $0xb0] sm:$0xff]   ;;  %v157_v7 = vld [vmem:[%s6803_s23 + $0xb8] sm:$0xff]   ;;  %v161_v8 = vld [vmem:[%s6803_s23 + $0xc0] sm:$0xff]  }
  0x13   : > { %140 = vst [vmem:[%s6808_s24 + $0x10] sm:$0xff] %v139_v2   ;;  %v165_v9 = vld [vmem:[%s6803_s23 + $0xc8] sm:$0xff]   ;;  %v169_v10 = vld [vmem:[%s6803_s23 + $0xd0] sm:$0xff]   ;;  %v173_v11 = vld [vmem:[%s6803_s23 + $0xd8] sm:$0xf] }
  0x14   : > { %144 = vst [vmem:[%s6808_s24 + $0x18] sm:$0xff] %v143_v3   ;;  %v175_v12 = vld [vmem:[%s6803_s23 + $0x160] sm:$0xff]   ;;  %v179_v13 = vld [vmem:[%s6803_s23 + $0x168] sm:$0xff]   ;;  %v183_v14 = vld [vmem:[%s6803_s23 + $0x170] sm:$0xff]  }
  0x15   : > { %148 = vst [vmem:[%s6808_s24 + $0x20] sm:$0xff] %v147_v4   ;;  %v187_v15 = vld [vmem:[%s6803_s23 + $0x178] sm:$0xff]   ;;  %v191_v16 = vld [vmem:[%s6803_s23 + $0x180] sm:$0xff]   ;;  %v195_v17 = vld [vmem:[%s6803_s23 + $0x188] sm:$0xf] }
  0x16   : > { %152 = vst [vmem:[%s6808_s24 + $0x28] sm:$0xf] %v151_v5  ;;  %v197_v18 = vld [vmem:[%s6803_s23 + $0x210] sm:$0xff]   ;;  %v201_v19 = vld [vmem:[%s6803_s23 + $0x218] sm:$0xff]   ;;  %v205_v20 = vld [vmem:[%s6803_s23 + $0x220] sm:$0xff]  }
  0x17   : > { %154 = vst [vmem:[%s6808_s24 + $0x2c] sm:$0xff] %v153_v6   ;;  %v209_v21 = vld [vmem:[%s6803_s23 + $0x228] sm:$0xff]   ;;  %v213_v22 = vld [vmem:[%s6803_s23 + $0x230] sm:$0xff]   ;;  %v217_v23 = vld [vmem:[%s6803_s23 + $0x238] sm:$0xf] }
  0x18   : > { %158 = vst [vmem:[%s6808_s24 + $0x34] sm:$0xff] %v157_v7   ;;  %v219_v24 = vld [vmem:[%s6803_s23 + $0x2c0] sm:$0xff]   ;;  %v223_v25 = vld [vmem:[%s6803_s23 + $0x2c8] sm:$0xff]   ;;  %v227_v26 = vld [vmem:[%s6803_s23 + $0x2d0] sm:$0xff]  }
  0x19   : > { %162 = vst [vmem:[%s6808_s24 + $0x3c] sm:$0xff] %v161_v8   ;;  %v231_v27 = vld [vmem:[%s6803_s23 + $0x2d8] sm:$0xff]   ;;  %v235_v28 = vld [vmem:[%s6803_s23 + $0x2e0] sm:$0xff]   ;;  %v239_v29 = vld [vmem:[%s6803_s23 + $0x2e8] sm:$0xf] }
  0x1a   : > { %166 = vst [vmem:[%s6808_s24 + $0x44] sm:$0xff] %v165_v9   ;;  %v241_v30 = vld [vmem:[%s6803_s23 + $0x370] sm:$0xff]   ;;  %v245_v31 = vld [vmem:[%s6803_s23 + $0x378] sm:$0xff]   ;;  %v249_v32 = vld [vmem:[%s6803_s23 + $0x380] sm:$0xff]  }
  0x1b   : > { %170 = vst [vmem:[%s6808_s24 + $0x4c] sm:$0xff] %v169_v10   ;;  %v253_v33 = vld [vmem:[%s6803_s23 + $0x388] sm:$0xff]   ;;  %v257_v34 = vld [vmem:[%s6803_s23 + $0x390] sm:$0xff]   ;;  %v261_v35 = vld [vmem:[%s6803_s23 + $0x398] sm:$0xf] }
  0x1c   : > { %174 = vst [vmem:[%s6808_s24 + $0x54] sm:$0xf] %v173_v11  ;;  %v263_v36 = vld [vmem:[%s6803_s23 + $0x420] sm:$0xff]   ;;  %v267_v37 = vld [vmem:[%s6803_s23 + $0x428] sm:$0xff]   ;;  %v271_v38 = vld [vmem:[%s6803_s23 + $0x430] sm:$0xff]  }
  0x1d   : > { %176 = vst [vmem:[%s6808_s24 + $0x58] sm:$0xff] %v175_v12   ;;  %v275_v39 = vld [vmem:[%s6803_s23 + $0x438] sm:$0xff]   ;;  %v279_v40 = vld [vmem:[%s6803_s23 + $0x440] sm:$0xff]   ;;  %v283_v41 = vld [vmem:[%s6803_s23 + $0x448] sm:$0xf] }
  0x1e   : > { %180 = vst [vmem:[%s6808_s24 + $0x60] sm:$0xff] %v179_v13   ;;  %v285_v42 = vld [vmem:[%s6803_s23 + $0x4d0] sm:$0xff]   ;;  %v289_v43 = vld [vmem:[%s6803_s23 + $0x4d8] sm:$0xff]   ;;  %v293_v44 = vld [vmem:[%s6803_s23 + $0x4e0] sm:$0xff]  }
  0x1f   : > { %184 = vst [vmem:[%s6808_s24 + $0x68] sm:$0xff] %v183_v14   ;;  %v297_v45 = vld [vmem:[%s6803_s23 + $0x4e8] sm:$0xff]   ;;  %v301_v46 = vld [vmem:[%s6803_s23 + $0x4f0] sm:$0xff]   ;;  %v305_v47 = vld [vmem:[%s6803_s23 + $0x4f8] sm:$0xf] }
  0x20   : > { %188 = vst [vmem:[%s6808_s24 + $0x70] sm:$0xff] %v187_v15   ;;  %v307_v48 = vld [vmem:[%s6803_s23 + $0x580] sm:$0xff]   ;;  %v311_v49 = vld [vmem:[%s6803_s23 + $0x588] sm:$0xff]   ;;  %v315_v50 = vld [vmem:[%s6803_s23 + $0x590] sm:$0xff]  }
  0x21   : > { %192 = vst [vmem:[%s6808_s24 + $0x78] sm:$0xff] %v191_v16   ;;  %v319_v51 = vld [vmem:[%s6803_s23 + $0x598] sm:$0xff]   ;;  %v323_v52 = vld [vmem:[%s6803_s23 + $0x5a0] sm:$0xff]   ;;  %v327_v53 = vld [vmem:[%s6803_s23 + $0x5a8] sm:$0xf] }
  0x22   : > { %196 = vst [vmem:[%s6808_s24 + $0x80] sm:$0xf] %v195_v17  ;;  %v329_v54 = vld [vmem:[%s6803_s23 + $0x630] sm:$0xff]   ;;  %v333_v55 = vld [vmem:[%s6803_s23 + $0x638] sm:$0xff]   ;;  %v337_v56 = vld [vmem:[%s6803_s23 + $0x640] sm:$0xff]  }
  0x23   : > { %198 = vst [vmem:[%s6808_s24 + $0x84] sm:$0xff] %v197_v18   ;;  %v341_v57 = vld [vmem:[%s6803_s23 + $0x648] sm:$0xff]   ;;  %v345_v58 = vld [vmem:[%s6803_s23 + $0x650] sm:$0xff]   ;;  %v349_v59 = vld [vmem:[%s6803_s23 + $0x658] sm:$0xf] }
  0x24   : > { %202 = vst [vmem:[%s6808_s24 + $0x8c] sm:$0xff] %v201_v19   ;;  %v351_v60 = vld [vmem:[%s6803_s23 + $0x6e0] sm:$0xff]   ;;  %v355_v61 = vld [vmem:[%s6803_s23 + $0x6e8] sm:$0xff]   ;;  %v359_v62 = vld [vmem:[%s6803_s23 + $0x6f0] sm:$0xff]  }
  0x25   : > { %206 = vst [vmem:[%s6808_s24 + $0x94] sm:$0xff] %v205_v20   ;;  %v363_v63 = vld [vmem:[%s6803_s23 + $0x6f8] sm:$0xff]   ;;  %v367_v0 = vld [vmem:[%s6803_s23 + $0x700] sm:$0xff]   ;;  %v371_v1 = vld [vmem:[%s6803_s23 + $0x708] sm:$0xf] }
  0x26   : > { %210 = vst [vmem:[%s6808_s24 + $0x9c] sm:$0xff] %v209_v21   ;;  %v373_v2 = vld [vmem:[%s6803_s23 + $0x790] sm:$0xff]   ;;  %v377_v3 = vld [vmem:[%s6803_s23 + $0x798] sm:$0xff]   ;;  %v381_v4 = vld [vmem:[%s6803_s23 + $0x7a0] sm:$0xff]  }
  0x27   : > { %214 = vst [vmem:[%s6808_s24 + $0xa4] sm:$0xff] %v213_v22   ;;  %v385_v5 = vld [vmem:[%s6803_s23 + $0x7a8] sm:$0xff]   ;;  %v389_v6 = vld [vmem:[%s6803_s23 + $0x7b0] sm:$0xff]   ;;  %v393_v7 = vld [vmem:[%s6803_s23 + $0x7b8] sm:$0xf] }
  0x28   : > { %218 = vst [vmem:[%s6808_s24 + $0xac] sm:$0xf] %v217_v23  ;;  %v395_v8 = vld [vmem:[%s6803_s23 + $0x840] sm:$0xff]   ;;  %v399_v9 = vld [vmem:[%s6803_s23 + $0x848] sm:$0xff]   ;;  %v403_v10 = vld [vmem:[%s6803_s23 + $0x850] sm:$0xff]  }
  0x29   : > { %220 = vst [vmem:[%s6808_s24 + $0xb0] sm:$0xff] %v219_v24   ;;  %v407_v11 = vld [vmem:[%s6803_s23 + $0x858] sm:$0xff]   ;;  %v411_v12 = vld [vmem:[%s6803_s23 + $0x860] sm:$0xff]   ;;  %v415_v13 = vld [vmem:[%s6803_s23 + $0x868] sm:$0xf] }
  0x2a   : > { %224 = vst [vmem:[%s6808_s24 + $0xb8] sm:$0xff] %v223_v25   ;;  %v417_v14 = vld [vmem:[%s6803_s23 + $0x8f0] sm:$0xff]   ;;  %v421_v15 = vld [vmem:[%s6803_s23 + $0x8f8] sm:$0xff]   ;;  %v425_v16 = vld [vmem:[%s6803_s23 + $0x900] sm:$0xff]  }
  0x2b   : > { %228 = vst [vmem:[%s6808_s24 + $0xc0] sm:$0xff] %v227_v26   ;;  %v429_v17 = vld [vmem:[%s6803_s23 + $0x908] sm:$0xff]   ;;  %v433_v18 = vld [vmem:[%s6803_s23 + $0x910] sm:$0xff]   ;;  %v437_v19 = vld [vmem:[%s6803_s23 + $0x918] sm:$0xf] }
  0x2c   : > { %232 = vst [vmem:[%s6808_s24 + $0xc8] sm:$0xff] %v231_v27   ;;  %v439_v20 = vld [vmem:[%s6803_s23 + $0x9a0] sm:$0xff]   ;;  %v443_v21 = vld [vmem:[%s6803_s23 + $0x9a8] sm:$0xff]   ;;  %v447_v22 = vld [vmem:[%s6803_s23 + $0x9b0] sm:$0xff]  }
  0x2d   : > { %236 = vst [vmem:[%s6808_s24 + $0xd0] sm:$0xff] %v235_v28   ;;  %v451_v23 = vld [vmem:[%s6803_s23 + $0x9b8] sm:$0xff]   ;;  %v455_v24 = vld [vmem:[%s6803_s23 + $0x9c0] sm:$0xff]   ;;  %v459_v25 = vld [vmem:[%s6803_s23 + $0x9c8] sm:$0xf] }
  0x2e   : > { %240 = vst [vmem:[%s6808_s24 + $0xd8] sm:$0xf] %v239_v29  ;;  %v461_v26 = vld [vmem:[%s6803_s23 + $0xa50] sm:$0xff]   ;;  %v465_v27 = vld [vmem:[%s6803_s23 + $0xa58] sm:$0xff]   ;;  %v469_v28 = vld [vmem:[%s6803_s23 + $0xa60] sm:$0xff]  }
  0x2f   : > { %242 = vst [vmem:[%s6808_s24 + $0xdc] sm:$0xff] %v241_v30   ;;  %v473_v29 = vld [vmem:[%s6803_s23 + $0xa68] sm:$0xff]   ;;  %v477_v30 = vld [vmem:[%s6803_s23 + $0xa70] sm:$0xff]  }
  0x30   : > { %246 = vst [vmem:[%s6808_s24 + $0xe4] sm:$0xff] %v245_v31   ;;  %v481_v31 = vld [vmem:[%s6803_s23 + $0xa78] sm:$0xf] }
  0x31   : > { %250 = vst [vmem:[%s6808_s24 + $0xec] sm:$0xff] %v249_v32   ;;  %v483_v32 = vld [vmem:[%s6803_s23 + $0xb00] sm:$0xff]  }
  0x32   : > { %254 = vst [vmem:[%s6808_s24 + $0xf4] sm:$0xff] %v253_v33   ;;  %v487_v33 = vld [vmem:[%s6803_s23 + $0xb08] sm:$0xff]  }
  0x33   : > { %258 = vst [vmem:[%s6808_s24 + $0xfc] sm:$0xff] %v257_v34   ;;  %v491_v34 = vld [vmem:[%s6803_s23 + $0xb10] sm:$0xff]  }
  0x34   : > { %262 = vst [vmem:[%s6808_s24 + $0x104] sm:$0xf] %v261_v35  ;;  %v495_v35 = vld [vmem:[%s6803_s23 + $0xb18] sm:$0xff]  }
  0x35   : > { %264 = vst [vmem:[%s6808_s24 + $0x108] sm:$0xff] %v263_v36   ;;  %v499_v36 = vld [vmem:[%s6803_s23 + $0xb20] sm:$0xff]  }
  0x36   : > { %268 = vst [vmem:[%s6808_s24 + $0x110] sm:$0xff] %v267_v37   ;;  %v503_v37 = vld [vmem:[%s6803_s23 + $0xb28] sm:$0xf] }
  0x37   : > { %272 = vst [vmem:[%s6808_s24 + $0x118] sm:$0xff] %v271_v38   ;;  %v505_v38 = vld [vmem:[%s6803_s23 + $0xbb0] sm:$0xff]  }
  0x38   : > { %276 = vst [vmem:[%s6808_s24 + $0x120] sm:$0xff] %v275_v39   ;;  %v509_v39 = vld [vmem:[%s6803_s23 + $0xbb8] sm:$0xff]  }
  0x39   : > { %280 = vst [vmem:[%s6808_s24 + $0x128] sm:$0xff] %v279_v40   ;;  %v513_v40 = vld [vmem:[%s6803_s23 + $0xbc0] sm:$0xff]  }
  0x3a   : > { %284 = vst [vmem:[%s6808_s24 + $0x130] sm:$0xf] %v283_v41  ;;  %v517_v41 = vld [vmem:[%s6803_s23 + $0xbc8] sm:$0xff]  }
  0x3b   : > { %286 = vst [vmem:[%s6808_s24 + $0x134] sm:$0xff] %v285_v42   ;;  %v521_v42 = vld [vmem:[%s6803_s23 + $0xbd0] sm:$0xff]  }
  0x3c   : > { %290 = vst [vmem:[%s6808_s24 + $0x13c] sm:$0xff] %v289_v43   ;;  %v525_v43 = vld [vmem:[%s6803_s23 + $0xbd8] sm:$0xf] }
  0x3d   : > { %294 = vst [vmem:[%s6808_s24 + $0x144] sm:$0xff] %v293_v44   ;;  %v527_v44 = vld [vmem:[%s6803_s23 + $0xc60] sm:$0xff]  }
  0x3e   : > { %298 = vst [vmem:[%s6808_s24 + $0x14c] sm:$0xff] %v297_v45   ;;  %v531_v45 = vld [vmem:[%s6803_s23 + $0xc68] sm:$0xff]  }
  0x3f   : > { %302 = vst [vmem:[%s6808_s24 + $0x154] sm:$0xff] %v301_v46   ;;  %v535_v46 = vld [vmem:[%s6803_s23 + $0xc70] sm:$0xff]  }
  0x40   : > { %306 = vst [vmem:[%s6808_s24 + $0x15c] sm:$0xf] %v305_v47  ;;  %v539_v47 = vld [vmem:[%s6803_s23 + $0xc78] sm:$0xff]  }
  0x41   : > { %308 = vst [vmem:[%s6808_s24 + $0x160] sm:$0xff] %v307_v48   ;;  %v543_v48 = vld [vmem:[%s6803_s23 + $0xc80] sm:$0xff]  }
  0x42   : > { %312 = vst [vmem:[%s6808_s24 + $0x168] sm:$0xff] %v311_v49   ;;  %v547_v49 = vld [vmem:[%s6803_s23 + $0xc88] sm:$0xf] }
  0x43   : > { %316 = vst [vmem:[%s6808_s24 + $0x170] sm:$0xff] %v315_v50   ;;  %v549_v50 = vld [vmem:[%s6803_s23 + $0xd10] sm:$0xff]  }
  0x44   : > { %320 = vst [vmem:[%s6808_s24 + $0x178] sm:$0xff] %v319_v51   ;;  %v553_v51 = vld [vmem:[%s6803_s23 + $0xd18] sm:$0xff]  }
  0x45   : > { %324 = vst [vmem:[%s6808_s24 + $0x180] sm:$0xff] %v323_v52   ;;  %v557_v52 = vld [vmem:[%s6803_s23 + $0xd20] sm:$0xff]  }
  0x46   : > { %328 = vst [vmem:[%s6808_s24 + $0x188] sm:$0xf] %v327_v53  ;;  %v561_v53 = vld [vmem:[%s6803_s23 + $0xd28] sm:$0xff]  }
  0x47   : > { %330 = vst [vmem:[%s6808_s24 + $0x18c] sm:$0xff] %v329_v54   ;;  %v565_v54 = vld [vmem:[%s6803_s23 + $0xd30] sm:$0xff]  }
  0x48   : > { %334 = vst [vmem:[%s6808_s24 + $0x194] sm:$0xff] %v333_v55   ;;  %v569_v55 = vld [vmem:[%s6803_s23 + $0xd38] sm:$0xf] }
  0x49   : > { %338 = vst [vmem:[%s6808_s24 + $0x19c] sm:$0xff] %v337_v56   ;;  %v571_v56 = vld [vmem:[%s6803_s23 + $0xdc0] sm:$0xff]  }
  0x4a   : > { %342 = vst [vmem:[%s6808_s24 + $0x1a4] sm:$0xff] %v341_v57   ;;  %v575_v57 = vld [vmem:[%s6803_s23 + $0xdc8] sm:$0xff]  }
  0x4b   : > { %346 = vst [vmem:[%s6808_s24 + $0x1ac] sm:$0xff] %v345_v58   ;;  %v579_v58 = vld [vmem:[%s6803_s23 + $0xdd0] sm:$0xff]  }
  0x4c   : > { %350 = vst [vmem:[%s6808_s24 + $0x1b4] sm:$0xf] %v349_v59  ;;  %v583_v59 = vld [vmem:[%s6803_s23 + $0xdd8] sm:$0xff]  }
  0x4d   : > { %352 = vst [vmem:[%s6808_s24 + $0x1b8] sm:$0xff] %v351_v60   ;;  %v587_v60 = vld [vmem:[%s6803_s23 + $0xde0] sm:$0xff]  }
  0x4e   : > { %356 = vst [vmem:[%s6808_s24 + $0x1c0] sm:$0xff] %v355_v61   ;;  %v591_v61 = vld [vmem:[%s6803_s23 + $0xde8] sm:$0xf] }
  0x4f   : > { %360 = vst [vmem:[%s6808_s24 + $0x1c8] sm:$0xff] %v359_v62   ;;  %v593_v62 = vld [vmem:[%s6803_s23 + $0xe70] sm:$0xff]  }
  0x50   : > { %364 = vst [vmem:[%s6808_s24 + $0x1d0] sm:$0xff] %v363_v63   ;;  %v597_v63 = vld [vmem:[%s6803_s23 + $0xe78] sm:$0xff]  }
  0x51   : > { %368 = vst [vmem:[%s6808_s24 + $0x1d8] sm:$0xff] %v367_v0   ;;  %v601_v0 = vld [vmem:[%s6803_s23 + $0xe80] sm:$0xff]  }
  0x52   : > { %372 = vst [vmem:[%s6808_s24 + $0x1e0] sm:$0xf] %v371_v1  ;;  %v605_v1 = vld [vmem:[%s6803_s23 + $0xe88] sm:$0xff]  }
  0x53   : > { %374 = vst [vmem:[%s6808_s24 + $0x1e4] sm:$0xff] %v373_v2   ;;  %v609_v2 = vld [vmem:[%s6803_s23 + $0xe90] sm:$0xff]  }
  0x54   : > { %378 = vst [vmem:[%s6808_s24 + $0x1ec] sm:$0xff] %v377_v3   ;;  %v613_v3 = vld [vmem:[%s6803_s23 + $0xe98] sm:$0xf] }
  0x55   : > { %382 = vst [vmem:[%s6808_s24 + $0x1f4] sm:$0xff] %v381_v4   ;;  %v615_v4 = vld [vmem:[%s6803_s23 + $0xf20] sm:$0xff]  }
  0x56   : > { %386 = vst [vmem:[%s6808_s24 + $0x1fc] sm:$0xff] %v385_v5   ;;  %v619_v5 = vld [vmem:[%s6803_s23 + $0xf28] sm:$0xff]  }
  0x57   : > { %390 = vst [vmem:[%s6808_s24 + $0x204] sm:$0xff] %v389_v6   ;;  %v623_v6 = vld [vmem:[%s6803_s23 + $0xf30] sm:$0xff]  }
  0x58   : > { %394 = vst [vmem:[%s6808_s24 + $0x20c] sm:$0xf] %v393_v7  ;;  %v627_v7 = vld [vmem:[%s6803_s23 + $0xf38] sm:$0xff]  }
  0x59   : > { %396 = vst [vmem:[%s6808_s24 + $0x210] sm:$0xff] %v395_v8   ;;  %v631_v8 = vld [vmem:[%s6803_s23 + $0xf40] sm:$0xff]  }
  0x5a   : > { %400 = vst [vmem:[%s6808_s24 + $0x218] sm:$0xff] %v399_v9   ;;  %v635_v9 = vld [vmem:[%s6803_s23 + $0xf48] sm:$0xf] }
  0x5b   : > { %404 = vst [vmem:[%s6808_s24 + $0x220] sm:$0xff] %v403_v10   ;;  %v637_v10 = vld [vmem:[%s6803_s23 + $0xfd0] sm:$0xff]  }
  0x5c   : > { %408 = vst [vmem:[%s6808_s24 + $0x228] sm:$0xff] %v407_v11   ;;  %v641_v11 = vld [vmem:[%s6803_s23 + $0xfd8] sm:$0xff]  }
  0x5d   : > { %412 = vst [vmem:[%s6808_s24 + $0x230] sm:$0xff] %v411_v12   ;;  %v645_v12 = vld [vmem:[%s6803_s23 + $0xfe0] sm:$0xff]  }
  0x5e   : > { %416 = vst [vmem:[%s6808_s24 + $0x238] sm:$0xf] %v415_v13  ;;  %v649_v13 = vld [vmem:[%s6803_s23 + $0xfe8] sm:$0xff]  }
  0x5f   : > { %418 = vst [vmem:[%s6808_s24 + $0x23c] sm:$0xff] %v417_v14   ;;  %v653_v14 = vld [vmem:[%s6803_s23 + $0xff0] sm:$0xff]  }
  0x60   : > { %422 = vst [vmem:[%s6808_s24 + $0x244] sm:$0xff] %v421_v15   ;;  %v657_v15 = vld [vmem:[%s6803_s23 + $0xff8] sm:$0xf] }
  0x61   : > { %426 = vst [vmem:[%s6808_s24 + $0x24c] sm:$0xff] %v425_v16   ;;  %v659_v16 = vld [vmem:[%s6803_s23 + $0x1080] sm:$0xff]  }
  0x62   : > { %430 = vst [vmem:[%s6808_s24 + $0x254] sm:$0xff] %v429_v17   ;;  %v663_v17 = vld [vmem:[%s6803_s23 + $0x1088] sm:$0xff]  }
  0x63   : > { %434 = vst [vmem:[%s6808_s24 + $0x25c] sm:$0xff] %v433_v18   ;;  %v667_v18 = vld [vmem:[%s6803_s23 + $0x1090] sm:$0xff]  }
  0x64   : > { %438 = vst [vmem:[%s6808_s24 + $0x264] sm:$0xf] %v437_v19  ;;  %v671_v19 = vld [vmem:[%s6803_s23 + $0x1098] sm:$0xff]  }
  0x65   : > { %440 = vst [vmem:[%s6808_s24 + $0x268] sm:$0xff] %v439_v20   ;;  %v675_v20 = vld [vmem:[%s6803_s23 + $0x10a0] sm:$0xff]  }
  0x66   : > { %444 = vst [vmem:[%s6808_s24 + $0x270] sm:$0xff] %v443_v21   ;;  %v679_v21 = vld [vmem:[%s6803_s23 + $0x10a8] sm:$0xf] }
  0x67   : > { %448 = vst [vmem:[%s6808_s24 + $0x278] sm:$0xff] %v447_v22   ;;  %v681_v22 = vld [vmem:[%s6803_s23 + $0x1130] sm:$0xff]  }
  0x68   : > { %452 = vst [vmem:[%s6808_s24 + $0x280] sm:$0xff] %v451_v23   ;;  %v685_v23 = vld [vmem:[%s6803_s23 + $0x1138] sm:$0xff]  }
  0x69   : > { %456 = vst [vmem:[%s6808_s24 + $0x288] sm:$0xff] %v455_v24   ;;  %v689_v24 = vld [vmem:[%s6803_s23 + $0x1140] sm:$0xff]  }
  0x6a   : > { %460 = vst [vmem:[%s6808_s24 + $0x290] sm:$0xf] %v459_v25  ;;  %v693_v25 = vld [vmem:[%s6803_s23 + $0x1148] sm:$0xff]  }
  0x6b   : > { %462 = vst [vmem:[%s6808_s24 + $0x294] sm:$0xff] %v461_v26   ;;  %v697_v26 = vld [vmem:[%s6803_s23 + $0x1150] sm:$0xff]  }
  0x6c   : > { %466 = vst [vmem:[%s6808_s24 + $0x29c] sm:$0xff] %v465_v27   ;;  %v701_v27 = vld [vmem:[%s6803_s23 + $0x1158] sm:$0xf] }
  0x6d   : > { %470 = vst [vmem:[%s6808_s24 + $0x2a4] sm:$0xff] %v469_v28   ;;  %v703_v28 = vld [vmem:[%s6803_s23 + $0x11e0] sm:$0xff]  }
  0x6e   : > { %474 = vst [vmem:[%s6808_s24 + $0x2ac] sm:$0xff] %v473_v29   ;;  %v707_v29 = vld [vmem:[%s6803_s23 + $0x11e8] sm:$0xff]  }
  0x6f   : > { %478 = vst [vmem:[%s6808_s24 + $0x2b4] sm:$0xff] %v477_v30   ;;  %v711_v30 = vld [vmem:[%s6803_s23 + $0x11f0] sm:$0xff]  }
  0x70   : > { %482 = vst [vmem:[%s6808_s24 + $0x2bc] sm:$0xf] %v481_v31  ;;  %v715_v31 = vld [vmem:[%s6803_s23 + $0x11f8] sm:$0xff]  }
  0x71   : > { %484 = vst [vmem:[%s6808_s24 + $0x2c0] sm:$0xff] %v483_v32   ;;  %v719_v32 = vld [vmem:[%s6803_s23 + $0x1200] sm:$0xff]  }
  0x72   : > { %488 = vst [vmem:[%s6808_s24 + $0x2c8] sm:$0xff] %v487_v33   ;;  %v723_v33 = vld [vmem:[%s6803_s23 + $0x1208] sm:$0xf] }
  0x73   : > { %492 = vst [vmem:[%s6808_s24 + $0x2d0] sm:$0xff] %v491_v34   ;;  %v725_v34 = vld [vmem:[%s6803_s23 + $0x1290] sm:$0xff]  }
  0x74   : > { %496 = vst [vmem:[%s6808_s24 + $0x2d8] sm:$0xff] %v495_v35   ;;  %v729_v35 = vld [vmem:[%s6803_s23 + $0x1298] sm:$0xff]  }
  0x75   : > { %500 = vst [vmem:[%s6808_s24 + $0x2e0] sm:$0xff] %v499_v36   ;;  %v733_v36 = vld [vmem:[%s6803_s23 + $0x12a0] sm:$0xff]  }
  0x76   : > { %504 = vst [vmem:[%s6808_s24 + $0x2e8] sm:$0xf] %v503_v37  ;;  %v737_v37 = vld [vmem:[%s6803_s23 + $0x12a8] sm:$0xff]  }
  0x77   : > { %506 = vst [vmem:[%s6808_s24 + $0x2ec] sm:$0xff] %v505_v38   ;;  %v741_v38 = vld [vmem:[%s6803_s23 + $0x12b0] sm:$0xff]  }
  0x78   : > { %510 = vst [vmem:[%s6808_s24 + $0x2f4] sm:$0xff] %v509_v39   ;;  %v745_v39 = vld [vmem:[%s6803_s23 + $0x12b8] sm:$0xf] }
  0x79   : > { %514 = vst [vmem:[%s6808_s24 + $0x2fc] sm:$0xff] %v513_v40   ;;  %v747_v40 = vld [vmem:[%s6803_s23 + $0x1340] sm:$0xff]  }
  0x7a   : > { %518 = vst [vmem:[%s6808_s24 + $0x304] sm:$0xff] %v517_v41   ;;  %v751_v41 = vld [vmem:[%s6803_s23 + $0x1348] sm:$0xff]  }
  0x7b   : > { %522 = vst [vmem:[%s6808_s24 + $0x30c] sm:$0xff] %v521_v42   ;;  %v755_v42 = vld [vmem:[%s6803_s23 + $0x1350] sm:$0xff]  }
  0x7c   : > { %526 = vst [vmem:[%s6808_s24 + $0x314] sm:$0xf] %v525_v43  ;;  %v759_v43 = vld [vmem:[%s6803_s23 + $0x1358] sm:$0xff]  }
  0x7d   : > { %528 = vst [vmem:[%s6808_s24 + $0x318] sm:$0xff] %v527_v44   ;;  %v763_v44 = vld [vmem:[%s6803_s23 + $0x1360] sm:$0xff]  }
  0x7e   : > { %532 = vst [vmem:[%s6808_s24 + $0x320] sm:$0xff] %v531_v45   ;;  %v767_v45 = vld [vmem:[%s6803_s23 + $0x1368] sm:$0xf] }
  0x7f   : > { %536 = vst [vmem:[%s6808_s24 + $0x328] sm:$0xff] %v535_v46   ;;  %v769_v46 = vld [vmem:[%s6803_s23 + $0x13f0] sm:$0xff]  }
  0x80   : > { %540 = vst [vmem:[%s6808_s24 + $0x330] sm:$0xff] %v539_v47   ;;  %v773_v47 = vld [vmem:[%s6803_s23 + $0x13f8] sm:$0xff]  }
  0x81   : > { %544 = vst [vmem:[%s6808_s24 + $0x338] sm:$0xff] %v543_v48   ;;  %v777_v48 = vld [vmem:[%s6803_s23 + $0x1400] sm:$0xff]  }
  0x82   : > { %548 = vst [vmem:[%s6808_s24 + $0x340] sm:$0xf] %v547_v49  ;;  %v781_v49 = vld [vmem:[%s6803_s23 + $0x1408] sm:$0xff]  }
  0x83   : > { %550 = vst [vmem:[%s6808_s24 + $0x344] sm:$0xff] %v549_v50   ;;  %v785_v50 = vld [vmem:[%s6803_s23 + $0x1410] sm:$0xff]  }
  0x84   : > { %554 = vst [vmem:[%s6808_s24 + $0x34c] sm:$0xff] %v553_v51   ;;  %v789_v51 = vld [vmem:[%s6803_s23 + $0x1418] sm:$0xf] }
  0x85   : > { %558 = vst [vmem:[%s6808_s24 + $0x354] sm:$0xff] %v557_v52   ;;  %v791_v52 = vld [vmem:[%s6803_s23 + $0x14a0] sm:$0xff]  }
  0x86   : > { %562 = vst [vmem:[%s6808_s24 + $0x35c] sm:$0xff] %v561_v53   ;;  %v795_v53 = vld [vmem:[%s6803_s23 + $0x14a8] sm:$0xff]  }
  0x87   : > { %566 = vst [vmem:[%s6808_s24 + $0x364] sm:$0xff] %v565_v54   ;;  %v799_v54 = vld [vmem:[%s6803_s23 + $0x14b0] sm:$0xff]  }
  0x88   : > { %570 = vst [vmem:[%s6808_s24 + $0x36c] sm:$0xf] %v569_v55  ;;  %v803_v55 = vld [vmem:[%s6803_s23 + $0x14b8] sm:$0xff]  }
  0x89   : > { %572 = vst [vmem:[%s6808_s24 + $0x370] sm:$0xff] %v571_v56   ;;  %v807_v56 = vld [vmem:[%s6803_s23 + $0x14c0] sm:$0xff]  }
  0x8a   : > { %576 = vst [vmem:[%s6808_s24 + $0x378] sm:$0xff] %v575_v57   ;;  %v811_v57 = vld [vmem:[%s6803_s23 + $0x14c8] sm:$0xf] }
  0x8b   : > { %580 = vst [vmem:[%s6808_s24 + $0x380] sm:$0xff] %v579_v58   ;;  %v813_v58 = vld [vmem:[%s6803_s23 + $0x1550] sm:$0xff]  }
  0x8c   : > { %584 = vst [vmem:[%s6808_s24 + $0x388] sm:$0xff] %v583_v59   ;;  %v817_v59 = vld [vmem:[%s6803_s23 + $0x1558] sm:$0xff]  }
  0x8d   : > { %588 = vst [vmem:[%s6808_s24 + $0x390] sm:$0xff] %v587_v60   ;;  %v821_v60 = vld [vmem:[%s6803_s23 + $0x1560] sm:$0xff]  }
  0x8e   : > { %592 = vst [vmem:[%s6808_s24 + $0x398] sm:$0xf] %v591_v61  ;;  %v825_v61 = vld [vmem:[%s6803_s23 + $0x1568] sm:$0xff]  }
  0x8f   : > { %594 = vst [vmem:[%s6808_s24 + $0x39c] sm:$0xff] %v593_v62   ;;  %v829_v62 = vld [vmem:[%s6803_s23 + $0x1570] sm:$0xff]  }
  0x90   : > { %598 = vst [vmem:[%s6808_s24 + $0x3a4] sm:$0xff] %v597_v63   ;;  %v833_v63 = vld [vmem:[%s6803_s23 + $0x1578] sm:$0xf] }
  0x91   : > { %602 = vst [vmem:[%s6808_s24 + $0x3ac] sm:$0xff] %v601_v0   ;;  %v835_v0 = vld [vmem:[%s6803_s23 + $0x1600] sm:$0xff]  }
  0x92   : > { %606 = vst [vmem:[%s6808_s24 + $0x3b4] sm:$0xff] %v605_v1   ;;  %v839_v1 = vld [vmem:[%s6803_s23 + $0x1608] sm:$0xff]  }
  0x93   : > { %610 = vst [vmem:[%s6808_s24 + $0x3bc] sm:$0xff] %v609_v2   ;;  %v843_v2 = vld [vmem:[%s6803_s23 + $0x1610] sm:$0xff]  }
  0x94   : > { %614 = vst [vmem:[%s6808_s24 + $0x3c4] sm:$0xf] %v613_v3  ;;  %v847_v3 = vld [vmem:[%s6803_s23 + $0x1618] sm:$0xff]  }
  0x95   : > { %616 = vst [vmem:[%s6808_s24 + $0x3c8] sm:$0xff] %v615_v4   ;;  %v851_v4 = vld [vmem:[%s6803_s23 + $0x1620] sm:$0xff]  }
  0x96   : > { %620 = vst [vmem:[%s6808_s24 + $0x3d0] sm:$0xff] %v619_v5   ;;  %v855_v5 = vld [vmem:[%s6803_s23 + $0x1628] sm:$0xf] }
  0x97   : > { %624 = vst [vmem:[%s6808_s24 + $0x3d8] sm:$0xff] %v623_v6   ;;  %v857_v6 = vld [vmem:[%s6803_s23 + $0x16b0] sm:$0xff]  }
  0x98   : > { %628 = vst [vmem:[%s6808_s24 + $0x3e0] sm:$0xff] %v627_v7   ;;  %v861_v7 = vld [vmem:[%s6803_s23 + $0x16b8] sm:$0xff]  }
  0x99   : > { %632 = vst [vmem:[%s6808_s24 + $0x3e8] sm:$0xff] %v631_v8   ;;  %v865_v8 = vld [vmem:[%s6803_s23 + $0x16c0] sm:$0xff]  }
  0x9a   : > { %636 = vst [vmem:[%s6808_s24 + $0x3f0] sm:$0xf] %v635_v9  ;;  %v869_v9 = vld [vmem:[%s6803_s23 + $0x16c8] sm:$0xff]  }
  0x9b   : > { %638 = vst [vmem:[%s6808_s24 + $0x3f4] sm:$0xff] %v637_v10   ;;  %v873_v10 = vld [vmem:[%s6803_s23 + $0x16d0] sm:$0xff]  }
  0x9c   : > { %642 = vst [vmem:[%s6808_s24 + $0x3fc] sm:$0xff] %v641_v11   ;;  %v877_v11 = vld [vmem:[%s6803_s23 + $0x16d8] sm:$0xf] }
  0x9d   : > { %646 = vst [vmem:[%s6808_s24 + $0x404] sm:$0xff] %v645_v12   ;;  %v879_v12 = vld [vmem:[%s6803_s23 + $0x1760] sm:$0xff]  }
  0x9e   : > { %650 = vst [vmem:[%s6808_s24 + $0x40c] sm:$0xff] %v649_v13   ;;  %v883_v13 = vld [vmem:[%s6803_s23 + $0x1768] sm:$0xff]  }
  0x9f   : > { %654 = vst [vmem:[%s6808_s24 + $0x414] sm:$0xff] %v653_v14   ;;  %v887_v14 = vld [vmem:[%s6803_s23 + $0x1770] sm:$0xff]  }
  0xa0   : > { %658 = vst [vmem:[%s6808_s24 + $0x41c] sm:$0xf] %v657_v15  ;;  %v891_v15 = vld [vmem:[%s6803_s23 + $0x1778] sm:$0xff]  }
  0xa1   : > { %660 = vst [vmem:[%s6808_s24 + $0x420] sm:$0xff] %v659_v16   ;;  %v895_v16 = vld [vmem:[%s6803_s23 + $0x1780] sm:$0xff]  }
  0xa2   : > { %664 = vst [vmem:[%s6808_s24 + $0x428] sm:$0xff] %v663_v17   ;;  %v899_v17 = vld [vmem:[%s6803_s23 + $0x1788] sm:$0xf] }
  0xa3   : > { %668 = vst [vmem:[%s6808_s24 + $0x430] sm:$0xff] %v667_v18   ;;  %v901_v18 = vld [vmem:[%s6803_s23 + $0x1810] sm:$0xff]  }
  0xa4   : > { %672 = vst [vmem:[%s6808_s24 + $0x438] sm:$0xff] %v671_v19   ;;  %v905_v19 = vld [vmem:[%s6803_s23 + $0x1818] sm:$0xff]  }
  0xa5   : > { %676 = vst [vmem:[%s6808_s24 + $0x440] sm:$0xff] %v675_v20   ;;  %v909_v20 = vld [vmem:[%s6803_s23 + $0x1820] sm:$0xff]  }
  0xa6   : > { %680 = vst [vmem:[%s6808_s24 + $0x448] sm:$0xf] %v679_v21  ;;  %v913_v21 = vld [vmem:[%s6803_s23 + $0x1828] sm:$0xff]  }
  0xa7   : > { %682 = vst [vmem:[%s6808_s24 + $0x44c] sm:$0xff] %v681_v22   ;;  %v917_v22 = vld [vmem:[%s6803_s23 + $0x1830] sm:$0xff]  }
  0xa8   : > { %686 = vst [vmem:[%s6808_s24 + $0x454] sm:$0xff] %v685_v23   ;;  %v921_v23 = vld [vmem:[%s6803_s23 + $0x1838] sm:$0xf] }
  0xa9   : > { %690 = vst [vmem:[%s6808_s24 + $0x45c] sm:$0xff] %v689_v24  }
  0xaa   : > { %694 = vst [vmem:[%s6808_s24 + $0x464] sm:$0xff] %v693_v25  }
  0xab   : > { %698 = vst [vmem:[%s6808_s24 + $0x46c] sm:$0xff] %v697_v26  }
  0xac   : > { %702 = vst [vmem:[%s6808_s24 + $0x474] sm:$0xf] %v701_v27 }
  0xad   : > { %704 = vst [vmem:[%s6808_s24 + $0x478] sm:$0xff] %v703_v28  }
  0xae   : > { %708 = vst [vmem:[%s6808_s24 + $0x480] sm:$0xff] %v707_v29  }
  0xaf   : > { %712 = vst [vmem:[%s6808_s24 + $0x488] sm:$0xff] %v711_v30  }
  0xb0   : > { %716 = vst [vmem:[%s6808_s24 + $0x490] sm:$0xff] %v715_v31  }
  0xb1   : > { %720 = vst [vmem:[%s6808_s24 + $0x498] sm:$0xff] %v719_v32  }
  0xb2   : > { %724 = vst [vmem:[%s6808_s24 + $0x4a0] sm:$0xf] %v723_v33 }
  0xb3   : > { %726 = vst [vmem:[%s6808_s24 + $0x4a4] sm:$0xff] %v725_v34  }
  0xb4   : > { %730 = vst [vmem:[%s6808_s24 + $0x4ac] sm:$0xff] %v729_v35  }
  0xb5   : > { %734 = vst [vmem:[%s6808_s24 + $0x4b4] sm:$0xff] %v733_v36  }
  0xb6   : > { %738 = vst [vmem:[%s6808_s24 + $0x4bc] sm:$0xff] %v737_v37  }
  0xb7   : > { %742 = vst [vmem:[%s6808_s24 + $0x4c4] sm:$0xff] %v741_v38  }
  0xb8   : > { %746 = vst [vmem:[%s6808_s24 + $0x4cc] sm:$0xf] %v745_v39 }
  0xb9   : > { %748 = vst [vmem:[%s6808_s24 + $0x4d0] sm:$0xff] %v747_v40  }
  0xba   : > { %752 = vst [vmem:[%s6808_s24 + $0x4d8] sm:$0xff] %v751_v41  }
  0xbb   : > { %756 = vst [vmem:[%s6808_s24 + $0x4e0] sm:$0xff] %v755_v42  }
  0xbc   : > { %760 = vst [vmem:[%s6808_s24 + $0x4e8] sm:$0xff] %v759_v43  }
  0xbd   : > { %764 = vst [vmem:[%s6808_s24 + $0x4f0] sm:$0xff] %v763_v44  }
  0xbe   : > { %768 = vst [vmem:[%s6808_s24 + $0x4f8] sm:$0xf] %v767_v45 }
  0xbf   : > { %770 = vst [vmem:[%s6808_s24 + $0x4fc] sm:$0xff] %v769_v46  }
  0xc0   : > { %774 = vst [vmem:[%s6808_s24 + $0x504] sm:$0xff] %v773_v47  }
  0xc1   : > { %778 = vst [vmem:[%s6808_s24 + $0x50c] sm:$0xff] %v777_v48  }
  0xc2   : > { %782 = vst [vmem:[%s6808_s24 + $0x514] sm:$0xff] %v781_v49  }
  0xc3   : > { %786 = vst [vmem:[%s6808_s24 + $0x51c] sm:$0xff] %v785_v50  }
  0xc4   : > { %790 = vst [vmem:[%s6808_s24 + $0x524] sm:$0xf] %v789_v51 }
  0xc5   : > { %792 = vst [vmem:[%s6808_s24 + $0x528] sm:$0xff] %v791_v52  }
  0xc6   : > { %796 = vst [vmem:[%s6808_s24 + $0x530] sm:$0xff] %v795_v53  }
  0xc7   : > { %800 = vst [vmem:[%s6808_s24 + $0x538] sm:$0xff] %v799_v54  }
  0xc8   : > { %804 = vst [vmem:[%s6808_s24 + $0x540] sm:$0xff] %v803_v55  }
  0xc9   : > { %808 = vst [vmem:[%s6808_s24 + $0x548] sm:$0xff] %v807_v56  }
  0xca   : > { %812 = vst [vmem:[%s6808_s24 + $0x550] sm:$0xf] %v811_v57 }
  0xcb   : > { %814 = vst [vmem:[%s6808_s24 + $0x554] sm:$0xff] %v813_v58  }
  0xcc   : > { %818 = vst [vmem:[%s6808_s24 + $0x55c] sm:$0xff] %v817_v59  }
  0xcd   : > { %822 = vst [vmem:[%s6808_s24 + $0x564] sm:$0xff] %v821_v60  }
  0xce   : > { %826 = vst [vmem:[%s6808_s24 + $0x56c] sm:$0xff] %v825_v61  }
  0xcf   : > { %830 = vst [vmem:[%s6808_s24 + $0x574] sm:$0xff] %v829_v62  }
  0xd0   : > { %834 = vst [vmem:[%s6808_s24 + $0x57c] sm:$0xf] %v833_v63 }
  0xd1   : > { %836 = vst [vmem:[%s6808_s24 + $0x580] sm:$0xff] %v835_v0  }
  0xd2   : > { %840 = vst [vmem:[%s6808_s24 + $0x588] sm:$0xff] %v839_v1  }
  0xd3   : > { %844 = vst [vmem:[%s6808_s24 + $0x590] sm:$0xff] %v843_v2  }
  0xd4   : > { %848 = vst [vmem:[%s6808_s24 + $0x598] sm:$0xff] %v847_v3  }
  0xd5   : > { %852 = vst [vmem:[%s6808_s24 + $0x5a0] sm:$0xff] %v851_v4  }
  0xd6   : > { %856 = vst [vmem:[%s6808_s24 + $0x5a8] sm:$0xf] %v855_v5 }
  0xd7   : > { %858 = vst [vmem:[%s6808_s24 + $0x5ac] sm:$0xff] %v857_v6  }
  0xd8   : > { %862 = vst [vmem:[%s6808_s24 + $0x5b4] sm:$0xff] %v861_v7  }
  0xd9   : > { %866 = vst [vmem:[%s6808_s24 + $0x5bc] sm:$0xff] %v865_v8  }
  0xda   : > { %870 = vst [vmem:[%s6808_s24 + $0x5c4] sm:$0xff] %v869_v9  }
  0xdb   : > { %874 = vst [vmem:[%s6808_s24 + $0x5cc] sm:$0xff] %v873_v10  }
  0xdc   : > { %878 = vst [vmem:[%s6808_s24 + $0x5d4] sm:$0xf] %v877_v11 }
  0xdd   : > { %880 = vst [vmem:[%s6808_s24 + $0x5d8] sm:$0xff] %v879_v12  }
  0xde   : > { %884 = vst [vmem:[%s6808_s24 + $0x5e0] sm:$0xff] %v883_v13  }
  0xdf   : > { %888 = vst [vmem:[%s6808_s24 + $0x5e8] sm:$0xff] %v887_v14  }
  0xe0   : > { %892 = vst [vmem:[%s6808_s24 + $0x5f0] sm:$0xff] %v891_v15  }
  0xe1   : > { %896 = vst [vmem:[%s6808_s24 + $0x5f8] sm:$0xff] %v895_v16  }
  0xe2   : > { %900 = vst [vmem:[%s6808_s24 + $0x600] sm:$0xf] %v899_v17 }
  0xe3   : > { %902 = vst [vmem:[%s6808_s24 + $0x604] sm:$0xff] %v901_v18  }
  0xe4   : > { %906 = vst [vmem:[%s6808_s24 + $0x60c] sm:$0xff] %v905_v19  }
  0xe5   : > { %910 = vst [vmem:[%s6808_s24 + $0x614] sm:$0xff] %v909_v20  }
  0xe6   : > { %914 = vst [vmem:[%s6808_s24 + $0x61c] sm:$0xff] %v913_v21  }
  0xe7   : > { %918 = vst [vmem:[%s6808_s24 + $0x624] sm:$0xff] %v917_v22  }
  0xe8   : > { %922 = vst [vmem:[%s6808_s24 + $0x62c] sm:$0xf] %v921_v23 }
  0xe9 PF: > { %3348 = sbr.rel (!%p6791_p3) target bundleno = 273 (0x111), region = 72  ;;  %s3350_s25 = sand.u32 (%p6791_p3), 1, %s6742_s10  }
  0xea   : > { %s7246_s28 = scalar_lea.vmem (%p6791_p3), %s7683_s1, %s6746_s11  ;;  %s6696_s29 = smul.u32 (%p6791_p3), 36, %s3350_s25 }
  0xeb   : > { %v3370_v24 = vld [vmem:[%s7246_s28] sm:$0x1] (%p6791_p3)  ;;  %v3372_v25 = vld [vmem:[%s7246_s28 + $0x4] sm:$0x1] (%p6791_p3)  ;;  %v3374_v26 = vld [vmem:[%s7246_s28 + $0x8] sm:$0x1] (%p6791_p3) }
  0xec   : > { %s7251_s30 = scalar_lea.vmem (%p6791_p3), [#allocation3], %s6696_s29  ;;  %v3376_v27 = vld [vmem:[%s7246_s28 + $0xc] sm:$0x1] (%p6791_p3)  ;;  %v3378_v28 = vld [vmem:[%s7246_s28 + $0x10] sm:$0x1] (%p6791_p3) }
  0xed   : > { %3371 = vst [vmem:[%s7251_s30] sm:$0x1] (%p6791_p3), %v3370_v24  ;;  %v3380_v29 = vld [vmem:[%s7246_s28 + $0x14] sm:$0x1] (%p6791_p3)  ;;  %v3382_v30 = vld [vmem:[%s7246_s28 + $0x18] sm:$0x1] (%p6791_p3) }
  0xee   : > { %3373 = vst [vmem:[%s7251_s30 + $0x1] sm:$0x1] %v3372_v25  ;;  %v3384_v31 = vld [vmem:[%s7246_s28 + $0x1c] sm:$0x1]  ;;  %v3386_v32 = vld [vmem:[%s7246_s28 + $0x20] sm:$0x1] }
  0xef   : > { %3375 = vst [vmem:[%s7251_s30 + $0x2] sm:$0x1] %v3374_v26  ;;  %v3388_v33 = vld [vmem:[%s7246_s28 + $0x24] sm:$0x1]  ;;  %v3390_v34 = vld [vmem:[%s7246_s28 + $0x28] sm:$0x1] }
  0xf0   : > { %3377 = vst [vmem:[%s7251_s30 + $0x3] sm:$0x1] %v3376_v27  ;;  %v3392_v35 = vld [vmem:[%s7246_s28 + $0x2c] sm:$0x1]  ;;  %v3394_v36 = vld [vmem:[%s7246_s28 + $0x30] sm:$0x1] }
  0xf1   : > { %3379 = vst [vmem:[%s7251_s30 + $0x4] sm:$0x1] %v3378_v28  ;;  %v3396_v37 = vld [vmem:[%s7246_s28 + $0x34] sm:$0x1]  ;;  %v3398_v38 = vld [vmem:[%s7246_s28 + $0x38] sm:$0x1] }
  0xf2   : > { %3381 = vst [vmem:[%s7251_s30 + $0x5] sm:$0x1] %v3380_v29  ;;  %v3400_v39 = vld [vmem:[%s7246_s28 + $0x3c] sm:$0x1]  ;;  %v3402_v40 = vld [vmem:[%s7246_s28 + $0x40] sm:$0x1] }
  0xf3   : > { %3383 = vst [vmem:[%s7251_s30 + $0x6] sm:$0x1] %v3382_v30  ;;  %v3404_v41 = vld [vmem:[%s7246_s28 + $0x44] sm:$0x1]  ;;  %v3406_v42 = vld [vmem:[%s7246_s28 + $0x48] sm:$0x1] }
  0xf4   : > { %3385 = vst [vmem:[%s7251_s30 + $0x7] sm:$0x1] %v3384_v31  ;;  %v3408_v43 = vld [vmem:[%s7246_s28 + $0x4c] sm:$0x1]  ;;  %v3410_v44 = vld [vmem:[%s7246_s28 + $0x50] sm:$0x1] }
  0xf5   : > { %3387 = vst [vmem:[%s7251_s30 + $0x8] sm:$0x1] %v3386_v32  ;;  %v3412_v45 = vld [vmem:[%s7246_s28 + $0x54] sm:$0x1]  ;;  %v3414_v46 = vld [vmem:[%s7246_s28 + $0x58] sm:$0x1] }
  0xf6   : > { %3389 = vst [vmem:[%s7251_s30 + $0x9] sm:$0x1] %v3388_v33  ;;  %v3416_v47 = vld [vmem:[%s7246_s28 + $0x5c] sm:$0x1]  ;;  %v3418_v48 = vld [vmem:[%s7246_s28 + $0x60] sm:$0x1] }
  0xf7   : > { %3391 = vst [vmem:[%s7251_s30 + $0xa] sm:$0x1] %v3390_v34  ;;  %v3420_v49 = vld [vmem:[%s7246_s28 + $0x64] sm:$0x1]  ;;  %v3422_v50 = vld [vmem:[%s7246_s28 + $0x68] sm:$0x1] }
  0xf8   : > { %3393 = vst [vmem:[%s7251_s30 + $0xb] sm:$0x1] %v3392_v35  ;;  %v3424_v51 = vld [vmem:[%s7246_s28 + $0x6c] sm:$0x1]  ;;  %v3426_v52 = vld [vmem:[%s7246_s28 + $0x70] sm:$0x1] }
  0xf9   : > { %3395 = vst [vmem:[%s7251_s30 + $0xc] sm:$0x1] %v3394_v36  ;;  %v3428_v53 = vld [vmem:[%s7246_s28 + $0x74] sm:$0x1]  ;;  %v3430_v54 = vld [vmem:[%s7246_s28 + $0x78] sm:$0x1] }
  0xfa   : > { %3397 = vst [vmem:[%s7251_s30 + $0xd] sm:$0x1] %v3396_v37  ;;  %v3432_v55 = vld [vmem:[%s7246_s28 + $0x7c] sm:$0x1]  ;;  %v3434_v56 = vld [vmem:[%s7246_s28 + $0x80] sm:$0x1] }
  0xfb   : > { %3399 = vst [vmem:[%s7251_s30 + $0xe] sm:$0x1] %v3398_v38  ;;  %v3436_v57 = vld [vmem:[%s7246_s28 + $0x84] sm:$0x1]  ;;  %v3438_v58 = vld [vmem:[%s7246_s28 + $0x88] sm:$0x1] }
  0xfc   : > { %3401 = vst [vmem:[%s7251_s30 + $0xf] sm:$0x1] %v3400_v39  ;;  %v3440_v59 = vld [vmem:[%s7246_s28 + $0x8c] sm:$0x1] }
  0xfd   : > { %3403 = vst [vmem:[%s7251_s30 + $0x10] sm:$0x1] %v3402_v40 }
  0xfe   : > { %3405 = vst [vmem:[%s7251_s30 + $0x11] sm:$0x1] %v3404_v41 }
  0xff   : > { %3407 = vst [vmem:[%s7251_s30 + $0x12] sm:$0x1] %v3406_v42 }
 0x100   : > { %3409 = vst [vmem:[%s7251_s30 + $0x13] sm:$0x1] %v3408_v43 }
 0x101   : > { %3411 = vst [vmem:[%s7251_s30 + $0x14] sm:$0x1] %v3410_v44 }
 0x102   : > { %3413 = vst [vmem:[%s7251_s30 + $0x15] sm:$0x1] %v3412_v45 }
 0x103   : > { %3415 = vst [vmem:[%s7251_s30 + $0x16] sm:$0x1] %v3414_v46 }
 0x104   : > { %3417 = vst [vmem:[%s7251_s30 + $0x17] sm:$0x1] %v3416_v47 }
 0x105   : > { %3419 = vst [vmem:[%s7251_s30 + $0x18] sm:$0x1] %v3418_v48 }
 0x106   : > { %3421 = vst [vmem:[%s7251_s30 + $0x19] sm:$0x1] %v3420_v49 }
 0x107   : > { %3423 = vst [vmem:[%s7251_s30 + $0x1a] sm:$0x1] %v3422_v50 }
 0x108   : > { %3425 = vst [vmem:[%s7251_s30 + $0x1b] sm:$0x1] %v3424_v51 }
 0x109   : > { %3427 = vst [vmem:[%s7251_s30 + $0x1c] sm:$0x1] %v3426_v52 }
 0x10a   : > { %3429 = vst [vmem:[%s7251_s30 + $0x1d] sm:$0x1] %v3428_v53 }
 0x10b   : > { %3431 = vst [vmem:[%s7251_s30 + $0x1e] sm:$0x1] %v3430_v54 }
 0x10c   : > { %3433 = vst [vmem:[%s7251_s30 + $0x1f] sm:$0x1] %v3432_v55 }
 0x10d   : > { %3435 = vst [vmem:[%s7251_s30 + $0x20] sm:$0x1] %v3434_v56 }
 0x10e   : > { %3437 = vst [vmem:[%s7251_s30 + $0x21] sm:$0x1] %v3436_v57 }
 0x10f   : > { %3439 = vst [vmem:[%s7251_s30 + $0x22] sm:$0x1] %v3438_v58 }
 0x110   : > { %3441 = vst [vmem:[%s7251_s30 + $0x23] sm:$0x1] %v3440_v59 }
 0x111 PF: > { %p5461_p5 = scmp.ge.s32.totalorder %s6746_s11, 1  ;;  %p3536_p6 = scmp.lt.s32.totalorder %s6746_s11, 5 }
 0x113   : > { %p3537_p7 = pnand %p5461_p5, %p3536_p6 }
 0x114   : > { %s3543_s3 = sand.u32 (!%p3537_p7), 1, %s6738_s9   ;;  %p7647_p8 = scmp.lt.s32.totalorder (!%p3537_p7), %s5456_s12, 3 }
 0x115   : > { %3540 = sbr.rel (%p3537_p7) target bundleno = 607 (0x25f), region = 113 }
 0x116   : > { %s6697_s4 = smul.u32 (!%p3537_p7), 1584, %s3543_s3 }
 0x117   : > { %s6698_s5 = smul.u32 (!%p3537_p7), 36, %s3543_s3 }
 0x118   : > { %s7325_s6 = scalar_lea.vmem (!%p3537_p7), [#allocation2], %s6697_s4 }
 0x119   : > { %s7333_s7 = scalar_lea.vmem (!%p3537_p7), [#allocation3], %s6698_s5 }
 0x11a   : > { %v5886_v60 = vld [vmem:[%s7325_s6] sm:$0xff]   ;;  %v6533_v61 = vld [vmem:[%s7325_s6 + $0x8] sm:$0xff]   ;;  %v6534_v62 = vld [vmem:[%s7325_s6 + $0x10] sm:$0xff]   ;;  %s7691_s12 = smov (!%p7647_p8, %s5456_s12), 3  ;;  %vm5353_vm0 = vcmask 519168   ;;  %vm5364_vm1 = vcmask 516096  }
 0x11b   : > { %v6535_v63 = vld [vmem:[%s7325_s6 + $0x18] sm:$0xff]   ;;  %v5887_v0 = vunpack.c.l.bf16 %v5886_v60  ;;  %v6536_v1 = vld [vmem:[%s7325_s6 + $0x20] sm:$0xff]   ;;  %v3590_v2 = vld [vmem:[%s7325_s6 + $0x28] sm:$0x1]  ;;  %v5888_v4 = vunpack.c.h.bf16 %v5886_v60  ;;  %v5891_v5 = vunpack.c.l.bf16 %v6533_v61  ;;  %v5892_v6 = vunpack.c.h.bf16 %v6533_v61  ;;  %s6699_s9 = smul.u32 44, %s7691_s12 }
 0x11c   : > { %v3602_v3 = vld [vmem:[%s7333_s7] sm:$0x1]  ;;  %v6538_v9 = vld [vmem:[%s7325_s6 + $0x38] sm:$0xff]   ;;  %v5895_v10 = vunpack.c.l.bf16 %v6534_v62  ;;  %v5896_v11 = vunpack.c.h.bf16 %v6534_v62  ;;  %v5899_v12 = vunpack.c.l.bf16 %v6535_v63  ;;  %v5900_v13 = vunpack.c.h.bf16 %v6535_v63  ;;  %v5463_v14 = vld [vmem:[%s7325_s6 + $0x2c] sm:$0xf] }
 0x11d   : > { %v3603_v7 = vunpack.c.l.bf16 %v3602_v3  ;;  %v6537_v8 = vld [vmem:[%s7325_s6 + $0x30] sm:$0xff]   ;;  %v6539_v15 = vld [vmem:[%s7325_s6 + $0x40] sm:$0xff]   ;;  %v6540_v16 = vld [vmem:[%s7325_s6 + $0x48] sm:$0xff]   ;;  %v5903_v17 = vunpack.c.l.bf16 %v6536_v1  ;;  %v5904_v18 = vunpack.c.h.bf16 %v6536_v1  ;;  %v3601_v19 = vunpack.c.l.bf16 %v3590_v2  ;;  %s3579_s12 = scalar_lea.vmem %s7684_s2, %s6699_s9 }
 0x11e   : > { %v5472_v21 = vld [vmem:[%s7325_s6 + $0x50] sm:$0xf]  ;;  %v5473_v22 = vld [vmem:[%s7325_s6 + $0x54] sm:$0x1]  ;;  %v5907_v23 = vunpack.c.l.bf16 %v6537_v8  ;;  %v5908_v24 = vunpack.c.h.bf16 %v6537_v8  ;;  %v5911_v25 = vunpack.c.l.bf16 %v6538_v9  ;;  %v5912_v26 = vunpack.c.h.bf16 %v6538_v9  ;;  %v5474_v27 = vld [vmem:[%s7333_s7 + $0x1] sm:$0x1] }
 0x11f   : > { %v3604_v20 = vperm.slane %v3603_v7, 0  ;;  %v5915_v28 = vunpack.c.l.bf16 %v6539_v15  ;;  %v5916_v29 = vunpack.c.h.bf16 %v6539_v15  ;;  %v5919_v30 = vunpack.c.l.bf16 %v6540_v16  ;;  %v6541_v40 = vld [vmem:[%s7325_s6 + $0x58] sm:$0xff]   ;;  %v7346_v41 = vld [vmem:[%s7325_s6 + $0x60] sm:$0xff]   ;;  %v7349_v46 = vld [vmem:[%s7325_s6 + $0x68] sm:$0xff]  }
 0x120   : > { %v5920_v31 = vunpack.c.h.bf16 %v6540_v16  ;;  %v3639_v33 = vunpack.c.l.bf16 %v5463_v14  ;;  %v3648_v34 = vunpack.c.l.bf16 %v5472_v21  ;;  %v3649_v35 = vunpack.c.l.bf16 %v5473_v22  ;;  %v7352_v51 = vld [vmem:[%s7325_s6 + $0x70] sm:$0xff]   ;;  %v6545_v60 = vld [vmem:[%s7325_s6 + $0x78] sm:$0xff]   ;;  %v5485_v1 = vld [vmem:[%s7325_s6 + $0x80] sm:$0x1] }
 0x121   : > { %v3605_v32 = vmul.f32 %v5887_v0, %v3604_v20  ;;  %v3606_v36 = vmul.f32 %v5888_v4, %v3604_v20  ;;  %v3607_v37 = vmul.f32 %v5891_v5, %v3604_v20  ;;  %v3608_v38 = vmul.f32 %v5892_v6, %v3604_v20  ;;  %v5486_v6 = vld [vmem:[%s7333_s7 + $0x2] sm:$0x1]  ;;  %v6546_v15 = vld [vmem:[%s7325_s6 + $0x88] sm:$0xff]   ;;  %v6548_v21 = vld [vmem:[%s7325_s6 + $0x98] sm:$0xff]  }
 0x122   : > { %v3652_v39 = vunpack.c.l.bf16 %v5474_v27  ;;  %v3609_v42 = vmul.f32 %v5895_v10, %v3604_v20  ;;  %v3610_v43 = vmul.f32 %v5896_v11, %v3604_v20  ;;  %v3611_v44 = vmul.f32 %v5899_v12, %v3604_v20 }
 0x123   : > { %v3612_v45 = vmul.f32 %v5900_v13, %v3604_v20  ;;  %v3613_v47 = vmul.f32 %v5903_v17, %v3604_v20  ;;  %v3614_v48 = vmul.f32 %v5904_v18, %v3604_v20  ;;  %v3615_v49 = vmul.f32 %v3604_v20, %v3601_v19  ;;  %v6547_v20 = vld [vmem:[%s7325_s6 + $0x90] sm:$0xff]  }
 0x124   : > { %v3653_v50 = vperm.slane %v3652_v39, 0  ;;  %v5923_v52 = vunpack.c.l.bf16 %v6541_v40  ;;  %v5924_v53 = vunpack.c.h.bf16 %v6541_v40  ;;  %v5927_v54 = vunpack.c.l.bf16 %v7346_v41 }
 0x125   : > { %v5928_v55 = vunpack.c.h.bf16 %v7346_v41  ;;  %v5931_v58 = vunpack.c.l.bf16 %v7349_v46  ;;  %v5932_v59 = vunpack.c.h.bf16 %v7349_v46  ;;  %v5935_v0 = vunpack.c.l.bf16 %v7352_v51 }
 0x126   : > { %v3654_v56 = vmul.f32 %v3653_v50, %v3639_v33  ;;  %v3655_v57 = vmul.f32 %v5907_v23, %v3653_v50  ;;  %v3656_v61 = vmul.f32 %v5908_v24, %v3653_v50  ;;  %v3657_v62 = vmul.f32 %v5911_v25, %v3653_v50 }
 0x127   : > { %v3658_v63 = vmul.f32 %v5912_v26, %v3653_v50  ;;  %v3659_v2 = vmul.f32 %v5915_v28, %v3653_v50  ;;  %v3660_v3 = vmul.f32 %v5916_v29, %v3653_v50  ;;  %v3661_v4 = vmul.f32 %v5919_v30, %v3653_v50  ;;  %v6549_v26 = vld [vmem:[%s7325_s6 + $0xa0] sm:$0xff]  }
 0x128   : > { %v3662_v5 = vmul.f32 %v5920_v31, %v3653_v50  ;;  %v3663_v7 = vmul.f32 %v3653_v50, %v3648_v34  ;;  %v3664_v8 = vmul.f32 %v3653_v50, %v3649_v35  ;;  %v5936_v9 = vunpack.c.h.bf16 %v7352_v51  ;;  %v5498_v31 = vld [vmem:[%s7333_s7 + $0x3] sm:$0x1] }
 0x129   : > { %v5939_v10 = vunpack.c.l.bf16 %v6545_v60  ;;  %v3665_v11 = vadd.f32 %v3654_v56, %v3605_v32  ;;  %v3666_v12 = vadd.f32 %v3655_v57, %v3606_v36  ;;  %v5940_v13 = vunpack.c.h.bf16 %v6545_v60 }
 0x12a   : > { %v3698_v14 = vunpack.c.l.bf16 %v5485_v1  ;;  %v3667_v16 = vadd.f32 %v3656_v61, %v3607_v37  ;;  %v3668_v17 = vadd.f32 %v3657_v62, %v3608_v38  ;;  %v3669_v18 = vadd.f32 %v3658_v63, %v3609_v42  ;;  %v5487_v38 = vld [vmem:[%s7325_s6 + $0x84] sm:$0xf] }
 0x12b   : > { %v3701_v19 = vunpack.c.l.bf16 %v5486_v6  ;;  %v3670_v22 = vadd.f32 %v3659_v2, %v3610_v43  ;;  %v3671_v23 = vadd.f32 %v3660_v3, %v3611_v44  ;;  %v3672_v24 = vadd.f32 %v3661_v4, %v3612_v45  ;;  %v5496_v44 = vld [vmem:[%s7325_s6 + $0xa8] sm:$0xf]  ;;  %v5497_v45 = vld [vmem:[%s7325_s6 + $0xac] sm:$0x1] }
 0x12c   : > { %v3673_v25 = vadd.f32 %v3662_v5, %v3613_v47  ;;  %v3674_v27 = vadd.f32 %v3663_v7, %v3614_v48  ;;  %v3675_v28 = vadd.f32 %v3664_v8, %v3615_v49  ;;  %v5943_v30 = vunpack.c.l.bf16 %v6546_v15  ;;  %v6550_v7 = vld [vmem:[%s7325_s6 + $0xb0] sm:$0xff]   ;;  %v6551_v8 = vld [vmem:[%s7325_s6 + $0xb8] sm:$0xff]  }
 0x12d   : > { %v3702_v29 = vperm.slane %v3701_v19, 0  ;;  %v5944_v32 = vunpack.c.h.bf16 %v6546_v15  ;;  %v5947_v33 = vunpack.c.l.bf16 %v6547_v20  ;;  %v5948_v34 = vunpack.c.h.bf16 %v6547_v20 }
 0x12e   : > { %v5951_v35 = vunpack.c.l.bf16 %v6548_v21  ;;  %v5952_v39 = vunpack.c.h.bf16 %v6548_v21  ;;  %v5955_v40 = vunpack.c.l.bf16 %v6549_v26  ;;  %v3750_v46 = vunpack.c.l.bf16 %v5498_v31 }
 0x12f   : > { %v3703_v36 = vmul.f32 %v5923_v52, %v3702_v29  ;;  %v3704_v37 = vmul.f32 %v5924_v53, %v3702_v29  ;;  %v3705_v41 = vmul.f32 %v5927_v54, %v3702_v29  ;;  %v3706_v42 = vmul.f32 %v5928_v55, %v3702_v29 }
 0x130   : > { %v3707_v43 = vmul.f32 %v5931_v58, %v3702_v29  ;;  %v3708_v47 = vmul.f32 %v5932_v59, %v3702_v29  ;;  %v3709_v48 = vmul.f32 %v5935_v0, %v3702_v29  ;;  %v3710_v49 = vmul.f32 %v5936_v9, %v3702_v29 }
 0x131   : > { %v3711_v50 = vmul.f32 %v5939_v10, %v3702_v29  ;;  %v3712_v51 = vmul.f32 %v5940_v13, %v3702_v29  ;;  %v3713_v56 = vmul.f32 %v3702_v29, %v3698_v14  ;;  %v5956_v57 = vunpack.c.h.bf16 %v6549_v26  ;;  %v6552_v13 = vld [vmem:[%s7325_s6 + $0xc0] sm:$0xff]   ;;  %v6553_v26 = vld [vmem:[%s7325_s6 + $0xc8] sm:$0xff]  }
 0x132   : > { %v3737_v60 = vunpack.c.l.bf16 %v5487_v38  ;;  %v3714_v61 = vadd.f32 %v3703_v36, %v3665_v11  ;;  %v3715_v52 = vadd.f32 %v3704_v37, %v3666_v12  ;;  %v3746_v53 = vunpack.c.l.bf16 %v5496_v44  ;;  %v6555_v38 = vld [vmem:[%s7325_s6 + $0xe0] sm:$0xff]   ;;  %v6557_v44 = vld [vmem:[%s7325_s6 + $0xf0] sm:$0xff]  }
 0x133   : > { %v3747_v62 = vunpack.c.l.bf16 %v5497_v45  ;;  %v3716_v54 = vadd.f32 %v3705_v41, %v3667_v16  ;;  %v3717_v55 = vadd.f32 %v3706_v42, %v3668_v17  ;;  %v3718_v58 = vadd.f32 %v3707_v43, %v3669_v18  ;;  %v6558_v45 = vld [vmem:[%s7325_s6 + $0xf8] sm:$0xff]  }
 0x134   : > { %v3751_v63 = vperm.slane %v3750_v46, 0  ;;  %v3719_v1 = vadd.f32 %v3708_v47, %v3670_v22  ;;  %v3720_v59 = vadd.f32 %v3709_v48, %v3671_v23  ;;  %v3721_v0 = vadd.f32 %v3710_v49, %v3672_v24 }
 0x135   : > { %v3722_v2 = vadd.f32 %v3711_v50, %v3673_v25  ;;  %v3723_v3 = vadd.f32 %v3712_v51, %v3674_v27  ;;  %v3724_v4 = vadd.f32 %v3713_v56, %v3675_v28  ;;  %v5959_v19 = vunpack.c.l.bf16 %v6550_v7  ;;  %v5510_v27 = vld [vmem:[%s7333_s7 + $0x4] sm:$0x1]  ;;  %v5511_v50 = vld [vmem:[%s7325_s6 + $0xdc] sm:$0xf] }
 0x136   : > { %v3752_v5 = vmul.f32 %v3751_v63, %v3737_v60  ;;  %v3753_v6 = vmul.f32 %v5943_v30, %v3751_v63  ;;  %v3754_v9 = vmul.f32 %v5944_v32, %v3751_v63  ;;  %v3755_v10 = vmul.f32 %v5947_v33, %v3751_v63  ;;  %v6554_v32 = vld [vmem:[%s7325_s6 + $0xd0] sm:$0xff]   ;;  %v5509_v33 = vld [vmem:[%s7325_s6 + $0xd8] sm:$0x1] }
 0x137   : > { %v3756_v11 = vmul.f32 %v5948_v34, %v3751_v63  ;;  %v3757_v12 = vmul.f32 %v5951_v35, %v3751_v63  ;;  %v3758_v14 = vmul.f32 %v5952_v39, %v3751_v63  ;;  %v3759_v15 = vmul.f32 %v5955_v40, %v3751_v63  ;;  %v6556_v39 = vld [vmem:[%s7325_s6 + $0xe8] sm:$0xff]  }
 0x138   : > { %v3760_v16 = vmul.f32 %v5956_v57, %v3751_v63  ;;  %v3761_v17 = vmul.f32 %v3751_v63, %v3746_v53  ;;  %v3762_v18 = vmul.f32 %v3751_v63, %v3747_v62  ;;  %v5960_v20 = vunpack.c.h.bf16 %v6550_v7 }
 0x139   : > { %v5963_v21 = vunpack.c.l.bf16 %v6551_v8  ;;  %v3763_v22 = vadd.f32 %v3752_v5, %v3714_v61  ;;  %v3764_v23 = vadd.f32 %v3753_v6, %v3715_v52  ;;  %v5964_v24 = vunpack.c.h.bf16 %v6551_v8  ;;  %v5522_v61 = vld [vmem:[%s7333_s7 + $0x5] sm:$0x1]  ;;  %v7387_v6 = vld [vmem:[%s7325_s6 + $0x108] sm:$0xff]  }
 0x13a   : > { %v5967_v25 = vunpack.c.l.bf16 %v6552_v13  ;;  %v3765_v28 = vadd.f32 %v3754_v9, %v3716_v54  ;;  %v3766_v29 = vadd.f32 %v3755_v10, %v3717_v55  ;;  %v3767_v30 = vadd.f32 %v3756_v11, %v3718_v58 }
 0x13b   : > { %v3768_v31 = vadd.f32 %v3757_v12, %v3719_v1  ;;  %v3769_v34 = vadd.f32 %v3758_v14, %v3720_v59  ;;  %v3770_v35 = vadd.f32 %v3759_v15, %v3721_v0  ;;  %v3771_v36 = vadd.f32 %v3760_v16, %v3722_v2  ;;  %v5520_v1 = vld [vmem:[%s7325_s6 + $0x100] sm:$0xf]  ;;  %v5521_v59 = vld [vmem:[%s7325_s6 + $0x104] sm:$0x1] }
 0x13c   : > { %v3772_v37 = vadd.f32 %v3761_v17, %v3723_v3  ;;  %v3773_v40 = vadd.f32 %v3762_v18, %v3724_v4  ;;  %v5968_v41 = vunpack.c.h.bf16 %v6552_v13  ;;  %v5971_v42 = vunpack.c.l.bf16 %v6553_v26 }
 0x13d   : > { %v3799_v43 = vunpack.c.l.bf16 %v5510_v27  ;;  %v5972_v46 = vunpack.c.h.bf16 %v6553_v26  ;;  %v5975_v47 = vunpack.c.l.bf16 %v6554_v32  ;;  %v5976_v48 = vunpack.c.h.bf16 %v6554_v32 }
 0x13e   : > { %v3796_v49 = vunpack.c.l.bf16 %v5509_v33  ;;  %v5979_v56 = vunpack.c.l.bf16 %v6555_v38  ;;  %v5980_v57 = vunpack.c.h.bf16 %v6555_v38  ;;  %v5983_v60 = vunpack.c.l.bf16 %v6556_v39  ;;  %v6560_v33 = vld [vmem:[%s7325_s6 + $0x110] sm:$0xff]  }
 0x13f   : > { %v3800_v51 = vperm.slane %v3799_v43, 0  ;;  %v5984_v52 = vunpack.c.h.bf16 %v6556_v39  ;;  %v5987_v53 = vunpack.c.l.bf16 %v6557_v44  ;;  %v5988_v62 = vunpack.c.h.bf16 %v6557_v44 }
 0x140   : > { %v5991_v54 = vunpack.c.l.bf16 %v6558_v45  ;;  %v5992_v63 = vunpack.c.h.bf16 %v6558_v45  ;;  %v3835_v0 = vunpack.c.l.bf16 %v5511_v50  ;;  %v3848_v5 = vunpack.c.l.bf16 %v5522_v61 }
 0x141   : > { %v3801_v55 = vmul.f32 %v5959_v19, %v3800_v51  ;;  %v3802_v58 = vmul.f32 %v5960_v20, %v3800_v51  ;;  %v3803_v2 = vmul.f32 %v5963_v21, %v3800_v51  ;;  %v3804_v3 = vmul.f32 %v5964_v24, %v3800_v51 }
 0x142   : > { %v3805_v4 = vmul.f32 %v5967_v25, %v3800_v51  ;;  %v3806_v7 = vmul.f32 %v5968_v41, %v3800_v51  ;;  %v3807_v8 = vmul.f32 %v5971_v42, %v3800_v51  ;;  %v3808_v9 = vmul.f32 %v5972_v46, %v3800_v51 }
 0x143   : > { %v3809_v10 = vmul.f32 %v5975_v47, %v3800_v51  ;;  %v3810_v11 = vmul.f32 %v5976_v48, %v3800_v51  ;;  %v3811_v12 = vmul.f32 %v3800_v51, %v3796_v49  ;;  %v3844_v13 = vunpack.c.l.bf16 %v5520_v1  ;;  %v6563_v51 = vld [vmem:[%s7325_s6 + $0x128] sm:$0xff]  }
 0x144   : > { %v3845_v14 = vunpack.c.l.bf16 %v5521_v59  ;;  %v3812_v15 = vadd.f32 %v3801_v55, %v3763_v22  ;;  %v3813_v16 = vadd.f32 %v3802_v58, %v3764_v23  ;;  %v5995_v17 = vunpack.c.l.bf16 %v7387_v6  ;;  %v6561_v23 = vld [vmem:[%s7325_s6 + $0x118] sm:$0xff]   ;;  %v6566_v1 = vld [vmem:[%s7325_s6 + $0x148] sm:$0xff]  }
 0x145   : > { %v5996_v18 = vunpack.c.h.bf16 %v7387_v6  ;;  %v3814_v19 = vadd.f32 %v3803_v2, %v3765_v28  ;;  %v3815_v20 = vadd.f32 %v3804_v3, %v3766_v29  ;;  %v3816_v21 = vadd.f32 %v3805_v4, %v3767_v30  ;;  %v6562_v29 = vld [vmem:[%s7325_s6 + $0x120] sm:$0xff]   ;;  %v6567_v4 = vld [vmem:[%s7325_s6 + $0x150] sm:$0xff]  }
 0x146   : > { %v3849_v24 = vperm.slane %v3848_v5, 0  ;;  %v3817_v25 = vadd.f32 %v3806_v7, %v3768_v31  ;;  %v3818_v26 = vadd.f32 %v3807_v8, %v3769_v34  ;;  %v3819_v27 = vadd.f32 %v3808_v9, %v3770_v35  ;;  %v5546_v9 = vld [vmem:[%s7333_s7 + $0x7] sm:$0x1] }
 0x147   : > { %v3820_v32 = vadd.f32 %v3809_v10, %v3771_v36  ;;  %v3821_v38 = vadd.f32 %v3810_v11, %v3772_v37  ;;  %v3822_v39 = vadd.f32 %v3811_v12, %v3773_v40  ;;  %v5999_v31 = vunpack.c.l.bf16 %v6560_v33  ;;  %v5534_v40 = vld [vmem:[%s7333_s7 + $0x6] sm:$0x1] }
 0x148   : > { %v3850_v41 = vmul.f32 %v3849_v24, %v3835_v0  ;;  %v3851_v22 = vmul.f32 %v5979_v56, %v3849_v24  ;;  %v3852_v42 = vmul.f32 %v5980_v57, %v3849_v24  ;;  %v3853_v43 = vmul.f32 %v5983_v60, %v3849_v24 }
 0x149   : > { %v3854_v44 = vmul.f32 %v5984_v52, %v3849_v24  ;;  %v3855_v28 = vmul.f32 %v5987_v53, %v3849_v24  ;;  %v3856_v30 = vmul.f32 %v5988_v62, %v3849_v24  ;;  %v3857_v45 = vmul.f32 %v5991_v54, %v3849_v24  ;;  %v5533_v52 = vld [vmem:[%s7325_s6 + $0x130] sm:$0x1]  ;;  %v6564_v53 = vld [vmem:[%s7325_s6 + $0x138] sm:$0xff]  }
 0x14a   : > { %v3858_v46 = vmul.f32 %v5992_v63, %v3849_v24  ;;  %v3859_v34 = vmul.f32 %v3849_v24, %v3844_v13  ;;  %v3860_v35 = vmul.f32 %v3849_v24, %v3845_v14  ;;  %v6000_v36 = vunpack.c.h.bf16 %v6560_v33  ;;  %v6565_v63 = vld [vmem:[%s7325_s6 + $0x140] sm:$0xff]  }
 0x14b   : > { %v6003_v37 = vunpack.c.l.bf16 %v6561_v23  ;;  %v3861_v47 = vadd.f32 %v3850_v41, %v3812_v15  ;;  %v3862_v48 = vadd.f32 %v3851_v22, %v3813_v16  ;;  %v6004_v49 = vunpack.c.h.bf16 %v6561_v23  ;;  %v5535_v16 = vld [vmem:[%s7325_s6 + $0x134] sm:$0xf] }
 0x14c   : > { %v6007_v50 = vunpack.c.l.bf16 %v6562_v29  ;;  %v3863_v56 = vadd.f32 %v3852_v42, %v3814_v19  ;;  %v3864_v57 = vadd.f32 %v3853_v43, %v3815_v20  ;;  %v3865_v60 = vadd.f32 %v3854_v44, %v3816_v21 }
 0x14d   : > { %v3866_v61 = vadd.f32 %v3855_v28, %v3817_v25  ;;  %v3867_v62 = vadd.f32 %v3856_v30, %v3818_v26  ;;  %v3868_v54 = vadd.f32 %v3857_v45, %v3819_v27  ;;  %v3869_v55 = vadd.f32 %v3858_v46, %v3820_v32  ;;  %v5544_v26 = vld [vmem:[%s7325_s6 + $0x158] sm:$0xf]  ;;  %v5545_v27 = vld [vmem:[%s7325_s6 + $0x15c] sm:$0x1] }
 0x14e   : > { %v3897_v58 = vunpack.c.l.bf16 %v5534_v40  ;;  %v3870_v59 = vadd.f32 %v3859_v34, %v3821_v38  ;;  %v3871_v0 = vadd.f32 %v3860_v35, %v3822_v39  ;;  %v6008_v2 = vunpack.c.h.bf16 %v6562_v29 }
 0x14f   : > { %v6011_v3 = vunpack.c.l.bf16 %v6563_v51  ;;  %v6012_v5 = vunpack.c.h.bf16 %v6563_v51  ;;  %v3894_v6 = vunpack.c.l.bf16 %v5533_v52  ;;  %v6015_v8 = vunpack.c.l.bf16 %v6564_v53  ;;  %v6568_v51 = vld [vmem:[%s7325_s6 + $0x160] sm:$0xff]  }
 0x150   : > { %v3898_v7 = vperm.slane %v3897_v58, 0  ;;  %v6016_v10 = vunpack.c.h.bf16 %v6564_v53  ;;  %v6019_v11 = vunpack.c.l.bf16 %v6565_v63  ;;  %v6020_v12 = vunpack.c.h.bf16 %v6565_v63 }
 0x151   : > { %v6023_v13 = vunpack.c.l.bf16 %v6566_v1  ;;  %v6024_v19 = vunpack.c.h.bf16 %v6566_v1  ;;  %v6027_v20 = vunpack.c.l.bf16 %v6567_v4  ;;  %v3946_v32 = vunpack.c.l.bf16 %v5546_v9 }
 0x152   : > { %v3899_v14 = vmul.f32 %v5995_v17, %v3898_v7  ;;  %v3900_v15 = vmul.f32 %v5996_v18, %v3898_v7  ;;  %v3901_v21 = vmul.f32 %v5999_v31, %v3898_v7  ;;  %v3902_v24 = vmul.f32 %v6000_v36, %v3898_v7 }
 0x153   : > { %v3903_v25 = vmul.f32 %v6003_v37, %v3898_v7  ;;  %v3904_v33 = vmul.f32 %v6004_v49, %v3898_v7  ;;  %v3905_v38 = vmul.f32 %v6007_v50, %v3898_v7  ;;  %v3906_v39 = vmul.f32 %v6008_v2, %v3898_v7 }
 0x154   : > { %v3907_v41 = vmul.f32 %v6011_v3, %v3898_v7  ;;  %v3908_v22 = vmul.f32 %v6012_v5, %v3898_v7  ;;  %v3909_v23 = vmul.f32 %v3898_v7, %v3894_v6  ;;  %v6028_v42 = vunpack.c.h.bf16 %v6567_v4  ;;  %v6571_v4 = vld [vmem:[%s7325_s6 + $0x178] sm:$0xff]  }
 0x155   : > { %v3933_v43 = vunpack.c.l.bf16 %v5535_v16  ;;  %v3910_v44 = vadd.f32 %v3899_v14, %v3861_v47  ;;  %v3911_v17 = vadd.f32 %v3900_v15, %v3862_v48  ;;  %v3942_v18 = vunpack.c.l.bf16 %v5544_v26  ;;  %v6569_v47 = vld [vmem:[%s7325_s6 + $0x168] sm:$0xff]   ;;  %v6573_v16 = vld [vmem:[%s7325_s6 + $0x190] sm:$0xff]   ;;  %v6575_v26 = vld [vmem:[%s7325_s6 + $0x1a0] sm:$0xff]  }
 0x156   : > { %v3943_v28 = vunpack.c.l.bf16 %v5545_v27  ;;  %v3912_v29 = vadd.f32 %v3901_v21, %v3863_v56  ;;  %v3913_v30 = vadd.f32 %v3902_v24, %v3864_v57  ;;  %v3914_v45 = vadd.f32 %v3903_v25, %v3865_v60  ;;  %v6570_v57 = vld [vmem:[%s7325_s6 + $0x170] sm:$0xff]   ;;  %v5558_v5 = vld [vmem:[%s7333_s7 + $0x8] sm:$0x1] }
 0x157   : > { %v3947_v46 = vperm.slane %v3946_v32, 0  ;;  %v3915_v31 = vadd.f32 %v3904_v33, %v3866_v61  ;;  %v3916_v34 = vadd.f32 %v3905_v38, %v3867_v62  ;;  %v3917_v35 = vadd.f32 %v3906_v39, %v3868_v54  ;;  %v6576_v27 = vld [vmem:[%s7325_s6 + $0x1a8] sm:$0xff]  }
 0x158   : > { %v3918_v36 = vadd.f32 %v3907_v41, %v3869_v55  ;;  %v3919_v37 = vadd.f32 %v3908_v22, %v3870_v59  ;;  %v3920_v40 = vadd.f32 %v3909_v23, %v3871_v0  ;;  %v6031_v54 = vunpack.c.l.bf16 %v6568_v51  ;;  %v5559_v41 = vld [vmem:[%s7325_s6 + $0x18c] sm:$0xf] }
 0x159   : > { %v3948_v49 = vmul.f32 %v3947_v46, %v3933_v43  ;;  %v3949_v50 = vmul.f32 %v6015_v8, %v3947_v46  ;;  %v3950_v52 = vmul.f32 %v6016_v10, %v3947_v46  ;;  %v3951_v48 = vmul.f32 %v6019_v11, %v3947_v46  ;;  %v6572_v10 = vld [vmem:[%s7325_s6 + $0x180] sm:$0xff]   ;;  %v5557_v11 = vld [vmem:[%s7325_s6 + $0x188] sm:$0x1] }
 0x15a   : > { %v3952_v53 = vmul.f32 %v6020_v12, %v3947_v46  ;;  %v3953_v56 = vmul.f32 %v6023_v13, %v3947_v46  ;;  %v3954_v60 = vmul.f32 %v6024_v19, %v3947_v46  ;;  %v3955_v58 = vmul.f32 %v6027_v20, %v3947_v46  ;;  %v6574_v19 = vld [vmem:[%s7325_s6 + $0x198] sm:$0xff]  }
 0x15b   : > { %v3956_v63 = vmul.f32 %v6028_v42, %v3947_v46  ;;  %v3957_v61 = vmul.f32 %v3947_v46, %v3942_v18  ;;  %v3958_v62 = vmul.f32 %v3947_v46, %v3943_v28  ;;  %v6032_v55 = vunpack.c.h.bf16 %v6568_v51 }
 0x15c   : > { %v6035_v1 = vunpack.c.l.bf16 %v6569_v47  ;;  %v3959_v59 = vadd.f32 %v3948_v49, %v3910_v44  ;;  %v3960_v0 = vadd.f32 %v3949_v50, %v3911_v17  ;;  %v6036_v2 = vunpack.c.h.bf16 %v6569_v47  ;;  %v5570_v44 = vld [vmem:[%s7333_s7 + $0x9] sm:$0x1] }
 0x15d   : > { %v6039_v3 = vunpack.c.l.bf16 %v6570_v57  ;;  %v3961_v6 = vadd.f32 %v3950_v52, %v3912_v29  ;;  %v3962_v7 = vadd.f32 %v3951_v48, %v3913_v30  ;;  %v3963_v8 = vadd.f32 %v3952_v53, %v3914_v45  ;;  %v7421_v50 = vld [vmem:[%s7325_s6 + $0x1b8] sm:$0xff]  }
 0x15e   : > { %v3964_v9 = vadd.f32 %v3953_v56, %v3915_v31  ;;  %v3965_v12 = vadd.f32 %v3954_v60, %v3916_v34  ;;  %v3966_v13 = vadd.f32 %v3955_v58, %v3917_v35  ;;  %v3967_v14 = vadd.f32 %v3956_v63, %v3918_v36  ;;  %v5568_v31 = vld [vmem:[%s7325_s6 + $0x1b0] sm:$0xf]  ;;  %v5569_v34 = vld [vmem:[%s7325_s6 + $0x1b4] sm:$0x1] }
 0x15f   : > { %v3968_v15 = vadd.f32 %v3957_v61, %v3919_v37  ;;  %v3969_v20 = vadd.f32 %v3958_v62, %v3920_v40  ;;  %v6040_v21 = vunpack.c.h.bf16 %v6570_v57  ;;  %v6043_v24 = vunpack.c.l.bf16 %v6571_v4 }
 0x160   : > { %v3995_v25 = vunpack.c.l.bf16 %v5558_v5  ;;  %v6044_v32 = vunpack.c.h.bf16 %v6571_v4  ;;  %v6047_v33 = vunpack.c.l.bf16 %v6572_v10  ;;  %v6048_v38 = vunpack.c.h.bf16 %v6572_v10 }
 0x161   : > { %v3992_v39 = vunpack.c.l.bf16 %v5557_v11  ;;  %v6051_v23 = vunpack.c.l.bf16 %v6573_v16  ;;  %v6052_v42 = vunpack.c.h.bf16 %v6573_v16  ;;  %v6055_v43 = vunpack.c.l.bf16 %v6574_v19  ;;  %v6578_v11 = vld [vmem:[%s7325_s6 + $0x1c0] sm:$0xff]  }
 0x162   : > { %v3996_v22 = vperm.slane %v3995_v25, 0  ;;  %v6056_v17 = vunpack.c.h.bf16 %v6574_v19  ;;  %v6059_v18 = vunpack.c.l.bf16 %v6575_v26  ;;  %v6060_v28 = vunpack.c.h.bf16 %v6575_v26 }
 0x163   : > { %v6063_v29 = vunpack.c.l.bf16 %v6576_v27  ;;  %v6064_v46 = vunpack.c.h.bf16 %v6576_v27  ;;  %v4031_v35 = vunpack.c.l.bf16 %v5559_v41  ;;  %v4044_v49 = vunpack.c.l.bf16 %v5570_v44 }
 0x164   : > { %v3997_v30 = vmul.f32 %v6031_v54, %v3996_v22  ;;  %v3998_v45 = vmul.f32 %v6032_v55, %v3996_v22  ;;  %v3999_v36 = vmul.f32 %v6035_v1, %v3996_v22  ;;  %v4000_v37 = vmul.f32 %v6036_v2, %v3996_v22 }
 0x165   : > { %v4001_v40 = vmul.f32 %v6039_v3, %v3996_v22  ;;  %v4002_v51 = vmul.f32 %v6040_v21, %v3996_v22  ;;  %v4003_v47 = vmul.f32 %v6043_v24, %v3996_v22  ;;  %v4004_v52 = vmul.f32 %v6044_v32, %v3996_v22 }
 0x166   : > { %v4005_v48 = vmul.f32 %v6047_v33, %v3996_v22  ;;  %v4006_v53 = vmul.f32 %v6048_v38, %v3996_v22  ;;  %v4007_v56 = vmul.f32 %v3996_v22, %v3992_v39  ;;  %v4040_v57 = vunpack.c.l.bf16 %v5568_v31  ;;  %v6581_v22 = vld [vmem:[%s7325_s6 + $0x1d8] sm:$0xff]  }
 0x167   : > { %v4041_v60 = vunpack.c.l.bf16 %v5569_v34  ;;  %v4008_v58 = vadd.f32 %v3997_v30, %v3959_v59  ;;  %v4009_v63 = vadd.f32 %v3998_v45, %v3960_v0  ;;  %v6067_v61 = vunpack.c.l.bf16 %v7421_v50  ;;  %v6579_v0 = vld [vmem:[%s7325_s6 + $0x1c8] sm:$0xff]   ;;  %v6584_v31 = vld [vmem:[%s7325_s6 + $0x1f8] sm:$0xff]  }
 0x168   : > { %v6068_v62 = vunpack.c.h.bf16 %v7421_v50  ;;  %v4010_v54 = vadd.f32 %v3999_v36, %v3961_v6  ;;  %v4011_v55 = vadd.f32 %v4000_v37, %v3962_v7  ;;  %v4012_v1 = vadd.f32 %v4001_v40, %v3963_v8  ;;  %v6580_v7 = vld [vmem:[%s7325_s6 + $0x1d0] sm:$0xff]   ;;  %v6585_v40 = vld [vmem:[%s7325_s6 + $0x200] sm:$0xff]  }
 0x169   : > { %v4045_v2 = vperm.slane %v4044_v49, 0  ;;  %v4013_v3 = vadd.f32 %v4002_v51, %v3964_v9  ;;  %v4014_v4 = vadd.f32 %v4003_v47, %v3965_v12  ;;  %v4015_v5 = vadd.f32 %v4004_v52, %v3966_v13  ;;  %v5594_v52 = vld [vmem:[%s7333_s7 + $0xb] sm:$0x1] }
 0x16a   : > { %v4016_v10 = vadd.f32 %v4005_v48, %v3967_v14  ;;  %v4017_v16 = vadd.f32 %v4006_v53, %v3968_v15  ;;  %v4018_v19 = vadd.f32 %v4007_v56, %v3969_v20  ;;  %v6071_v9 = vunpack.c.l.bf16 %v6578_v11  ;;  %v5582_v20 = vld [vmem:[%s7333_s7 + $0xa] sm:$0x1] }
 0x16b   : > { %v4046_v21 = vmul.f32 %v4045_v2, %v4031_v35  ;;  %v4047_v59 = vmul.f32 %v6051_v23, %v4045_v2  ;;  %v4048_v24 = vmul.f32 %v6052_v42, %v4045_v2  ;;  %v4049_v25 = vmul.f32 %v6055_v43, %v4045_v2 }
 0x16c   : > { %v4050_v26 = vmul.f32 %v6056_v17, %v4045_v2  ;;  %v4051_v6 = vmul.f32 %v6059_v18, %v4045_v2  ;;  %v4052_v8 = vmul.f32 %v6060_v28, %v4045_v2  ;;  %v4053_v27 = vmul.f32 %v6063_v29, %v4045_v2  ;;  %v5581_v17 = vld [vmem:[%s7325_s6 + $0x1e0] sm:$0x1]  ;;  %v6582_v18 = vld [vmem:[%s7325_s6 + $0x1e8] sm:$0xff]  }
 0x16d   : > { %v4054_v32 = vmul.f32 %v6064_v46, %v4045_v2  ;;  %v4055_v12 = vmul.f32 %v4045_v2, %v4040_v57  ;;  %v4056_v13 = vmul.f32 %v4045_v2, %v4041_v60  ;;  %v6072_v14 = vunpack.c.h.bf16 %v6578_v11  ;;  %v6583_v46 = vld [vmem:[%s7325_s6 + $0x1f0] sm:$0xff]  }
 0x16e   : > { %v6075_v15 = vunpack.c.l.bf16 %v6579_v0  ;;  %v4057_v33 = vadd.f32 %v4046_v21, %v4008_v58  ;;  %v4058_v38 = vadd.f32 %v4047_v59, %v4009_v63  ;;  %v6076_v39 = vunpack.c.h.bf16 %v6579_v0  ;;  %v5583_v63 = vld [vmem:[%s7325_s6 + $0x1e4] sm:$0xf] }
 0x16f   : > { %v6079_v41 = vunpack.c.l.bf16 %v6580_v7  ;;  %v4059_v23 = vadd.f32 %v4048_v24, %v4010_v54  ;;  %v4060_v42 = vadd.f32 %v4049_v25, %v4011_v55  ;;  %v4061_v43 = vadd.f32 %v4050_v26, %v4012_v1 }
 0x170   : > { %v4062_v44 = vadd.f32 %v4051_v6, %v4013_v3  ;;  %v4063_v28 = vadd.f32 %v4052_v8, %v4014_v4  ;;  %v4064_v29 = vadd.f32 %v4053_v27, %v4015_v5  ;;  %v4065_v30 = vadd.f32 %v4054_v32, %v4016_v10  ;;  %v5592_v4 = vld [vmem:[%s7325_s6 + $0x208] sm:$0xf]  ;;  %v5593_v5 = vld [vmem:[%s7325_s6 + $0x20c] sm:$0x1] }
 0x171   : > { %v4093_v45 = vunpack.c.l.bf16 %v5582_v20  ;;  %v4066_v34 = vadd.f32 %v4055_v12, %v4017_v16  ;;  %v4067_v35 = vadd.f32 %v4056_v13, %v4018_v19  ;;  %v6080_v36 = vunpack.c.h.bf16 %v6580_v7 }
 0x172   : > { %v6083_v37 = vunpack.c.l.bf16 %v6581_v22  ;;  %v6084_v49 = vunpack.c.h.bf16 %v6581_v22  ;;  %v4090_v50 = vunpack.c.l.bf16 %v5581_v17  ;;  %v6087_v47 = vunpack.c.l.bf16 %v6582_v18  ;;  %v6586_v22 = vld [vmem:[%s7325_s6 + $0x210] sm:$0xff]  }
 0x173   : > { %v4094_v51 = vperm.slane %v4093_v45, 0  ;;  %v6088_v48 = vunpack.c.h.bf16 %v6582_v18  ;;  %v6091_v53 = vunpack.c.l.bf16 %v6583_v46  ;;  %v6092_v56 = vunpack.c.h.bf16 %v6583_v46 }
 0x174   : > { %v6095_v57 = vunpack.c.l.bf16 %v6584_v31  ;;  %v6096_v54 = vunpack.c.h.bf16 %v6584_v31  ;;  %v6099_v55 = vunpack.c.l.bf16 %v6585_v40  ;;  %v4142_v10 = vunpack.c.l.bf16 %v5594_v52 }
 0x175   : > { %v4095_v60 = vmul.f32 %v6067_v61, %v4094_v51  ;;  %v4096_v58 = vmul.f32 %v6068_v62, %v4094_v51  ;;  %v4097_v1 = vmul.f32 %v6071_v9, %v4094_v51  ;;  %v4098_v2 = vmul.f32 %v6072_v14, %v4094_v51 }
 0x176   : > { %v4099_v3 = vmul.f32 %v6075_v15, %v4094_v51  ;;  %v4100_v11 = vmul.f32 %v6076_v39, %v4094_v51  ;;  %v4101_v16 = vmul.f32 %v6079_v41, %v4094_v51  ;;  %v4102_v19 = vmul.f32 %v6080_v36, %v4094_v51 }
 0x177   : > { %v4103_v21 = vmul.f32 %v6083_v37, %v4094_v51  ;;  %v4104_v59 = vmul.f32 %v6084_v49, %v4094_v51  ;;  %v4105_v0 = vmul.f32 %v4094_v51, %v4090_v50  ;;  %v6100_v24 = vunpack.c.h.bf16 %v6585_v40  ;;  %v6589_v40 = vld [vmem:[%s7325_s6 + $0x228] sm:$0xff]  }
 0x178   : > { %v4129_v25 = vunpack.c.l.bf16 %v5583_v63  ;;  %v4106_v26 = vadd.f32 %v4095_v60, %v4057_v33  ;;  %v4107_v61 = vadd.f32 %v4096_v58, %v4058_v38  ;;  %v4138_v62 = vunpack.c.l.bf16 %v5592_v4  ;;  %v6587_v33 = vld [vmem:[%s7325_s6 + $0x218] sm:$0xff]   ;;  %v5606_v49 = vld [vmem:[%s7333_s7 + $0xc] sm:$0x1]  ;;  %v6593_v4 = vld [vmem:[%s7325_s6 + $0x250] sm:$0xff]  }
 0x179   : > { %v4139_v6 = vunpack.c.l.bf16 %v5593_v5  ;;  %v4108_v7 = vadd.f32 %v4097_v1, %v4059_v23  ;;  %v4109_v8 = vadd.f32 %v4098_v2, %v4060_v42  ;;  %v4110_v27 = vadd.f32 %v4099_v3, %v4061_v43  ;;  %v6588_v42 = vld [vmem:[%s7325_s6 + $0x220] sm:$0xff]   ;;  %v6594_v5 = vld [vmem:[%s7325_s6 + $0x258] sm:$0xff]  }
 0x17a   : > { %v4143_v32 = vperm.slane %v4142_v10, 0  ;;  %v4111_v9 = vadd.f32 %v4100_v11, %v4062_v44  ;;  %v4112_v12 = vadd.f32 %v4101_v16, %v4063_v28  ;;  %v4113_v13 = vadd.f32 %v4102_v19, %v4064_v29  ;;  %v6591_v63 = vld [vmem:[%s7325_s6 + $0x240] sm:$0xff]  }
 0x17b   : > { %v4114_v14 = vadd.f32 %v4103_v21, %v4065_v30  ;;  %v4115_v15 = vadd.f32 %v4104_v59, %v4066_v34  ;;  %v4116_v20 = vadd.f32 %v4105_v0, %v4067_v35  ;;  %v6103_v29 = vunpack.c.l.bf16 %v6586_v22  ;;  %v5607_v21 = vld [vmem:[%s7325_s6 + $0x23c] sm:$0xf] }
 0x17c   : > { %v4144_v39 = vmul.f32 %v4143_v32, %v4129_v25  ;;  %v4145_v41 = vmul.f32 %v6087_v47, %v4143_v32  ;;  %v4146_v17 = vmul.f32 %v6088_v48, %v4143_v32  ;;  %v4147_v38 = vmul.f32 %v6091_v53, %v4143_v32  ;;  %v6590_v48 = vld [vmem:[%s7325_s6 + $0x230] sm:$0xff]   ;;  %v5605_v53 = vld [vmem:[%s7325_s6 + $0x238] sm:$0x1] }
 0x17d   : > { %v4148_v18 = vmul.f32 %v6092_v56, %v4143_v32  ;;  %v4149_v23 = vmul.f32 %v6095_v57, %v4143_v32  ;;  %v4150_v43 = vmul.f32 %v6096_v54, %v4143_v32  ;;  %v4151_v45 = vmul.f32 %v6099_v55, %v4143_v32  ;;  %v6592_v54 = vld [vmem:[%s7325_s6 + $0x248] sm:$0xff]  }
 0x17e   : > { %v4152_v46 = vmul.f32 %v6100_v24, %v4143_v32  ;;  %v4153_v44 = vmul.f32 %v4143_v32, %v4138_v62  ;;  %v4154_v28 = vmul.f32 %v4143_v32, %v4139_v6  ;;  %v6104_v30 = vunpack.c.h.bf16 %v6586_v22 }
 0x17f   : > { %v6107_v31 = vunpack.c.l.bf16 %v6587_v33  ;;  %v4155_v34 = vadd.f32 %v4144_v39, %v4106_v26  ;;  %v4156_v35 = vadd.f32 %v4145_v41, %v4107_v61  ;;  %v6108_v36 = vunpack.c.h.bf16 %v6587_v33  ;;  %v5618_v26 = vld [vmem:[%s7333_s7 + $0xd] sm:$0x1] }
 0x180   : > { %v6111_v37 = vunpack.c.l.bf16 %v6588_v42  ;;  %v4157_v50 = vadd.f32 %v4146_v17, %v4108_v7  ;;  %v4158_v51 = vadd.f32 %v4147_v38, %v4109_v8  ;;  %v4159_v47 = vadd.f32 %v4148_v18, %v4110_v27  ;;  %v7455_v41 = vld [vmem:[%s7325_s6 + $0x268] sm:$0xff]  }
 0x181   : > { %v4160_v52 = vadd.f32 %v4149_v23, %v4111_v9  ;;  %v4161_v56 = vadd.f32 %v4150_v43, %v4112_v12  ;;  %v4162_v57 = vadd.f32 %v4151_v45, %v4113_v13  ;;  %v4163_v60 = vadd.f32 %v4152_v46, %v4114_v14  ;;  %v5616_v9 = vld [vmem:[%s7325_s6 + $0x260] sm:$0xf]  ;;  %v5617_v12 = vld [vmem:[%s7325_s6 + $0x264] sm:$0x1] }
 0x182   : > { %v4164_v58 = vadd.f32 %v4153_v44, %v4115_v15  ;;  %v4165_v55 = vadd.f32 %v4154_v28, %v4116_v20  ;;  %v6112_v1 = vunpack.c.h.bf16 %v6588_v42  ;;  %v6115_v2 = vunpack.c.l.bf16 %v6589_v40 }
 0x183   : > { %v4191_v3 = vunpack.c.l.bf16 %v5606_v49  ;;  %v6116_v10 = vunpack.c.h.bf16 %v6589_v40  ;;  %v6119_v11 = vunpack.c.l.bf16 %v6590_v48  ;;  %v6120_v16 = vunpack.c.h.bf16 %v6590_v48 }
 0x184   : > { %v4188_v19 = vunpack.c.l.bf16 %v5605_v53  ;;  %v6123_v0 = vunpack.c.l.bf16 %v6591_v63  ;;  %v6124_v24 = vunpack.c.h.bf16 %v6591_v63  ;;  %v6127_v25 = vunpack.c.l.bf16 %v6592_v54  ;;  %v6596_v53 = vld [vmem:[%s7325_s6 + $0x270] sm:$0xff]  }
 0x185   : > { %v4192_v59 = vperm.slane %v4191_v3, 0  ;;  %v6128_v61 = vunpack.c.h.bf16 %v6592_v54  ;;  %v6131_v62 = vunpack.c.l.bf16 %v6593_v4  ;;  %v6132_v6 = vunpack.c.h.bf16 %v6593_v4 }
 0x186   : > { %v6135_v7 = vunpack.c.l.bf16 %v6594_v5  ;;  %v6136_v32 = vunpack.c.h.bf16 %v6594_v5  ;;  %v4227_v13 = vunpack.c.l.bf16 %v5607_v21  ;;  %v4240_v39 = vunpack.c.l.bf16 %v5618_v26 }
 0x187   : > { %v4193_v8 = vmul.f32 %v6103_v29, %v4192_v59  ;;  %v4194_v27 = vmul.f32 %v6104_v30, %v4192_v59  ;;  %v4195_v14 = vmul.f32 %v6107_v31, %v4192_v59  ;;  %v4196_v15 = vmul.f32 %v6108_v36, %v4192_v59 }
 0x188   : > { %v4197_v20 = vmul.f32 %v6111_v37, %v4192_v59  ;;  %v4198_v22 = vmul.f32 %v6112_v1, %v4192_v59  ;;  %v4199_v33 = vmul.f32 %v6115_v2, %v4192_v59  ;;  %v4200_v17 = vmul.f32 %v6116_v10, %v4192_v59 }
 0x189   : > { %v4201_v38 = vmul.f32 %v6119_v11, %v4192_v59  ;;  %v4202_v18 = vmul.f32 %v6120_v16, %v4192_v59  ;;  %v4203_v23 = vmul.f32 %v4192_v59, %v4188_v19  ;;  %v4236_v42 = vunpack.c.l.bf16 %v5616_v9  ;;  %v6599_v59 = vld [vmem:[%s7325_s6 + $0x288] sm:$0xff]  }
 0x18a   : > { %v4237_v43 = vunpack.c.l.bf16 %v5617_v12  ;;  %v4204_v45 = vadd.f32 %v4193_v8, %v4155_v34  ;;  %v4205_v46 = vadd.f32 %v4194_v27, %v4156_v35  ;;  %v6139_v44 = vunpack.c.l.bf16 %v7455_v41  ;;  %v6597_v35 = vld [vmem:[%s7325_s6 + $0x278] sm:$0xff]   ;;  %v6602_v9 = vld [vmem:[%s7325_s6 + $0x2a8] sm:$0xff]  }
 0x18b   : > { %v6140_v28 = vunpack.c.h.bf16 %v7455_v41  ;;  %v4206_v29 = vadd.f32 %v4195_v14, %v4157_v50  ;;  %v4207_v30 = vadd.f32 %v4196_v15, %v4158_v51  ;;  %v4208_v31 = vadd.f32 %v4197_v20, %v4159_v47  ;;  %v6598_v51 = vld [vmem:[%s7325_s6 + $0x280] sm:$0xff]   ;;  %v6603_v20 = vld [vmem:[%s7325_s6 + $0x2b0] sm:$0xff]  }
 0x18c   : > { %v4241_v36 = vperm.slane %v4240_v39, 0  ;;  %v4209_v37 = vadd.f32 %v4198_v22, %v4160_v52  ;;  %v4210_v40 = vadd.f32 %v4199_v33, %v4161_v56  ;;  %v4211_v49 = vadd.f32 %v4200_v17, %v4162_v57  ;;  %v5642_v17 = vld [vmem:[%s7333_s7 + $0xf] sm:$0x1] }
 0x18d   : > { %v4212_v48 = vadd.f32 %v4201_v38, %v4163_v60  ;;  %v4213_v63 = vadd.f32 %v4202_v18, %v4164_v58  ;;  %v4214_v54 = vadd.f32 %v4203_v23, %v4165_v55  ;;  %v6143_v52 = vunpack.c.l.bf16 %v6596_v53  ;;  %v5630_v55 = vld [vmem:[%s7333_s7 + $0xe] sm:$0x1] }
 0x18e   : > { %v4242_v1 = vmul.f32 %v4241_v36, %v4227_v13  ;;  %v4243_v34 = vmul.f32 %v6123_v0, %v4241_v36  ;;  %v4244_v2 = vmul.f32 %v6124_v24, %v4241_v36  ;;  %v4245_v3 = vmul.f32 %v6127_v25, %v4241_v36 }
 0x18f   : > { %v4246_v4 = vmul.f32 %v6128_v61, %v4241_v36  ;;  %v4247_v50 = vmul.f32 %v6131_v62, %v4241_v36  ;;  %v4248_v47 = vmul.f32 %v6132_v6, %v4241_v36  ;;  %v4249_v5 = vmul.f32 %v6135_v7, %v4241_v36  ;;  %v5629_v61 = vld [vmem:[%s7325_s6 + $0x290] sm:$0x1]  ;;  %v6600_v62 = vld [vmem:[%s7325_s6 + $0x298] sm:$0xff]  }
 0x190   : > { %v4250_v10 = vmul.f32 %v6136_v32, %v4241_v36  ;;  %v4251_v56 = vmul.f32 %v4241_v36, %v4236_v42  ;;  %v4252_v57 = vmul.f32 %v4241_v36, %v4237_v43  ;;  %v6144_v60 = vunpack.c.h.bf16 %v6596_v53  ;;  %v6601_v32 = vld [vmem:[%s7325_s6 + $0x2a0] sm:$0xff]  }
 0x191   : > { %v6147_v58 = vunpack.c.l.bf16 %v6597_v35  ;;  %v4253_v11 = vadd.f32 %v4242_v1, %v4204_v45  ;;  %v4254_v16 = vadd.f32 %v4243_v34, %v4205_v46  ;;  %v6148_v19 = vunpack.c.h.bf16 %v6597_v35  ;;  %v5631_v46 = vld [vmem:[%s7325_s6 + $0x294] sm:$0xf] }
 0x192   : > { %v6151_v21 = vunpack.c.l.bf16 %v6598_v51  ;;  %v4255_v0 = vadd.f32 %v4244_v2, %v4206_v29  ;;  %v4256_v24 = vadd.f32 %v4245_v3, %v4207_v30  ;;  %v4257_v25 = vadd.f32 %v4246_v4, %v4208_v31 }
 0x193   : > { %v4258_v26 = vadd.f32 %v4247_v50, %v4209_v37  ;;  %v4259_v6 = vadd.f32 %v4248_v47, %v4210_v40  ;;  %v4260_v7 = vadd.f32 %v4249_v5, %v4211_v49  ;;  %v4261_v8 = vadd.f32 %v4250_v10, %v4212_v48  ;;  %v5640_v40 = vld [vmem:[%s7325_s6 + $0x2b8] sm:$0xf]  ;;  %v5641_v49 = vld [vmem:[%s7325_s6 + $0x2bc] sm:$0x1] }
 0x194   : > { %v4289_v27 = vunpack.c.l.bf16 %v5630_v55  ;;  %v4262_v12 = vadd.f32 %v4251_v56, %v4213_v63  ;;  %v4263_v13 = vadd.f32 %v4252_v57, %v4214_v54  ;;  %v6152_v14 = vunpack.c.h.bf16 %v6598_v51 }
 0x195   : > { %v6155_v15 = vunpack.c.l.bf16 %v6599_v59  ;;  %v6156_v39 = vunpack.c.h.bf16 %v6599_v59  ;;  %v4286_v41 = vunpack.c.l.bf16 %v5629_v61  ;;  %v6159_v33 = vunpack.c.l.bf16 %v6600_v62  ;;  %v6604_v59 = vld [vmem:[%s7325_s6 + $0x2c0] sm:$0xff]  }
 0x196   : > { %v4290_v22 = vperm.slane %v4289_v27, 0  ;;  %v6160_v38 = vunpack.c.h.bf16 %v6600_v62  ;;  %v6163_v18 = vunpack.c.l.bf16 %v6601_v32  ;;  %v6164_v23 = vunpack.c.h.bf16 %v6601_v32 }
 0x197   : > { %v6167_v42 = vunpack.c.l.bf16 %v6602_v9  ;;  %v6168_v29 = vunpack.c.h.bf16 %v6602_v9  ;;  %v6171_v30 = vunpack.c.l.bf16 %v6603_v20  ;;  %v4338_v48 = vunpack.c.l.bf16 %v5642_v17 }
 0x198   : > { %v4291_v43 = vmul.f32 %v6139_v44, %v4290_v22  ;;  %v4292_v45 = vmul.f32 %v6140_v28, %v4290_v22  ;;  %v4293_v31 = vmul.f32 %v6143_v52, %v4290_v22  ;;  %v4294_v36 = vmul.f32 %v6144_v60, %v4290_v22 }
 0x199   : > { %v4295_v37 = vmul.f32 %v6147_v58, %v4290_v22  ;;  %v4296_v53 = vmul.f32 %v6148_v19, %v4290_v22  ;;  %v4297_v63 = vmul.f32 %v6151_v21, %v4290_v22  ;;  %v4298_v54 = vmul.f32 %v6152_v14, %v4290_v22 }
 0x19a   : > { %v4299_v1 = vmul.f32 %v6155_v15, %v4290_v22  ;;  %v4300_v34 = vmul.f32 %v6156_v39, %v4290_v22  ;;  %v4301_v35 = vmul.f32 %v4290_v22, %v4286_v41  ;;  %v6172_v2 = vunpack.c.h.bf16 %v6603_v20  ;;  %v6607_v20 = vld [vmem:[%s7325_s6 + $0x2d8] sm:$0xff]   ;;  %v5654_v39 = vld [vmem:[%s7333_s7 + $0x10] sm:$0x1] }
 0x19b   : > { %v4325_v3 = vunpack.c.l.bf16 %v5631_v46  ;;  %v4302_v4 = vadd.f32 %v4291_v43, %v4253_v11  ;;  %v4303_v44 = vadd.f32 %v4292_v45, %v4254_v16  ;;  %v4334_v28 = vunpack.c.l.bf16 %v5640_v40  ;;  %v6605_v11 = vld [vmem:[%s7325_s6 + $0x2c8] sm:$0xff]   ;;  %v6609_v46 = vld [vmem:[%s7325_s6 + $0x2f0] sm:$0xff]   ;;  %v6611_v40 = vld [vmem:[%s7325_s6 + $0x300] sm:$0xff]  }
 0x19c   : > { %v4335_v50 = vunpack.c.l.bf16 %v5641_v49  ;;  %v4304_v51 = vadd.f32 %v4293_v31, %v4255_v0  ;;  %v4305_v47 = vadd.f32 %v4294_v36, %v4256_v24  ;;  %v4306_v5 = vadd.f32 %v4295_v37, %v4257_v25  ;;  %v6606_v24 = vld [vmem:[%s7325_s6 + $0x2d0] sm:$0xff]   ;;  %v6612_v49 = vld [vmem:[%s7325_s6 + $0x308] sm:$0xff]  }
 0x19d   : > { %v4339_v10 = vperm.slane %v4338_v48, 0  ;;  %v4307_v52 = vadd.f32 %v4296_v53, %v4258_v26  ;;  %v4308_v56 = vadd.f32 %v4297_v63, %v4259_v6  ;;  %v4309_v57 = vadd.f32 %v4298_v54, %v4260_v7 }
 0x19e   : > { %v4310_v60 = vadd.f32 %v4299_v1, %v4261_v8  ;;  %v4311_v58 = vadd.f32 %v4300_v34, %v4262_v12  ;;  %v4312_v55 = vadd.f32 %v4301_v35, %v4263_v13  ;;  %v6175_v7 = vunpack.c.l.bf16 %v6604_v59  ;;  %v5655_v1 = vld [vmem:[%s7325_s6 + $0x2ec] sm:$0xf] }
 0x19f   : > { %v4340_v19 = vmul.f32 %v4339_v10, %v4325_v3  ;;  %v4341_v21 = vmul.f32 %v6159_v33, %v4339_v10  ;;  %v4342_v61 = vmul.f32 %v6160_v38, %v4339_v10  ;;  %v4343_v16 = vmul.f32 %v6163_v18, %v4339_v10  ;;  %v6608_v38 = vld [vmem:[%s7325_s6 + $0x2e0] sm:$0xff]   ;;  %v5653_v18 = vld [vmem:[%s7325_s6 + $0x2e8] sm:$0x1] }
 0x1a0   : > { %v4344_v62 = vmul.f32 %v6164_v23, %v4339_v10  ;;  %v4345_v0 = vmul.f32 %v6167_v42, %v4339_v10  ;;  %v4346_v25 = vmul.f32 %v6168_v29, %v4339_v10  ;;  %v4347_v27 = vmul.f32 %v6171_v30, %v4339_v10  ;;  %v6610_v29 = vld [vmem:[%s7325_s6 + $0x2f8] sm:$0xff]  }
 0x1a1   : > { %v4348_v32 = vmul.f32 %v6172_v2, %v4339_v10  ;;  %v4349_v26 = vmul.f32 %v4339_v10, %v4334_v28  ;;  %v4350_v6 = vmul.f32 %v4339_v10, %v4335_v50  ;;  %v6176_v8 = vunpack.c.h.bf16 %v6604_v59 }
 0x1a2   : > { %v6179_v9 = vunpack.c.l.bf16 %v6605_v11  ;;  %v4351_v12 = vadd.f32 %v4340_v19, %v4302_v4  ;;  %v4352_v13 = vadd.f32 %v4341_v21, %v4303_v44  ;;  %v6180_v14 = vunpack.c.h.bf16 %v6605_v11  ;;  %v5666_v4 = vld [vmem:[%s7333_s7 + $0x11] sm:$0x1]  ;;  %v7489_v21 = vld [vmem:[%s7325_s6 + $0x318] sm:$0xff]  }
 0x1a3   : > { %v6183_v15 = vunpack.c.l.bf16 %v6606_v24  ;;  %v4353_v41 = vadd.f32 %v4342_v61, %v4304_v51  ;;  %v4354_v22 = vadd.f32 %v4343_v16, %v4305_v47  ;;  %v4355_v33 = vadd.f32 %v4344_v62, %v4306_v5 }
 0x1a4   : > { %v4356_v17 = vadd.f32 %v4345_v0, %v4307_v52  ;;  %v4357_v23 = vadd.f32 %v4346_v25, %v4308_v56  ;;  %v4358_v42 = vadd.f32 %v4347_v27, %v4309_v57  ;;  %v4359_v43 = vadd.f32 %v4348_v32, %v4310_v60  ;;  %v5664_v52 = vld [vmem:[%s7325_s6 + $0x310] sm:$0xf]  ;;  %v5665_v56 = vld [vmem:[%s7325_s6 + $0x314] sm:$0x1] }
 0x1a5   : > { %v4360_v45 = vadd.f32 %v4349_v26, %v4311_v58  ;;  %v4361_v30 = vadd.f32 %v4350_v6, %v4312_v55  ;;  %v6184_v31 = vunpack.c.h.bf16 %v6606_v24  ;;  %v6187_v36 = vunpack.c.l.bf16 %v6607_v20 }
 0x1a6   : > { %v4387_v37 = vunpack.c.l.bf16 %v5654_v39  ;;  %v6188_v48 = vunpack.c.h.bf16 %v6607_v20  ;;  %v6191_v53 = vunpack.c.l.bf16 %v6608_v38  ;;  %v6192_v63 = vunpack.c.h.bf16 %v6608_v38 }
 0x1a7   : > { %v4384_v54 = vunpack.c.l.bf16 %v5653_v18  ;;  %v6195_v35 = vunpack.c.l.bf16 %v6609_v46  ;;  %v6196_v2 = vunpack.c.h.bf16 %v6609_v46  ;;  %v6199_v3 = vunpack.c.l.bf16 %v6610_v29  ;;  %v6614_v18 = vld [vmem:[%s7325_s6 + $0x320] sm:$0xff]  }
 0x1a8   : > { %v4388_v34 = vperm.slane %v4387_v37, 0  ;;  %v6200_v44 = vunpack.c.h.bf16 %v6610_v29  ;;  %v6203_v28 = vunpack.c.l.bf16 %v6611_v40  ;;  %v6204_v50 = vunpack.c.h.bf16 %v6611_v40 }
 0x1a9   : > { %v6207_v51 = vunpack.c.l.bf16 %v6612_v49  ;;  %v6208_v10 = vunpack.c.h.bf16 %v6612_v49  ;;  %v4423_v57 = vunpack.c.l.bf16 %v5655_v1  ;;  %v4436_v19 = vunpack.c.l.bf16 %v5666_v4 }
 0x1aa   : > { %v4389_v47 = vmul.f32 %v6175_v7, %v4388_v34  ;;  %v4390_v5 = vmul.f32 %v6176_v8, %v4388_v34  ;;  %v4391_v60 = vmul.f32 %v6179_v9, %v4388_v34  ;;  %v4392_v58 = vmul.f32 %v6180_v14, %v4388_v34 }
 0x1ab   : > { %v4393_v55 = vmul.f32 %v6183_v15, %v4388_v34  ;;  %v4394_v59 = vmul.f32 %v6184_v31, %v4388_v34  ;;  %v4395_v11 = vmul.f32 %v6187_v36, %v4388_v34  ;;  %v4396_v61 = vmul.f32 %v6188_v48, %v4388_v34 }
 0x1ac   : > { %v4397_v16 = vmul.f32 %v6191_v53, %v4388_v34  ;;  %v4398_v62 = vmul.f32 %v6192_v63, %v4388_v34  ;;  %v4399_v0 = vmul.f32 %v4388_v34, %v4384_v54  ;;  %v4432_v24 = vunpack.c.l.bf16 %v5664_v52  ;;  %v6617_v34 = vld [vmem:[%s7325_s6 + $0x338] sm:$0xff]  }
 0x1ad   : > { %v4433_v25 = vunpack.c.l.bf16 %v5665_v56  ;;  %v4400_v27 = vadd.f32 %v4389_v47, %v4351_v12  ;;  %v4401_v32 = vadd.f32 %v4390_v5, %v4352_v13  ;;  %v6211_v26 = vunpack.c.l.bf16 %v7489_v21  ;;  %v6615_v13 = vld [vmem:[%s7325_s6 + $0x328] sm:$0xff]   ;;  %v6620_v52 = vld [vmem:[%s7325_s6 + $0x358] sm:$0xff]  }
 0x1ae   : > { %v6212_v6 = vunpack.c.h.bf16 %v7489_v21  ;;  %v4402_v7 = vadd.f32 %v4391_v60, %v4353_v41  ;;  %v4403_v8 = vadd.f32 %v4392_v58, %v4354_v22  ;;  %v4404_v9 = vadd.f32 %v4393_v55, %v4355_v33  ;;  %v6616_v22 = vld [vmem:[%s7325_s6 + $0x330] sm:$0xff]   ;;  %v6621_v55 = vld [vmem:[%s7325_s6 + $0x360] sm:$0xff]  }
 0x1af   : > { %v4437_v14 = vperm.slane %v4436_v19, 0  ;;  %v4405_v15 = vadd.f32 %v4394_v59, %v4356_v17  ;;  %v4406_v20 = vadd.f32 %v4395_v11, %v4357_v23  ;;  %v4407_v39 = vadd.f32 %v4396_v61, %v4358_v42  ;;  %v5690_v61 = vld [vmem:[%s7333_s7 + $0x13] sm:$0x1] }
 0x1b0   : > { %v4408_v38 = vadd.f32 %v4397_v16, %v4359_v43  ;;  %v4409_v46 = vadd.f32 %v4398_v62, %v4360_v45  ;;  %v4410_v29 = vadd.f32 %v4399_v0, %v4361_v30  ;;  %v6215_v17 = vunpack.c.l.bf16 %v6614_v18  ;;  %v5678_v30 = vld [vmem:[%s7333_s7 + $0x12] sm:$0x1] }
 0x1b1   : > { %v4438_v31 = vmul.f32 %v4437_v14, %v4423_v57  ;;  %v4439_v12 = vmul.f32 %v6195_v35, %v4437_v14  ;;  %v4440_v36 = vmul.f32 %v6196_v2, %v4437_v14  ;;  %v4441_v37 = vmul.f32 %v6199_v3, %v4437_v14 }
 0x1b2   : > { %v4442_v40 = vmul.f32 %v6200_v44, %v4437_v14  ;;  %v4443_v41 = vmul.f32 %v6203_v28, %v4437_v14  ;;  %v4444_v33 = vmul.f32 %v6204_v50, %v4437_v14  ;;  %v4445_v49 = vmul.f32 %v6207_v51, %v4437_v14  ;;  %v5677_v44 = vld [vmem:[%s7325_s6 + $0x340] sm:$0x1]  ;;  %v6618_v28 = vld [vmem:[%s7325_s6 + $0x348] sm:$0xff]  }
 0x1b3   : > { %v4446_v48 = vmul.f32 %v6208_v10, %v4437_v14  ;;  %v4447_v23 = vmul.f32 %v4437_v14, %v4432_v24  ;;  %v4448_v42 = vmul.f32 %v4437_v14, %v4433_v25  ;;  %v6216_v43 = vunpack.c.h.bf16 %v6614_v18  ;;  %v6619_v10 = vld [vmem:[%s7325_s6 + $0x350] sm:$0xff]  }
 0x1b4   : > { %v6219_v45 = vunpack.c.l.bf16 %v6615_v13  ;;  %v4449_v53 = vadd.f32 %v4438_v31, %v4400_v27  ;;  %v4450_v63 = vadd.f32 %v4439_v12, %v4401_v32  ;;  %v6220_v54 = vunpack.c.h.bf16 %v6615_v13  ;;  %v5679_v32 = vld [vmem:[%s7325_s6 + $0x344] sm:$0xf] }
 0x1b5   : > { %v6223_v1 = vunpack.c.l.bf16 %v6616_v22  ;;  %v4451_v35 = vadd.f32 %v4440_v36, %v4402_v7  ;;  %v4452_v2 = vadd.f32 %v4441_v37, %v4403_v8  ;;  %v4453_v3 = vadd.f32 %v4442_v40, %v4404_v9 }
 0x1b6   : > { %v4454_v4 = vadd.f32 %v4443_v41, %v4405_v15  ;;  %v4455_v50 = vadd.f32 %v4444_v33, %v4406_v20  ;;  %v4456_v51 = vadd.f32 %v4445_v49, %v4407_v39  ;;  %v4457_v47 = vadd.f32 %v4446_v48, %v4408_v38  ;;  %v5688_v20 = vld [vmem:[%s7325_s6 + $0x368] sm:$0xf]  ;;  %v5689_v39 = vld [vmem:[%s7325_s6 + $0x36c] sm:$0x1] }
 0x1b7   : > { %v4485_v5 = vunpack.c.l.bf16 %v5678_v30  ;;  %v4458_v56 = vadd.f32 %v4447_v23, %v4409_v46  ;;  %v4459_v57 = vadd.f32 %v4448_v42, %v4410_v29  ;;  %v6224_v60 = vunpack.c.h.bf16 %v6616_v22 }
 0x1b8   : > { %v6227_v58 = vunpack.c.l.bf16 %v6617_v34  ;;  %v6228_v19 = vunpack.c.h.bf16 %v6617_v34  ;;  %v4482_v21 = vunpack.c.l.bf16 %v5677_v44  ;;  %v6231_v11 = vunpack.c.l.bf16 %v6618_v28  ;;  %v6622_v34 = vld [vmem:[%s7325_s6 + $0x370] sm:$0xff]  }
 0x1b9   : > { %v4486_v59 = vperm.slane %v4485_v5, 0  ;;  %v6232_v16 = vunpack.c.h.bf16 %v6618_v28  ;;  %v6235_v62 = vunpack.c.l.bf16 %v6619_v10  ;;  %v6236_v0 = vunpack.c.h.bf16 %v6619_v10 }
 0x1ba   : > { %v6239_v24 = vunpack.c.l.bf16 %v6620_v52  ;;  %v6240_v7 = vunpack.c.h.bf16 %v6620_v52  ;;  %v6243_v8 = vunpack.c.l.bf16 %v6621_v55  ;;  %v4534_v38 = vunpack.c.l.bf16 %v5690_v61 }
 0x1bb   : > { %v4487_v25 = vmul.f32 %v6211_v26, %v4486_v59  ;;  %v4488_v27 = vmul.f32 %v6212_v6, %v4486_v59  ;;  %v4489_v9 = vmul.f32 %v6215_v17, %v4486_v59  ;;  %v4490_v14 = vmul.f32 %v6216_v43, %v4486_v59 }
 0x1bc   : > { %v4491_v15 = vmul.f32 %v6219_v45, %v4486_v59  ;;  %v4492_v18 = vmul.f32 %v6220_v54, %v4486_v59  ;;  %v4493_v46 = vmul.f32 %v6223_v1, %v4486_v59  ;;  %v4494_v29 = vmul.f32 %v6224_v60, %v4486_v59 }
 0x1bd   : > { %v4495_v31 = vmul.f32 %v6227_v58, %v4486_v59  ;;  %v4496_v12 = vmul.f32 %v6228_v19, %v4486_v59  ;;  %v4497_v13 = vmul.f32 %v4486_v59, %v4482_v21  ;;  %v6244_v36 = vunpack.c.h.bf16 %v6621_v55  ;;  %v6625_v55 = vld [vmem:[%s7325_s6 + $0x388] sm:$0xff]  }
 0x1be   : > { %v4521_v37 = vunpack.c.l.bf16 %v5679_v32  ;;  %v4498_v40 = vadd.f32 %v4487_v25, %v4449_v53  ;;  %v4499_v26 = vadd.f32 %v4488_v27, %v4450_v63  ;;  %v4530_v6 = vunpack.c.l.bf16 %v5688_v20  ;;  %v6623_v53 = vld [vmem:[%s7325_s6 + $0x378] sm:$0xff]   ;;  %v5702_v19 = vld [vmem:[%s7333_s7 + $0x14] sm:$0x1]  ;;  %v6627_v32 = vld [vmem:[%s7325_s6 + $0x3a0] sm:$0xff]  }
 0x1bf   : > { %v4531_v41 = vunpack.c.l.bf16 %v5689_v39  ;;  %v4500_v22 = vadd.f32 %v4489_v9, %v4451_v35  ;;  %v4501_v33 = vadd.f32 %v4490_v14, %v4452_v2  ;;  %v4502_v49 = vadd.f32 %v4491_v15, %v4453_v3  ;;  %v6624_v2 = vld [vmem:[%s7325_s6 + $0x380] sm:$0xff]   ;;  %v6629_v20 = vld [vmem:[%s7325_s6 + $0x3b0] sm:$0xff]   ;;  %v6630_v39 = vld [vmem:[%s7325_s6 + $0x3b8] sm:$0xff]  }
 0x1c0   : > { %v4535_v48 = vperm.slane %v4534_v38, 0  ;;  %v4503_v17 = vadd.f32 %v4492_v18, %v4454_v4  ;;  %v4504_v23 = vadd.f32 %v4493_v46, %v4455_v50  ;;  %v4505_v42 = vadd.f32 %v4494_v29, %v4456_v51 }
 0x1c1   : > { %v4506_v43 = vadd.f32 %v4495_v31, %v4457_v47  ;;  %v4507_v45 = vadd.f32 %v4496_v12, %v4458_v56  ;;  %v4508_v30 = vadd.f32 %v4497_v13, %v4459_v57  ;;  %v6247_v51 = vunpack.c.l.bf16 %v6622_v34  ;;  %v5703_v31 = vld [vmem:[%s7325_s6 + $0x39c] sm:$0xf] }
 0x1c2   : > { %v4536_v54 = vmul.f32 %v4535_v48, %v4521_v37  ;;  %v4537_v1 = vmul.f32 %v6231_v11, %v4535_v48  ;;  %v4538_v44 = vmul.f32 %v6232_v16, %v4535_v48  ;;  %v4539_v63 = vmul.f32 %v6235_v62, %v4535_v48  ;;  %v6626_v16 = vld [vmem:[%s7325_s6 + $0x390] sm:$0xff]   ;;  %v5701_v62 = vld [vmem:[%s7325_s6 + $0x398] sm:$0x1] }
 0x1c3   : > { %v4540_v28 = vmul.f32 %v6236_v0, %v4535_v48  ;;  %v4541_v35 = vmul.f32 %v6239_v24, %v4535_v48  ;;  %v4542_v3 = vmul.f32 %v6240_v7, %v4535_v48  ;;  %v4543_v5 = vmul.f32 %v6243_v8, %v4535_v48  ;;  %v6628_v7 = vld [vmem:[%s7325_s6 + $0x3a8] sm:$0xff]  }
 0x1c4   : > { %v4544_v10 = vmul.f32 %v6244_v36, %v4535_v48  ;;  %v4545_v4 = vmul.f32 %v4535_v48, %v4530_v6  ;;  %v4546_v50 = vmul.f32 %v4535_v48, %v4531_v41  ;;  %v6248_v47 = vunpack.c.h.bf16 %v6622_v34 }
 0x1c5   : > { %v6251_v52 = vunpack.c.l.bf16 %v6623_v53  ;;  %v4547_v56 = vadd.f32 %v4536_v54, %v4498_v40  ;;  %v4548_v57 = vadd.f32 %v4537_v1, %v4499_v26  ;;  %v6252_v60 = vunpack.c.h.bf16 %v6623_v53  ;;  %v5714_v40 = vld [vmem:[%s7333_s7 + $0x15] sm:$0x1] }
 0x1c6   : > { %v6255_v58 = vunpack.c.l.bf16 %v6624_v2  ;;  %v4549_v21 = vadd.f32 %v4538_v44, %v4500_v22  ;;  %v4550_v59 = vadd.f32 %v4539_v63, %v4501_v33  ;;  %v4551_v11 = vadd.f32 %v4540_v28, %v4502_v49  ;;  %v7523_v1 = vld [vmem:[%s7325_s6 + $0x3c8] sm:$0xff]  }
 0x1c7   : > { %v4552_v61 = vadd.f32 %v4541_v35, %v4503_v17  ;;  %v4553_v0 = vadd.f32 %v4542_v3, %v4504_v23  ;;  %v4554_v24 = vadd.f32 %v4543_v5, %v4505_v42  ;;  %v4555_v25 = vadd.f32 %v4544_v10, %v4506_v43  ;;  %v5712_v17 = vld [vmem:[%s7325_s6 + $0x3c0] sm:$0xf]  ;;  %v5713_v23 = vld [vmem:[%s7325_s6 + $0x3c4] sm:$0x1] }
 0x1c8   : > { %v4556_v27 = vadd.f32 %v4545_v4, %v4507_v45  ;;  %v4557_v8 = vadd.f32 %v4546_v50, %v4508_v30  ;;  %v6256_v9 = vunpack.c.h.bf16 %v6624_v2  ;;  %v6259_v14 = vunpack.c.l.bf16 %v6625_v55 }
 0x1c9   : > { %v4583_v15 = vunpack.c.l.bf16 %v5702_v19  ;;  %v6260_v38 = vunpack.c.h.bf16 %v6625_v55  ;;  %v6263_v18 = vunpack.c.l.bf16 %v6626_v16  ;;  %v6264_v46 = vunpack.c.h.bf16 %v6626_v16 }
 0x1ca   : > { %v4580_v29 = vunpack.c.l.bf16 %v5701_v62  ;;  %v6267_v13 = vunpack.c.l.bf16 %v6627_v32  ;;  %v6268_v36 = vunpack.c.h.bf16 %v6627_v32  ;;  %v6271_v37 = vunpack.c.l.bf16 %v6628_v7  ;;  %v6632_v62 = vld [vmem:[%s7325_s6 + $0x3d0] sm:$0xff]  }
 0x1cb   : > { %v4584_v12 = vperm.slane %v4583_v15, 0  ;;  %v6272_v26 = vunpack.c.h.bf16 %v6628_v7  ;;  %v6275_v6 = vunpack.c.l.bf16 %v6629_v20  ;;  %v6276_v41 = vunpack.c.h.bf16 %v6629_v20 }
 0x1cc   : > { %v6279_v22 = vunpack.c.l.bf16 %v6630_v39  ;;  %v6280_v48 = vunpack.c.h.bf16 %v6630_v39  ;;  %v4619_v42 = vunpack.c.l.bf16 %v5703_v31  ;;  %v4632_v54 = vunpack.c.l.bf16 %v5714_v40 }
 0x1cd   : > { %v4585_v33 = vmul.f32 %v6247_v51, %v4584_v12  ;;  %v4586_v49 = vmul.f32 %v6248_v47, %v4584_v12  ;;  %v4587_v43 = vmul.f32 %v6251_v52, %v4584_v12  ;;  %v4588_v45 = vmul.f32 %v6252_v60, %v4584_v12 }
 0x1ce   : > { %v4589_v30 = vmul.f32 %v6255_v58, %v4584_v12  ;;  %v4590_v34 = vmul.f32 %v6256_v9, %v4584_v12  ;;  %v4591_v53 = vmul.f32 %v6259_v14, %v4584_v12  ;;  %v4592_v44 = vmul.f32 %v6260_v38, %v4584_v12 }
 0x1cf   : > { %v4593_v63 = vmul.f32 %v6263_v18, %v4584_v12  ;;  %v4594_v28 = vmul.f32 %v6264_v46, %v4584_v12  ;;  %v4595_v35 = vmul.f32 %v4584_v12, %v4580_v29  ;;  %v4628_v2 = vunpack.c.l.bf16 %v5712_v17  ;;  %v6635_v12 = vld [vmem:[%s7325_s6 + $0x3e8] sm:$0xff]  }
 0x1d0   : > { %v4629_v3 = vunpack.c.l.bf16 %v5713_v23  ;;  %v4596_v5 = vadd.f32 %v4585_v33, %v4547_v56  ;;  %v4597_v10 = vadd.f32 %v4586_v49, %v4548_v57  ;;  %v6283_v4 = vunpack.c.l.bf16 %v7523_v1  ;;  %v6633_v57 = vld [vmem:[%s7325_s6 + $0x3d8] sm:$0xff]   ;;  %v6638_v17 = vld [vmem:[%s7325_s6 + $0x408] sm:$0xff]  }
 0x1d1   : > { %v6284_v50 = vunpack.c.h.bf16 %v7523_v1  ;;  %v4598_v51 = vadd.f32 %v4587_v43, %v4549_v21  ;;  %v4599_v47 = vadd.f32 %v4588_v45, %v4550_v59  ;;  %v4600_v52 = vadd.f32 %v4589_v30, %v4551_v11  ;;  %v6634_v59 = vld [vmem:[%s7325_s6 + $0x3e0] sm:$0xff]   ;;  %v6639_v30 = vld [vmem:[%s7325_s6 + $0x410] sm:$0xff]  }
 0x1d2   : > { %v4633_v60 = vperm.slane %v4632_v54, 0  ;;  %v4601_v58 = vadd.f32 %v4590_v34, %v4552_v61  ;;  %v4602_v55 = vadd.f32 %v4591_v53, %v4553_v0  ;;  %v4603_v19 = vadd.f32 %v4592_v44, %v4554_v24  ;;  %v5738_v44 = vld [vmem:[%s7333_s7 + $0x17] sm:$0x1] }
 0x1d3   : > { %v4604_v16 = vadd.f32 %v4593_v63, %v4555_v25  ;;  %v4605_v32 = vadd.f32 %v4594_v28, %v4556_v27  ;;  %v4606_v7 = vadd.f32 %v4595_v35, %v4557_v8  ;;  %v6287_v61 = vunpack.c.l.bf16 %v6632_v62  ;;  %v5726_v8 = vld [vmem:[%s7333_s7 + $0x16] sm:$0x1] }
 0x1d4   : > { %v4634_v9 = vmul.f32 %v4633_v60, %v4619_v42  ;;  %v4635_v56 = vmul.f32 %v6267_v13, %v4633_v60  ;;  %v4636_v14 = vmul.f32 %v6268_v36, %v4633_v60  ;;  %v4637_v15 = vmul.f32 %v6271_v37, %v4633_v60 }
 0x1d5   : > { %v4638_v20 = vmul.f32 %v6272_v26, %v4633_v60  ;;  %v4639_v21 = vmul.f32 %v6275_v6, %v4633_v60  ;;  %v4640_v11 = vmul.f32 %v6276_v41, %v4633_v60  ;;  %v4641_v39 = vmul.f32 %v6279_v22, %v4633_v60  ;;  %v5725_v26 = vld [vmem:[%s7325_s6 + $0x3f0] sm:$0x1]  ;;  %v6636_v6 = vld [vmem:[%s7325_s6 + $0x3f8] sm:$0xff]  }
 0x1d6   : > { %v4642_v38 = vmul.f32 %v6280_v48, %v4633_v60  ;;  %v4643_v0 = vmul.f32 %v4633_v60, %v4628_v2  ;;  %v4644_v24 = vmul.f32 %v4633_v60, %v4629_v3  ;;  %v6288_v25 = vunpack.c.h.bf16 %v6632_v62  ;;  %v6637_v48 = vld [vmem:[%s7325_s6 + $0x400] sm:$0xff]  }
 0x1d7   : > { %v6291_v27 = vunpack.c.l.bf16 %v6633_v57  ;;  %v4645_v18 = vadd.f32 %v4634_v9, %v4596_v5  ;;  %v4646_v46 = vadd.f32 %v4635_v56, %v4597_v10  ;;  %v6292_v29 = vunpack.c.h.bf16 %v6633_v57  ;;  %v5727_v10 = vld [vmem:[%s7325_s6 + $0x3f4] sm:$0xf] }
 0x1d8   : > { %v6295_v31 = vunpack.c.l.bf16 %v6634_v59  ;;  %v4647_v13 = vadd.f32 %v4636_v14, %v4598_v51  ;;  %v4648_v36 = vadd.f32 %v4637_v15, %v4599_v47  ;;  %v4649_v37 = vadd.f32 %v4638_v20, %v4600_v52 }
 0x1d9   : > { %v4650_v40 = vadd.f32 %v4639_v21, %v4601_v58  ;;  %v4651_v41 = vadd.f32 %v4640_v11, %v4602_v55  ;;  %v4652_v22 = vadd.f32 %v4641_v39, %v4603_v19  ;;  %v4653_v33 = vadd.f32 %v4642_v38, %v4604_v16  ;;  %v5736_v55 = vld [vmem:[%s7325_s6 + $0x418] sm:$0xf]  ;;  %v5737_v19 = vld [vmem:[%s7325_s6 + $0x41c] sm:$0x1] }
 0x1da   : > { %v4681_v49 = vunpack.c.l.bf16 %v5726_v8  ;;  %v4654_v23 = vadd.f32 %v4643_v0, %v4605_v32  ;;  %v4655_v42 = vadd.f32 %v4644_v24, %v4606_v7  ;;  %v6296_v43 = vunpack.c.h.bf16 %v6634_v59 }
 0x1db   : > { %v6299_v45 = vunpack.c.l.bf16 %v6635_v12  ;;  %v6300_v54 = vunpack.c.h.bf16 %v6635_v12  ;;  %v4678_v1 = vunpack.c.l.bf16 %v5725_v26  ;;  %v6303_v53 = vunpack.c.l.bf16 %v6636_v6  ;;  %v6640_v12 = vld [vmem:[%s7325_s6 + $0x420] sm:$0xff]  }
 0x1dc   : > { %v4682_v34 = vperm.slane %v4681_v49, 0  ;;  %v6304_v63 = vunpack.c.h.bf16 %v6636_v6  ;;  %v6307_v28 = vunpack.c.l.bf16 %v6637_v48  ;;  %v6308_v35 = vunpack.c.h.bf16 %v6637_v48 }
 0x1dd   : > { %v6311_v2 = vunpack.c.l.bf16 %v6638_v17  ;;  %v6312_v51 = vunpack.c.h.bf16 %v6638_v17  ;;  %v6315_v47 = vunpack.c.l.bf16 %v6639_v30  ;;  %v4730_v16 = vunpack.c.l.bf16 %v5738_v44 }
 0x1de   : > { %v4683_v3 = vmul.f32 %v6283_v4, %v4682_v34  ;;  %v4684_v5 = vmul.f32 %v6284_v50, %v4682_v34  ;;  %v4685_v52 = vmul.f32 %v6287_v61, %v4682_v34  ;;  %v4686_v60 = vmul.f32 %v6288_v25, %v4682_v34 }
 0x1df   : > { %v4687_v58 = vmul.f32 %v6291_v27, %v4682_v34  ;;  %v4688_v62 = vmul.f32 %v6292_v29, %v4682_v34  ;;  %v4689_v32 = vmul.f32 %v6295_v31, %v4682_v34  ;;  %v4690_v7 = vmul.f32 %v6296_v43, %v4682_v34 }
 0x1e0   : > { %v4691_v9 = vmul.f32 %v6299_v45, %v4682_v34  ;;  %v4692_v56 = vmul.f32 %v6300_v54, %v4682_v34  ;;  %v4693_v57 = vmul.f32 %v4682_v34, %v4678_v1  ;;  %v6316_v14 = vunpack.c.h.bf16 %v6639_v30  ;;  %v6643_v30 = vld [vmem:[%s7325_s6 + $0x438] sm:$0xff]  }
 0x1e1   : > { %v4717_v15 = vunpack.c.l.bf16 %v5727_v10  ;;  %v4694_v20 = vadd.f32 %v4683_v3, %v4645_v18  ;;  %v4695_v4 = vadd.f32 %v4684_v5, %v4646_v46  ;;  %v4726_v50 = vunpack.c.l.bf16 %v5736_v55  ;;  %v6641_v18 = vld [vmem:[%s7325_s6 + $0x428] sm:$0xff]   ;;  %v6645_v10 = vld [vmem:[%s7325_s6 + $0x450] sm:$0xff]   ;;  %v6647_v55 = vld [vmem:[%s7325_s6 + $0x460] sm:$0xff]  }
 0x1e2   : > { %v4727_v21 = vunpack.c.l.bf16 %v5737_v19  ;;  %v4696_v59 = vadd.f32 %v4685_v52, %v4647_v13  ;;  %v4697_v11 = vadd.f32 %v4686_v60, %v4648_v36  ;;  %v4698_v39 = vadd.f32 %v4687_v58, %v4649_v37  ;;  %v6642_v36 = vld [vmem:[%s7325_s6 + $0x430] sm:$0xff]   ;;  %v5750_v54 = vld [vmem:[%s7333_s7 + $0x18] sm:$0x1] }
 0x1e3   : > { %v4731_v38 = vperm.slane %v4730_v16, 0  ;;  %v4699_v61 = vadd.f32 %v4688_v62, %v4650_v40  ;;  %v4700_v0 = vadd.f32 %v4689_v32, %v4651_v41  ;;  %v4701_v24 = vadd.f32 %v4690_v7, %v4652_v22  ;;  %v6648_v19 = vld [vmem:[%s7325_s6 + $0x468] sm:$0xff]  }
 0x1e4   : > { %v4702_v25 = vadd.f32 %v4691_v9, %v4653_v33  ;;  %v4703_v27 = vadd.f32 %v4692_v56, %v4654_v23  ;;  %v4704_v8 = vadd.f32 %v4693_v57, %v4655_v42  ;;  %v6319_v22 = vunpack.c.l.bf16 %v6640_v12  ;;  %v5751_v9 = vld [vmem:[%s7325_s6 + $0x44c] sm:$0xf] }
 0x1e5   : > { %v4732_v29 = vmul.f32 %v4731_v38, %v4717_v15  ;;  %v4733_v31 = vmul.f32 %v6303_v53, %v4731_v38  ;;  %v4734_v26 = vmul.f32 %v6304_v63, %v4731_v38  ;;  %v4735_v46 = vmul.f32 %v6307_v28, %v4731_v38  ;;  %v6644_v63 = vld [vmem:[%s7325_s6 + $0x440] sm:$0xff]   ;;  %v5749_v28 = vld [vmem:[%s7325_s6 + $0x448] sm:$0x1] }
 0x1e6   : > { %v4736_v6 = vmul.f32 %v6308_v35, %v4731_v38  ;;  %v4737_v13 = vmul.f32 %v6311_v2, %v4731_v38  ;;  %v4738_v37 = vmul.f32 %v6312_v51, %v4731_v38  ;;  %v4739_v49 = vmul.f32 %v6315_v47, %v4731_v38  ;;  %v6646_v51 = vld [vmem:[%s7325_s6 + $0x458] sm:$0xff]  }
 0x1e7   : > { %v4740_v48 = vmul.f32 %v6316_v14, %v4731_v38  ;;  %v4741_v40 = vmul.f32 %v4731_v38, %v4726_v50  ;;  %v4742_v41 = vmul.f32 %v4731_v38, %v4727_v21  ;;  %v6320_v33 = vunpack.c.h.bf16 %v6640_v12 }
 0x1e8   : > { %v6323_v17 = vunpack.c.l.bf16 %v6641_v18  ;;  %v4743_v23 = vadd.f32 %v4732_v29, %v4694_v20  ;;  %v4744_v42 = vadd.f32 %v4733_v31, %v4695_v4  ;;  %v6324_v43 = vunpack.c.h.bf16 %v6641_v18  ;;  %v5762_v20 = vld [vmem:[%s7333_s7 + $0x19] sm:$0x1] }
 0x1e9   : > { %v6327_v45 = vunpack.c.l.bf16 %v6642_v36  ;;  %v4745_v1 = vadd.f32 %v4734_v26, %v4696_v59  ;;  %v4746_v34 = vadd.f32 %v4735_v46, %v4697_v11  ;;  %v4747_v53 = vadd.f32 %v4736_v6, %v4698_v39  ;;  %v7557_v31 = vld [vmem:[%s7325_s6 + $0x478] sm:$0xff]  }
 0x1ea   : > { %v4748_v44 = vadd.f32 %v4737_v13, %v4699_v61  ;;  %v4749_v35 = vadd.f32 %v4738_v37, %v4700_v0  ;;  %v4750_v2 = vadd.f32 %v4739_v49, %v4701_v24  ;;  %v4751_v3 = vadd.f32 %v4740_v48, %v4702_v25  ;;  %v5760_v61 = vld [vmem:[%s7325_s6 + $0x470] sm:$0xf]  ;;  %v5761_v0 = vld [vmem:[%s7325_s6 + $0x474] sm:$0x1] }
 0x1eb   : > { %v4752_v5 = vadd.f32 %v4741_v40, %v4703_v27  ;;  %v4753_v47 = vadd.f32 %v4742_v41, %v4704_v8  ;;  %v6328_v52 = vunpack.c.h.bf16 %v6642_v36  ;;  %v6331_v60 = vunpack.c.l.bf16 %v6643_v30 }
 0x1ec   : > { %v4779_v58 = vunpack.c.l.bf16 %v5750_v54  ;;  %v6332_v16 = vunpack.c.h.bf16 %v6643_v30  ;;  %v6335_v62 = vunpack.c.l.bf16 %v6644_v63  ;;  %v6336_v32 = vunpack.c.h.bf16 %v6644_v63 }
 0x1ed   : > { %v4776_v7 = vunpack.c.l.bf16 %v5749_v28  ;;  %v6339_v57 = vunpack.c.l.bf16 %v6645_v10  ;;  %v6340_v14 = vunpack.c.h.bf16 %v6645_v10  ;;  %v6343_v15 = vunpack.c.l.bf16 %v6646_v51  ;;  %v6650_v28 = vld [vmem:[%s7325_s6 + $0x480] sm:$0xff]  }
 0x1ee   : > { %v4780_v56 = vperm.slane %v4779_v58, 0  ;;  %v6344_v4 = vunpack.c.h.bf16 %v6646_v51  ;;  %v6347_v50 = vunpack.c.l.bf16 %v6647_v55  ;;  %v6348_v21 = vunpack.c.h.bf16 %v6647_v55 }
 0x1ef   : > { %v6351_v59 = vunpack.c.l.bf16 %v6648_v19  ;;  %v6352_v38 = vunpack.c.h.bf16 %v6648_v19  ;;  %v4815_v24 = vunpack.c.l.bf16 %v5751_v9  ;;  %v4828_v29 = vunpack.c.l.bf16 %v5762_v20 }
 0x1f0   : > { %v4781_v11 = vmul.f32 %v6319_v22, %v4780_v56  ;;  %v4782_v39 = vmul.f32 %v6320_v33, %v4780_v56  ;;  %v4783_v25 = vmul.f32 %v6323_v17, %v4780_v56  ;;  %v4784_v27 = vmul.f32 %v6324_v43, %v4780_v56 }
 0x1f1   : > { %v4785_v8 = vmul.f32 %v6327_v45, %v4780_v56  ;;  %v4786_v12 = vmul.f32 %v6328_v52, %v4780_v56  ;;  %v4787_v18 = vmul.f32 %v6331_v60, %v4780_v56  ;;  %v4788_v26 = vmul.f32 %v6332_v16, %v4780_v56 }
 0x1f2   : > { %v4789_v46 = vmul.f32 %v6335_v62, %v4780_v56  ;;  %v4790_v6 = vmul.f32 %v6336_v32, %v4780_v56  ;;  %v4791_v13 = vmul.f32 %v4780_v56, %v4776_v7  ;;  %v4824_v36 = vunpack.c.l.bf16 %v5760_v61  ;;  %v6653_v56 = vld [vmem:[%s7325_s6 + $0x498] sm:$0xff]  }
 0x1f3   : > { %v4825_v37 = vunpack.c.l.bf16 %v5761_v0  ;;  %v4792_v49 = vadd.f32 %v4781_v11, %v4743_v23  ;;  %v4793_v48 = vadd.f32 %v4782_v39, %v4744_v42  ;;  %v6355_v40 = vunpack.c.l.bf16 %v7557_v31  ;;  %v6651_v42 = vld [vmem:[%s7325_s6 + $0x488] sm:$0xff]   ;;  %v6656_v61 = vld [vmem:[%s7325_s6 + $0x4b8] sm:$0xff]  }
 0x1f4   : > { %v6356_v41 = vunpack.c.h.bf16 %v7557_v31  ;;  %v4794_v22 = vadd.f32 %v4783_v25, %v4745_v1  ;;  %v4795_v33 = vadd.f32 %v4784_v27, %v4746_v34  ;;  %v4796_v17 = vadd.f32 %v4785_v8, %v4747_v53  ;;  %v6652_v34 = vld [vmem:[%s7325_s6 + $0x490] sm:$0xff]   ;;  %v6657_v8 = vld [vmem:[%s7325_s6 + $0x4c0] sm:$0xff]  }
 0x1f5   : > { %v4829_v43 = vperm.slane %v4828_v29, 0  ;;  %v4797_v45 = vadd.f32 %v4786_v12, %v4748_v44  ;;  %v4798_v30 = vadd.f32 %v4787_v18, %v4749_v35  ;;  %v4799_v54 = vadd.f32 %v4788_v26, %v4750_v2  ;;  %v5786_v26 = vld [vmem:[%s7333_s7 + $0x1b] sm:$0x1] }
 0x1f6   : > { %v4800_v63 = vadd.f32 %v4789_v46, %v4751_v3  ;;  %v4801_v10 = vadd.f32 %v4790_v6, %v4752_v5  ;;  %v4802_v51 = vadd.f32 %v4791_v13, %v4753_v47  ;;  %v6359_v44 = vunpack.c.l.bf16 %v6650_v28  ;;  %v5774_v47 = vld [vmem:[%s7333_s7 + $0x1a] sm:$0x1] }
 0x1f7   : > { %v4830_v52 = vmul.f32 %v4829_v43, %v4815_v24  ;;  %v4831_v23 = vmul.f32 %v6339_v57, %v4829_v43  ;;  %v4832_v60 = vmul.f32 %v6340_v14, %v4829_v43  ;;  %v4833_v58 = vmul.f32 %v6343_v15, %v4829_v43 }
 0x1f8   : > { %v4834_v55 = vmul.f32 %v6344_v4, %v4829_v43  ;;  %v4835_v1 = vmul.f32 %v6347_v50, %v4829_v43  ;;  %v4836_v53 = vmul.f32 %v6348_v21, %v4829_v43  ;;  %v4837_v19 = vmul.f32 %v6351_v59, %v4829_v43  ;;  %v5773_v4 = vld [vmem:[%s7325_s6 + $0x4a0] sm:$0x1]  ;;  %v6654_v50 = vld [vmem:[%s7325_s6 + $0x4a8] sm:$0xff]  }
 0x1f9   : > { %v4838_v16 = vmul.f32 %v6352_v38, %v4829_v43  ;;  %v4839_v35 = vmul.f32 %v4829_v43, %v4824_v36  ;;  %v4840_v2 = vmul.f32 %v4829_v43, %v4825_v37  ;;  %v6360_v3 = vunpack.c.h.bf16 %v6650_v28  ;;  %v6655_v38 = vld [vmem:[%s7325_s6 + $0x4b0] sm:$0xff]  }
 0x1fa   : > { %v6363_v5 = vunpack.c.l.bf16 %v6651_v42  ;;  %v4841_v62 = vadd.f32 %v4830_v52, %v4792_v49  ;;  %v4842_v32 = vadd.f32 %v4831_v23, %v4793_v48  ;;  %v6364_v7 = vunpack.c.h.bf16 %v6651_v42  ;;  %v5775_v48 = vld [vmem:[%s7325_s6 + $0x4a4] sm:$0xf] }
 0x1fb   : > { %v6367_v9 = vunpack.c.l.bf16 %v6652_v34  ;;  %v4843_v57 = vadd.f32 %v4832_v60, %v4794_v22  ;;  %v4844_v14 = vadd.f32 %v4833_v58, %v4795_v33  ;;  %v4845_v15 = vadd.f32 %v4834_v55, %v4796_v17 }
 0x1fc   : > { %v4846_v20 = vadd.f32 %v4835_v1, %v4797_v45  ;;  %v4847_v21 = vadd.f32 %v4836_v53, %v4798_v30  ;;  %v4848_v59 = vadd.f32 %v4837_v19, %v4799_v54  ;;  %v4849_v11 = vadd.f32 %v4838_v16, %v4800_v63  ;;  %v5784_v30 = vld [vmem:[%s7325_s6 + $0x4c8] sm:$0xf]  ;;  %v5785_v54 = vld [vmem:[%s7325_s6 + $0x4cc] sm:$0x1] }
 0x1fd   : > { %v4877_v39 = vunpack.c.l.bf16 %v5774_v47  ;;  %v4850_v0 = vadd.f32 %v4839_v35, %v4801_v10  ;;  %v4851_v24 = vadd.f32 %v4840_v2, %v4802_v51  ;;  %v6368_v25 = vunpack.c.h.bf16 %v6652_v34 }
 0x1fe   : > { %v6371_v27 = vunpack.c.l.bf16 %v6653_v56  ;;  %v6372_v29 = vunpack.c.h.bf16 %v6653_v56  ;;  %v4874_v31 = vunpack.c.l.bf16 %v5773_v4  ;;  %v6375_v18 = vunpack.c.l.bf16 %v6654_v50  ;;  %v6658_v56 = vld [vmem:[%s7325_s6 + $0x4d0] sm:$0xff]  }
 0x1ff   : > { %v4878_v12 = vperm.slane %v4877_v39, 0  ;;  %v6376_v46 = vunpack.c.h.bf16 %v6654_v50  ;;  %v6379_v6 = vunpack.c.l.bf16 %v6655_v38  ;;  %v6380_v13 = vunpack.c.h.bf16 %v6655_v38 }
 0x200   : > { %v6383_v36 = vunpack.c.l.bf16 %v6656_v61  ;;  %v6384_v22 = vunpack.c.h.bf16 %v6656_v61  ;;  %v6387_v33 = vunpack.c.l.bf16 %v6657_v8  ;;  %v4926_v63 = vunpack.c.l.bf16 %v5786_v26 }
 0x201   : > { %v4879_v37 = vmul.f32 %v6355_v40, %v4878_v12  ;;  %v4880_v49 = vmul.f32 %v6356_v41, %v4878_v12  ;;  %v4881_v17 = vmul.f32 %v6359_v44, %v4878_v12  ;;  %v4882_v43 = vmul.f32 %v6360_v3, %v4878_v12 }
 0x202   : > { %v4883_v45 = vmul.f32 %v6363_v5, %v4878_v12  ;;  %v4884_v28 = vmul.f32 %v6364_v7, %v4878_v12  ;;  %v4885_v10 = vmul.f32 %v6367_v9, %v4878_v12  ;;  %v4886_v51 = vmul.f32 %v6368_v25, %v4878_v12 }
 0x203   : > { %v4887_v52 = vmul.f32 %v6371_v27, %v4878_v12  ;;  %v4888_v23 = vmul.f32 %v6372_v29, %v4878_v12  ;;  %v4889_v42 = vmul.f32 %v4878_v12, %v4874_v31  ;;  %v6388_v60 = vunpack.c.h.bf16 %v6657_v8  ;;  %v6661_v8 = vld [vmem:[%s7325_s6 + $0x4e8] sm:$0xff]   ;;  %v5798_v29 = vld [vmem:[%s7333_s7 + $0x1c] sm:$0x1] }
 0x204   : > { %v4913_v58 = vunpack.c.l.bf16 %v5775_v48  ;;  %v4890_v55 = vadd.f32 %v4879_v37, %v4841_v62  ;;  %v4891_v40 = vadd.f32 %v4880_v49, %v4842_v32  ;;  %v4922_v41 = vunpack.c.l.bf16 %v5784_v30  ;;  %v6659_v62 = vld [vmem:[%s7325_s6 + $0x4d8] sm:$0xff]   ;;  %v6663_v48 = vld [vmem:[%s7325_s6 + $0x500] sm:$0xff]   ;;  %v6665_v30 = vld [vmem:[%s7325_s6 + $0x510] sm:$0xff]  }
 0x205   : > { %v4923_v1 = vunpack.c.l.bf16 %v5785_v54  ;;  %v4892_v34 = vadd.f32 %v4881_v17, %v4843_v57  ;;  %v4893_v53 = vadd.f32 %v4882_v43, %v4844_v14  ;;  %v4894_v19 = vadd.f32 %v4883_v45, %v4845_v15  ;;  %v6660_v14 = vld [vmem:[%s7325_s6 + $0x4e0] sm:$0xff]   ;;  %v6666_v54 = vld [vmem:[%s7325_s6 + $0x518] sm:$0xff]  }
 0x206   : > { %v4927_v16 = vperm.slane %v4926_v63, 0  ;;  %v4895_v44 = vadd.f32 %v4884_v28, %v4846_v20  ;;  %v4896_v35 = vadd.f32 %v4885_v10, %v4847_v21  ;;  %v4897_v2 = vadd.f32 %v4886_v51, %v4848_v59 }
 0x207   : > { %v4898_v3 = vadd.f32 %v4887_v52, %v4849_v11  ;;  %v4899_v5 = vadd.f32 %v4888_v23, %v4850_v0  ;;  %v4900_v47 = vadd.f32 %v4889_v42, %v4851_v24  ;;  %v6391_v59 = vunpack.c.l.bf16 %v6658_v56  ;;  %v5799_v52 = vld [vmem:[%s7325_s6 + $0x4fc] sm:$0xf] }
 0x208   : > { %v4928_v7 = vmul.f32 %v4927_v16, %v4913_v58  ;;  %v4929_v9 = vmul.f32 %v6375_v18, %v4927_v16  ;;  %v4930_v4 = vmul.f32 %v6376_v46, %v4927_v16  ;;  %v4931_v32 = vmul.f32 %v6379_v6, %v4927_v16  ;;  %v6662_v46 = vld [vmem:[%s7325_s6 + $0x4f0] sm:$0xff]   ;;  %v5797_v6 = vld [vmem:[%s7325_s6 + $0x4f8] sm:$0x1] }
 0x209   : > { %v4932_v50 = vmul.f32 %v6380_v13, %v4927_v16  ;;  %v4933_v57 = vmul.f32 %v6383_v36, %v4927_v16  ;;  %v4934_v15 = vmul.f32 %v6384_v22, %v4927_v16  ;;  %v4935_v39 = vmul.f32 %v6387_v33, %v4927_v16  ;;  %v6664_v22 = vld [vmem:[%s7325_s6 + $0x508] sm:$0xff]  }
 0x20a   : > { %v4936_v38 = vmul.f32 %v6388_v60, %v4927_v16  ;;  %v4937_v20 = vmul.f32 %v4927_v16, %v4922_v41  ;;  %v4938_v21 = vmul.f32 %v4927_v16, %v4923_v1  ;;  %v6392_v11 = vunpack.c.h.bf16 %v6658_v56 }
 0x20b   : > { %v6395_v61 = vunpack.c.l.bf16 %v6659_v62  ;;  %v4939_v0 = vadd.f32 %v4928_v7, %v4890_v55  ;;  %v4940_v24 = vadd.f32 %v4929_v9, %v4891_v40  ;;  %v6396_v25 = vunpack.c.h.bf16 %v6659_v62  ;;  %v5810_v55 = vld [vmem:[%s7333_s7 + $0x1d] sm:$0x1]  ;;  %v7591_v9 = vld [vmem:[%s7325_s6 + $0x528] sm:$0xff]  }
 0x20c   : > { %v6399_v27 = vunpack.c.l.bf16 %v6660_v14  ;;  %v4941_v31 = vadd.f32 %v4930_v4, %v4892_v34  ;;  %v4942_v12 = vadd.f32 %v4931_v32, %v4893_v53  ;;  %v4943_v18 = vadd.f32 %v4932_v50, %v4894_v19 }
 0x20d   : > { %v4944_v26 = vadd.f32 %v4933_v57, %v4895_v44  ;;  %v4945_v13 = vadd.f32 %v4934_v15, %v4896_v35  ;;  %v4946_v36 = vadd.f32 %v4935_v39, %v4897_v2  ;;  %v4947_v37 = vadd.f32 %v4936_v38, %v4898_v3  ;;  %v5808_v44 = vld [vmem:[%s7325_s6 + $0x520] sm:$0xf]  ;;  %v5809_v35 = vld [vmem:[%s7325_s6 + $0x524] sm:$0x1] }
 0x20e   : > { %v4948_v49 = vadd.f32 %v4937_v20, %v4899_v5  ;;  %v4949_v33 = vadd.f32 %v4938_v21, %v4900_v47  ;;  %v6400_v17 = vunpack.c.h.bf16 %v6660_v14  ;;  %v6403_v43 = vunpack.c.l.bf16 %v6661_v8 }
 0x20f   : > { %v4975_v45 = vunpack.c.l.bf16 %v5798_v29  ;;  %v6404_v63 = vunpack.c.h.bf16 %v6661_v8  ;;  %v6407_v28 = vunpack.c.l.bf16 %v6662_v46  ;;  %v6408_v10 = vunpack.c.h.bf16 %v6662_v46 }
 0x210   : > { %v4972_v51 = vunpack.c.l.bf16 %v5797_v6  ;;  %v6411_v42 = vunpack.c.l.bf16 %v6663_v48  ;;  %v6412_v60 = vunpack.c.h.bf16 %v6663_v48  ;;  %v6415_v58 = vunpack.c.l.bf16 %v6664_v22  ;;  %v6668_v6 = vld [vmem:[%s7325_s6 + $0x530] sm:$0xff]  }
 0x211   : > { %v4976_v23 = vperm.slane %v4975_v45, 0  ;;  %v6416_v40 = vunpack.c.h.bf16 %v6664_v22  ;;  %v6419_v41 = vunpack.c.l.bf16 %v6665_v30  ;;  %v6420_v1 = vunpack.c.h.bf16 %v6665_v30 }
 0x212   : > { %v6423_v34 = vunpack.c.l.bf16 %v6666_v54  ;;  %v6424_v16 = vunpack.c.h.bf16 %v6666_v54  ;;  %v5011_v2 = vunpack.c.l.bf16 %v5799_v52  ;;  %v5024_v7 = vunpack.c.l.bf16 %v5810_v55 }
 0x213   : > { %v4977_v53 = vmul.f32 %v6391_v59, %v4976_v23  ;;  %v4978_v19 = vmul.f32 %v6392_v11, %v4976_v23  ;;  %v4979_v3 = vmul.f32 %v6395_v61, %v4976_v23  ;;  %v4980_v5 = vmul.f32 %v6396_v25, %v4976_v23 }
 0x214   : > { %v4981_v47 = vmul.f32 %v6399_v27, %v4976_v23  ;;  %v4982_v56 = vmul.f32 %v6400_v17, %v4976_v23  ;;  %v4983_v62 = vmul.f32 %v6403_v43, %v4976_v23  ;;  %v4984_v4 = vmul.f32 %v6404_v63, %v4976_v23 }
 0x215   : > { %v4985_v32 = vmul.f32 %v6407_v28, %v4976_v23  ;;  %v4986_v50 = vmul.f32 %v6408_v10, %v4976_v23  ;;  %v4987_v57 = vmul.f32 %v4976_v23, %v4972_v51  ;;  %v5020_v14 = vunpack.c.l.bf16 %v5808_v44  ;;  %v6671_v23 = vld [vmem:[%s7325_s6 + $0x548] sm:$0xff]  }
 0x216   : > { %v5021_v15 = vunpack.c.l.bf16 %v5809_v35  ;;  %v4988_v39 = vadd.f32 %v4977_v53, %v4939_v0  ;;  %v4989_v38 = vadd.f32 %v4978_v19, %v4940_v24  ;;  %v6427_v20 = vunpack.c.l.bf16 %v7591_v9  ;;  %v6669_v24 = vld [vmem:[%s7325_s6 + $0x538] sm:$0xff]   ;;  %v6674_v44 = vld [vmem:[%s7325_s6 + $0x568] sm:$0xff]  }
 0x217   : > { %v6428_v21 = vunpack.c.h.bf16 %v7591_v9  ;;  %v4990_v59 = vadd.f32 %v4979_v3, %v4941_v31  ;;  %v4991_v11 = vadd.f32 %v4980_v5, %v4942_v12  ;;  %v4992_v61 = vadd.f32 %v4981_v47, %v4943_v18  ;;  %v6670_v12 = vld [vmem:[%s7325_s6 + $0x540] sm:$0xff]   ;;  %v6675_v47 = vld [vmem:[%s7325_s6 + $0x570] sm:$0xff]  }
 0x218   : > { %v5025_v25 = vperm.slane %v5024_v7, 0  ;;  %v4993_v27 = vadd.f32 %v4982_v56, %v4944_v26  ;;  %v4994_v8 = vadd.f32 %v4983_v62, %v4945_v13  ;;  %v4995_v29 = vadd.f32 %v4984_v4, %v4946_v36  ;;  %v5834_v4 = vld [vmem:[%s7333_s7 + $0x1f] sm:$0x1] }
 0x219   : > { %v4996_v46 = vadd.f32 %v4985_v32, %v4947_v37  ;;  %v4997_v48 = vadd.f32 %v4986_v50, %v4948_v49  ;;  %v4998_v22 = vadd.f32 %v4987_v57, %v4949_v33  ;;  %v6431_v26 = vunpack.c.l.bf16 %v6668_v6  ;;  %v5822_v33 = vld [vmem:[%s7333_s7 + $0x1e] sm:$0x1] }
 0x21a   : > { %v5026_v17 = vmul.f32 %v5025_v25, %v5011_v2  ;;  %v5027_v0 = vmul.f32 %v6411_v42, %v5025_v25  ;;  %v5028_v43 = vmul.f32 %v6412_v60, %v5025_v25  ;;  %v5029_v45 = vmul.f32 %v6415_v58, %v5025_v25 }
 0x21b   : > { %v5030_v30 = vmul.f32 %v6416_v40, %v5025_v25  ;;  %v5031_v31 = vmul.f32 %v6419_v41, %v5025_v25  ;;  %v5032_v18 = vmul.f32 %v6420_v1, %v5025_v25  ;;  %v5033_v54 = vmul.f32 %v6423_v34, %v5025_v25  ;;  %v5821_v40 = vld [vmem:[%s7325_s6 + $0x550] sm:$0x1]  ;;  %v6672_v41 = vld [vmem:[%s7325_s6 + $0x558] sm:$0xff]  }
 0x21c   : > { %v5034_v63 = vmul.f32 %v6424_v16, %v5025_v25  ;;  %v5035_v13 = vmul.f32 %v5025_v25, %v5020_v14  ;;  %v5036_v36 = vmul.f32 %v5025_v25, %v5021_v15  ;;  %v6432_v37 = vunpack.c.h.bf16 %v6668_v6  ;;  %v6673_v16 = vld [vmem:[%s7325_s6 + $0x560] sm:$0xff]  }
 0x21d   : > { %v6435_v49 = vunpack.c.l.bf16 %v6669_v24  ;;  %v5037_v28 = vadd.f32 %v5026_v17, %v4988_v39  ;;  %v5038_v10 = vadd.f32 %v5027_v0, %v4989_v38  ;;  %v6436_v51 = vunpack.c.h.bf16 %v6669_v24  ;;  %v5823_v38 = vld [vmem:[%s7325_s6 + $0x554] sm:$0xf] }
 0x21e   : > { %v6439_v52 = vunpack.c.l.bf16 %v6670_v12  ;;  %v5039_v42 = vadd.f32 %v5028_v43, %v4990_v59  ;;  %v5040_v60 = vadd.f32 %v5029_v45, %v4991_v11  ;;  %v5041_v58 = vadd.f32 %v5030_v30, %v4992_v61 }
 0x21f   : > { %v5042_v55 = vadd.f32 %v5031_v31, %v4993_v27  ;;  %v5043_v1 = vadd.f32 %v5032_v18, %v4994_v8  ;;  %v5044_v34 = vadd.f32 %v5033_v54, %v4995_v29  ;;  %v5045_v53 = vadd.f32 %v5034_v63, %v4996_v46  ;;  %v5832_v8 = vld [vmem:[%s7325_s6 + $0x578] sm:$0xf]  ;;  %v5833_v29 = vld [vmem:[%s7325_s6 + $0x57c] sm:$0x1] }
 0x220   : > { %v5073_v19 = vunpack.c.l.bf16 %v5822_v33  ;;  %v5046_v35 = vadd.f32 %v5035_v13, %v4997_v48  ;;  %v5047_v2 = vadd.f32 %v5036_v36, %v4998_v22  ;;  %v6440_v3 = vunpack.c.h.bf16 %v6670_v12 }
 0x221   : > { %v6443_v5 = vunpack.c.l.bf16 %v6671_v23  ;;  %v6444_v7 = vunpack.c.h.bf16 %v6671_v23  ;;  %v5070_v9 = vunpack.c.l.bf16 %v5821_v40  ;;  %v6447_v62 = vunpack.c.l.bf16 %v6672_v41  ;;  %v6676_v23 = vld [vmem:[%s7325_s6 + $0x580] sm:$0xff]  }
 0x222   : > { %v5074_v56 = vperm.slane %v5073_v19, 0  ;;  %v6448_v32 = vunpack.c.h.bf16 %v6672_v41  ;;  %v6451_v50 = vunpack.c.l.bf16 %v6673_v16  ;;  %v6452_v57 = vunpack.c.h.bf16 %v6673_v16 }
 0x223   : > { %v6455_v14 = vunpack.c.l.bf16 %v6674_v44  ;;  %v6456_v59 = vunpack.c.h.bf16 %v6674_v44  ;;  %v6459_v11 = vunpack.c.l.bf16 %v6675_v47  ;;  %v5122_v46 = vunpack.c.l.bf16 %v5834_v4 }
 0x224   : > { %v5075_v15 = vmul.f32 %v6427_v20, %v5074_v56  ;;  %v5076_v39 = vmul.f32 %v6428_v21, %v5074_v56  ;;  %v5077_v61 = vmul.f32 %v6431_v26, %v5074_v56  ;;  %v5078_v25 = vmul.f32 %v6432_v37, %v5074_v56 }
 0x225   : > { %v5079_v27 = vmul.f32 %v6435_v49, %v5074_v56  ;;  %v5080_v6 = vmul.f32 %v6436_v51, %v5074_v56  ;;  %v5081_v48 = vmul.f32 %v6439_v52, %v5074_v56  ;;  %v5082_v22 = vmul.f32 %v6440_v3, %v5074_v56 }
 0x226   : > { %v5083_v17 = vmul.f32 %v6443_v5, %v5074_v56  ;;  %v5084_v0 = vmul.f32 %v6444_v7, %v5074_v56  ;;  %v5085_v24 = vmul.f32 %v5074_v56, %v5070_v9  ;;  %v6460_v43 = vunpack.c.h.bf16 %v6675_v47  ;;  %v6679_v47 = vld [vmem:[%s7325_s6 + $0x598] sm:$0xff]   ;;  %v5846_v7 = vld [vmem:[%s7333_s7 + $0x20] sm:$0x1] }
 0x227   : > { %v5109_v45 = vunpack.c.l.bf16 %v5823_v38  ;;  %v5086_v30 = vadd.f32 %v5075_v15, %v5037_v28  ;;  %v5087_v20 = vadd.f32 %v5076_v39, %v5038_v10  ;;  %v5118_v21 = vunpack.c.l.bf16 %v5832_v8  ;;  %v6677_v28 = vld [vmem:[%s7325_s6 + $0x588] sm:$0xff]   ;;  %v6681_v38 = vld [vmem:[%s7325_s6 + $0x5b0] sm:$0xff]   ;;  %v6683_v8 = vld [vmem:[%s7325_s6 + $0x5c0] sm:$0xff]  }
 0x228   : > { %v5119_v31 = vunpack.c.l.bf16 %v5833_v29  ;;  %v5088_v12 = vadd.f32 %v5077_v61, %v5039_v42  ;;  %v5089_v18 = vadd.f32 %v5078_v25, %v5040_v60  ;;  %v5090_v54 = vadd.f32 %v5079_v27, %v5041_v58  ;;  %v6678_v60 = vld [vmem:[%s7325_s6 + $0x590] sm:$0xff]   ;;  %v6684_v29 = vld [vmem:[%s7325_s6 + $0x5c8] sm:$0xff]  }
 0x229   : > { %v5123_v63 = vperm.slane %v5122_v46, 0  ;;  %v5091_v26 = vadd.f32 %v5080_v6, %v5042_v55  ;;  %v5092_v13 = vadd.f32 %v5081_v48, %v5043_v1  ;;  %v5093_v36 = vadd.f32 %v5082_v22, %v5044_v34 }
 0x22a   : > { %v5094_v37 = vadd.f32 %v5083_v17, %v5045_v53  ;;  %v5095_v49 = vadd.f32 %v5084_v0, %v5046_v35  ;;  %v5096_v33 = vadd.f32 %v5085_v24, %v5047_v2  ;;  %v6463_v34 = vunpack.c.l.bf16 %v6676_v23  ;;  %v5847_v17 = vld [vmem:[%s7325_s6 + $0x5ac] sm:$0xf] }
 0x22b   : > { %v5124_v51 = vmul.f32 %v5123_v63, %v5109_v45  ;;  %v5125_v52 = vmul.f32 %v6447_v62, %v5123_v63  ;;  %v5126_v40 = vmul.f32 %v6448_v32, %v5123_v63  ;;  %v5127_v10 = vmul.f32 %v6451_v50, %v5123_v63  ;;  %v6680_v32 = vld [vmem:[%s7325_s6 + $0x5a0] sm:$0xff]   ;;  %v5845_v50 = vld [vmem:[%s7325_s6 + $0x5a8] sm:$0x1] }
 0x22c   : > { %v5128_v41 = vmul.f32 %v6452_v57, %v5123_v63  ;;  %v5129_v42 = vmul.f32 %v6455_v14, %v5123_v63  ;;  %v5130_v58 = vmul.f32 %v6456_v59, %v5123_v63  ;;  %v5131_v19 = vmul.f32 %v6459_v11, %v5123_v63  ;;  %v6682_v59 = vld [vmem:[%s7325_s6 + $0x5b8] sm:$0xff]  }
 0x22d   : > { %v5132_v16 = vmul.f32 %v6460_v43, %v5123_v63  ;;  %v5133_v55 = vmul.f32 %v5123_v63, %v5118_v21  ;;  %v5134_v1 = vmul.f32 %v5123_v63, %v5119_v31  ;;  %v6464_v53 = vunpack.c.h.bf16 %v6676_v23 }
 0x22e   : > { %v6467_v44 = vunpack.c.l.bf16 %v6677_v28  ;;  %v5135_v35 = vadd.f32 %v5124_v51, %v5086_v30  ;;  %v5136_v2 = vadd.f32 %v5125_v52, %v5087_v20  ;;  %v6468_v3 = vunpack.c.h.bf16 %v6677_v28  ;;  %v5858_v30 = vld [vmem:[%s7333_s7 + $0x21] sm:$0x1]  ;;  %v7625_v52 = vld [vmem:[%s7325_s6 + $0x5d8] sm:$0xff]  }
 0x22f   : > { %v6471_v5 = vunpack.c.l.bf16 %v6678_v60  ;;  %v5137_v9 = vadd.f32 %v5126_v40, %v5088_v12  ;;  %v5138_v56 = vadd.f32 %v5127_v10, %v5089_v18  ;;  %v5139_v62 = vadd.f32 %v5128_v41, %v5090_v54 }
 0x230   : > { %v5140_v4 = vadd.f32 %v5129_v42, %v5091_v26  ;;  %v5141_v57 = vadd.f32 %v5130_v58, %v5092_v13  ;;  %v5142_v14 = vadd.f32 %v5131_v19, %v5093_v36  ;;  %v5143_v15 = vadd.f32 %v5132_v16, %v5094_v37  ;;  %v5856_v26 = vld [vmem:[%s7325_s6 + $0x5d0] sm:$0xf]  ;;  %v5857_v13 = vld [vmem:[%s7325_s6 + $0x5d4] sm:$0x1] }
 0x231   : > { %v5144_v39 = vadd.f32 %v5133_v55, %v5095_v49  ;;  %v5145_v11 = vadd.f32 %v5134_v1, %v5096_v33  ;;  %v6472_v61 = vunpack.c.h.bf16 %v6678_v60  ;;  %v6475_v25 = vunpack.c.l.bf16 %v6679_v47 }
 0x232   : > { %v5171_v27 = vunpack.c.l.bf16 %v5846_v7  ;;  %v6476_v46 = vunpack.c.h.bf16 %v6679_v47  ;;  %v6479_v6 = vunpack.c.l.bf16 %v6680_v32  ;;  %v6480_v48 = vunpack.c.h.bf16 %v6680_v32 }
 0x233   : > { %v5168_v22 = vunpack.c.l.bf16 %v5845_v50  ;;  %v6483_v24 = vunpack.c.l.bf16 %v6681_v38  ;;  %v6484_v43 = vunpack.c.h.bf16 %v6681_v38  ;;  %v6487_v45 = vunpack.c.l.bf16 %v6682_v59  ;;  %v6686_v50 = vld [vmem:[%s7325_s6 + $0x5e0] sm:$0xff]  }
 0x234   : > { %v5172_v0 = vperm.slane %v5171_v27, 0  ;;  %v6488_v20 = vunpack.c.h.bf16 %v6682_v59  ;;  %v6491_v21 = vunpack.c.l.bf16 %v6683_v8  ;;  %v6492_v31 = vunpack.c.h.bf16 %v6683_v8 }
 0x235   : > { %v6495_v12 = vunpack.c.l.bf16 %v6684_v29  ;;  %v6496_v63 = vunpack.c.h.bf16 %v6684_v29  ;;  %v5207_v36 = vunpack.c.l.bf16 %v5847_v17  ;;  %v5220_v51 = vunpack.c.l.bf16 %v5858_v30 }
 0x236   : > { %v5173_v18 = vmul.f32 %v6463_v34, %v5172_v0  ;;  %v5174_v54 = vmul.f32 %v6464_v53, %v5172_v0  ;;  %v5175_v37 = vmul.f32 %v6467_v44, %v5172_v0  ;;  %v5176_v49 = vmul.f32 %v6468_v3, %v5172_v0 }
 0x237   : > { %v5177_v33 = vmul.f32 %v6471_v5, %v5172_v0  ;;  %v5178_v23 = vmul.f32 %v6472_v61, %v5172_v0  ;;  %v5179_v28 = vmul.f32 %v6475_v25, %v5172_v0  ;;  %v5180_v40 = vmul.f32 %v6476_v46, %v5172_v0 }
 0x238   : > { %v5181_v10 = vmul.f32 %v6479_v6, %v5172_v0  ;;  %v5182_v41 = vmul.f32 %v6480_v48, %v5172_v0  ;;  %v5183_v42 = vmul.f32 %v5172_v0, %v5168_v22  ;;  %v5216_v60 = vunpack.c.l.bf16 %v5856_v26  ;;  %v6689_v0 = vld [vmem:[%s7325_s6 + $0x5f8] sm:$0xff]  }
 0x239   : > { %v5217_v58 = vunpack.c.l.bf16 %v5857_v13  ;;  %v5184_v19 = vadd.f32 %v5173_v18, %v5135_v35  ;;  %v5185_v16 = vadd.f32 %v5174_v54, %v5136_v2  ;;  %v6499_v55 = vunpack.c.l.bf16 %v7625_v52  ;;  %v6687_v2 = vld [vmem:[%s7325_s6 + $0x5e8] sm:$0xff]   ;;  %v6692_v26 = vld [vmem:[%s7325_s6 + $0x618] sm:$0xff]  }
 0x23a   : > { %v6500_v1 = vunpack.c.h.bf16 %v7625_v52  ;;  %v5186_v34 = vadd.f32 %v5175_v37, %v5137_v9  ;;  %v5187_v53 = vadd.f32 %v5176_v49, %v5138_v56  ;;  %v5188_v44 = vadd.f32 %v5177_v33, %v5139_v62  ;;  %v6688_v56 = vld [vmem:[%s7325_s6 + $0x5f0] sm:$0xff]   ;;  %v6693_v33 = vld [vmem:[%s7325_s6 + $0x620] sm:$0xff]  }
 0x23b   : > { %v5221_v3 = vperm.slane %v5220_v51, 0  ;;  %v5189_v5 = vadd.f32 %v5178_v23, %v5140_v4  ;;  %v5190_v47 = vadd.f32 %v5179_v28, %v5141_v57  ;;  %v5191_v7 = vadd.f32 %v5180_v40, %v5142_v14  ;;  %v5882_v40 = vld [vmem:[%s7333_s7 + $0x23] sm:$0x1] }
 0x23c   : > { %v5192_v32 = vadd.f32 %v5181_v10, %v5143_v15  ;;  %v5193_v38 = vadd.f32 %v5182_v41, %v5144_v39  ;;  %v5194_v59 = vadd.f32 %v5183_v42, %v5145_v11  ;;  %v6503_v4 = vunpack.c.l.bf16 %v6686_v50  ;;  %v5870_v11 = vld [vmem:[%s7333_s7 + $0x22] sm:$0x1] }
 0x23d   : > { %v5222_v61 = vmul.f32 %v5221_v3, %v5207_v36  ;;  %v5223_v35 = vmul.f32 %v6483_v24, %v5221_v3  ;;  %v5224_v25 = vmul.f32 %v6484_v43, %v5221_v3  ;;  %v5225_v27 = vmul.f32 %v6487_v45, %v5221_v3 }
 0x23e   : > { %v5226_v8 = vmul.f32 %v6488_v20, %v5221_v3  ;;  %v5227_v9 = vmul.f32 %v6491_v21, %v5221_v3  ;;  %v5228_v62 = vmul.f32 %v6492_v31, %v5221_v3  ;;  %v5229_v29 = vmul.f32 %v6495_v12, %v5221_v3  ;;  %v5869_v20 = vld [vmem:[%s7325_s6 + $0x600] sm:$0x1]  ;;  %v6690_v21 = vld [vmem:[%s7325_s6 + $0x608] sm:$0xff]  }
 0x23f   : > { %v5230_v46 = vmul.f32 %v6496_v63, %v5221_v3  ;;  %v5231_v57 = vmul.f32 %v5221_v3, %v5216_v60  ;;  %v5232_v14 = vmul.f32 %v5221_v3, %v5217_v58  ;;  %v6504_v15 = vunpack.c.h.bf16 %v6686_v50  ;;  %v6691_v63 = vld [vmem:[%s7325_s6 + $0x610] sm:$0xff]   ;;  %v5881_v3 = vld [vmem:[%s7325_s6 + $0x62c] sm:$0x1] }
 0x240   : > { %v6507_v39 = vunpack.c.l.bf16 %v6687_v2  ;;  %v5233_v6 = vadd.f32 %v5222_v61, %v5184_v19  ;;  %v5234_v48 = vadd.f32 %v5223_v35, %v5185_v16  ;;  %v6508_v22 = vunpack.c.h.bf16 %v6687_v2  ;;  %v5871_v16 = vld [vmem:[%s7325_s6 + $0x604] sm:$0xf] }
 0x241   : > { %v6511_v17 = vunpack.c.l.bf16 %v6688_v56  ;;  %v5235_v24 = vadd.f32 %v5224_v25, %v5186_v34  ;;  %v5236_v43 = vadd.f32 %v5225_v27, %v5187_v53  ;;  %v5237_v45 = vadd.f32 %v5226_v8, %v5188_v44  ;;  %v5880_v44 = vld [vmem:[%s7325_s6 + $0x628] sm:$0xf] }
 0x242   : > { %v5238_v30 = vadd.f32 %v5227_v9, %v5189_v5  ;;  %v5239_v31 = vadd.f32 %v5228_v62, %v5190_v47  ;;  %v5240_v12 = vadd.f32 %v5229_v29, %v5191_v7  ;;  %v5241_v18 = vadd.f32 %v5230_v46, %v5192_v32 }
 0x243   : > { %v5269_v54 = vunpack.c.l.bf16 %v5870_v11  ;;  %v7638_v13 = vadd.f32 %v5231_v57, %v5193_v38  ;;  %v5243_v36 = vadd.f32 %v5232_v14, %v5194_v59  ;;  %v6512_v37 = vunpack.c.h.bf16 %v6688_v56 }
 0x244   : > { %v6515_v49 = vunpack.c.l.bf16 %v6689_v0  ;;  %v6516_v51 = vunpack.c.h.bf16 %v6689_v0  ;;  %v5266_v52 = vunpack.c.l.bf16 %v5869_v20  ;;  %v6519_v28 = vunpack.c.l.bf16 %v6690_v21 }
 0x245   : > { %v5270_v23 = vperm.slane %v5269_v54, 0  ;;  %v6520_v10 = vunpack.c.h.bf16 %v6690_v21  ;;  %v6523_v41 = vunpack.c.l.bf16 %v6691_v63  ;;  %v6524_v42 = vunpack.c.h.bf16 %v6691_v63 }
 0x246   : > { %v6527_v60 = vunpack.c.l.bf16 %v6692_v26  ;;  %v6528_v34 = vunpack.c.h.bf16 %v6692_v26  ;;  %v6531_v53 = vunpack.c.l.bf16 %v6693_v33  ;;  %v5318_v32 = vunpack.c.l.bf16 %v5882_v40 }
 0x247   : > { %v5271_v58 = vmul.f32 %v6499_v55, %v5270_v23  ;;  %v5272_v19 = vmul.f32 %v6500_v1, %v5270_v23  ;;  %v5273_v5 = vmul.f32 %v6503_v4, %v5270_v23  ;;  %v5274_v47 = vmul.f32 %v6504_v15, %v5270_v23 }
 0x248   : > { %v5275_v7 = vmul.f32 %v6507_v39, %v5270_v23  ;;  %v5276_v50 = vmul.f32 %v6508_v22, %v5270_v23  ;;  %v5277_v38 = vmul.f32 %v6511_v17, %v5270_v23  ;;  %v5278_v55 = vmul.f32 %v6512_v37, %v5270_v23 }
 0x249   : > { %v5279_v1 = vmul.f32 %v6515_v49, %v5270_v23  ;;  %v6532_v59 = vunpack.c.h.bf16 %v6693_v33  ;;  %v5305_v61 = vunpack.c.l.bf16 %v5871_v16  ;;  %v5314_v35 = vunpack.c.l.bf16 %v5880_v44 }
 0x24a   : > { %v5315_v2 = vunpack.c.l.bf16 %v5881_v3  ;;  %v5280_v25 = vmul.f32 %v6516_v51, %v5270_v23  ;;  %v5281_v27 = vmul.f32 %v5270_v23, %v5266_v52  ;;  %v5282_v8 = vadd.f32 %v5271_v58, %v5233_v6 }
 0x24b   : > { %v5283_v9 = vadd.f32 %v5272_v19, %v5234_v48  ;;  %v5284_v56 = vadd.f32 %v5273_v5, %v5235_v24  ;;  %v5285_v62 = vadd.f32 %v5274_v47, %v5236_v43  ;;  %v5286_v29 = vadd.f32 %v5275_v7, %v5237_v45  ;;  %v5367_v19 = vld [vmem:[%s3579_s12 + $0x28] sm:$0x1] }
 0x24c   : > { %v5319_v46 = vperm.slane %v5318_v32, 0  ;;  %v5287_v4 = vadd.f32 %v5276_v50, %v5238_v30  ;;  %v5288_v57 = vadd.f32 %v5277_v38, %v5239_v31  ;;  %v5289_v14 = vadd.f32 %v5278_v55, %v5240_v12 }
 0x24d   : > { %v5290_v15 = vadd.f32 %v5279_v1, %v5241_v18  ;;  %v5292_v0 = vadd.f32 %v5281_v27, %v5243_v36  ;;  %v5291_v31 = vadd.f32 %v5280_v25, %v7638_v13  ;;  %vm5365_vm2 = vsmask.f32 256 }
 0x24e   : > { %v5320_v39 = vmul.f32 %v5319_v46, %v5305_v61  ;;  %v5321_v11 = vmul.f32 %v6519_v28, %v5319_v46  ;;  %v5322_v22 = vmul.f32 %v6520_v10, %v5319_v46  ;;  %v5323_v17 = vmul.f32 %v6523_v41, %v5319_v46  ;;  %vm5366_vm3 = vmand %vm5364_vm1, %vm5365_vm2 }
 0x24f   : > { %v5324_v6 = vmul.f32 %v6524_v42, %v5319_v46  ;;  %v5325_v48 = vmul.f32 %v6527_v60, %v5319_v46  ;;  %v5326_v20 = vmul.f32 %v6528_v34, %v5319_v46  ;;  %v5327_v21 = vmul.f32 %v6531_v53, %v5319_v46 }
 0x250   : > { %v5328_v54 = vmul.f32 %v6532_v59, %v5319_v46  ;;  %v5330_v24 = vmul.f32 %v5319_v46, %v5315_v2  ;;  %v5331_v63 = vadd.f32 %v5320_v39, %v5282_v8  ;;  %v5332_v43 = vadd.f32 %v5321_v11, %v5283_v9 }
 0x251   : > { %v5333_v45 = vadd.f32 %v5322_v22, %v5284_v56  ;;  %v5334_v26 = vadd.f32 %v5323_v17, %v5285_v62  ;;  %v5335_v30 = vadd.f32 %v5324_v6, %v5286_v29  ;;  %v5329_v12 = vmul.f32 %v5319_v46, %v5314_v35 }
 0x252   : > { %v5336_v18 = vadd.f32 %v5325_v48, %v5287_v4  ;;  %v5337_v37 = vadd.f32 %v5326_v20, %v5288_v57  ;;  %v5342_v49 = vpack.c.bf16 %v5331_v63, %v5331_v63  ;;  %v5343_v36 = vpack.c.bf16 %v5332_v43, %v5332_v43 }
 0x253   : > { %v5338_v33 = vadd.f32 %v5327_v21, %v5289_v14  ;;  %v5341_v51 = vadd.f32 %v5330_v24, %v5292_v0  ;;  %v5344_v52 = vpack.c.bf16 %v5333_v45, %v5333_v45  ;;  %v5345_v23 = vpack.c.bf16 %v5334_v26, %v5334_v26 }
 0x254   : > { %v5339_v28 = vadd.f32 %v5328_v54, %v5290_v15  ;;  %v5346_v40 = vpack.c.bf16 %v5335_v30, %v5335_v30  ;;  %5354 = vst.msk [vmem:[%s3579_s12] sm:$0xf] %vm5353_vm0, %v5342_v49  ;;  %v5340_v10 = vadd.f32 %v5329_v12, %v5291_v31  ;;  %v5347_v13 = vpack.c.bf16 %v5336_v18, %v5336_v18 }
 0x255   : > { %5355 = vst.msk [vmem:[%s3579_s12 + $0x4] sm:$0xf] %vm5353_vm0, %v5343_v36  ;;  %v5348_v41 = vpack.c.bf16 %v5337_v37, %v5337_v37  ;;  %v5349_v42 = vpack.c.bf16 %v5338_v33, %v5338_v33  ;;  %v5352_v60 = vpack.c.bf16 %v5341_v51, %v5341_v51 }
 0x256   : > { %5356 = vst.msk [vmem:[%s3579_s12 + $0x8] sm:$0xf] %vm5353_vm0, %v5344_v52  ;;  %v5350_v58 = vpack.c.bf16 %v5339_v28, %v5339_v28  ;;  %v5351_v16 = vpack.c.bf16 %v5340_v10, %v5340_v10 }
 0x257   : > { %5357 = vst.msk [vmem:[%s3579_s12 + $0xc] sm:$0xf] %vm5353_vm0, %v5345_v23  ;;  %v5368_v34 = vsel %vm5366_vm3, %v5352_v60, %v5367_v19 }
 0x258   : > { %5358 = vst.msk [vmem:[%s3579_s12 + $0x10] sm:$0xf] %vm5353_vm0, %v5346_v40 }
 0x259   : > { %5359 = vst.msk [vmem:[%s3579_s12 + $0x14] sm:$0xf] %vm5353_vm0, %v5347_v13 }
 0x25a   : > { %5360 = vst.msk [vmem:[%s3579_s12 + $0x18] sm:$0xf] %vm5353_vm0, %v5348_v41 }
 0x25b   : > { %5361 = vst.msk [vmem:[%s3579_s12 + $0x1c] sm:$0xf] %vm5353_vm0, %v5349_v42 }
 0x25c   : > { %5362 = vst.msk [vmem:[%s3579_s12 + $0x20] sm:$0xf] %vm5353_vm0, %v5350_v58 }
 0x25d   : > { %5363 = vst.msk [vmem:[%s3579_s12 + $0x24] sm:$0xf] %vm5353_vm0, %v5351_v16 }
 0x25e   : > { %5369 = vst [vmem:[%s3579_s12 + $0x28] sm:$0x1] %v5368_v34 }
 0x25f PF: > { %p9_p9 = scmp.ge.s32.totalorder %s6780_s13, 6   ;;  %s7687_s9 = smov %s6742_s10 }
 0x260   : > { %s7688_s10 = smov %s6789_s16  ;;  %s7689_s11 = smov %s6780_s13 }
 0x261   :  { %11 = sbr.rel (!%p9_p9) target bundleno = 2 (0x2), region = 238 }

// kernel: depthwise_ban_forward.7
= control target key start
LH: loop header
LB: loop body
LE: loop exit
PB: predicated region body
PF: predicated region fallthrough
CT: control target
= control target key end

     0   :  { %s2391_s21 = smov 0   ;;  %s3088_s0 = inlined_call_operand.vmem [shape: bf16[2,176,576], index: 0, kind: input, shape index: {}]   ;;  %s3089_s1 = inlined_call_operand.vmem [shape: bf16[2,576,64], index: 1, kind: input, shape index: {}]   ;;  %s3090_s2 = inlined_call_operand.vmem [shape: f32[2,1,64], index: 2, kind: input, shape index: {}]   ;;  %s3091_s3 = inlined_call_operand.vmem [shape: f32[64,64], index: 3, kind: input, shape index: {}]   ;;  %s3092_s4 = inlined_call_operand.vmem [shape: f32[2,1,64], index: 4, kind: input, shape index: {}]   ;;  %s3093_s5 = inlined_call_operand.vmem [shape: f32[2,1,64], index: 5, kind: input, shape index: {}]   ;;  %s3094_s6 = inlined_call_operand.vmem [shape: bf16[2,176,64], index: 6, kind: output, shape index: {}]  }
   0x1 LB: > { %s1827_s22 = sadd.s32 4294967295, %s2353_s21   ;;  %p1831_p0 = scmp.ge.s32.totalorder %s2353_s21, 1  ;;  %s2353_s21 = sphi %s2391_s21, %s16_s21  }
   0x2   : > { %p246_p1 = scmp.lt.s32.totalorder %s2353_s21, 3 }
   0x4   : > { %p247_p2 = pnand %p1831_p0, %p246_p1 }
   0x6   : > { %250 = sbr.rel (%p247_p2) target bundleno = 782 (0x30e), region = 44 }
   0xb   : > { %p290_p3 = scmp.lt.s32.totalorder %s1827_s22, 1  ;;  %vm948_vm0 = vcmask 523264   ;;  %vm1411_vm2 = vcmask 1041409   ;;  %vm1710_vm7 = vcmask 519168  }
   0xd   : > { %s3104_s22 = smov (!%p290_p3, %s1827_s22), 1 }
   0xe   : > { %s2330_s23 = smul.u32 288, %s3104_s22  ;;  %s302_s30 = scalar_lea.vmem %s3090_s2, %s3104_s22 }
   0xf   : > { %s2329_s27 = smul.u32 440, %s3104_s22  ;;  %s308_s8 = scalar_lea.vmem %s3093_s5, %s3104_s22 }
  0x10   : > { %s2405_s26 = scalar_lea.vmem %s3089_s1, %s2330_s23  ;;  %s305_s11 = scalar_lea.vmem %s3092_s4, %s3104_s22 }
  0x11   : > { %v2276_v0 = vld [vmem:[%s2405_s26 + $0x38] sm:$0xff]  ;;  %v2275_v1 = vld [vmem:[%s2405_s26 + $0x30] sm:$0xff]  ;;  %v2274_v2 = vld [vmem:[%s2405_s26 + $0x28] sm:$0xff]  ;;  %s2421_s9 = scalar_lea.vmem %s3088_s0, %s2329_s27  ;;  %s2331_s14 = smul.u32 88, %s3104_s22 }
  0x12   : > { %2305 = vmatpush.bf16.msra.mxu1 %v2276_v0  ;;  %2306 = vmatpush.bf16.msra.mxu2 %v2276_v0  ;;  %v2273_v3 = vld [vmem:[%s2405_s26 + $0x20] sm:$0xff]  ;;  %v2272_v4 = vld [vmem:[%s2405_s26 + $0x18] sm:$0xff]  ;;  %v2271_v5 = vld [vmem:[%s2405_s26 + $0x10] sm:$0xff] }
  0x13   : > { %2307 = vmatpush.bf16.msra.mxu3 %v2276_v0  ;;  %982 = vmatpush.bf16.msra.mxu0 %v2276_v0  ;;  %v2270_v6 = vld [vmem:[%s2405_s26 + $0x8] sm:$0xff]  ;;  %v1897_v7 = vld [vmem:[%s2421_s9 + $0x78] sm:$0xf]  ;;  %v2269_v10 = vld [vmem:[%s2405_s26] sm:$0xff]  ;;  %s3010_s16 = scalar_lea.vmem %s3094_s6, %s2331_s14 }
  0x14   : > { %v2231_v8 = vld [vmem:[%s2421_s9 + $0x88] sm:$0xf0]  ;;  %v1937_v9 = vld [vmem:[%s2421_s9 + $0xc8] sm:$0xf]  ;;  %v2241_v11 = vld [vmem:[%s2421_s9 + $0xd8] sm:$0xf0] }
  0x15   : > { %v1997_v12 = vld [vmem:[%s2421_s9 + $0x140] sm:$0xf]  ;;  %v2256_v13 = vld [vmem:[%s2421_s9 + $0x150] sm:$0xf0]  ;;  %v2292_v16 = vld [vmem:[%s2405_s26 + $0xb8] sm:$0xff]  ;;  %v1898_v18 = vor.u32 %v2231_v8, %v1897_v7  ;;  %v1938_v19 = vor.u32 %v2241_v11, %v1937_v9 }
  0x16   : > { %2308 = vmatpush.bf16.msra.mxu1 %v2275_v1  ;;  %2309 = vmatpush.bf16.msra.mxu2 %v2275_v1  ;;  %v1837_v14 = vld [vmem:[%s2421_s9] sm:$0xf]  ;;  %v2216_v15 = vld [vmem:[%s2421_s9 + $0x10] sm:$0xf0]  ;;  %v2284_v17 = vld [vmem:[%s2405_s26 + $0x78] sm:$0xff]  ;;  %v1998_v20 = vor.u32 %v2256_v13, %v1997_v12 }
  0x17   : > { %2310 = vmatpush.bf16.msra.mxu3 %v2275_v1  ;;  %983 = vmatpush.bf16.msra.mxu0 %v2275_v1  ;;  %v1838_v21 = vor.u32 %v2216_v15, %v1837_v14  ;;  %v2300_v22 = vld [vmem:[%s2405_s26 + $0xf8] sm:$0xff]  ;;  %v2283_v24 = vld [vmem:[%s2405_s26 + $0x70] sm:$0xff]  ;;  %v2282_v28 = vld [vmem:[%s2405_s26 + $0x68] sm:$0xff] }
  0x18   : > { %v2304_v23 = vld [vmem:[%s2405_s26 + $0x118] sm:$0xff]  ;;  %v2291_v25 = vld [vmem:[%s2405_s26 + $0xb0] sm:$0xff]  ;;  %v2290_v29 = vld [vmem:[%s2405_s26 + $0xa8] sm:$0xff] }
  0x19   : > { %v2299_v26 = vld [vmem:[%s2405_s26 + $0xf0] sm:$0xff]  ;;  %v2298_v30 = vld [vmem:[%s2405_s26 + $0xe8] sm:$0xff]  ;;  %v2281_v32 = vld [vmem:[%s2405_s26 + $0x60] sm:$0xff] }
  0x1a   : > { %2311 = vmatpush.bf16.msra.mxu1 %v2274_v2  ;;  %2312 = vmatpush.bf16.msra.mxu2 %v2274_v2  ;;  %v2303_v27 = vld [vmem:[%s2405_s26 + $0x110] sm:$0xff]  ;;  %v2302_v31 = vld [vmem:[%s2405_s26 + $0x108] sm:$0xff]  ;;  %v1917_v33 = vld [vmem:[%s2421_s9 + $0xa0] sm:$0xf] }
  0x1b   : > { %2313 = vmatpush.bf16.msra.mxu3 %v2274_v2  ;;  %984 = vmatpush.bf16.msra.mxu0 %v2274_v2  ;;  %v2289_v34 = vld [vmem:[%s2405_s26 + $0xa0] sm:$0xff]  ;;  %v2236_v35 = vld [vmem:[%s2421_s9 + $0xb0] sm:$0xf0]  ;;  %v1957_v36 = vld [vmem:[%s2421_s9 + $0xf0] sm:$0xf] }
  0x1c   : > { %v2246_v37 = vld [vmem:[%s2421_s9 + $0x100] sm:$0xf0]  ;;  %v2017_v38 = vld [vmem:[%s2421_s9 + $0x168] sm:$0xf]  ;;  %v2261_v39 = vld [vmem:[%s2421_s9 + $0x178] sm:$0xf0]  ;;  %v1918_v46 = vor.u32 %v2236_v35, %v1917_v33 }
  0x1d   : > { %v1857_v40 = vld [vmem:[%s2421_s9 + $0x28] sm:$0xf]  ;;  %v2221_v41 = vld [vmem:[%s2421_s9 + $0x38] sm:$0xf0]  ;;  %v2297_v42 = vld [vmem:[%s2405_s26 + $0xe0] sm:$0xff]  ;;  %v1958_v47 = vor.u32 %v2246_v37, %v1957_v36  ;;  %v2018_v48 = vor.u32 %v2261_v39, %v2017_v38 }
  0x1e   : > { %2314 = vmatpush.bf16.msra.mxu1 %v2273_v3  ;;  %2315 = vmatpush.bf16.msra.mxu2 %v2273_v3  ;;  %v2301_v43 = vld [vmem:[%s2405_s26 + $0x100] sm:$0xff]  ;;  %v2280_v44 = vld [vmem:[%s2405_s26 + $0x58] sm:$0xff]  ;;  %v1858_v49 = vor.u32 %v2221_v41, %v1857_v40  ;;  %v2279_v51 = vld [vmem:[%s2405_s26 + $0x50] sm:$0xff] }
  0x1f   : > { %2316 = vmatpush.bf16.msra.mxu3 %v2273_v3  ;;  %985 = vmatpush.bf16.msra.mxu0 %v2273_v3  ;;  %v2288_v45 = vld [vmem:[%s2405_s26 + $0x98] sm:$0xff]  ;;  %v2287_v52 = vld [vmem:[%s2405_s26 + $0x90] sm:$0xff]  ;;  %v2278_v54 = vld [vmem:[%s2405_s26 + $0x48] sm:$0xff] }
  0x20   : > { %v2296_v50 = vld [vmem:[%s2405_s26 + $0xd8] sm:$0xff]  ;;  %v2295_v53 = vld [vmem:[%s2405_s26 + $0xd0] sm:$0xff]  ;;  %v2286_v55 = vld [vmem:[%s2405_s26 + $0x88] sm:$0xff] }
  0x21   : > { %v2294_v56 = vld [vmem:[%s2405_s26 + $0xc8] sm:$0xff]  ;;  %v2277_v57 = vld [vmem:[%s2405_s26 + $0x40] sm:$0xff]  ;;  %v1977_v59 = vld [vmem:[%s2421_s9 + $0x118] sm:$0xf] }
  0x22   : > { %2317 = vmatpush.bf16.msra.mxu1 %v2272_v4  ;;  %2318 = vmatpush.bf16.msra.mxu2 %v2272_v4  ;;  %v2285_v58 = vld [vmem:[%s2405_s26 + $0x80] sm:$0xff]  ;;  %v2251_v60 = vld [vmem:[%s2421_s9 + $0x128] sm:$0xf0]  ;;  %v2037_v61 = vld [vmem:[%s2421_s9 + $0x190] sm:$0xf] }
  0x23   : > { %2319 = vmatpush.bf16.msra.mxu3 %v2272_v4  ;;  %986 = vmatpush.bf16.msra.mxu0 %v2272_v4  ;;  %v2266_v62 = vld [vmem:[%s2421_s9 + $0x1a0] sm:$0xf0]  ;;  %v1839_v0 = vld [vmem:[%s2421_s9 + $0x14] sm:$0xf0]  ;;  %v1877_v1 = vld [vmem:[%s2421_s9 + $0x50] sm:$0xf]  ;;  %v1978_v4 = vor.u32 %v2251_v60, %v1977_v59 }
  0x24   : > { %v2214_v63 = vld [vmem:[%s2421_s9 + $0x4] sm:$0xf]  ;;  %v2219_v8 = vld [vmem:[%s2421_s9 + $0x2c] sm:$0xf]  ;;  %v1859_v9 = vld [vmem:[%s2421_s9 + $0x3c] sm:$0xf0] }
  0x25   : > { %v2226_v2 = vld [vmem:[%s2421_s9 + $0x60] sm:$0xf0]  ;;  %v2217_v11 = vld [vmem:[%s2421_s9 + $0x18] sm:$0xf0]  ;;  %v2215_v12 = vld [vmem:[%s2421_s9 + $0xc] sm:$0xf] }
  0x26   : > { %2320 = vmatpush.bf16.msra.mxu1 %v2271_v5  ;;  %2321 = vmatpush.bf16.msra.mxu2 %v2271_v5  ;;  %v2293_v3 = vld [vmem:[%s2405_s26 + $0xc0] sm:$0xff]  ;;  %v1878_v7 = vor.u32 %v2226_v2, %v1877_v1  ;;  %v1853_v14 = vld [vmem:[%s2421_s9 + $0x10] sm:$0xf]  ;;  %v2227_v35 = vld [vmem:[%s2421_s9 + $0x68] sm:$0xf0] }
  0x27   : > { %2322 = vmatpush.bf16.msra.mxu3 %v2271_v5  ;;  %987 = vmatpush.bf16.msra.mxu0 %v2271_v5  ;;  %v1842_v5 = vor.u32 %v2214_v63, %v1839_v0  ;;  %v1847_v13 = vld [vmem:[%s2421_s9 + $0x1c] sm:$0xf0]  ;;  %v2218_v15 = vld [vmem:[%s2421_s9 + $0x20] sm:$0xf0]  ;;  %v1899_v33 = vld [vmem:[%s2421_s9 + $0x8c] sm:$0xf0] }
  0x28   : > { %v2225_v36 = vld [vmem:[%s2421_s9 + $0x5c] sm:$0xf]  ;;  %v1887_v37 = vld [vmem:[%s2421_s9 + $0x6c] sm:$0xf0]  ;;  %v1893_v38 = vld [vmem:[%s2421_s9 + $0x60] sm:$0xf] }
  0x29   : > { %v2228_v39 = vld [vmem:[%s2421_s9 + $0x70] sm:$0xf0]  ;;  %v2237_v59 = vld [vmem:[%s2421_s9 + $0xb8] sm:$0xf0]  ;;  %v2235_v60 = vld [vmem:[%s2421_s9 + $0xac] sm:$0xf] }
  0x2a   : > { %2323 = vmatpush.bf16.msra.mxu1 %v2270_v6  ;;  %2324 = vmatpush.bf16.msra.mxu2 %v2270_v6  ;;  %v2238_v63 = vld [vmem:[%s2421_s9 + $0xc0] sm:$0xf0] }
  0x2b   : > { %2325 = vmatpush.bf16.msra.mxu3 %v2270_v6  ;;  %988 = vmatpush.bf16.msra.mxu0 %v2270_v6  ;;  %v2038_v6 = vor.u32 %v2266_v62, %v2037_v61  ;;  %v1927_v61 = vld [vmem:[%s2421_s9 + $0xbc] sm:$0xf0]  ;;  %v1933_v62 = vld [vmem:[%s2421_s9 + $0xb0] sm:$0xf] }
  0x2c   : > { %v1930_v2 = vor.u32 %v2235_v60, %v1927_v61 }
  0x2e   : > { %2326 = vmatpush.bf16.msra.mxu1 %v2269_v10  ;;  %2327 = vmatpush.bf16.msra.mxu2 %v2269_v10 }
  0x2f   : > { %2328 = vmatpush.bf16.msra.mxu3 %v2269_v10  ;;  %989 = vmatpush.bf16.msra.mxu0 %v2269_v10  ;;  %v1845_v10 = vld [vmem:[%s2421_s9 + $0x8] sm:$0xf] }
  0x31   : > { %1005 = vmatmul.bf16.vlgmr.msra.gmra.mxu1 %v1898_v18  ;;  %1015 = vmatmul.bf16.vlgmr.msra.gmra.mxu2 %v1938_v19  ;;  %v1850_v18 = vor.u32 %v2215_v12, %v1847_v13  ;;  %v1854_v19 = vor.u32 %v2218_v15, %v1853_v14 }
  0x32   : > { %1110 = vmatpush.bf16.msrb.mxu2 %v2292_v16  ;;  %1046 = vmatpush.bf16.msrb.mxu1 %v2284_v17  ;;  %v1862_v16 = vor.u32 %v2219_v8, %v1859_v9  ;;  %v1846_v17 = vor.u32 %v2217_v11, %v1845_v10  ;;  %v2240_v8 = vld [vmem:[%s2421_s9 + $0xd4] sm:$0xf]  ;;  %v1947_v9 = vld [vmem:[%s2421_s9 + $0xe4] sm:$0xf0]  ;;  %v1953_v10 = vld [vmem:[%s2421_s9 + $0xd8] sm:$0xf] }
  0x33   : > { %1030 = vmatmul.bf16.vlgmr.msra.gmra.mxu3 %v1998_v20  ;;  %990 = vmatmul.bf16.vlgmr.msra.gmra.mxu0 %v1838_v21  ;;  %v2224_v20 = vld [vmem:[%s2421_s9 + $0x54] sm:$0xf]  ;;  %v1879_v21 = vld [vmem:[%s2421_s9 + $0x64] sm:$0xf0]  ;;  %v2243_v11 = vld [vmem:[%s2421_s9 + $0xe8] sm:$0xf0]  ;;  %v1950_v15 = vor.u32 %v2240_v8, %v1947_v9 }
  0x34   : > { %1174 = vmatpush.bf16.msrb.mxu3 %v2300_v22  ;;  %1242 = vmatpush.bf16.msrb.mxu0 %v2304_v23  ;;  %v1865_v22 = vld [vmem:[%s2421_s9 + $0x30] sm:$0xf]  ;;  %v2222_v23 = vld [vmem:[%s2421_s9 + $0x40] sm:$0xf0]  ;;  %v2007_v8 = vld [vmem:[%s2421_s9 + $0x15c] sm:$0xf0] }
  0x35   : > { %v2013_v9 = vld [vmem:[%s2421_s9 + $0x150] sm:$0xf] }
  0x36   : > { %1047 = vmatpush.bf16.msrb.mxu1 %v2283_v24  ;;  %1111 = vmatpush.bf16.msrb.mxu2 %v2291_v25  ;;  %v2220_v24 = vld [vmem:[%s2421_s9 + $0x34] sm:$0xf]  ;;  %v1867_v25 = vld [vmem:[%s2421_s9 + $0x44] sm:$0xf0] }
  0x38   : > { %1175 = vmatpush.bf16.msrb.mxu3 %v2299_v26  ;;  %1243 = vmatpush.bf16.msrb.mxu0 %v2303_v27  ;;  %v1873_v26 = vld [vmem:[%s2421_s9 + $0x38] sm:$0xf]  ;;  %v2223_v27 = vld [vmem:[%s2421_s9 + $0x48] sm:$0xf0] }
  0x3a   : > { %1048 = vmatpush.bf16.msrb.mxu1 %v2282_v28  ;;  %1112 = vmatpush.bf16.msrb.mxu2 %v2290_v29  ;;  %v1882_v28 = vor.u32 %v2224_v20, %v1879_v21  ;;  %v1866_v29 = vor.u32 %v2222_v23, %v1865_v22  ;;  %v2249_v22 = vld [vmem:[%s2421_s9 + $0x11c] sm:$0xf]  ;;  %v1979_v23 = vld [vmem:[%s2421_s9 + $0x12c] sm:$0xf0] }
  0x3c   : > { %1176 = vmatpush.bf16.msrb.mxu3 %v2298_v30  ;;  %1244 = vmatpush.bf16.msrb.mxu0 %v2302_v31  ;;  %v1870_v30 = vor.u32 %v2220_v24, %v1867_v25  ;;  %v1874_v31 = vor.u32 %v2223_v27, %v1873_v26  ;;  %v1965_v24 = vld [vmem:[%s2421_s9 + $0xf8] sm:$0xf]  ;;  %v2247_v25 = vld [vmem:[%s2421_s9 + $0x108] sm:$0xf0]  ;;  %v2245_v26 = vld [vmem:[%s2421_s9 + $0xfc] sm:$0xf] }
  0x3d   : > { %v1967_v27 = vld [vmem:[%s2421_s9 + $0x10c] sm:$0xf0] }
  0x3e   : > { %1049 = vmatpush.bf16.msrb.mxu1 %v2281_v32  ;;  %1113 = vmatpush.bf16.msrb.mxu2 %v2289_v34  ;;  %v2229_v32 = vld [vmem:[%s2421_s9 + $0x7c] sm:$0xf]  ;;  %v1885_v34 = vld [vmem:[%s2421_s9 + $0x58] sm:$0xf] }
  0x3f   : > { %v1902_v40 = vor.u32 %v2229_v32, %v1899_v33  ;;  %v1886_v41 = vor.u32 %v2227_v35, %v1885_v34  ;;  %v1982_v32 = vor.u32 %v2249_v22, %v1979_v23  ;;  %v1966_v33 = vor.u32 %v2247_v25, %v1965_v24 }
  0x40   : > { %1177 = vmatpush.bf16.msrb.mxu3 %v2297_v42  ;;  %1245 = vmatpush.bf16.msrb.mxu0 %v2301_v43  ;;  %v1890_v42 = vor.u32 %v2225_v36, %v1887_v37  ;;  %v1894_v43 = vor.u32 %v2228_v39, %v1893_v38  ;;  %v1970_v35 = vor.u32 %v2245_v26, %v1967_v27 }
  0x41   : > { %1010 = vmatmul.bf16.gmra.mxu1 %v1918_v46  ;;  %1020 = vmatmul.bf16.gmra.mxu2 %v1958_v47  ;;  %v1905_v46 = vld [vmem:[%s2421_s9 + $0x80] sm:$0xf]  ;;  %v2232_v47 = vld [vmem:[%s2421_s9 + $0x90] sm:$0xf0] }
  0x42   : > { %1050 = vmatpush.bf16.msrb.mxu1 %v2280_v44  ;;  %1114 = vmatpush.bf16.msrb.mxu2 %v2288_v45  ;;  %v2234_v44 = vld [vmem:[%s2421_s9 + $0xa4] sm:$0xf]  ;;  %v1919_v45 = vld [vmem:[%s2421_s9 + $0xb4] sm:$0xf0] }
  0x43   : > { %1035 = vmatmul.bf16.gmra.mxu3 %v2018_v48  ;;  %995 = vmatmul.bf16.gmra.mxu0 %v1858_v49  ;;  %v2230_v48 = vld [vmem:[%s2421_s9 + $0x84] sm:$0xf]  ;;  %v1907_v49 = vld [vmem:[%s2421_s9 + $0x94] sm:$0xf0] }
  0x44   : > { %1178 = vmatpush.bf16.msrb.mxu3 %v2296_v50  ;;  %v1913_v50 = vld [vmem:[%s2421_s9 + $0x88] sm:$0xf] }
  0x46   : > { %1051 = vmatpush.bf16.msrb.mxu1 %v2279_v51  ;;  %1115 = vmatpush.bf16.msrb.mxu2 %v2287_v52  ;;  %v2233_v51 = vld [vmem:[%s2421_s9 + $0x98] sm:$0xf0]  ;;  %v1922_v52 = vor.u32 %v2234_v44, %v1919_v45  ;;  %v1999_v44 = vld [vmem:[%s2421_s9 + $0x154] sm:$0xf0]  ;;  %v1985_v45 = vld [vmem:[%s2421_s9 + $0x120] sm:$0xf] }
  0x48   : > { %1179 = vmatpush.bf16.msrb.mxu3 %v2295_v53  ;;  %v1906_v53 = vor.u32 %v2232_v47, %v1905_v46  ;;  %v2252_v46 = vld [vmem:[%s2421_s9 + $0x130] sm:$0xf0]  ;;  %v2250_v47 = vld [vmem:[%s2421_s9 + $0x124] sm:$0xf] }
  0x4a   : > { %1052 = vmatpush.bf16.msrb.mxu1 %v2278_v54  ;;  %1116 = vmatpush.bf16.msrb.mxu2 %v2286_v55  ;;  %v1910_v54 = vor.u32 %v2230_v48, %v1907_v49  ;;  %v1914_v55 = vor.u32 %v2233_v51, %v1913_v50  ;;  %v1987_v48 = vld [vmem:[%s2421_s9 + $0x134] sm:$0xf0]  ;;  %v1993_v49 = vld [vmem:[%s2421_s9 + $0x128] sm:$0xf]  ;;  %v2253_v50 = vld [vmem:[%s2421_s9 + $0x138] sm:$0xf0] }
  0x4c   : > { %1180 = vmatpush.bf16.msrb.mxu3 %v2294_v56  ;;  %v2239_v56 = vld [vmem:[%s2421_s9 + $0xcc] sm:$0xf] }
  0x4e   : > { %1053 = vmatpush.bf16.msrb.mxu1 %v2277_v57  ;;  %1117 = vmatpush.bf16.msrb.mxu2 %v2285_v58  ;;  %v1939_v57 = vld [vmem:[%s2421_s9 + $0xdc] sm:$0xf0]  ;;  %v1925_v58 = vld [vmem:[%s2421_s9 + $0xa8] sm:$0xf] }
  0x4f   : > { %v1942_v0 = vor.u32 %v2239_v56, %v1939_v57  ;;  %v1926_v1 = vor.u32 %v2237_v59, %v1925_v58  ;;  %v1990_v57 = vor.u32 %v2250_v47, %v1987_v48  ;;  %v1994_v58 = vor.u32 %v2253_v50, %v1993_v49  ;;  %v2260_v47 = vld [vmem:[%s2421_s9 + $0x174] sm:$0xf]  ;;  %v2027_v48 = vld [vmem:[%s2421_s9 + $0x184] sm:$0xf0]  ;;  %v2033_v49 = vld [vmem:[%s2421_s9 + $0x178] sm:$0xf] }
  0x50   : > { %1181 = vmatpush.bf16.msrb.mxu3 %v2293_v3  ;;  %v1934_v3 = vor.u32 %v2238_v63, %v1933_v62  ;;  %v2263_v50 = vld [vmem:[%s2421_s9 + $0x188] sm:$0xf0] }
  0x51   : > { %1025 = vmatmul.bf16.gmra.mxu2 %v1978_v4  ;;  %1054 = vmatmul.bf16.vlgmr.msrb.gmra.mxu1 %v1842_v5  ;;  %v2244_v4 = vld [vmem:[%s2421_s9 + $0xf4] sm:$0xf]  ;;  %v1959_v5 = vld [vmem:[%s2421_s9 + $0x104] sm:$0xf0] }
  0x52   : > { %v1962_v12 = vor.u32 %v2244_v4, %v1959_v5  ;;  %v2019_v4 = vld [vmem:[%s2421_s9 + $0x17c] sm:$0xf0]  ;;  %v2005_v5 = vld [vmem:[%s2421_s9 + $0x148] sm:$0xf] }
  0x53   : > { %1040 = vmatmul.bf16.gmra.mxu3 %v2038_v6  ;;  %1000 = vmatmul.bf16.gmra.mxu0 %v1878_v7  ;;  %v1945_v6 = vld [vmem:[%s2421_s9 + $0xd0] sm:$0xf]  ;;  %v2242_v7 = vld [vmem:[%s2421_s9 + $0xe0] sm:$0xf0] }
  0x54   : > { %v1946_v13 = vor.u32 %v2242_v7, %v1945_v6  ;;  %v2257_v6 = vld [vmem:[%s2421_s9 + $0x158] sm:$0xf0]  ;;  %v2255_v7 = vld [vmem:[%s2421_s9 + $0x14c] sm:$0xf] }
  0x55   : > { %v2010_v22 = vor.u32 %v2255_v7, %v2007_v8 }
  0x61   : > { %1059 = vmatmul.bf16.gmra.mxu1 %v1862_v16  ;;  %1118 = vmatmul.bf16.vlgmr.msrb.gmra.mxu2 %v1846_v17  ;;  %v1954_v16 = vor.u32 %v2243_v11, %v1953_v10  ;;  %v2258_v10 = vld [vmem:[%s2421_s9 + $0x160] sm:$0xf0] }
  0x62   : > { %v2014_v23 = vor.u32 %v2258_v10, %v2013_v9 }
  0x63   : > { %1182 = vmatmul.bf16.vlgmr.msrb.gmra.mxu3 %v1850_v18  ;;  %2199 = vmatmul.msk.bf16.vlgmr.msrb.gmra.mxu0 %vm948_vm0, %v1854_v19 }
  0x71   : > { %1064 = vmatmul.bf16.gmra.mxu1 %v1882_v28  ;;  %1123 = vmatmul.bf16.gmra.mxu2 %v1866_v29  ;;  %v1973_v28 = vld [vmem:[%s2421_s9 + $0x100] sm:$0xf]  ;;  %v2248_v29 = vld [vmem:[%s2421_s9 + $0x110] sm:$0xf0] }
  0x72   : > { %v1974_v36 = vor.u32 %v2248_v29, %v1973_v28 }
  0x73   : > { %1187 = vmatmul.bf16.gmra.mxu3 %v1870_v30  ;;  %2200 = vmatmul.msk.bf16.gmra.mxu0 %vm948_vm0, %v1874_v31 }
  0x81   : > { %1069 = vmatmul.bf16.gmra.mxu1 %v1902_v40  ;;  %1128 = vmatmul.bf16.gmra.mxu2 %v1886_v41 }
  0x83   : > { %1192 = vmatmul.bf16.gmra.mxu3 %v1890_v42  ;;  %2201 = vmatmul.msk.bf16.gmra.mxu0 %vm948_vm0, %v1894_v43  ;;  %v2565_v42 = vld [vmem:[%s302_s30] ss:$0 sm:$0xff]  ;;  %v2254_v43 = vld [vmem:[%s2421_s9 + $0x144] sm:$0xf] }
  0x91   : > { %1074 = vmatmul.bf16.gmra.mxu1 %v1922_v52  ;;  %1133 = vmatmul.bf16.gmra.mxu2 %v1906_v53 }
  0x93   : > { %1197 = vmatmul.bf16.gmra.mxu3 %v1910_v54  ;;  %2202 = vmatmul.msk.bf16.gmra.mxu0 %vm948_vm0, %v1914_v55  ;;  %v2002_v54 = vor.u32 %v2254_v43, %v1999_v44  ;;  %v1986_v55 = vor.u32 %v2252_v46, %v1985_v45  ;;  %v2264_v43 = vld [vmem:[%s2421_s9 + $0x194] sm:$0xf]  ;;  %v2039_v44 = vld [vmem:[%s2421_s9 + $0x1a4] sm:$0xf0]  ;;  %v2025_v45 = vld [vmem:[%s2421_s9 + $0x170] sm:$0xf] }
  0x94   : > { %v2262_v46 = vld [vmem:[%s2421_s9 + $0x180] sm:$0xf0] }
  0xa1   : > { %1079 = vmatmul.bf16.gmra.mxu1 %v1942_v0  ;;  %1138 = vmatmul.bf16.gmra.mxu2 %v1926_v1 }
  0xa3   : > { %1202 = vmatmul.bf16.gmra.mxu3 %v1930_v2  ;;  %2203 = vmatmul.msk.bf16.gmra.mxu0 %vm948_vm0, %v1934_v3  ;;  %v2259_v3 = vld [vmem:[%s2421_s9 + $0x16c] sm:$0xf] }
  0xae   : > { %v2530_v14 = vpop.f32.mrf.mxu1 }
  0xb0   : > { %v991_v17 = vpop.f32.mrf.mxu0 }
  0xb1   : > { %1084 = vmatmul.bf16.gmra.mxu1 %v1962_v12  ;;  %1143 = vmatmul.bf16.gmra.mxu2 %v1946_v13  ;;  %v992_v52 = vadd.f32 %v2565_v42, %v991_v17  ;;  %v1408_v12 = vld [vmem:[%s3091_s3 + $0x38] sm:$0xff]  ;;  %v2006_v17 = vor.u32 %v2257_v6, %v2005_v5 }
  0xb2   : > { %1423 = vmatpush.msra.mxu1 %v1408_v12  ;;  %1582 = vmatpush.msra.mxu2 %v1408_v12 }
  0xb3   : > { %1207 = vmatmul.bf16.gmra.mxu3 %v1950_v15  ;;  %2204 = vmatmul.msk.bf16.gmra.mxu0 %vm948_vm0, %v1954_v16  ;;  %v2022_v16 = vor.u32 %v2259_v3, %v2019_v4 }
  0xb4   : > { %v2533_v18 = vpop.f32.mrf.mxu2 }
  0xb6   : > { %v2535_v19 = vpop.f32.mrf.mxu3  ;;  %v2537_v20 = vpop.f32.mrf.mxu1 }
  0xb8   : > { %v993_v21 = vpop.f32.mrf.mxu0 }
  0xb9   : > { %v994_v62 = vadd.f32 %v2565_v42, %v993_v21 }
  0xbc   : > { %v2547_v30 = vpop.f32.mrf.mxu2 }
  0xbe   : > { %v2549_v31 = vpop.f32.mrf.mxu3  ;;  %v2551_v34 = vpop.f32.mrf.mxu1 }
  0xc0   : > { %v996_v37 = vpop.f32.mrf.mxu0 }
  0xc1   : > { %1089 = vmatmul.bf16.gmra.mxu1 %v1982_v32  ;;  %1148 = vmatmul.bf16.gmra.mxu2 %v1966_v33  ;;  %v997_v13 = vadd.f32 %v2565_v42, %v996_v37 }
  0xc3   : > { %1212 = vmatmul.bf16.gmra.mxu3 %v1970_v35  ;;  %2205 = vmatmul.msk.bf16.gmra.mxu0 %vm948_vm0, %v1974_v36 }
  0xc4   : > { %v2554_v38 = vpop.f32.mrf.mxu2 }
  0xc6   : > { %v2556_v39 = vpop.f32.mrf.mxu3  ;;  %v2558_v40 = vpop.f32.mrf.mxu1 }
  0xc8   : > { %v998_v41 = vpop.f32.mrf.mxu0 }
  0xc9   : > { %v999_v27 = vadd.f32 %v2565_v42, %v998_v41  ;;  %v1407_v41 = vld [vmem:[%s3091_s3 + $0x30] sm:$0xff] }
  0xca   : > { %1424 = vmatpush.msra.mxu1 %v1407_v41  ;;  %1583 = vmatpush.msra.mxu2 %v1407_v41 }
  0xcc   : > { %v2575_v51 = vpop.f32.mrf.mxu2 }
  0xce   : > { %v2578_v53 = vpop.f32.mrf.mxu3  ;;  %v1055_v56 = vpop.f32.mrf.mxu1 }
  0xcf   : > { %v1056_v59 = vadd.f32 %v1055_v56, %v992_v52 }
  0xd0   : > { %v1001_v60 = vpop.f32.mrf.mxu0 }
  0xd1   : > { %1094 = vmatmul.bf16.gmra.mxu1 %v2002_v54  ;;  %1153 = vmatmul.bf16.gmra.mxu2 %v1986_v55  ;;  %v1002_v52 = vadd.f32 %v2565_v42, %v1001_v60 }
  0xd3   : > { %1217 = vmatmul.bf16.gmra.mxu3 %v1990_v57  ;;  %2206 = vmatmul.msk.bf16.gmra.mxu0 %vm948_vm0, %v1994_v58  ;;  %v2042_v57 = vor.u32 %v2264_v43, %v2039_v44  ;;  %v2026_v58 = vor.u32 %v2262_v46, %v2025_v45 }
  0xd4   : > { %v2581_v61 = vpop.f32.mrf.mxu2 }
  0xd6   : > { %v2584_v63 = vpop.f32.mrf.mxu3  ;;  %v1057_v0 = vpop.f32.mrf.mxu1 }
  0xd7   : > { %v1058_v1 = vadd.f32 %v1057_v0, %v994_v62  ;;  %v2030_v62 = vor.u32 %v2260_v47, %v2027_v48  ;;  %v2034_v0 = vor.u32 %v2263_v50, %v2033_v49 }
  0xd8   : > { %v2586_v2 = vpop.f32.mrf.mxu0 }
  0xd9   : > { %v1004_v6 = vadd.f32 %v2565_v42, %v2586_v2 }
  0xdc   : > { %v2596_v11 = vpop.f32.mrf.mxu2 }
  0xde   : > { %v2602_v15 = vpop.f32.mrf.mxu3  ;;  %v1060_v21 = vpop.f32.mrf.mxu1 }
  0xdf   : > { %3097 = vst [vmem:[#allocation2_spill] sm:$0xff] %v2602_v15  ;;  %v1061_v24 = vadd.f32 %v1060_v21, %v997_v13  ;;  %v2267_v21 = vld [vmem:[%s2421_s9 + $0x1a8] sm:$0xf0] }
  0xe0   : > { %v1247_v25 = vpop.f32.mrf.mxu0 }
  0xe1   : > { %1099 = vmatmul.bf16.gmra.mxu1 %v2022_v16  ;;  %1158 = vmatmul.bf16.gmra.mxu2 %v2006_v17  ;;  %v2045_v17 = vld [vmem:[%s2421_s9 + $0x198] sm:$0xf] }
  0xe3   : > { %1222 = vmatmul.bf16.gmra.mxu3 %v2010_v22  ;;  %2207 = vmatmul.msk.bf16.gmra.mxu0 %vm948_vm0, %v2014_v23  ;;  %v2265_v22 = vld [vmem:[%s2421_s9 + $0x19c] sm:$0xf]  ;;  %v2047_v23 = vld [vmem:[%s2421_s9 + $0x1ac] sm:$0xf0] }
  0xe4   : > { %v1119_v26 = vpop.f32.mrf.mxu2 }
  0xe5   : > { %v1120_v28 = vadd.f32 %v1119_v26, %v1056_v59  ;;  %v2268_v26 = vld [vmem:[%s2421_s9 + $0x1b0] sm:$0xf0] }
  0xe6   : > { %v1183_v29 = vpop.f32.mrf.mxu3  ;;  %v1062_v32 = vpop.f32.mrf.mxu1 }
  0xe7   : > { %v1184_v33 = vadd.f32 %v1183_v29, %v1120_v28  ;;  %v1063_v35 = vadd.f32 %v1062_v32, %v999_v27  ;;  %v1007_v28 = vadd.f32 %v2565_v42, %v2530_v14  ;;  %v1406_v14 = vld [vmem:[%s3091_s3 + $0x28] sm:$0xff] }
  0xe8   : > { %v1249_v36 = vpop.f32.mrf.mxu0  ;;  %1425 = vmatpush.msra.mxu1 %v1406_v14  ;;  %1584 = vmatpush.msra.mxu2 %v1406_v14 }
  0xe9   : > { %v2606_v37 = vadd.f32 %v1247_v25, %v1184_v33  ;;  %v2053_v25 = vld [vmem:[%s2421_s9 + $0x1a0] sm:$0xf]  ;;  %v2050_v33 = vor.u32 %v2265_v22, %v2047_v23 }
  0xeb   : > { %3098 = vst [vmem:[#allocation3_spill] sm:$0xff] %v2606_v37 }
  0xec   : > { %v1121_v54 = vpop.f32.mrf.mxu2 }
  0xed   : > { %v1122_v55 = vadd.f32 %v1121_v54, %v1058_v1 }
  0xee   : > { %v1185_v56 = vpop.f32.mrf.mxu3  ;;  %v1065_v59 = vpop.f32.mrf.mxu1 }
  0xef   : > { %v1186_v3 = vadd.f32 %v1185_v56, %v1122_v55  ;;  %v1066_v4 = vadd.f32 %v1065_v59, %v1002_v52 }
  0xf0   : > { %v1252_v5 = vpop.f32.mrf.mxu0 }
  0xf1   : > { %v2620_v60 = vadd.f32 %v1249_v36, %v1186_v3  ;;  %1104 = vmatmul.bf16.gmra.mxu1 %v2042_v57  ;;  %1163 = vmatmul.bf16.gmra.mxu2 %v2026_v58  ;;  %v2054_v36 = vor.u32 %v2268_v26, %v2053_v25 }
  0xf3   : > { %3099 = vst [vmem:[#allocation4_spill] sm:$0xff] %v2620_v60  ;;  %1227 = vmatmul.bf16.gmra.mxu3 %v2030_v62  ;;  %2208 = vmatmul.msk.bf16.gmra.mxu0 %vm948_vm0, %v2034_v0 }
  0xf4   : > { %v1124_v1 = vpop.f32.mrf.mxu2 }
  0xf5   : > { %v1125_v7 = vadd.f32 %v1124_v1, %v1061_v24  ;;  %v2046_v24 = vor.u32 %v2267_v21, %v2045_v17 }
  0xf6   : > { %v1188_v8 = vpop.f32.mrf.mxu3  ;;  %v1067_v9 = vpop.f32.mrf.mxu1 }
  0xf7   : > { %v1189_v10 = vadd.f32 %v1188_v8, %v1125_v7  ;;  %v1068_v12 = vadd.f32 %v1067_v9, %v1004_v6 }
  0xf8   : > { %v1254_v13 = vpop.f32.mrf.mxu0 }
  0xf9   : > { %v2625_v16 = vadd.f32 %v1252_v5, %v1189_v10 }
  0xfc   : > { %v1126_v27 = vpop.f32.mrf.mxu2 }
  0xfd   : > { %v1127_v29 = vadd.f32 %v1126_v27, %v1063_v35  ;;  %v1009_v35 = vadd.f32 %v2565_v42, %v2537_v20  ;;  %v1014_v20 = vadd.f32 %v2565_v42, %v2558_v40  ;;  %v1012_v40 = vadd.f32 %v2565_v42, %v2551_v34 }
  0xfe   : > { %v1190_v2 = vpop.f32.mrf.mxu3  ;;  %v1070_v32 = vpop.f32.mrf.mxu1 }
  0xff   : > { %v1191_v43 = vadd.f32 %v1190_v2, %v1127_v29  ;;  %v1071_v44 = vadd.f32 %v1070_v32, %v1007_v28 }
 0x100   : > { %v1257_v45 = vpop.f32.mrf.mxu0 }
 0x101   : > { %v2635_v46 = vadd.f32 %v1254_v13, %v1191_v43  ;;  %1168 = vmatmul.bf16.gmra.mxu2 %v2046_v24 }
 0x103   : > { %1232 = vmatmul.bf16.gmra.mxu3 %v2050_v33  ;;  %2209 = vmatmul.msk.bf16.gmra.mxu0 %vm948_vm0, %v2054_v36 }
 0x104   : > { %v1129_v47 = vpop.f32.mrf.mxu2 }
 0x105   : > { %v1130_v48 = vadd.f32 %v1129_v47, %v1066_v4 }
 0x106   : > { %v1193_v49 = vpop.f32.mrf.mxu3  ;;  %v1072_v50 = vpop.f32.mrf.mxu1 }
 0x107   : > { %v1194_v52 = vadd.f32 %v1193_v49, %v1130_v48  ;;  %v1073_v54 = vadd.f32 %v1072_v50, %v1009_v35  ;;  %v1404_v50 = vld [vmem:[%s3091_s3 + $0x18] sm:$0xff] }
 0x108   : > { %v1259_v41 = vpop.f32.mrf.mxu0 }
 0x109   : > { %v2643_v55 = vadd.f32 %v1257_v45, %v1194_v52 }
 0x10c   : > { %v1131_v56 = vpop.f32.mrf.mxu2 }
 0x10d   : > { %v1132_v57 = vadd.f32 %v1131_v56, %v1068_v12  ;;  %v1017_v12 = vadd.f32 %v2565_v42, %v2533_v18  ;;  %v1405_v18 = vld [vmem:[%s3091_s3 + $0x20] sm:$0xff] }
 0x10e   : > { %v1195_v58 = vpop.f32.mrf.mxu3  ;;  %v1075_v59 = vpop.f32.mrf.mxu1  ;;  %1426 = vmatpush.msra.mxu1 %v1405_v18  ;;  %1585 = vmatpush.msra.mxu2 %v1405_v18 }
 0x10f   : > { %v1196_v62 = vadd.f32 %v1195_v58, %v1132_v57  ;;  %v1076_v28 = vadd.f32 %v1075_v59, %v1012_v40 }
 0x110   : > { %v1262_v0 = vpop.f32.mrf.mxu0  ;;  %1427 = vmatpush.msra.mxu1 %v1404_v50  ;;  %1586 = vmatpush.msra.mxu2 %v1404_v50  ;;  %v1302_v50 = vlaneseq }
 0x111   : > { %v2645_v3 = vadd.f32 %v1259_v41, %v1196_v62 }
 0x114   : > { %v1134_v5 = vpop.f32.mrf.mxu2 }
 0x115   : > { %v1135_v4 = vadd.f32 %v1134_v5, %v1071_v44 }
 0x116   : > { %v1198_v1 = vpop.f32.mrf.mxu3  ;;  %v1077_v6 = vpop.f32.mrf.mxu1 }
 0x117   : > { %v1199_v7 = vadd.f32 %v1198_v1, %v1135_v4  ;;  %v1078_v8 = vadd.f32 %v1077_v6, %v1014_v20  ;;  %v1403_v4 = vld [vmem:[%s3091_s3 + $0x10] sm:$0xff] }
 0x118   : > { %v1264_v9 = vpop.f32.mrf.mxu0  ;;  %1428 = vmatpush.msra.mxu1 %v1403_v4  ;;  %1587 = vmatpush.msra.mxu2 %v1403_v4 }
 0x119   : > { %v2649_v10 = vadd.f32 %v1262_v0, %v1199_v7 }
 0x11c   : > { %v1136_v13 = vpop.f32.mrf.mxu2 }
 0x11d   : > { %v1137_v17 = vadd.f32 %v1136_v13, %v1073_v54 }
 0x11e   : > { %v1200_v21 = vpop.f32.mrf.mxu3  ;;  %v1080_v22 = vpop.f32.mrf.mxu1 }
 0x11f   : > { %v1201_v23 = vadd.f32 %v1200_v21, %v1137_v17  ;;  %v1081_v25 = vadd.f32 %v1080_v22, %v1017_v12 }
 0x120   : > { %v1267_v26 = vpop.f32.mrf.mxu0 }
 0x121   : > { %v2655_v27 = vadd.f32 %v1264_v9, %v1201_v23 }
 0x124   : > { %v1139_v29 = vpop.f32.mrf.mxu2 }
 0x125   : > { %v1140_v2 = vadd.f32 %v1139_v29, %v1076_v28 }
 0x126   : > { %v1203_v24 = vpop.f32.mrf.mxu3  ;;  %v1082_v32 = vpop.f32.mrf.mxu1 }
 0x127   : > { %v1204_v33 = vadd.f32 %v1203_v24, %v1140_v2 }
 0x128   : > { %v1269_v36 = vpop.f32.mrf.mxu0 }
 0x129   : > { %v2657_v43 = vadd.f32 %v1267_v26, %v1204_v33 }
 0x12c   : > { %v1141_v44 = vpop.f32.mrf.mxu2 }
 0x12d   : > { %v1142_v45 = vadd.f32 %v1141_v44, %v1078_v8  ;;  %v1022_v44 = vadd.f32 %v2565_v42, %v2554_v38 }
 0x12e   : > { %v1205_v34 = vpop.f32.mrf.mxu3  ;;  %v1085_v47 = vpop.f32.mrf.mxu1 }
 0x12f   : > { %v1206_v14 = vadd.f32 %v1205_v34, %v1142_v45  ;;  %v1019_v45 = vadd.f32 %v2565_v42, %v2547_v30  ;;  %v1086_v34 = vadd.f32 %v1085_v47, %v1022_v44  ;;  %v1029_v30 = vadd.f32 %v2565_v42, %v2596_v11 }
 0x130   : > { %v1272_v35 = vpop.f32.mrf.mxu0  ;;  %v1352_v11 = vsel %vm948_vm0, %v2635_v46, 0.0 }
 0x131   : > { %v2662_v48 = vadd.f32 %v1269_v36, %v1206_v14  ;;  %v1024_v14 = vadd.f32 %v2565_v42, %v2575_v51  ;;  %v1347_v51 = vsel %vm948_vm0, %v2606_v37, 0.0 }
 0x134   : > { %v1144_v49 = vpop.f32.mrf.mxu2 }
 0x135   : > { %v1145_v52 = vadd.f32 %v1144_v49, %v1081_v25  ;;  %v1402_v25 = vld [vmem:[%s3091_s3 + $0x8] sm:$0xff]  ;;  %v1083_v49 = vadd.f32 %v1082_v32, %v1019_v45  ;;  %v1350_v32 = vsel %vm948_vm0, %v2625_v16, 0.0 }
 0x136   : > { %v1208_v54 = vpop.f32.mrf.mxu3  ;;  %v1087_v57 = vpop.f32.mrf.mxu1  ;;  %1429 = vmatpush.msra.mxu1 %v1402_v25  ;;  %1588 = vmatpush.msra.mxu2 %v1402_v25 }
 0x137   : > { %v1209_v41 = vadd.f32 %v1208_v54, %v1145_v52  ;;  %v1027_v54 = vadd.f32 %v2565_v42, %v2581_v61  ;;  %v1088_v4 = vadd.f32 %v1087_v57, %v1024_v14  ;;  %v1032_v57 = vadd.f32 %v2565_v42, %v2535_v19 }
 0x138   : > { %v2667_v56 = vpop.f32.mrf.mxu0 }
 0x139   : > { %v2669_v58 = vadd.f32 %v1272_v35, %v1209_v41  ;;  %v1348_v41 = vsel %vm948_vm0, %v2620_v60, 0.0 }
 0x13a   : > { %v1349_v45 = vadd.f32 %v1348_v41, %v1347_v51  ;;  %v1360_v51 = vsel %vm948_vm0, %v2655_v27, 0.0 }
 0x13c   : > { %v1146_v59 = vpop.f32.mrf.mxu2  ;;  %v1351_v37 = vadd.f32 %v1350_v32, %v1349_v45 }
 0x13d   : > { %v1147_v47 = vadd.f32 %v1146_v59, %v1083_v49  ;;  %v1034_v49 = vadd.f32 %v2565_v42, %v2549_v31  ;;  %v1356_v31 = vsel %vm948_vm0, %v2645_v3, 0.0 }
 0x13e   : > { %v1210_v62 = vpop.f32.mrf.mxu3  ;;  %v1090_v5 = vpop.f32.mrf.mxu1  ;;  %v1353_v19 = vadd.f32 %v1352_v11, %v1351_v37  ;;  %v1364_v11 = vsel %vm948_vm0, %v2662_v48, 0.0 }
 0x13f   : > { %v1211_v15 = vadd.f32 %v1210_v62, %v1147_v47 }
 0x140   : > { %v2671_v0 = vpop.f32.mrf.mxu0 }
 0x141   : > { %v2735_v37 = vadd.f32 %v2667_v56, %v1211_v15 }
 0x144   : > { %v1149_v20 = vpop.f32.mrf.mxu2 }
 0x145   : > { %v1150_v52 = vadd.f32 %v1149_v20, %v1086_v34  ;;  %v1091_v20 = vadd.f32 %v1090_v5, %v1027_v54  ;;  %v1303_v34 = vshrl.u32 %v1302_v50, 7  ;;  %v1354_v5 = vsel %vm948_vm0, %v2643_v55, 0.0 }
 0x146   : > { %v1213_v1 = vpop.f32.mrf.mxu3  ;;  %v1092_v7 = vpop.f32.mrf.mxu1 }
 0x147   : > { %v1214_v60 = vadd.f32 %v1213_v1, %v1150_v52  ;;  %v1093_v59 = vadd.f32 %v1092_v7, %v1029_v30  ;;  %v1037_v1 = vadd.f32 %v2565_v42, %v2556_v39  ;;  %v2723_v52 = vadd.s32 80, %v1303_v34 }
 0x148   : > { %v2676_v6 = vpop.f32.mrf.mxu0  ;;  %v1358_v39 = vsel %vm948_vm0, %v2649_v10, 0.0 }
 0x149   : > { %v2726_v7 = vadd.f32 %v2671_v0, %v1214_v60  ;;  %vm1324_vm1 = vcmp.lt.s32.totalorder %v2723_v52, 81 }
 0x14a   : > { %v1335_v45 = vsel %vm1324_vm1, %v2669_v58, 0.0 }
 0x14c   : > { %v1151_v8 = vpop.f32.mrf.mxu2 }
 0x14d   : > { %v1152_v61 = vadd.f32 %v1151_v8, %v1088_v4 }
 0x14e   : > { %v1215_v9 = vpop.f32.mrf.mxu3  ;;  %v1095_v21 = vpop.f32.mrf.mxu1 }
 0x14f   : > { %v1216_v8 = vadd.f32 %v1215_v9, %v1152_v61  ;;  %v1096_v54 = vadd.f32 %v1095_v21, %v1032_v57  ;;  %v1039_v9 = vadd.f32 %v2565_v42, %v2578_v53  ;;  %v1355_v21 = vadd.f32 %v1354_v5, %v1353_v19  ;;  %v1401_v61 = vld [vmem:[%s3091_s3] sm:$0xff] }
 0x150   : > { %v2678_v13 = vpop.f32.mrf.mxu0  ;;  %v1375_v53 = vsel %vm948_vm0, %v2726_v7, 0.0  ;;  %1430 = vmatpush.msra.mxu1 %v1401_v61  ;;  %1589 = vmatpush.msra.mxu2 %v1401_v61 }
 0x151   : > { %v2738_v0 = vadd.f32 %v2676_v6, %v1216_v8  ;;  %v1357_v47 = vadd.f32 %v1356_v31, %v1355_v21  ;;  %v3100_v21 = vld [vmem:[#allocation2_spill] sm:$0xff] }
 0x154   : > { %v1154_v12 = vpop.f32.mrf.mxu2 }
 0x155   : > { %v1155_v14 = vadd.f32 %v1154_v12, %v1091_v20  ;;  %v1374_v20 = vsel %vm948_vm0, %v2735_v37, 0.0 }
 0x156   : > { %v1218_v17 = vpop.f32.mrf.mxu3  ;;  %v1097_v28 = vpop.f32.mrf.mxu1  ;;  %v1376_v34 = vadd.f32 %v1375_v53, %v1374_v20 }
 0x157   : > { %v1219_v12 = vadd.f32 %v1218_v17, %v1155_v14  ;;  %v1098_v62 = vadd.f32 %v1097_v28, %v1034_v49 }
 0x158   : > { %v2680_v22 = vpop.f32.mrf.mxu0 }
 0x159   : > { %v2746_v15 = vadd.f32 %v2678_v13, %v1219_v12  ;;  %v1377_v13 = vsel %vm948_vm0, %v2738_v0, 0.0 }
 0x15a   : > { %v1378_v5 = vadd.f32 %v1377_v13, %v1376_v34 }
 0x15c   : > { %v1156_v23 = vpop.f32.mrf.mxu2 }
 0x15d   : > { %v1157_v50 = vadd.f32 %v1156_v23, %v1093_v59  ;;  %v1379_v59 = vsel %vm948_vm0, %v2746_v15, 0.0 }
 0x15e   : > { %v1220_v26 = vpop.f32.mrf.mxu3  ;;  %v1100_v33 = vpop.f32.mrf.mxu1 }
 0x15f   : > { %v1221_v23 = vadd.f32 %v1220_v26, %v1157_v50  ;;  %v1101_v17 = vadd.f32 %v1100_v33, %v1037_v1  ;;  %v1042_v26 = vadd.f32 %v2565_v42, %v2584_v63  ;;  %v1359_v33 = vadd.f32 %v1358_v39, %v1357_v47 }
 0x160   : > { %v2685_v40 = vpop.f32.mrf.mxu0  ;;  %v1366_v50 = vsel %vm948_vm0, %v1335_v45, 0.0  ;;  %v1044_v39 = vadd.f32 %v2565_v42, %v3100_v21 }
 0x164   : > { %v1159_v29 = vpop.f32.mrf.mxu2 }
 0x165   : > { %v1160_v41 = vadd.f32 %v1159_v29, %v1096_v54 }
 0x166   : > { %v2687_v2 = vpop.f32.mrf.mxu3  ;;  %v1102_v38 = vpop.f32.mrf.mxu1 }
 0x167   : > { %v1224_v56 = vadd.f32 %v2687_v2, %v1160_v41  ;;  %v1103_v6 = vadd.f32 %v1102_v38, %v1039_v9  ;;  %v2761_v2 = vadd.f32 %v2680_v22, %v1221_v23 }
 0x168   : > { %v2689_v24 = vpop.f32.mrf.mxu0 }
 0x169   : > { %v2772_v22 = vadd.f32 %v2685_v40, %v1224_v56  ;;  %v1381_v1 = vsel %vm948_vm0, %v2761_v2, 0.0  ;;  %v1380_v40 = vadd.f32 %v1379_v59, %v1378_v5 }
 0x16c   : > { %v1161_v36 = vpop.f32.mrf.mxu2 }
 0x16d   : > { %v1162_v28 = vadd.f32 %v1161_v36, %v1098_v62  ;;  %v1362_v36 = vsel %vm948_vm0, %v2657_v43, 0.0 }
 0x16e   : > { %v2691_v18 = vpop.f32.mrf.mxu3  ;;  %v1105_v29 = vpop.f32.mrf.mxu1 }
 0x16f   : > { %v1226_v38 = vadd.f32 %v2691_v18, %v1162_v28  ;;  %v1106_v57 = vadd.f32 %v1105_v29, %v1042_v26 }
 0x170   : > { %v2699_v35 = vpop.f32.mrf.mxu0 }
 0x171   : > { %v2779_v19 = vadd.f32 %v2689_v24, %v1226_v38 }
 0x173   : > { %v1385_v24 = vsel %vm948_vm0, %v2779_v19, 0.0 }
 0x174   : > { %v1164_v25 = vpop.f32.mrf.mxu2 }
 0x175   : > { %v1165_v32 = vadd.f32 %v1164_v25, %v1101_v17  ;;  %v1361_v25 = vadd.f32 %v1360_v51, %v1359_v33  ;;  %v1382_v17 = vadd.f32 %v1381_v1, %v1380_v40  ;;  %v2355_v1 = vmov 162.0  }
 0x176   : > { %v2707_v44 = vpop.f32.mrf.mxu3  ;;  %2343 = vrcp.f32 %v2355_v1 }
 0x177   : > { %v1229_v18 = vadd.f32 %v2707_v44, %v1165_v32  ;;  %v1363_v49 = vadd.f32 %v1362_v36, %v1361_v25  ;;  %v1383_v44 = vsel %vm948_vm0, %v2772_v22, 0.0 }
 0x178   : > { %v1294_v4 = vpop.f32.mrf.mxu0  ;;  %v1384_v28 = vadd.f32 %v1383_v44, %v1382_v17 }
 0x179   : > { %v1365_v62 = vadd.f32 %v1364_v11, %v1363_v49  ;;  %v2784_v41 = vadd.f32 %v2699_v35, %v1229_v18 }
 0x17a   : > { %v1386_v56 = vadd.f32 %v1385_v24, %v1384_v28  ;;  %v3101_v24 = vld [vmem:[#allocation3_spill] sm:$0xff] }
 0x17b   : > { %v1367_v23 = vadd.f32 %v1366_v50, %v1365_v62  ;;  %v1387_v47 = vsel %vm948_vm0, %v2784_v41, 0.0 }
 0x17c   : > { %v1166_v30 = vpop.f32.mrf.mxu2  ;;  %v1388_v26 = vadd.f32 %v1387_v47, %v1386_v56 }
 0x17d   : > { %v1167_v63 = vadd.f32 %v1166_v30, %v1103_v6  ;;  %v1107_v30 = vpop.f32.mrf.mxu1  ;;  %v1368_v53 = vrot.slane %v1367_v23, 4 }
 0x17e   : > { %v1230_v60 = vpop.f32.mrf.mxu3  ;;  %v1108_v29 = vadd.f32 %v1107_v30, %v1044_v39 }
 0x17f   : > { %v1231_v31 = vadd.f32 %v1230_v60, %v1167_v63  ;;  %v1369_v20 = vadd.f32 %v1368_v53, %v1367_v23 }
 0x180   : > { %v1297_v12 = vpop.f32.mrf.mxu0 }
 0x181   : > { %v2790_v60 = vadd.f32 %v1294_v4, %v1231_v31  ;;  %v1370_v45 = vrot.slane %v1369_v20, 2  ;;  %v2344_v31 = vpop.eup %2343 }
 0x182   : > { %vm1440_vm3 = vweird.f32 %v2344_v31 }
 0x183   : > { %v1389_v42 = vsel %vm948_vm0, %v2790_v60, 0.0  ;;  %v1371_v11 = vadd.f32 %v1370_v45, %v1369_v20 }
 0x184   : > { %v1169_v14 = vpop.f32.mrf.mxu2  ;;  %v1390_v61 = vadd.f32 %v1389_v42, %v1388_v26 }
 0x185   : > { %v1170_v8 = vadd.f32 %v1169_v14, %v1106_v57  ;;  %v1372_v14 = vrot.slane %v1371_v11, 1 }
 0x186   : > { %v1233_v54 = vpop.f32.mrf.mxu3 }
 0x187   : > { %v1234_v9 = vadd.f32 %v1233_v54, %v1170_v8  ;;  %v1373_v8 = vadd.f32 %v1372_v14, %v1371_v11 }
 0x188   : > { %v1299_v36 = vpop.f32.mrf.mxu0 }
 0x189   : > { %v2794_v51 = vadd.f32 %v1297_v12, %v1234_v9  ;;  %v1436_v12 = vmul.f32 162.0, %v2344_v31 }
 0x18b   : > { %v1391_v4 = vsel %vm948_vm0, %v2794_v51, 0.0  ;;  %v1437_v62 = vsub.f32 1.0, %v1436_v12 }
 0x18c   : > { %v1171_v35 = vpop.f32.mrf.mxu2  ;;  %v1392_v38 = vadd.f32 %v1391_v4, %v1390_v61 }
 0x18d   : > { %v1172_v6 = vadd.f32 %v1171_v35, %v1108_v29  ;;  %v1438_v40 = vmul.f32 %v2344_v31, %v1437_v62  ;;  %v3102_v29 = vld [vmem:[#allocation4_spill] sm:$0xff] }
 0x18e   : > { %v1235_v32 = vpop.f32.mrf.mxu3 }
 0x18f   : > { %v1236_v33 = vadd.f32 %v1235_v32, %v1172_v6  ;;  %v1439_v44 = vadd.f32 %v2344_v31, %v1438_v40 }
 0x191   : > { %v2800_v13 = vadd.f32 %v1299_v36, %v1236_v33  ;;  %v2812_v30 = vsel %vm1440_vm3, %v2344_v31, %v1439_v44 }
 0x193   : > { %v1346_v63 = vsel %vm1324_vm1, %v2800_v13, 0.0 }
 0x194   : > { %v1393_v25 = vsel %vm948_vm0, %v1346_v63, 0.0 }
 0x195   : > { %v1394_v34 = vadd.f32 %v1393_v25, %v1392_v38 }
 0x197   : > { %v1395_v57 = vrot.slane %v1394_v34, 4 }
 0x199   : > { %v1396_v59 = vadd.f32 %v1395_v57, %v1394_v34 }
 0x19b   : > { %v1397_v18 = vrot.slane %v1396_v59, 2 }
 0x19d   : > { %v1398_v49 = vadd.f32 %v1397_v18, %v1396_v59 }
 0x19f   : > { %v1399_v5 = vrot.slane %v1398_v49, 1 }
 0x1a1   : > { %v1400_v54 = vadd.f32 %v1399_v5, %v1398_v49 }
 0x1a3   : > { %v1412_v50 = vsel %vm1411_vm2, %v1400_v54, %v1373_v8 }
 0x1a4   : > { %2210 = vmatmul.msk.f32.vlgmr.msra.gmra.mxu1 %vm948_vm0, %v1412_v50 }
 0x221   : > { %v1432_v9 = vpop.f32.mrf.mxu1 }
 0x222   : > { %v1442_v21 = vmul.f32 %v2812_v30, %v1432_v9 }
 0x224   : > { %v1444_v39 = vrot.slane %v1442_v21, 1  ;;  %v1445_v23 = vperm.slane %v1442_v21, 0 }
 0x226   : > { %v2815_v17 = vperm.slane %v1444_v39, 0  ;;  %v2818_v28 = vsub.f32 %v3101_v24, %v1445_v23  ;;  %v2821_v47 = vsub.f32 %v3102_v29, %v1445_v23  ;;  %v2824_v35 = vsub.f32 %v2625_v16, %v1445_v23 }
 0x227   : > { %v2837_v42 = vsub.f32 %v2635_v46, %v1445_v23  ;;  %v2869_v61 = vsub.f32 %v2655_v27, %v1445_v23  ;;  %v2878_v63 = vsub.f32 %v2657_v43, %v1445_v23  ;;  %v2892_v43 = vsub.f32 %v2662_v48, %v1445_v23 }
 0x228   : > { %v2828_v53 = vsub.f32 %v2735_v37, %v2815_v17  ;;  %v2832_v56 = vsub.f32 %v2726_v7, %v2815_v17  ;;  %v1493_v6 = vmul.f32 %v2818_v28, %v2818_v28  ;;  %v1494_v32 = vmul.f32 %v2821_v47, %v2821_v47 }
 0x229   : > { %v2843_v16 = vsub.f32 %v2738_v0, %v2815_v17  ;;  %v2846_v37 = vsub.f32 %v2643_v55, %v1445_v23  ;;  %v1495_v7 = vmul.f32 %v2824_v35, %v2824_v35  ;;  %v2854_v46 = vsub.f32 %v2746_v15, %v2815_v17 }
 0x22a   : > { %v1504_v26 = vmul.f32 %v2828_v53, %v2828_v53  ;;  %v1505_v33 = vmul.f32 %v2832_v56, %v2832_v56  ;;  %v1515_v4 = vsel %vm948_vm0, %v1493_v6, 0.0  ;;  %v2860_v0 = vsub.f32 %v2645_v3, %v1445_v23 }
 0x22b   : > { %v2863_v55 = vsub.f32 %v2649_v10, %v1445_v23  ;;  %v1496_v36 = vmul.f32 %v2837_v42, %v2837_v42  ;;  %v1516_v20 = vsel %vm948_vm0, %v1494_v32, 0.0  ;;  %v2873_v15 = vsub.f32 %v2761_v2, %v2815_v17 }
 0x22c   : > { %v1506_v38 = vmul.f32 %v2843_v16, %v2843_v16  ;;  %v1517_v3 = vadd.f32 %v1516_v20, %v1515_v4  ;;  %v1497_v10 = vmul.f32 %v2846_v37, %v2846_v37  ;;  %v1518_v25 = vsel %vm948_vm0, %v1495_v7, 0.0 }
 0x22d   : > { %v1542_v45 = vsel %vm948_vm0, %v1504_v26, 0.0  ;;  %v2886_v27 = vsub.f32 %v2772_v22, %v2815_v17  ;;  %v1507_v2 = vmul.f32 %v2854_v46, %v2854_v46  ;;  %v1543_v57 = vsel %vm948_vm0, %v1505_v33, 0.0 }
 0x22e   : > { %v1519_v34 = vadd.f32 %v1518_v25, %v1517_v3  ;;  %v1498_v11 = vmul.f32 %v2860_v0, %v2860_v0  ;;  %v1520_v59 = vsel %vm948_vm0, %v1496_v36, 0.0  ;;  %v1544_v18 = vadd.f32 %v1543_v57, %v1542_v45 }
 0x22f   : > { %v2899_v14 = vsub.f32 %v2779_v19, %v2815_v17  ;;  %v1508_v22 = vmul.f32 %v2873_v15, %v2873_v15  ;;  %v1545_v5 = vsel %vm948_vm0, %v1506_v38, 0.0  ;;  %v1459_v8 = vsub.f32 %v2669_v58, %v1445_v23 }
 0x230   : > { %v1521_v49 = vadd.f32 %v1520_v59, %v1519_v34  ;;  %v1499_v48 = vmul.f32 %v2863_v55, %v2863_v55  ;;  %v1522_v54 = vsel %vm948_vm0, %v1497_v10, 0.0  ;;  %v1546_v50 = vadd.f32 %v1545_v5, %v1544_v18 }
 0x231   : > { %v2910_v1 = vsub.f32 %v2784_v41, %v2815_v17  ;;  %v1509_v19 = vmul.f32 %v2886_v27, %v2886_v27  ;;  %v1547_v12 = vsel %vm948_vm0, %v1507_v2, 0.0  ;;  %v2917_v62 = vsub.f32 %v2790_v60, %v2815_v17 }
 0x232   : > { %v1523_v31 = vadd.f32 %v1522_v54, %v1521_v49  ;;  %v1500_v58 = vmul.f32 %v2869_v61, %v2869_v61  ;;  %v1524_v40 = vsel %vm948_vm0, %v1498_v11, 0.0  ;;  %v1548_v44 = vadd.f32 %v1547_v12, %v1546_v50 }
 0x233   : > { %v2924_v41 = vsub.f32 %v2794_v51, %v2815_v17  ;;  %v1510_v9 = vmul.f32 %v2899_v14, %v2899_v14  ;;  %v1549_v39 = vsel %vm948_vm0, %v1508_v22, 0.0  ;;  %v1470_v60 = vsub.f32 %v2800_v13, %v2815_v17 }
 0x234   : > { %v1525_v21 = vadd.f32 %v1524_v40, %v1523_v31  ;;  %v1501_v23 = vmul.f32 %v2878_v63, %v2878_v63  ;;  %v1526_v24 = vsel %vm948_vm0, %v1499_v48, 0.0  ;;  %v1550_v29 = vadd.f32 %v1549_v39, %v1548_v44 }
 0x235   : > { %v2936_v6 = vsel %vm1324_vm1, %v1459_v8, 0.0  ;;  %v1511_v51 = vmul.f32 %v2910_v1, %v2910_v1  ;;  %v1551_v7 = vsel %vm948_vm0, %v1509_v19, 0.0  ;;  %v1502_v26 = vmul.f32 %v2892_v43, %v2892_v43 }
 0x236   : > { %v1527_v32 = vadd.f32 %v1526_v24, %v1525_v21  ;;  %v1528_v13 = vsel %vm948_vm0, %v1500_v58, 0.0  ;;  %v1552_v17 = vadd.f32 %v1551_v7, %v1550_v29  ;;  %v1512_v33 = vmul.f32 %v2917_v62, %v2917_v62 }
 0x237   : > { %v1553_v36 = vsel %vm948_vm0, %v1510_v9, 0.0  ;;  %v2949_v20 = vsel %vm1324_vm1, %v1470_v60, 0.0  ;;  %v1503_v38 = vmul.f32 %v2936_v6, %v2936_v6  ;;  %v1530_v3 = vsel %vm948_vm0, %v1501_v23, 0.0 }
 0x238   : > { %v1529_v4 = vadd.f32 %v1528_v13, %v1527_v32  ;;  %v1554_v10 = vadd.f32 %v1553_v36, %v1552_v17  ;;  %v1513_v25 = vmul.f32 %v2924_v41, %v2924_v41  ;;  %v1555_v2 = vsel %vm948_vm0, %v1511_v51, 0.0  ;;  %v1609_v36 = vld [vmem:[%s305_s11] sm:$0x1] }
 0x239   : > { %v1532_v34 = vsel %vm948_vm0, %v1502_v26, 0.0  ;;  %v1514_v52 = vmul.f32 %v2949_v20, %v2949_v20  ;;  %v1557_v59 = vsel %vm948_vm0, %v1512_v33, 0.0  ;;  %v1534_v18 = vsel %vm948_vm0, %v1503_v38, 0.0 }
 0x23a   : > { %v1531_v45 = vadd.f32 %v1530_v3, %v1529_v4  ;;  %v1556_v57 = vadd.f32 %v1555_v2, %v1554_v10  ;;  %v1559_v5 = vsel %vm948_vm0, %v1513_v25, 0.0  ;;  %v2977_v2 = vld [vmem:[%s308_s8] ss:$0 sm:$0xff] }
 0x23b   : > { %v1561_v54 = vsel %vm948_vm0, %v1514_v52, 0.0 }
 0x23c   : > { %v1533_v11 = vadd.f32 %v1532_v34, %v1531_v45  ;;  %v1558_v22 = vadd.f32 %v1557_v59, %v1556_v57 }
 0x23e   : > { %v1535_v49 = vadd.f32 %v1534_v18, %v1533_v11  ;;  %v1560_v8 = vadd.f32 %v1559_v5, %v1558_v22 }
 0x240   : > { %v1536_v48 = vrot.slane %v1535_v49, 4  ;;  %v1562_v50 = vadd.f32 %v1561_v54, %v1560_v8 }
 0x242   : > { %v1537_v19 = vadd.f32 %v1536_v48, %v1535_v49  ;;  %v1563_v31 = vrot.slane %v1562_v50, 4 }
 0x244   : > { %v1538_v12 = vrot.slane %v1537_v19, 2  ;;  %v1564_v58 = vadd.f32 %v1563_v31, %v1562_v50 }
 0x246   : > { %v1539_v40 = vadd.f32 %v1538_v12, %v1537_v19  ;;  %v1565_v44 = vrot.slane %v1564_v58, 2 }
 0x248   : > { %v1540_v9 = vrot.slane %v1539_v40, 1  ;;  %v1566_v21 = vadd.f32 %v1565_v44, %v1564_v58 }
 0x24a   : > { %v1567_v39 = vrot.slane %v1566_v21, 1  ;;  %v1541_v60 = vadd.f32 %v1540_v9, %v1539_v40 }
 0x24c   : > { %v1568_v23 = vadd.f32 %v1567_v39, %v1566_v21 }
 0x24e   : > { %v1571_v24 = vsel %vm1411_vm2, %v1568_v23, %v1541_v60 }
 0x24f   : > { %2211 = vmatmul.msk.f32.vlgmr.msra.gmra.mxu2 %vm948_vm0, %v1571_v24 }
 0x2d2   : > { %v1591_v29 = vpop.f32.mrf.mxu2 }
 0x2d3   : > { %v1594_v51 = vmul.f32 %v1591_v29, %v2812_v30 }
 0x2d5   : > { %v1595_v32 = vadd.f32 1e-05, %v1594_v51 }
 0x2d7   : > { %2345 = vrsqrt.f32 %v1595_v32  ;;  %vm1602_vm5 = vweird.f32 %v1595_v32 }
 0x2dd   : > { %v2346_v7 = vpop.eup %2345 }
 0x2de   : > { %v1597_v26 = vmul.f32 %v2346_v7, %v1595_v32  ;;  %vm1603_vm4 = vweird.f32 %v2346_v7 }
 0x2df   : > { %vm1604_vm6 = vmor %vm1602_vm5, %vm1603_vm4 }
 0x2e0   : > { %v1598_v13 = vmul.f32 %v2346_v7, %v1597_v26 }
 0x2e2   : > { %v1599_v17 = vmul.f32 0.5, %v1598_v13 }
 0x2e4   : > { %v1600_v33 = vsub.f32 1.5, %v1599_v17 }
 0x2e6   : > { %v1601_v4 = vmul.f32 %v2346_v7, %v1600_v33 }
 0x2e8   : > { %v1605_v38 = vsel %vm1604_vm6, %v2346_v7, %v1601_v4 }
 0x2e9   : > { %v1610_v3 = vmul.f32 %v1609_v36, %v1605_v38  ;;  %v1607_v30 = vrot.slane %v1605_v38, 1 }
 0x2eb   : > { %v1614_v10 = vperm.slane %v1610_v3, 0  ;;  %v1611_v25 = vmul.f32 %v1609_v36, %v1607_v30 }
 0x2ed   : > { %v1618_v45 = vmul.f32 %v1614_v10, %v2818_v28  ;;  %v1619_v34 = vmul.f32 %v1614_v10, %v2821_v47  ;;  %v1620_v57 = vmul.f32 %v1614_v10, %v2824_v35  ;;  %v1621_v52 = vmul.f32 %v1614_v10, %v2837_v42 }
 0x2ee   : > { %v1622_v11 = vmul.f32 %v1614_v10, %v2846_v37  ;;  %v1623_v59 = vmul.f32 %v1614_v10, %v2860_v0  ;;  %v2984_v18 = vperm.slane %v1611_v25, 0  ;;  %v1624_v28 = vmul.f32 %v1614_v10, %v2863_v55 }
 0x2ef   : > { %v1644_v22 = vadd.f32 %v2977_v2, %v1618_v45  ;;  %v1625_v49 = vmul.f32 %v1614_v10, %v2869_v61  ;;  %v1645_v5 = vadd.f32 %v2977_v2, %v1619_v34  ;;  %v1646_v47 = vadd.f32 %v2977_v2, %v1620_v57 }
 0x2f0   : > { %v1647_v35 = vadd.f32 %v2977_v2, %v1621_v52  ;;  %v1626_v42 = vmul.f32 %v1614_v10, %v2878_v63  ;;  %v1648_v37 = vadd.f32 %v2977_v2, %v1622_v11  ;;  %v1627_v0 = vmul.f32 %v1614_v10, %v2892_v43 }
 0x2f1   : > { %v1649_v8 = vadd.f32 %v2977_v2, %v1623_v59  ;;  %v1628_v55 = vmul.f32 %v1614_v10, %v2936_v6  ;;  %v1629_v61 = vmul.f32 %v2984_v18, %v2828_v53  ;;  %v1650_v48 = vadd.f32 %v2977_v2, %v1624_v28 }
 0x2f2   : > { %v1666_v54 = vmax.f32 %v1644_v22, 0.0  ;;  %v1651_v50 = vadd.f32 %v2977_v2, %v1625_v49  ;;  %v1667_v19 = vmax.f32 %v1645_v5, 0.0  ;;  %v1668_v63 = vmax.f32 %v1646_v47, 0.0 }
 0x2f3   : > { %v1669_v31 = vmax.f32 %v1647_v35, 0.0  ;;  %v1630_v12 = vmul.f32 %v2984_v18, %v2832_v56  ;;  %v1631_v43 = vmul.f32 %v2984_v18, %v2843_v16  ;;  %v1652_v58 = vadd.f32 %v2977_v2, %v1626_v42 }
 0x2f4   : > { %v1670_v6 = vmax.f32 %v1648_v37, 0.0  ;;  %v1632_v53 = vmul.f32 %v2984_v18, %v2854_v46  ;;  %v1633_v40 = vmul.f32 %v2984_v18, %v2873_v15  ;;  %v1653_v56 = vadd.f32 %v2977_v2, %v1627_v0 }
 0x2f5   : > { %v1671_v44 = vmax.f32 %v1649_v8, 0.0  ;;  %v1654_v16 = vadd.f32 %v2977_v2, %v1628_v55  ;;  %v1655_v9 = vadd.f32 %v2977_v2, %v1629_v61  ;;  %v1672_v21 = vmax.f32 %v1650_v48, 0.0 }
 0x2f6   : > { %v1688_v39 = vpack.c.bf16 %v1666_v54, %v1666_v54  ;;  %v1673_v60 = vmax.f32 %v1651_v50, 0.0  ;;  %v1689_v23 = vpack.c.bf16 %v1667_v19, %v1667_v19  ;;  %v1690_v24 = vpack.c.bf16 %v1668_v63, %v1668_v63 }
 0x2f7   : > { %v1691_v29 = vpack.c.bf16 %v1669_v31, %v1669_v31  ;;  %v1634_v46 = vmul.f32 %v2984_v18, %v2886_v27  ;;  %v1656_v15 = vadd.f32 %v2977_v2, %v1630_v12  ;;  %v1674_v51 = vmax.f32 %v1652_v58, 0.0 }
 0x2f8   : > { %v1692_v32 = vpack.c.bf16 %v1670_v6, %v1670_v6  ;;  %1711 = vst.msk [vmem:[%s3010_s16] sm:$0xf] %vm1710_vm7, %v1688_v39  ;;  %v1635_v7 = vmul.f32 %v2984_v18, %v2899_v14  ;;  %v1657_v26 = vadd.f32 %v2977_v2, %v1631_v43  ;;  %v1675_v13 = vmax.f32 %v1653_v56, 0.0 }
 0x2f9   : > { %v1693_v17 = vpack.c.bf16 %v1671_v44, %v1671_v44  ;;  %1712 = vst.msk [vmem:[%s3010_s16 + $0x4] sm:$0xf] %vm1710_vm7, %v1689_v23  ;;  %v1636_v27 = vmul.f32 %v2984_v18, %v2910_v1  ;;  %v1658_v33 = vadd.f32 %v2977_v2, %v1632_v53  ;;  %v1676_v4 = vmax.f32 %v1654_v16, 0.0 }
 0x2fa   : > { %v1694_v36 = vpack.c.bf16 %v1672_v21, %v1672_v21  ;;  %1713 = vst.msk [vmem:[%s3010_s16 + $0x8] sm:$0xf] %vm1710_vm7, %v1690_v24  ;;  %v1637_v14 = vmul.f32 %v2984_v18, %v2917_v62  ;;  %v1659_v38 = vadd.f32 %v2977_v2, %v1633_v40  ;;  %v1677_v3 = vmax.f32 %v1655_v9, 0.0 }
 0x2fb   : > { %v1695_v30 = vpack.c.bf16 %v1673_v60, %v1673_v60  ;;  %1714 = vst.msk [vmem:[%s3010_s16 + $0xc] sm:$0xf] %vm1710_vm7, %v1691_v29  ;;  %v1638_v1 = vmul.f32 %v2984_v18, %v2924_v41  ;;  %v1660_v10 = vadd.f32 %v2977_v2, %v1634_v46  ;;  %v1678_v25 = vmax.f32 %v1656_v15, 0.0 }
 0x2fc   : > { %v1696_v45 = vpack.c.bf16 %v1674_v51, %v1674_v51  ;;  %1715 = vst.msk [vmem:[%s3010_s16 + $0x10] sm:$0xf] %vm1710_vm7, %v1692_v32  ;;  %v1639_v62 = vmul.f32 %v2984_v18, %v2949_v20  ;;  %v1661_v34 = vadd.f32 %v2977_v2, %v1635_v7  ;;  %v1679_v57 = vmax.f32 %v1657_v26, 0.0 }
 0x2fd   : > { %v1697_v52 = vpack.c.bf16 %v1675_v13, %v1675_v13  ;;  %1716 = vst.msk [vmem:[%s3010_s16 + $0x14] sm:$0xf] %vm1710_vm7, %v1693_v17  ;;  %v1662_v41 = vadd.f32 %v2977_v2, %v1636_v27  ;;  %v1680_v11 = vmax.f32 %v1658_v33, 0.0  ;;  %v1698_v59 = vpack.c.bf16 %v1676_v4, %v1676_v4 }
 0x2fe   : > { %1717 = vst.msk [vmem:[%s3010_s16 + $0x18] sm:$0xf] %vm1710_vm7, %v1694_v36  ;;  %v1663_v28 = vadd.f32 %v2977_v2, %v1637_v14  ;;  %v1681_v22 = vmax.f32 %v1659_v38, 0.0  ;;  %v1699_v20 = vpack.c.bf16 %v1677_v3, %v1677_v3  ;;  %v1664_v18 = vadd.f32 %v2977_v2, %v1638_v1 }
 0x2ff   : > { %1718 = vst.msk [vmem:[%s3010_s16 + $0x1c] sm:$0xf] %vm1710_vm7, %v1695_v30  ;;  %v1682_v49 = vmax.f32 %v1660_v10, 0.0  ;;  %v1700_v5 = vpack.c.bf16 %v1678_v25, %v1678_v25  ;;  %v1665_v47 = vadd.f32 %v2977_v2, %v1639_v62  ;;  %v1683_v35 = vmax.f32 %v1661_v34, 0.0 }
 0x300   : > { %1719 = vst.msk [vmem:[%s3010_s16 + $0x20] sm:$0xf] %vm1710_vm7, %v1696_v45  ;;  %v1701_v42 = vpack.c.bf16 %v1679_v57, %v1679_v57  ;;  %v1684_v37 = vmax.f32 %v1662_v41, 0.0  ;;  %v1702_v0 = vpack.c.bf16 %v1680_v11, %v1680_v11  ;;  %v1685_v8 = vmax.f32 %v1663_v28, 0.0 }
 0x301   : > { %1720 = vst.msk [vmem:[%s3010_s16 + $0x24] sm:$0xf] %vm1710_vm7, %v1697_v52  ;;  %v1703_v55 = vpack.c.bf16 %v1681_v22, %v1681_v22  ;;  %v1686_v61 = vmax.f32 %v1664_v18, 0.0  ;;  %v1704_v2 = vpack.c.bf16 %v1682_v49, %v1682_v49  ;;  %v1687_v48 = vmax.f32 %v1665_v47, 0.0 }
 0x302   : > { %1721 = vst.msk [vmem:[%s3010_s16 + $0x28] sm:$0xf] %vm1710_vm7, %v1698_v59  ;;  %v1705_v54 = vpack.c.bf16 %v1683_v35, %v1683_v35  ;;  %v1706_v50 = vpack.c.bf16 %v1684_v37, %v1684_v37  ;;  %v1707_v19 = vpack.c.bf16 %v1685_v8, %v1685_v8 }
 0x303   : > { %1722 = vst.msk [vmem:[%s3010_s16 + $0x2c] sm:$0xf] %vm1710_vm7, %v1699_v20  ;;  %v1708_v63 = vpack.c.bf16 %v1686_v61, %v1686_v61  ;;  %v1709_v31 = vpack.c.bf16 %v1687_v48, %v1687_v48 }
 0x304   : > { %1723 = vst.msk [vmem:[%s3010_s16 + $0x30] sm:$0xf] %vm1710_vm7, %v1700_v5 }
 0x305   : > { %1724 = vst.msk [vmem:[%s3010_s16 + $0x34] sm:$0xf] %vm1710_vm7, %v1701_v42 }
 0x306   : > { %1725 = vst.msk [vmem:[%s3010_s16 + $0x38] sm:$0xf] %vm1710_vm7, %v1702_v0 }
 0x307   : > { %1726 = vst.msk [vmem:[%s3010_s16 + $0x3c] sm:$0xf] %vm1710_vm7, %v1703_v55 }
 0x308   : > { %1727 = vst.msk [vmem:[%s3010_s16 + $0x40] sm:$0xf] %vm1710_vm7, %v1704_v2 }
 0x309   : > { %1728 = vst.msk [vmem:[%s3010_s16 + $0x44] sm:$0xf] %vm1710_vm7, %v1705_v54 }
 0x30a   : > { %1729 = vst.msk [vmem:[%s3010_s16 + $0x48] sm:$0xf] %vm1710_vm7, %v1706_v50 }
 0x30b   : > { %1730 = vst.msk [vmem:[%s3010_s16 + $0x4c] sm:$0xf] %vm1710_vm7, %v1707_v19 }
 0x30c   : > { %1731 = vst.msk [vmem:[%s3010_s16 + $0x50] sm:$0xf] %vm1710_vm7, %v1708_v63 }
 0x30d   : > { %1732 = vst.msk [vmem:[%s3010_s16 + $0x54] sm:$0xf] %vm1710_vm7, %v1709_v31 }
 0x30e PF: > { %s16_s21 = sadd.s32 1, %s2353_s21  }
 0x30f   : > { %p13_p4 = scmp.ge.s32.totalorder %s16_s21, 4  }
 0x311   :  { %15 = sbr.rel (!%p13_p4) target bundleno = 1 (0x1), region = 86 }

// kernel: depthwise_ban_forward.9
= control target key start
LH: loop header
LB: loop body
LE: loop exit
PB: predicated region body
PF: predicated region fallthrough
CT: control target
= control target key end

     0   :  { %s1831_s12 = smov 0   ;;  %s2140_s0 = inlined_call_operand.vmem [shape: bf16[2,176,576], index: 0, kind: input, shape index: {}]   ;;  %s2141_s1 = inlined_call_operand.vmem [shape: bf16[2,576,128], index: 1, kind: input, shape index: {}]   ;;  %s2142_s2 = inlined_call_operand.vmem [shape: f32[2,1,128], index: 2, kind: input, shape index: {}]   ;;  %s2143_s3 = inlined_call_operand.vmem [shape: f32[2,176,128], index: 3, kind: output, shape index: {}]  }
   0x1 LB: > { %s1291_s13 = sadd.s32 4294967295, %s1809_s12   ;;  %p1295_p0 = scmp.ge.s32.totalorder %s1809_s12, 1  ;;  %s1809_s12 = sphi %s1831_s12, %s13_s12  }
   0x2   : > { %p155_p1 = scmp.lt.s32.totalorder %s1809_s12, 3 }
   0x4   : > { %p156_p2 = pnand %p1295_p0, %p155_p1 }
   0x5   : > { %p187_p3 = scmp.lt.s32.totalorder (!%p156_p2), %s1291_s13, 1 }
   0x6   : > { %159 = sbr.rel (%p156_p2) target bundleno = 401 (0x191), region = 32 }
   0xb   : > { %s2145_s13 = smov (!%p187_p3, %s1291_s13), 1  ;;  %vm839_vm0 = vcmask 523264  }
   0xc   : > { %s1792_s14 = smul.u32 288, %s2145_s13  ;;  %s199_s21 = scalar_lea.vmem %s2142_s2, %s2145_s13 }
   0xd   : > { %s1791_s18 = smul.u32 440, %s2145_s13 }
   0xe   : > { %s1845_s17 = scalar_lea.vmem %s2141_s1, %s1792_s14  ;;  %s1793_s27 = smul.u32 176, %s2145_s13 }
   0xf   : > { %v1738_v0 = vld [vmem:[%s1845_s17 + $0x38] sm:$0xff]  ;;  %v1737_v1 = vld [vmem:[%s1845_s17 + $0x30] sm:$0xff]  ;;  %v1736_v2 = vld [vmem:[%s1845_s17 + $0x28] sm:$0xff]  ;;  %s1862_s24 = scalar_lea.vmem %s2140_s0, %s1791_s18 }
  0x10   : > { %873 = vmatpush.bf16.msra.mxu0 %v1738_v0  ;;  %1767 = vmatpush.bf16.msra.mxu1 %v1738_v0  ;;  %v1735_v3 = vld [vmem:[%s1845_s17 + $0x20] sm:$0xff]  ;;  %v1734_v4 = vld [vmem:[%s1845_s17 + $0x18] sm:$0xff]  ;;  %v1733_v5 = vld [vmem:[%s1845_s17 + $0x10] sm:$0xff]  ;;  %s2071_s30 = scalar_lea.vmem %s2143_s3, %s1793_s27 }
  0x11   : > { %1769 = vmatpush.bf16.msra.mxu3 %v1738_v0  ;;  %1768 = vmatpush.bf16.msra.mxu2 %v1738_v0  ;;  %v1732_v6 = vld [vmem:[%s1845_s17 + $0x8] sm:$0xff]  ;;  %v1731_v7 = vld [vmem:[%s1845_s17] sm:$0xff]  ;;  %v1678_v9 = vld [vmem:[%s1862_s24 + $0x10] sm:$0xf0] }
  0x12   : > { %v1301_v8 = vld [vmem:[%s1862_s24] sm:$0xf]  ;;  %v1361_v10 = vld [vmem:[%s1862_s24 + $0x78] sm:$0xf]  ;;  %v1693_v11 = vld [vmem:[%s1862_s24 + $0x88] sm:$0xf0] }
  0x13   : > { %v1461_v12 = vld [vmem:[%s1862_s24 + $0x140] sm:$0xf]  ;;  %v1718_v13 = vld [vmem:[%s1862_s24 + $0x150] sm:$0xf0]  ;;  %v1746_v14 = vld [vmem:[%s1845_s17 + $0x78] sm:$0xff]  ;;  %v1302_v18 = vor.u32 %v1678_v9, %v1301_v8  ;;  %v1362_v19 = vor.u32 %v1693_v11, %v1361_v10 }
  0x14   : > { %874 = vmatpush.bf16.msra.mxu0 %v1737_v1  ;;  %1770 = vmatpush.bf16.msra.mxu1 %v1737_v1  ;;  %v1762_v15 = vld [vmem:[%s1845_s17 + $0xf8] sm:$0xff]  ;;  %v1421_v16 = vld [vmem:[%s1862_s24 + $0xf0] sm:$0xf]  ;;  %v1708_v17 = vld [vmem:[%s1862_s24 + $0x100] sm:$0xf0]  ;;  %v1462_v20 = vor.u32 %v1718_v13, %v1461_v12 }
  0x15   : > { %1772 = vmatpush.bf16.msra.mxu3 %v1737_v1  ;;  %1771 = vmatpush.bf16.msra.mxu2 %v1737_v1  ;;  %v1754_v21 = vld [vmem:[%s1845_s17 + $0xb8] sm:$0xff]  ;;  %v1422_v22 = vor.u32 %v1708_v17, %v1421_v16  ;;  %v1745_v23 = vld [vmem:[%s1845_s17 + $0x70] sm:$0xff]  ;;  %v1744_v27 = vld [vmem:[%s1845_s17 + $0x68] sm:$0xff] }
  0x16   : > { %v1761_v24 = vld [vmem:[%s1845_s17 + $0xf0] sm:$0xff]  ;;  %v1766_v25 = vld [vmem:[%s1845_s17 + $0x118] sm:$0xff]  ;;  %v1760_v28 = vld [vmem:[%s1845_s17 + $0xe8] sm:$0xff] }
  0x17   : > { %v1753_v26 = vld [vmem:[%s1845_s17 + $0xb0] sm:$0xff]  ;;  %v1752_v30 = vld [vmem:[%s1845_s17 + $0xa8] sm:$0xff]  ;;  %v1743_v31 = vld [vmem:[%s1845_s17 + $0x60] sm:$0xff] }
  0x18   : > { %875 = vmatpush.bf16.msra.mxu0 %v1736_v2  ;;  %1773 = vmatpush.bf16.msra.mxu1 %v1736_v2  ;;  %v1765_v29 = vld [vmem:[%s1845_s17 + $0x110] sm:$0xff]  ;;  %v1759_v32 = vld [vmem:[%s1845_s17 + $0xe0] sm:$0xff]  ;;  %v1764_v33 = vld [vmem:[%s1845_s17 + $0x108] sm:$0xff] }
  0x19   : > { %1775 = vmatpush.bf16.msra.mxu3 %v1736_v2  ;;  %1774 = vmatpush.bf16.msra.mxu2 %v1736_v2  ;;  %v1321_v34 = vld [vmem:[%s1862_s24 + $0x28] sm:$0xf]  ;;  %v1683_v35 = vld [vmem:[%s1862_s24 + $0x38] sm:$0xf0]  ;;  %v1381_v36 = vld [vmem:[%s1862_s24 + $0xa0] sm:$0xf] }
  0x1a   : > { %v1698_v37 = vld [vmem:[%s1862_s24 + $0xb0] sm:$0xf0]  ;;  %v1481_v38 = vld [vmem:[%s1862_s24 + $0x168] sm:$0xf]  ;;  %v1751_v39 = vld [vmem:[%s1845_s17 + $0xa0] sm:$0xff]  ;;  %v1322_v46 = vor.u32 %v1683_v35, %v1321_v34 }
  0x1b   : > { %v1723_v40 = vld [vmem:[%s1862_s24 + $0x178] sm:$0xf0]  ;;  %v1441_v41 = vld [vmem:[%s1862_s24 + $0x118] sm:$0xf]  ;;  %v1713_v43 = vld [vmem:[%s1862_s24 + $0x128] sm:$0xf0]  ;;  %v1382_v47 = vor.u32 %v1698_v37, %v1381_v36 }
  0x1c   : > { %876 = vmatpush.bf16.msra.mxu0 %v1735_v3  ;;  %1776 = vmatpush.bf16.msra.mxu1 %v1735_v3  ;;  %v1742_v42 = vld [vmem:[%s1845_s17 + $0x58] sm:$0xff]  ;;  %v1763_v45 = vld [vmem:[%s1845_s17 + $0x100] sm:$0xff]  ;;  %v1482_v48 = vor.u32 %v1723_v40, %v1481_v38  ;;  %v1442_v50 = vor.u32 %v1713_v43, %v1441_v41  ;;  %v1741_v51 = vld [vmem:[%s1845_s17 + $0x50] sm:$0xff] }
  0x1d   : > { %1778 = vmatpush.bf16.msra.mxu3 %v1735_v3  ;;  %1777 = vmatpush.bf16.msra.mxu2 %v1735_v3  ;;  %v1758_v44 = vld [vmem:[%s1845_s17 + $0xd8] sm:$0xff]  ;;  %v1757_v52 = vld [vmem:[%s1845_s17 + $0xd0] sm:$0xff]  ;;  %v1740_v54 = vld [vmem:[%s1845_s17 + $0x48] sm:$0xff] }
  0x1e   : > { %v1750_v49 = vld [vmem:[%s1845_s17 + $0x98] sm:$0xff]  ;;  %v1749_v53 = vld [vmem:[%s1845_s17 + $0x90] sm:$0xff]  ;;  %v1756_v55 = vld [vmem:[%s1845_s17 + $0xc8] sm:$0xff] }
  0x1f   : > { %v1748_v56 = vld [vmem:[%s1845_s17 + $0x88] sm:$0xff]  ;;  %v1739_v57 = vld [vmem:[%s1845_s17 + $0x40] sm:$0xff]  ;;  %v1341_v59 = vld [vmem:[%s1862_s24 + $0x50] sm:$0xf] }
  0x20   : > { %877 = vmatpush.bf16.msra.mxu0 %v1734_v4  ;;  %1779 = vmatpush.bf16.msra.mxu1 %v1734_v4  ;;  %v1755_v58 = vld [vmem:[%s1845_s17 + $0xc0] sm:$0xff]  ;;  %v1401_v61 = vld [vmem:[%s1862_s24 + $0xc8] sm:$0xf]  ;;  %v1703_v62 = vld [vmem:[%s1862_s24 + $0xd8] sm:$0xf0] }
  0x21   : > { %1781 = vmatpush.bf16.msra.mxu3 %v1734_v4  ;;  %1780 = vmatpush.bf16.msra.mxu2 %v1734_v4  ;;  %v1688_v60 = vld [vmem:[%s1862_s24 + $0x60] sm:$0xf0]  ;;  %v1501_v0 = vld [vmem:[%s1862_s24 + $0x190] sm:$0xf]  ;;  %v1309_v2 = vld [vmem:[%s1862_s24 + $0x8] sm:$0xf] }
  0x22   : > { %v1747_v63 = vld [vmem:[%s1845_s17 + $0x80] sm:$0xff]  ;;  %v1679_v3 = vld [vmem:[%s1862_s24 + $0x18] sm:$0xf0]  ;;  %v1342_v4 = vor.u32 %v1688_v60, %v1341_v59  ;;  %v1303_v9 = vld [vmem:[%s1862_s24 + $0x14] sm:$0xf0] }
  0x23   : > { %v1728_v1 = vld [vmem:[%s1862_s24 + $0x1a0] sm:$0xf0]  ;;  %v1317_v10 = vld [vmem:[%s1862_s24 + $0x10] sm:$0xf]  ;;  %v1677_v12 = vld [vmem:[%s1862_s24 + $0xc] sm:$0xf] }
  0x24   : > { %878 = vmatpush.bf16.msra.mxu0 %v1733_v5  ;;  %1782 = vmatpush.bf16.msra.mxu1 %v1733_v5  ;;  %v1676_v8 = vld [vmem:[%s1862_s24 + $0x4] sm:$0xf]  ;;  %v1311_v13 = vld [vmem:[%s1862_s24 + $0x1c] sm:$0xf0]  ;;  %v1690_v35 = vld [vmem:[%s1862_s24 + $0x70] sm:$0xf0] }
  0x25   : > { %1784 = vmatpush.bf16.msra.mxu3 %v1733_v5  ;;  %1783 = vmatpush.bf16.msra.mxu2 %v1733_v5  ;;  %v1402_v5 = vor.u32 %v1703_v62, %v1401_v61  ;;  %v1680_v11 = vld [vmem:[%s1862_s24 + $0x20] sm:$0xf0]  ;;  %v1306_v16 = vor.u32 %v1676_v8, %v1303_v9  ;;  %v1357_v34 = vld [vmem:[%s1862_s24 + $0x60] sm:$0xf]  ;;  %v1687_v36 = vld [vmem:[%s1862_s24 + $0x5c] sm:$0xf] }
  0x26   : > { %v1318_v17 = vor.u32 %v1680_v11, %v1317_v10  ;;  %v1351_v37 = vld [vmem:[%s1862_s24 + $0x6c] sm:$0xf0]  ;;  %v1369_v38 = vld [vmem:[%s1862_s24 + $0x80] sm:$0xf]  ;;  %v1358_v41 = vor.u32 %v1690_v35, %v1357_v34  ;;  %v1700_v59 = vld [vmem:[%s1862_s24 + $0xc0] sm:$0xf0] }
  0x27   : > { %v1697_v60 = vld [vmem:[%s1862_s24 + $0xac] sm:$0xf]  ;;  %v1391_v61 = vld [vmem:[%s1862_s24 + $0xbc] sm:$0xf0]  ;;  %v1409_v62 = vld [vmem:[%s1862_s24 + $0xd0] sm:$0xf] }
  0x28   : > { %879 = vmatpush.bf16.msra.mxu0 %v1732_v6  ;;  %1785 = vmatpush.bf16.msra.mxu1 %v1732_v6  ;;  %v1702_v8 = vld [vmem:[%s1862_s24 + $0xd4] sm:$0xf]  ;;  %v1411_v9 = vld [vmem:[%s1862_s24 + $0xe4] sm:$0xf0]  ;;  %v1429_v10 = vld [vmem:[%s1862_s24 + $0xf8] sm:$0xf] }
  0x29   : > { %1787 = vmatpush.bf16.msra.mxu3 %v1732_v6  ;;  %1786 = vmatpush.bf16.msra.mxu2 %v1732_v6  ;;  %v1502_v6 = vor.u32 %v1728_v1, %v1501_v0  ;;  %v1709_v11 = vld [vmem:[%s1862_s24 + $0x108] sm:$0xf0] }
  0x2c   : > { %880 = vmatpush.bf16.msra.mxu0 %v1731_v7  ;;  %1788 = vmatpush.bf16.msra.mxu1 %v1731_v7 }
  0x2d   : > { %1790 = vmatpush.bf16.msra.mxu3 %v1731_v7  ;;  %1789 = vmatpush.bf16.msra.mxu2 %v1731_v7  ;;  %v1310_v7 = vor.u32 %v1679_v3, %v1309_v2  ;;  %v1394_v2 = vor.u32 %v1697_v60, %v1391_v61 }
  0x2f   : > { %881 = vmatmul.bf16.vlgmr.msra.gmra.mxu0 %v1302_v18  ;;  %896 = vmatmul.bf16.vlgmr.msra.gmra.mxu1 %v1362_v19  ;;  %v1314_v18 = vor.u32 %v1677_v12, %v1311_v13 }
  0x30   : > { %937 = vmatpush.bf16.msrb.mxu1 %v1746_v14  ;;  %921 = vmatmul.bf16.vlgmr.msra.gmra.mxu3 %v1462_v20  ;;  %v1329_v14 = vld [vmem:[%s1862_s24 + $0x30] sm:$0xf]  ;;  %v1681_v20 = vld [vmem:[%s1862_s24 + $0x2c] sm:$0xf] }
  0x31   : > { %1065 = vmatpush.bf16.msrb.mxu3 %v1762_v15  ;;  %1001 = vmatpush.bf16.msrb.mxu2 %v1754_v21  ;;  %v1684_v15 = vld [vmem:[%s1862_s24 + $0x40] sm:$0xf0]  ;;  %v1323_v21 = vld [vmem:[%s1862_s24 + $0x3c] sm:$0xf0] }
  0x32   : > { %911 = vmatmul.bf16.vlgmr.msra.gmra.mxu2 %v1422_v22  ;;  %1133 = vmatpush.bf16.msrb.mxu0 %v1766_v25  ;;  %v1330_v19 = vor.u32 %v1684_v15, %v1329_v14  ;;  %v1337_v22 = vld [vmem:[%s1862_s24 + $0x38] sm:$0xf]  ;;  %v1331_v25 = vld [vmem:[%s1862_s24 + $0x44] sm:$0xf0] }
  0x34   : > { %938 = vmatpush.bf16.msrb.mxu1 %v1745_v23  ;;  %v1685_v23 = vld [vmem:[%s1862_s24 + $0x48] sm:$0xf0] }
  0x35   : > { %1066 = vmatpush.bf16.msrb.mxu3 %v1761_v24  ;;  %1002 = vmatpush.bf16.msrb.mxu2 %v1753_v26  ;;  %v1682_v24 = vld [vmem:[%s1862_s24 + $0x34] sm:$0xf]  ;;  %v1349_v26 = vld [vmem:[%s1862_s24 + $0x58] sm:$0xf] }
  0x36   : > { %1134 = vmatpush.bf16.msrb.mxu0 %v1765_v29  ;;  %v1338_v29 = vor.u32 %v1685_v23, %v1337_v22 }
  0x38   : > { %939 = vmatpush.bf16.msrb.mxu1 %v1744_v27  ;;  %v1689_v27 = vld [vmem:[%s1862_s24 + $0x68] sm:$0xf0] }
  0x39   : > { %1067 = vmatpush.bf16.msrb.mxu3 %v1760_v28  ;;  %1003 = vmatpush.bf16.msrb.mxu2 %v1752_v30  ;;  %v1326_v28 = vor.u32 %v1681_v20, %v1323_v21  ;;  %v1334_v30 = vor.u32 %v1682_v24, %v1331_v25  ;;  %v1706_v25 = vld [vmem:[%s1862_s24 + $0xf4] sm:$0xf] }
  0x3a   : > { %1135 = vmatpush.bf16.msrb.mxu0 %v1764_v33  ;;  %v1343_v33 = vld [vmem:[%s1862_s24 + $0x64] sm:$0xf0] }
  0x3c   : > { %940 = vmatpush.bf16.msrb.mxu1 %v1743_v31  ;;  %v1350_v31 = vor.u32 %v1689_v27, %v1349_v26  ;;  %v1423_v26 = vld [vmem:[%s1862_s24 + $0x104] sm:$0xf0]  ;;  %v1437_v27 = vld [vmem:[%s1862_s24 + $0x100] sm:$0xf] }
  0x3d   : > { %1068 = vmatpush.bf16.msrb.mxu3 %v1759_v32  ;;  %1004 = vmatpush.bf16.msrb.mxu2 %v1751_v39  ;;  %v1686_v32 = vld [vmem:[%s1862_s24 + $0x54] sm:$0xf]  ;;  %v1426_v34 = vor.u32 %v1706_v25, %v1423_v26  ;;  %v1489_v25 = vld [vmem:[%s1862_s24 + $0x170] sm:$0xf]  ;;  %v1724_v26 = vld [vmem:[%s1862_s24 + $0x180] sm:$0xf0] }
  0x3e   : > { %1136 = vmatpush.bf16.msrb.mxu0 %v1763_v45  ;;  %v1694_v39 = vld [vmem:[%s1862_s24 + $0x90] sm:$0xf0]  ;;  %v1346_v40 = vor.u32 %v1686_v32, %v1343_v33  ;;  %v1363_v45 = vld [vmem:[%s1862_s24 + $0x8c] sm:$0xf0] }
  0x3f   : > { %886 = vmatmul.bf16.gmra.mxu0 %v1322_v46  ;;  %901 = vmatmul.bf16.gmra.mxu1 %v1382_v47  ;;  %v1370_v43 = vor.u32 %v1694_v39, %v1369_v38  ;;  %v1377_v46 = vld [vmem:[%s1862_s24 + $0x88] sm:$0xf]  ;;  %v1695_v47 = vld [vmem:[%s1862_s24 + $0x98] sm:$0xf0]  ;;  %v1714_v32 = vld [vmem:[%s1862_s24 + $0x130] sm:$0xf0] }
  0x40   : > { %941 = vmatpush.bf16.msrb.mxu1 %v1742_v42  ;;  %926 = vmatmul.bf16.gmra.mxu3 %v1482_v48  ;;  %v1354_v42 = vor.u32 %v1687_v36, %v1351_v37  ;;  %v1692_v48 = vld [vmem:[%s1862_s24 + $0x84] sm:$0xf] }
  0x41   : > { %1069 = vmatpush.bf16.msrb.mxu3 %v1758_v44  ;;  %1005 = vmatpush.bf16.msrb.mxu2 %v1750_v49  ;;  %v1691_v44 = vld [vmem:[%s1862_s24 + $0x7c] sm:$0xf]  ;;  %v1371_v49 = vld [vmem:[%s1862_s24 + $0x94] sm:$0xf0] }
  0x42   : > { %916 = vmatmul.bf16.gmra.mxu2 %v1442_v50  ;;  %v1389_v50 = vld [vmem:[%s1862_s24 + $0xa8] sm:$0xf] }
  0x44   : > { %942 = vmatpush.bf16.msrb.mxu1 %v1741_v51  ;;  %v1699_v51 = vld [vmem:[%s1862_s24 + $0xb8] sm:$0xf0] }
  0x45   : > { %1070 = vmatpush.bf16.msrb.mxu3 %v1757_v52  ;;  %1006 = vmatpush.bf16.msrb.mxu2 %v1749_v53  ;;  %v1366_v52 = vor.u32 %v1691_v44, %v1363_v45  ;;  %v1378_v53 = vor.u32 %v1695_v47, %v1377_v46 }
  0x48   : > { %943 = vmatpush.bf16.msrb.mxu1 %v1740_v54  ;;  %v1374_v54 = vor.u32 %v1692_v48, %v1371_v49 }
  0x49   : > { %1071 = vmatpush.bf16.msrb.mxu3 %v1756_v55  ;;  %1007 = vmatpush.bf16.msrb.mxu2 %v1748_v56  ;;  %v1390_v55 = vor.u32 %v1699_v51, %v1389_v50  ;;  %v1696_v56 = vld [vmem:[%s1862_s24 + $0xa4] sm:$0xf]  ;;  %v1711_v51 = vld [vmem:[%s1862_s24 + $0x11c] sm:$0xf] }
  0x4c   : > { %944 = vmatpush.bf16.msrb.mxu1 %v1739_v57  ;;  %v1383_v57 = vld [vmem:[%s1862_s24 + $0xb4] sm:$0xf0] }
  0x4d   : > { %1072 = vmatpush.bf16.msrb.mxu3 %v1755_v58  ;;  %1008 = vmatpush.bf16.msrb.mxu2 %v1747_v63  ;;  %v1397_v58 = vld [vmem:[%s1862_s24 + $0xb0] sm:$0xf]  ;;  %v1704_v63 = vld [vmem:[%s1862_s24 + $0xe0] sm:$0xf0]  ;;  %v1386_v0 = vor.u32 %v1696_v56, %v1383_v57  ;;  %v1451_v56 = vld [vmem:[%s1862_s24 + $0x134] sm:$0xf0] }
  0x4e   : > { %v1398_v1 = vor.u32 %v1700_v59, %v1397_v58  ;;  %v1410_v3 = vor.u32 %v1704_v63, %v1409_v62  ;;  %v1469_v57 = vld [vmem:[%s1862_s24 + $0x148] sm:$0xf]  ;;  %v1719_v58 = vld [vmem:[%s1862_s24 + $0x158] sm:$0xf0] }
  0x4f   : > { %891 = vmatmul.bf16.gmra.mxu0 %v1342_v4  ;;  %906 = vmatmul.bf16.gmra.mxu1 %v1402_v5  ;;  %v1701_v4 = vld [vmem:[%s1862_s24 + $0xcc] sm:$0xf]  ;;  %v1403_v5 = vld [vmem:[%s1862_s24 + $0xdc] sm:$0xf0] }
  0x50   : > { %931 = vmatmul.bf16.gmra.mxu3 %v1502_v6  ;;  %v1417_v6 = vld [vmem:[%s1862_s24 + $0xd8] sm:$0xf]  ;;  %v1406_v12 = vor.u32 %v1701_v4, %v1403_v5  ;;  %v1470_v4 = vor.u32 %v1719_v58, %v1469_v57  ;;  %v1725_v57 = vld [vmem:[%s1862_s24 + $0x188] sm:$0xf0]  ;;  %v1491_v58 = vld [vmem:[%s1862_s24 + $0x184] sm:$0xf0] }
  0x52   : > { %1009 = vmatmul.bf16.vlgmr.msrb.gmra.mxu2 %v1310_v7  ;;  %v1705_v7 = vld [vmem:[%s1862_s24 + $0xe8] sm:$0xf0] }
  0x53   : > { %v1418_v13 = vor.u32 %v1705_v7, %v1417_v6 }
  0x5f   : > { %945 = vmatmul.bf16.vlgmr.msrb.gmra.mxu1 %v1306_v16  ;;  %1663 = vmatmul.msk.bf16.vlgmr.msrb.gmra.mxu0 %vm839_vm0, %v1318_v17  ;;  %v1414_v16 = vor.u32 %v1702_v8, %v1411_v9  ;;  %v1430_v17 = vor.u32 %v1709_v11, %v1429_v10 }
  0x60   : > { %1073 = vmatmul.bf16.vlgmr.msrb.gmra.mxu3 %v1314_v18  ;;  %v1980_v18 = vld [vmem:[%s199_s21] ss:$0 sm:$0xff] }
  0x62   : > { %1014 = vmatmul.bf16.gmra.mxu2 %v1330_v19 }
  0x6f   : > { %950 = vmatmul.bf16.gmra.mxu1 %v1326_v28  ;;  %1664 = vmatmul.msk.bf16.gmra.mxu0 %vm839_vm0, %v1338_v29  ;;  %v1710_v28 = vld [vmem:[%s1862_s24 + $0x110] sm:$0xf0]  ;;  %v1707_v29 = vld [vmem:[%s1862_s24 + $0xfc] sm:$0xf] }
  0x70   : > { %1078 = vmatmul.bf16.gmra.mxu3 %v1334_v30  ;;  %v1431_v30 = vld [vmem:[%s1862_s24 + $0x10c] sm:$0xf0]  ;;  %v1438_v35 = vor.u32 %v1710_v28, %v1437_v27 }
  0x71   : > { %v1434_v39 = vor.u32 %v1707_v29, %v1431_v30 }
  0x72   : > { %1019 = vmatmul.bf16.gmra.mxu2 %v1350_v31  ;;  %v1449_v31 = vld [vmem:[%s1862_s24 + $0x120] sm:$0xf] }
  0x7f   : > { %955 = vmatmul.bf16.gmra.mxu1 %v1346_v40  ;;  %1665 = vmatmul.msk.bf16.gmra.mxu0 %vm839_vm0, %v1358_v41 }
  0x80   : > { %1083 = vmatmul.bf16.gmra.mxu3 %v1354_v42  ;;  %v1450_v42 = vor.u32 %v1714_v32, %v1449_v31 }
  0x82   : > { %1024 = vmatmul.bf16.gmra.mxu2 %v1370_v43 }
  0x8f   : > { %960 = vmatmul.bf16.gmra.mxu1 %v1366_v52  ;;  %1666 = vmatmul.msk.bf16.gmra.mxu0 %vm839_vm0, %v1378_v53  ;;  %v1443_v52 = vld [vmem:[%s1862_s24 + $0x12c] sm:$0xf0]  ;;  %v1457_v53 = vld [vmem:[%s1862_s24 + $0x128] sm:$0xf] }
  0x90   : > { %1088 = vmatmul.bf16.gmra.mxu3 %v1374_v54  ;;  %v1715_v54 = vld [vmem:[%s1862_s24 + $0x138] sm:$0xf0]  ;;  %v1446_v60 = vor.u32 %v1711_v51, %v1443_v52 }
  0x91   : > { %v1458_v61 = vor.u32 %v1715_v54, %v1457_v53  ;;  %v1721_v54 = vld [vmem:[%s1862_s24 + $0x16c] sm:$0xf] }
  0x92   : > { %1029 = vmatmul.bf16.gmra.mxu2 %v1390_v55  ;;  %v1712_v55 = vld [vmem:[%s1862_s24 + $0x124] sm:$0xf] }
  0x9f   : > { %965 = vmatmul.bf16.gmra.mxu1 %v1386_v0  ;;  %1667 = vmatmul.msk.bf16.gmra.mxu0 %vm839_vm0, %v1398_v1  ;;  %v1454_v1 = vor.u32 %v1712_v55, %v1451_v56  ;;  %v1483_v55 = vld [vmem:[%s1862_s24 + $0x17c] sm:$0xf0]  ;;  %v1497_v56 = vld [vmem:[%s1862_s24 + $0x178] sm:$0xf] }
  0xa0   : > { %1093 = vmatmul.bf16.gmra.mxu3 %v1394_v2 }
  0xa2   : > { %1034 = vmatmul.bf16.gmra.mxu2 %v1410_v3 }
  0xac   : > { %v1970_v14 = vpop.f32.mrf.mxu0  ;;  %v1972_v15 = vpop.f32.mrf.mxu1 }
  0xad   : > { %v883_v30 = vadd.f32 %v1980_v18, %v1970_v14 }
  0xaf   : > { %970 = vmatmul.bf16.gmra.mxu1 %v1406_v12  ;;  %1668 = vmatmul.msk.bf16.gmra.mxu0 %vm839_vm0, %v1418_v13  ;;  %v1716_v12 = vld [vmem:[%s1862_s24 + $0x144] sm:$0xf]  ;;  %v1463_v13 = vld [vmem:[%s1862_s24 + $0x154] sm:$0xf0] }
  0xb0   : > { %1098 = vmatmul.bf16.gmra.mxu3 %v1414_v16  ;;  %v1477_v16 = vld [vmem:[%s1862_s24 + $0x150] sm:$0xf]  ;;  %v1466_v28 = vor.u32 %v1716_v12, %v1463_v13 }
  0xb2   : > { %1039 = vmatmul.bf16.gmra.mxu2 %v1430_v17  ;;  %v1720_v17 = vld [vmem:[%s1862_s24 + $0x160] sm:$0xf0] }
  0xb3   : > { %v922_v19 = vpop.f32.mrf.mxu3  ;;  %v1478_v29 = vor.u32 %v1720_v17, %v1477_v16 }
  0xb4   : > { %v1983_v20 = vadd.f32 %v1980_v18, %v922_v19  ;;  %v1985_v21 = vpop.f32.mrf.mxu0  ;;  %v1987_v22 = vpop.f32.mrf.mxu1  ;;  %v1717_v19 = vld [vmem:[%s1862_s24 + $0x14c] sm:$0xf] }
  0xb5   : > { %v912_v23 = vpop.f32.mrf.mxu2 }
  0xb6   : > { %v1990_v24 = vadd.f32 %v1980_v18, %v912_v23  ;;  %v1471_v23 = vld [vmem:[%s1862_s24 + $0x15c] sm:$0xf0] }
  0xbb   : > { %v924_v33 = vpop.f32.mrf.mxu3 }
  0xbc   : > { %v2001_v36 = vadd.f32 %v1980_v18, %v924_v33  ;;  %v2003_v37 = vpop.f32.mrf.mxu0  ;;  %v902_v38 = vpop.f32.mrf.mxu1 }
  0xbd   : > { %v2006_v40 = vadd.f32 %v1980_v18, %v902_v38  ;;  %v914_v41 = vpop.f32.mrf.mxu2  ;;  %v1490_v38 = vor.u32 %v1724_v26, %v1489_v25 }
  0xbe   : > { %v2009_v43 = vadd.f32 %v1980_v18, %v914_v41 }
  0xbf   : > { %975 = vmatmul.bf16.gmra.mxu1 %v1426_v34  ;;  %1669 = vmatmul.msk.bf16.gmra.mxu0 %vm839_vm0, %v1438_v35  ;;  %v1474_v34 = vor.u32 %v1717_v19, %v1471_v23 }
  0xc0   : > { %1103 = vmatmul.bf16.gmra.mxu3 %v1434_v39 }
  0xc2   : > { %1044 = vmatmul.bf16.gmra.mxu2 %v1450_v42  ;;  %v885_v42 = vadd.f32 %v1980_v18, %v1985_v21  ;;  %v1722_v21 = vld [vmem:[%s1862_s24 + $0x174] sm:$0xf] }
  0xc3   : > { %v927_v44 = vpop.f32.mrf.mxu3  ;;  %v1494_v12 = vor.u32 %v1722_v21, %v1491_v58 }
  0xc4   : > { %v2013_v45 = vadd.f32 %v1980_v18, %v927_v44  ;;  %v2015_v46 = vpop.f32.mrf.mxu0  ;;  %v904_v47 = vpop.f32.mrf.mxu1 }
  0xc5   : > { %v2018_v48 = vadd.f32 %v1980_v18, %v904_v47  ;;  %v917_v49 = vpop.f32.mrf.mxu2  ;;  %v890_v25 = vadd.f32 %v1980_v18, %v2015_v46 }
  0xc6   : > { %v2021_v50 = vadd.f32 %v1980_v18, %v917_v49 }
  0xcb   : > { %v929_v59 = vpop.f32.mrf.mxu3 }
  0xcc   : > { %v2032_v62 = vadd.f32 %v1980_v18, %v929_v59  ;;  %v2034_v63 = vpop.f32.mrf.mxu0  ;;  %v907_v0 = vpop.f32.mrf.mxu1 }
  0xcd   : > { %v2037_v2 = vadd.f32 %v1980_v18, %v907_v0  ;;  %v919_v3 = vpop.f32.mrf.mxu2  ;;  %v893_v46 = vadd.f32 %v1980_v18, %v2034_v63 }
  0xce   : > { %v2040_v5 = vadd.f32 %v1980_v18, %v919_v3  ;;  %v1498_v3 = vor.u32 %v1725_v57, %v1497_v56 }
  0xcf   : > { %980 = vmatmul.bf16.gmra.mxu1 %v1446_v60  ;;  %1670 = vmatmul.msk.bf16.gmra.mxu0 %vm839_vm0, %v1458_v61  ;;  %v1509_v60 = vld [vmem:[%s1862_s24 + $0x198] sm:$0xf]  ;;  %v1729_v61 = vld [vmem:[%s1862_s24 + $0x1a8] sm:$0xf0] }
  0xd0   : > { %1108 = vmatmul.bf16.gmra.mxu3 %v1454_v1  ;;  %v1486_v1 = vor.u32 %v1721_v54, %v1483_v55  ;;  %v1510_v16 = vor.u32 %v1729_v61, %v1509_v60 }
  0xd2   : > { %1049 = vmatmul.bf16.gmra.mxu2 %v1470_v4  ;;  %v888_v4 = vadd.f32 %v1980_v18, %v2003_v37 }
  0xd3   : > { %v932_v6 = vpop.f32.mrf.mxu3 }
  0xd4   : > { %v2044_v7 = vadd.f32 %v1980_v18, %v932_v6  ;;  %v2046_v8 = vpop.f32.mrf.mxu0  ;;  %v909_v9 = vpop.f32.mrf.mxu1 }
  0xd5   : > { %v2049_v10 = vadd.f32 %v1980_v18, %v909_v9  ;;  %v1010_v11 = vpop.f32.mrf.mxu2  ;;  %v895_v58 = vadd.f32 %v1980_v18, %v2046_v8 }
  0xdb   : > { %v934_v27 = vpop.f32.mrf.mxu3 }
  0xdc   : > { %v2062_v31 = vadd.f32 %v1980_v18, %v934_v27  ;;  %v946_v32 = vpop.f32.mrf.mxu1  ;;  %v1138_v33 = vpop.f32.mrf.mxu0 }
  0xdd   : > { %v1012_v35 = vpop.f32.mrf.mxu2  ;;  %v947_v39 = vadd.f32 %v946_v32, %v883_v30 }
  0xdf   : > { %985 = vmatmul.bf16.gmra.mxu1 %v1466_v28  ;;  %1671 = vmatmul.msk.bf16.gmra.mxu0 %vm839_vm0, %v1478_v29  ;;  %v1011_v14 = vadd.f32 %v1010_v11, %v947_v39  ;;  %v1727_v39 = vld [vmem:[%s1862_s24 + $0x19c] sm:$0xf] }
  0xe0   : > { %1113 = vmatmul.bf16.gmra.mxu3 %v1474_v34  ;;  %v1503_v34 = vld [vmem:[%s1862_s24 + $0x1a4] sm:$0xf0] }
  0xe2   : > { %1054 = vmatmul.bf16.gmra.mxu2 %v1490_v38  ;;  %v1730_v38 = vld [vmem:[%s1862_s24 + $0x1b0] sm:$0xf0] }
  0xe3   : > { %v1074_v41 = vpop.f32.mrf.mxu3 }
  0xe4   : > { %v1075_v44 = vadd.f32 %v1074_v41, %v1011_v14  ;;  %v948_v47 = vpop.f32.mrf.mxu1  ;;  %v1140_v49 = vpop.f32.mrf.mxu0  ;;  %v1511_v14 = vld [vmem:[%s1862_s24 + $0x1ac] sm:$0xf0] }
  0xe5   : > { %v1015_v51 = vpop.f32.mrf.mxu2  ;;  %v949_v53 = vadd.f32 %v948_v47, %v885_v42 }
  0xe6   : > { %v1139_v52 = vadd.f32 %v1138_v33, %v1075_v44  ;;  %v1726_v33 = vld [vmem:[%s1862_s24 + $0x194] sm:$0xf] }
  0xe7   : > { %v1013_v59 = vadd.f32 %v1012_v35, %v949_v53  ;;  %v1517_v35 = vld [vmem:[%s1862_s24 + $0x1a0] sm:$0xf]  ;;  %v1506_v44 = vor.u32 %v1726_v33, %v1503_v34  ;;  %v1514_v53 = vor.u32 %v1727_v39, %v1511_v14 }
  0xe8   : > { %1193 = vst [vmem:[%s2071_s30] sm:$0xff] %v1139_v52  ;;  %v1518_v47 = vor.u32 %v1730_v38, %v1517_v35 }
  0xeb   : > { %v1076_v0 = vpop.f32.mrf.mxu3 }
  0xec   : > { %v1077_v6 = vadd.f32 %v1076_v0, %v1013_v59  ;;  %v951_v9 = vpop.f32.mrf.mxu1  ;;  %v1143_v11 = vpop.f32.mrf.mxu0 }
  0xed   : > { %v1017_v13 = vpop.f32.mrf.mxu2  ;;  %v952_v19 = vadd.f32 %v951_v9, %v888_v4 }
  0xee   : > { %v1141_v17 = vadd.f32 %v1140_v49, %v1077_v6  ;;  %v898_v6 = vadd.f32 %v1980_v18, %v1972_v15 }
  0xef   : > { %990 = vmatmul.bf16.gmra.mxu1 %v1486_v1  ;;  %1672 = vmatmul.msk.bf16.gmra.mxu0 %vm839_vm0, %v1498_v3  ;;  %v1016_v37 = vadd.f32 %v1015_v51, %v952_v19 }
  0xf0   : > { %1194 = vst [vmem:[%s2071_s30 + $0x8] sm:$0xff] %v1141_v17  ;;  %1118 = vmatmul.bf16.gmra.mxu3 %v1494_v12 }
  0xf2   : > { %1059 = vmatmul.bf16.gmra.mxu2 %v1510_v16 }
  0xf3   : > { %v1079_v23 = vpop.f32.mrf.mxu3 }
  0xf4   : > { %v1080_v26 = vadd.f32 %v1079_v23, %v1016_v37  ;;  %v953_v27 = vpop.f32.mrf.mxu1  ;;  %v1145_v28 = vpop.f32.mrf.mxu0  ;;  %v900_v37 = vadd.f32 %v1980_v18, %v1987_v22 }
  0xf5   : > { %v1020_v29 = vpop.f32.mrf.mxu2  ;;  %v954_v32 = vadd.f32 %v953_v27, %v890_v25 }
  0xf6   : > { %v1144_v30 = vadd.f32 %v1143_v11, %v1080_v26 }
  0xf7   : > { %v1018_v41 = vadd.f32 %v1017_v13, %v954_v32 }
  0xf8   : > { %1195 = vst [vmem:[%s2071_s30 + $0x10] sm:$0xff] %v1144_v30 }
  0xfb   : > { %v1081_v42 = vpop.f32.mrf.mxu3 }
  0xfc   : > { %v1082_v49 = vadd.f32 %v1081_v42, %v1018_v41  ;;  %v956_v51 = vpop.f32.mrf.mxu1  ;;  %v1148_v52 = vpop.f32.mrf.mxu0 }
  0xfd   : > { %v1022_v54 = vpop.f32.mrf.mxu2  ;;  %v957_v56 = vadd.f32 %v956_v51, %v893_v46 }
  0xfe   : > { %v1146_v55 = vadd.f32 %v1145_v28, %v1082_v49 }
  0xff   : > { %995 = vmatmul.bf16.gmra.mxu1 %v1506_v44  ;;  %1673 = vmatmul.msk.bf16.gmra.mxu0 %vm839_vm0, %v1518_v47  ;;  %v1021_v57 = vadd.f32 %v1020_v29, %v957_v56 }
 0x100   : > { %1196 = vst [vmem:[%s2071_s30 + $0x18] sm:$0xff] %v1146_v55  ;;  %1123 = vmatmul.bf16.gmra.mxu3 %v1514_v53 }
 0x103   : > { %v1084_v21 = vpop.f32.mrf.mxu3 }
 0x104   : > { %v1085_v59 = vadd.f32 %v1084_v21, %v1021_v57  ;;  %v958_v63 = vpop.f32.mrf.mxu1  ;;  %v1150_v60 = vpop.f32.mrf.mxu0 }
 0x105   : > { %v1025_v61 = vpop.f32.mrf.mxu2  ;;  %v959_v1 = vadd.f32 %v958_v63, %v895_v58 }
 0x106   : > { %v1149_v0 = vadd.f32 %v1148_v52, %v1085_v59 }
 0x107   : > { %v1023_v3 = vadd.f32 %v1022_v54, %v959_v1 }
 0x108   : > { %1197 = vst [vmem:[%s2071_s30 + $0x20] sm:$0xff] %v1149_v0 }
 0x10b   : > { %v1086_v4 = vpop.f32.mrf.mxu3 }
 0x10c   : > { %v1087_v9 = vadd.f32 %v1086_v4, %v1023_v3  ;;  %v961_v11 = vpop.f32.mrf.mxu1  ;;  %v1153_v12 = vpop.f32.mrf.mxu0 }
 0x10d   : > { %v1027_v13 = vpop.f32.mrf.mxu2  ;;  %v962_v8 = vadd.f32 %v961_v11, %v898_v6 }
 0x10e   : > { %v1151_v16 = vadd.f32 %v1150_v60, %v1087_v9 }
 0x10f   : > { %v1026_v17 = vadd.f32 %v1025_v61, %v962_v8 }
 0x110   : > { %1198 = vst [vmem:[%s2071_s30 + $0x28] sm:$0xff] %v1151_v16 }
 0x113   : > { %v1089_v19 = vpop.f32.mrf.mxu3 }
 0x114   : > { %v1090_v23 = vadd.f32 %v1089_v19, %v1026_v17  ;;  %v963_v25 = vpop.f32.mrf.mxu1  ;;  %v1155_v26 = vpop.f32.mrf.mxu0 }
 0x115   : > { %v1030_v27 = vpop.f32.mrf.mxu2  ;;  %v964_v15 = vadd.f32 %v963_v25, %v900_v37 }
 0x116   : > { %v1154_v28 = vadd.f32 %v1153_v12, %v1090_v23 }
 0x117   : > { %v1028_v29 = vadd.f32 %v1027_v13, %v964_v15 }
 0x118   : > { %1199 = vst [vmem:[%s2071_s30 + $0x30] sm:$0xff] %v1154_v28 }
 0x11b   : > { %v1091_v30 = vpop.f32.mrf.mxu3 }
 0x11c   : > { %v1092_v32 = vadd.f32 %v1091_v30, %v1028_v29  ;;  %v966_v33 = vpop.f32.mrf.mxu1  ;;  %v1158_v34 = vpop.f32.mrf.mxu0 }
 0x11d   : > { %v1032_v35 = vpop.f32.mrf.mxu2  ;;  %v967_v39 = vadd.f32 %v966_v33, %v2006_v40 }
 0x11e   : > { %v1156_v38 = vadd.f32 %v1155_v26, %v1092_v32 }
 0x11f   : > { %v1031_v18 = vadd.f32 %v1030_v27, %v967_v39 }
 0x120   : > { %1200 = vst [vmem:[%s2071_s30 + $0x38] sm:$0xff] %v1156_v38 }
 0x123   : > { %v1094_v22 = vpop.f32.mrf.mxu3 }
 0x124   : > { %v1095_v14 = vadd.f32 %v1094_v22, %v1031_v18  ;;  %v968_v41 = vpop.f32.mrf.mxu1  ;;  %v1160_v42 = vpop.f32.mrf.mxu0 }
 0x125   : > { %v1035_v44 = vpop.f32.mrf.mxu2  ;;  %v969_v46 = vadd.f32 %v968_v41, %v2018_v48 }
 0x126   : > { %v1159_v47 = vadd.f32 %v1158_v34, %v1095_v14 }
 0x127   : > { %v1033_v49 = vadd.f32 %v1032_v35, %v969_v46 }
 0x128   : > { %1201 = vst [vmem:[%s2071_s30 + $0x40] sm:$0xff] %v1159_v47 }
 0x12b   : > { %v1096_v51 = vpop.f32.mrf.mxu3 }
 0x12c   : > { %v1097_v52 = vadd.f32 %v1096_v51, %v1033_v49  ;;  %v971_v53 = vpop.f32.mrf.mxu1  ;;  %v1163_v54 = vpop.f32.mrf.mxu0 }
 0x12d   : > { %v1037_v55 = vpop.f32.mrf.mxu2  ;;  %v972_v56 = vadd.f32 %v971_v53, %v2037_v2 }
 0x12e   : > { %v1161_v40 = vadd.f32 %v1160_v42, %v1097_v52 }
 0x12f   : > { %v1036_v57 = vadd.f32 %v1035_v44, %v972_v56 }
 0x130   : > { %1202 = vst [vmem:[%s2071_s30 + $0x48] sm:$0xff] %v1161_v40 }
 0x133   : > { %v1099_v21 = vpop.f32.mrf.mxu3 }
 0x134   : > { %v1100_v58 = vadd.f32 %v1099_v21, %v1036_v57  ;;  %v973_v59 = vpop.f32.mrf.mxu1  ;;  %v1165_v63 = vpop.f32.mrf.mxu0 }
 0x135   : > { %v1040_v60 = vpop.f32.mrf.mxu2  ;;  %v974_v61 = vadd.f32 %v973_v59, %v2049_v10 }
 0x136   : > { %v1164_v48 = vadd.f32 %v1163_v54, %v1100_v58 }
 0x137   : > { %v1038_v0 = vadd.f32 %v1037_v55, %v974_v61 }
 0x138   : > { %1203 = vst [vmem:[%s2071_s30 + $0x50] sm:$0xff] %v1164_v48 }
 0x13b   : > { %v1101_v1 = vpop.f32.mrf.mxu3 }
 0x13c   : > { %v1102_v3 = vadd.f32 %v1101_v1, %v1038_v0  ;;  %v976_v4 = vpop.f32.mrf.mxu1  ;;  %v1168_v6 = vpop.f32.mrf.mxu0 }
 0x13d   : > { %v1042_v9 = vpop.f32.mrf.mxu2  ;;  %v977_v11 = vadd.f32 %v976_v4, %v1990_v24 }
 0x13e   : > { %v1166_v2 = vadd.f32 %v1165_v63, %v1102_v3 }
 0x13f   : > { %v1041_v12 = vadd.f32 %v1040_v60, %v977_v11 }
 0x140   : > { %1204 = vst [vmem:[%s2071_s30 + $0x58] sm:$0xff] %v1166_v2 }
 0x143   : > { %v1104_v13 = vpop.f32.mrf.mxu3 }
 0x144   : > { %v1105_v16 = vadd.f32 %v1104_v13, %v1041_v12  ;;  %v978_v8 = vpop.f32.mrf.mxu1  ;;  %v1170_v17 = vpop.f32.mrf.mxu0 }
 0x145   : > { %v1045_v19 = vpop.f32.mrf.mxu2  ;;  %v979_v37 = vadd.f32 %v978_v8, %v2009_v43 }
 0x146   : > { %v1169_v10 = vadd.f32 %v1168_v6, %v1105_v16 }
 0x147   : > { %v1043_v23 = vadd.f32 %v1042_v9, %v979_v37 }
 0x148   : > { %1205 = vst [vmem:[%s2071_s30 + $0x60] sm:$0xff] %v1169_v10 }
 0x14b   : > { %v1106_v25 = vpop.f32.mrf.mxu3 }
 0x14c   : > { %v1107_v26 = vadd.f32 %v1106_v25, %v1043_v23  ;;  %v981_v27 = vpop.f32.mrf.mxu1  ;;  %v1173_v28 = vpop.f32.mrf.mxu0 }
 0x14d   : > { %v1047_v15 = vpop.f32.mrf.mxu2  ;;  %v982_v29 = vadd.f32 %v981_v27, %v2021_v50 }
 0x14e   : > { %v1171_v24 = vadd.f32 %v1170_v17, %v1107_v26 }
 0x14f   : > { %v1046_v30 = vadd.f32 %v1045_v19, %v982_v29 }
 0x150   : > { %1206 = vst [vmem:[%s2071_s30 + $0x68] sm:$0xff] %v1171_v24 }
 0x153   : > { %v1109_v32 = vpop.f32.mrf.mxu3 }
 0x154   : > { %v1110_v33 = vadd.f32 %v1109_v32, %v1046_v30  ;;  %v983_v34 = vpop.f32.mrf.mxu1  ;;  %v1175_v35 = vpop.f32.mrf.mxu0 }
 0x155   : > { %v984_v43 = vadd.f32 %v983_v34, %v2040_v5  ;;  %v1050_v39 = vpop.f32.mrf.mxu2 }
 0x156   : > { %v1174_v38 = vadd.f32 %v1173_v28, %v1110_v33 }
 0x157   : > { %v1048_v18 = vadd.f32 %v1047_v15, %v984_v43 }
 0x158   : > { %1207 = vst [vmem:[%s2071_s30 + $0x70] sm:$0xff] %v1174_v38 }
 0x15b   : > { %v1111_v22 = vpop.f32.mrf.mxu3 }
 0x15c   : > { %v1112_v14 = vadd.f32 %v1111_v22, %v1048_v18  ;;  %v986_v41 = vpop.f32.mrf.mxu1  ;;  %v1178_v42 = vpop.f32.mrf.mxu0 }
 0x15d   : > { %v987_v50 = vadd.f32 %v986_v41, %v1983_v20  ;;  %v1052_v47 = vpop.f32.mrf.mxu2 }
 0x15e   : > { %v1176_v44 = vadd.f32 %v1175_v35, %v1112_v14 }
 0x15f   : > { %v1051_v46 = vadd.f32 %v1050_v39, %v987_v50 }
 0x160   : > { %1208 = vst [vmem:[%s2071_s30 + $0x78] sm:$0xff] %v1176_v44 }
 0x163   : > { %v1114_v49 = vpop.f32.mrf.mxu3 }
 0x164   : > { %v1115_v51 = vadd.f32 %v1114_v49, %v1051_v46  ;;  %v988_v52 = vpop.f32.mrf.mxu1  ;;  %v1180_v53 = vpop.f32.mrf.mxu0 }
 0x165   : > { %v989_v54 = vadd.f32 %v988_v52, %v2001_v36  ;;  %v1055_v40 = vpop.f32.mrf.mxu2 }
 0x166   : > { %v1179_v5 = vadd.f32 %v1178_v42, %v1115_v51 }
 0x167   : > { %v1053_v55 = vadd.f32 %v1052_v47, %v989_v54 }
 0x168   : > { %1209 = vst [vmem:[%s2071_s30 + $0x80] sm:$0xff] %v1179_v5 }
 0x16b   : > { %v1116_v56 = vpop.f32.mrf.mxu3 }
 0x16c   : > { %v1117_v57 = vadd.f32 %v1116_v56, %v1053_v55  ;;  %v991_v21 = vpop.f32.mrf.mxu1  ;;  %v1183_v59 = vpop.f32.mrf.mxu0 }
 0x16d   : > { %v992_v20 = vadd.f32 %v991_v21, %v2013_v45  ;;  %v1057_v0 = vpop.f32.mrf.mxu2 }
 0x16e   : > { %v1181_v58 = vadd.f32 %v1180_v53, %v1117_v57 }
 0x16f   : > { %v1056_v63 = vadd.f32 %v1055_v40, %v992_v20 }
 0x170   : > { %1210 = vst [vmem:[%s2071_s30 + $0x88] sm:$0xff] %v1181_v58 }
 0x173   : > { %v1119_v60 = vpop.f32.mrf.mxu3 }
 0x174   : > { %v1120_v48 = vadd.f32 %v1119_v60, %v1056_v63  ;;  %v993_v61 = vpop.f32.mrf.mxu1  ;;  %v1185_v3 = vpop.f32.mrf.mxu0 }
 0x175   : > { %v994_v36 = vadd.f32 %v993_v61, %v2032_v62  ;;  %v1060_v12 = vpop.f32.mrf.mxu2 }
 0x176   : > { %v1184_v1 = vadd.f32 %v1183_v59, %v1120_v48 }
 0x177   : > { %v1058_v4 = vadd.f32 %v1057_v0, %v994_v36 }
 0x178   : > { %1211 = vst [vmem:[%s2071_s30 + $0x90] sm:$0xff] %v1184_v1 }
 0x17b   : > { %v1121_v6 = vpop.f32.mrf.mxu3 }
 0x17c   : > { %v1122_v9 = vadd.f32 %v1121_v6, %v1058_v4  ;;  %v996_v2 = vpop.f32.mrf.mxu1  ;;  %v1188_v16 = vpop.f32.mrf.mxu0 }
 0x17d   : > { %v997_v45 = vadd.f32 %v996_v2, %v2044_v7  ;;  %v1062_v37 = vpop.f32.mrf.mxu2 }
 0x17e   : > { %v1186_v11 = vadd.f32 %v1185_v3, %v1122_v9 }
 0x17f   : > { %v1061_v13 = vadd.f32 %v1060_v12, %v997_v45 }
 0x180   : > { %1212 = vst [vmem:[%s2071_s30 + $0x98] sm:$0xff] %v1186_v11 }
 0x183   : > { %v1124_v8 = vpop.f32.mrf.mxu3 }
 0x184   : > { %v1125_v17 = vadd.f32 %v1124_v8, %v1061_v13  ;;  %v998_v19 = vpop.f32.mrf.mxu1  ;;  %v1190_v27 = vpop.f32.mrf.mxu0 }
 0x185   : > { %v999_v62 = vadd.f32 %v998_v19, %v2062_v31 }
 0x186   : > { %v1189_v10 = vadd.f32 %v1188_v16, %v1125_v17 }
 0x187   : > { %v1063_v23 = vadd.f32 %v1062_v37, %v999_v62 }
 0x188   : > { %1213 = vst [vmem:[%s2071_s30 + $0xa0] sm:$0xff] %v1189_v10 }
 0x18b   : > { %v1126_v25 = vpop.f32.mrf.mxu3 }
 0x18c   : > { %v1127_v26 = vadd.f32 %v1126_v25, %v1063_v23 }
 0x18e   : > { %v1191_v28 = vadd.f32 %v1190_v27, %v1127_v26 }
 0x190   : > { %1214 = vst [vmem:[%s2071_s30 + $0xa8] sm:$0xff] %v1191_v28 }
 0x191 PF: > { %s13_s12 = sadd.s32 1, %s1809_s12  }
 0x192   : > { %p10_p4 = scmp.ge.s32.totalorder %s13_s12, 4  }
 0x194   :  { %12 = sbr.rel (!%p10_p4) target bundleno = 1 (0x1), region = 68 }

</bundles_post_ra>
